<compile_context>
chip_gen: v6e
topology: v6e:2x2x1
jax: 0.10.0
libtpu: 0.0.40
codegen_flags: <defaults>
</compile_context>

<pallas_src>
import math
from functools import partial

import numpy as np
import jax
import jax.numpy as jnp
from jax import lax
from jax.experimental import pallas as pl
from jax.experimental.pallas import tpu as pltpu


# --------------------------------------------------------------------------
# small helpers
# --------------------------------------------------------------------------
def gaussian_kernel_1d(kernel_size, sigma):
    coord = np.arange(kernel_size, dtype=np.float64)
    mean = (kernel_size - 1) / 2.0
    g = np.exp(-((coord - mean) ** 2) / (2.0 * float(sigma) ** 2))
    return g / g.sum()


def gaussian_kernel_2d(kernel_size, sigma):
    g1 = gaussian_kernel_1d(kernel_size, sigma)
    return np.outer(g1, g1).astype(np.float32)


def _rup(x, m):
    return (x + m - 1) // m * m


def _largest_divisor_leq(total, cap):
    cap = int(max(1, min(total, cap)))
    for d in range(cap, 0, -1):
        if total % d == 0:
            return d
    return 1


def _pick_c_tile(C, H, W, pg):
    """Full C unless the padded scratch would pressure v7x's smaller VMEM."""
    if C % 128 != 0 or C <= 128:
        return C

    def scratch_bytes(cc):
        lane = _rup(cc + 1, 128)
        return 4 * ((H + 2 * pg) * _rup(W + 2 * pg, 8) * lane
                    + (H + 2 * pg) * _rup(W, 8) * lane
                    + (H + 2) * _rup(W + 2, 8) * _rup(cc, 128)
                    + _rup(H * W, 8) * _rup(cc, 128))

    return C if scratch_bytes(C) <= 12 * 1024 * 1024 else 128


def _vmem_limit_bytes(H, W, N, Cc, pg, t_h, t_n):
    f = 4
    lane = lambda c: _rup(max(c, 1), 128)
    sub = lambda s: _rup(max(s, 1), 8)
    HW = H * W
    est = 0
    est += (H + 2 * pg) * sub(W + 2 * pg) * lane(Cc + 1) * f      # fm_pad scratch
    est += (H + 2 * pg) * sub(W) * lane(Cc + 1) * f               # hbuf scratch
    est += (H + 2) * sub(W + 2) * lane(Cc) * f                    # dpad scratch
    est += sub(HW) * lane(Cc) * f                                 # yflat scratch
    # double-buffered input/output blocks
    est += 2 * f * (sub(N) * lane(Cc) * 2 + sub(1) * lane(N)
                    + 2 * sub(N) * lane(4) + sub(9) * lane(Cc) + sub(1) * lane(Cc))
    # transient one-hot / stencil values
    est += sub(t_h * W) * lane(N) * f * 2
    est += sub(t_n) * lane(HW) * f * 2
    est += (H + 2 * pg) * sub(W) * lane(Cc + 1) * f
    est += sub(HW) * lane(Cc) * f
    return int(min(48 * 1024 * 1024, max(16 * 1024 * 1024, 3 * est)))


# --------------------------------------------------------------------------
# fused kernel: token2map -> gaussian reconstruct -> depthwise 3x3 -> map2token
# --------------------------------------------------------------------------
def _fused_dwconv_kernel(x_ref, sidx_ref, gidx_ref, gw_ref, w_ref, b_ref,
                         out_ref, fm_pad, hbuf, dpad, yflat,
                         *, H, W, N, Cc, ks, g1, t_h, t_n):
    HW = H * W
    C1 = Cc + 1
    pg = (ks - 1) // 2 if ks >= 3 else 0

    # ---- zero padded scratch (halo must be zero) --------------------------
    dpad[...] = jnp.zeros_like(dpad)
    if ks >= 3:
        fm_pad[...] = jnp.zeros_like(fm_pad)

    # ---- stage 1: token2map scatter-add (one-hot MXU matmul, HW-chunked) --
    xb = x_ref[0]                                                # (N, Cc)
    # ones column folds the hit-count into the same matmul (no XLU reduction)
    xb_aug = jnp.concatenate([xb, jnp.ones((N, 1), jnp.float32)], axis=-1)
    idx_row = sidx_ref[0]                                        # (1, N) i32

    for ci in range(H // t_h):
        h0 = ci * t_h
        rows = t_h * W
        iota = lax.broadcasted_iota(jnp.int32, (rows, N), 0) + h0 * W
        ohT = (iota == idx_row).astype(jnp.float32)              # (rows, N)
        res = jnp.dot(ohT, xb_aug, preferred_element_type=jnp.float32,
                      precision=lax.Precision.HIGHEST)           # (rows, Cc+1)
        cnt = res[:, Cc:C1]                                      # (rows, 1)
        m = (cnt > 0.0).astype(jnp.float32)
        feat = res[:, :Cc] * (pl.reciprocal(cnt + 1e-6, approx=True) * m)
        if ks >= 3:
            blk = jnp.concatenate([feat, m], axis=-1).reshape(t_h, W, C1)
            fm_pad[pg + h0:pg + h0 + t_h, pg:pg + W, :] = blk    # [feat*mask, mask]
        else:
            dpad[1 + h0:1 + h0 + t_h, 1:1 + W, :] = feat.reshape(t_h, W, Cc)

    # ---- stage 2: gaussian reconstruct (separable stencil on VMEM refs) ---
    if ks >= 3:
        # horizontal pass: shifted ref-window loads (keep the vertical halo)
        acc = g1[0] * fm_pad[:, 0:W, :]
        for dx in range(1, ks):
            acc = acc + g1[dx] * fm_pad[:, dx:dx + W, :]
        hbuf[...] = acc                                          # (H+2pg, W, Cc+1)
        # vertical pass
        accv = g1[0] * hbuf[0:H, :, :]
        for dy in range(1, ks):
            accv = accv + g1[dy] * hbuf[dy:dy + H, :, :]
        gf = accv[:, :, :Cc]
        gm = accv[:, :, Cc:C1]
        mi = (gm > 0.0).astype(jnp.float32)
        fi = gf * (pl.reciprocal(gm + 1e-6, approx=True) * mi)
        f0 = fm_pad[pg:pg + H, pg:pg + W, 0:Cc]
        m0 = fm_pad[pg:pg + H, pg:pg + W, Cc:C1]
        dpad[1:1 + H, 1:1 + W, :] = f0 + (1.0 - m0) * fi

    # ---- stage 3: depthwise 3x3 conv + bias (shift-and-accumulate) --------
    wmat = w_ref[...]                                            # (9, Cc)
    acc3 = None
    for dy in range(3):
        for dx in range(3):
            wk = wmat[dy * 3 + dx, :].reshape(1, 1, Cc)
            term = dpad[dy:dy + H, dx:dx + W, :] * wk
            acc3 = term if acc3 is None else acc3 + term
    y = acc3 + b_ref[...].reshape(1, 1, Cc)
    yflat[...] = y.reshape(HW, Cc)

    # ---- stage 4: map2token bilinear gather (weighted one-hot matmul) -----
    gidx_all = gidx_ref[0]                                       # (N, 4) i32
    gw_all = gw_ref[0]                                           # (N, 4) f32
    toks = []
    for ni in range(N // t_n):
        n0 = ni * t_n
        idxs = gidx_all[n0:n0 + t_n, :]
        ws = gw_all[n0:n0 + t_n, :]
        iota = lax.broadcasted_iota(jnp.int32, (t_n, HW), 1)
        wm = jnp.where(iota == idxs[:, 0:1], ws[:, 0:1], 0.0)
        for k in range(1, 4):
            wm = wm + jnp.where(iota == idxs[:, k:k + 1], ws[:, k:k + 1], 0.0)
        toks.append(jnp.dot(wm, yflat[...], preferred_element_type=jnp.float32,
                            precision=lax.Precision.HIGHEST))
    out_ref[0] = toks[0] if len(toks) == 1 else jnp.concatenate(toks, axis=0)


# --------------------------------------------------------------------------
# MyDWConv forward (Pallas)
# --------------------------------------------------------------------------
def my_dwconv_forward(x, loc, H, W, kernel_size, sigma, dw_weight, dw_bias):
    """x: (B, N, C) tokens; loc: (B, N, 2) in [0,1] (x=width, y=height)."""
    B, N, C = x.shape
    HW = H * W
    x = x.astype(jnp.float32)
    loc = loc.astype(jnp.float32)
    dw_weight = dw_weight.astype(jnp.float32)
    dw_bias = dw_bias.astype(jnp.float32)

    # ---- glue: rounded scatter index for token2map ----
    locc = jnp.clip(loc, 0.0, 1.0)
    px = jnp.round(locc[..., 0] * (W - 1)).astype(jnp.int32)
    py = jnp.round(locc[..., 1] * (H - 1)).astype(jnp.int32)
    sidx = (px + py * W).reshape(B, 1, N)                        # (B, 1, N) i32

    # ---- glue: bilinear corner indices/weights for map2token (grid_sample,
    #      mode='bilinear', align_corners=False, padding_mode='zeros') ----
    ix = loc[..., 0] * W - 0.5
    iy = loc[..., 1] * H - 0.5
    x0 = jnp.floor(ix)
    y0 = jnp.floor(iy)
    x1 = x0 + 1.0
    y1 = y0 + 1.0

    def corner(cx, cy, w):
        cxi = cx.astype(jnp.int32)
        cyi = cy.astype(jnp.int32)
        valid = (cxi >= 0) & (cxi <= W - 1) & (cyi >= 0) & (cyi <= H - 1)
        ci = jnp.clip(cxi, 0, W - 1) + jnp.clip(cyi, 0, H - 1) * W
        return ci, w * valid.astype(jnp.float32)

    c00 = corner(x0, y0, (x1 - ix) * (y1 - iy))
    c10 = corner(x1, y0, (ix - x0) * (y1 - iy))
    c01 = corner(x0, y1, (x1 - ix) * (iy - y0))
    c11 = corner(x1, y1, (ix - x0) * (iy - y0))
    gidx = jnp.stack([c00[0], c10[0], c01[0], c11[0]], axis=-1)  # (B, N, 4) i32
    gw = jnp.stack([c00[1], c10[1], c01[1], c11[1]], axis=-1)    # (B, N, 4) f32

    ks = int(kernel_size)
    pg = (ks - 1) // 2 if ks >= 3 else 0
    g1 = tuple(float(v) for v in gaussian_kernel_1d(ks, sigma)) if ks >= 3 else ()

    # ---- tile / chunk choices ----
    Cc = _pick_c_tile(C, H, W, pg)
    onehot_budget = 2 * 1024 * 1024                              # bytes of live one-hot
    t_h = _largest_divisor_leq(H, max(1, onehot_budget // (W * max(N, 128) * 4)))
    t_n = _largest_divisor_leq(N, max(1, onehot_budget // (max(HW, 128) * 4)))

    scratch = [
        pltpu.VMEM((H + 2 * pg, W + 2 * pg, Cc + 1), jnp.float32),  # fm_pad ([feat,mask])
        pltpu.VMEM((H + 2 * pg, W, Cc + 1), jnp.float32),           # hbuf (separable tmp)
        pltpu.VMEM((H + 2, W + 2, Cc), jnp.float32),                # dpad (dwconv input)
        pltpu.VMEM((HW, Cc), jnp.float32),                          # yflat (gather RHS)
    ]

    kernel_fn = partial(_fused_dwconv_kernel, H=H, W=W, N=N, Cc=Cc,
                        ks=ks, g1=g1, t_h=t_h, t_n=t_n)

    out = pl.pallas_call(
        kernel_fn,
        out_shape=jax.ShapeDtypeStruct((B, N, C), jnp.float32),
        grid=(B, C // Cc),
        in_specs=[
            pl.BlockSpec((1, N, Cc), lambda b, c: (b, 0, c)),    # x tokens
            pl.BlockSpec((1, 1, N), lambda b, c: (b, 0, 0)),     # scatter idx
            pl.BlockSpec((1, N, 4), lambda b, c: (b, 0, 0)),     # gather corner idx
            pl.BlockSpec((1, N, 4), lambda b, c: (b, 0, 0)),     # gather corner weights
            pl.BlockSpec((9, Cc), lambda b, c: (0, c)),          # dw weight
            pl.BlockSpec((1, Cc), lambda b, c: (0, c)),          # dw bias
        ],
        out_specs=pl.BlockSpec((1, N, Cc), lambda b, c: (b, 0, c)),
        scratch_shapes=scratch,
        compiler_params=pltpu.CompilerParams(
            dimension_semantics=("parallel", "parallel"),
            vmem_limit_bytes=_vmem_limit_bytes(H, W, N, Cc, pg, t_h, t_n),
        ),
    )(x, sidx, gidx, gw, dw_weight, dw_bias)
    return out


# --------------------------------------------------------------------------
# pure-JAX reference (mirrors the PyTorch semantics) for a correctness check
# --------------------------------------------------------------------------
def reference_forward(x, loc, H, W, kernel_size, sigma, dw_weight, dw_bias):
    B, N, C = x.shape
    # token2map
    locc = jnp.clip(loc, 0.0, 1.0)
    px = jnp.round(locc[..., 0] * (W - 1)).astype(jnp.int32)
    py = jnp.round(locc[..., 1] * (H - 1)).astype(jnp.int32)
    idx = px + py * W + jnp.arange(B)[:, None] * H * W
    src = jnp.concatenate([x, jnp.ones((B, N, 1), x.dtype)], -1).reshape(B * N, C + 1)
    out = jnp.zeros((B * H * W, C + 1), x.dtype).at[idx.reshape(-1)].add(src)
    out = out.reshape(B, H, W, C + 1)
    feat, mask = out[..., :C], out[..., C:]
    feat = feat / (mask + 1e-6)
    mask = (mask > 0).astype(x.dtype)
    feat = feat * mask
    if kernel_size >= 3:
        gk = jnp.asarray(gaussian_kernel_2d(kernel_size, sigma))
        cat = jnp.concatenate([feat * mask, mask], -1)
        gkern = jnp.broadcast_to(gk[:, :, None, None], (kernel_size, kernel_size, 1, C + 1))
        pad = (kernel_size - 1) // 2
        g = lax.conv_general_dilated(cat, gkern, (1, 1), [(pad, pad), (pad, pad)],
                                     dimension_numbers=('NHWC', 'HWIO', 'NHWC'),
                                     feature_group_count=C + 1,
                                     precision=lax.Precision.HIGHEST)
        fi, mi = g[..., :C], g[..., C:]
        fi = fi / (mi + 1e-6)
        mi = (mi > 0).astype(x.dtype)
        fi = fi * mi
        feat = feat + (1 - mask) * fi
    # depthwise 3x3 conv
    wk = dw_weight.reshape(3, 3, 1, C)
    y = lax.conv_general_dilated(feat, wk, (1, 1), [(1, 1), (1, 1)],
                                 dimension_numbers=('NHWC', 'HWIO', 'NHWC'),
                                 feature_group_count=C,
                                 precision=lax.Precision.HIGHEST)
    y = y + dw_bias.reshape(1, 1, 1, C)
    # map2token (bilinear, align_corners=False, zeros padding)
    ix = loc[..., 0] * W - 0.5
    iy = loc[..., 1] * H - 0.5
    x0 = jnp.floor(ix)
    y0 = jnp.floor(iy)
    x1 = x0 + 1.0
    y1 = y0 + 1.0
    yflat = y.reshape(B, H * W, C)

    def samp(cx, cy, w):
        cxi = cx.astype(jnp.int32)
        cyi = cy.astype(jnp.int32)
        valid = ((cxi >= 0) & (cxi <= W - 1) & (cyi >= 0) & (cyi <= H - 1)).astype(x.dtype)
        ci = jnp.clip(cxi, 0, W - 1) + jnp.clip(cyi, 0, H - 1) * W
        vals = jnp.take_along_axis(yflat, ci[..., None], axis=1)
        return vals * (w * valid)[..., None]

    tok = (samp(x0, y0, (x1 - ix) * (y1 - iy)) + samp(x1, y0, (ix - x0) * (y1 - iy))
           + samp(x0, y1, (x1 - ix) * (iy - y0)) + samp(x1, y1, (ix - x0) * (iy - y0)))
    return tok


if __name__ == "__main__":
    B, N, C, H, W = 2, 8, 32, 16, 16
    kernel_size, sigma = 3, 2

    key = jax.random.PRNGKey(0)
    k1, k2, k3, k4 = jax.random.split(key, 4)
    x = jax.random.normal(k1, (B, N, C), jnp.float32)
    loc = jax.random.uniform(k2, (B, N, 2), jnp.float32)

    # deterministic parameter init (nn.Conv2d(dim, dim, 3, groups=dim, bias=True))
    # weight shape (dim, 1, 3, 3) stored here as (9, C): w9[dy*3+dx, c] = weight[c, 0, dy, dx]
    bound = 1.0 / math.sqrt(9.0)
    dw_weight = jax.random.uniform(k3, (9, C), jnp.float32, -bound, bound)
    dw_bias = jax.random.uniform(k4, (1, C), jnp.float32, -bound, bound)

    out = my_dwconv_forward(x, loc, H, W, kernel_size, sigma, dw_weight, dw_bias)
    out = jax.block_until_ready(out)

    ref = reference_forward(x, loc, H, W, kernel_size, sigma, dw_weight, dw_bias)
    assert out.shape == (B, N, C), out.shape
    err = float(jnp.max(jnp.abs(out - ref)))
    assert jnp.allclose(out, ref, atol=2e-3, rtol=2e-3), f"max abs err {err}"
    print("KERNEL_OK")
</pallas_src>

<mosaic_0001>
module attributes {stable_mosaic.version = 11 : i64} {
  func.func @_fused_dwconv_kernel(%arg0: i32, %arg1: i32, %arg2: memref<1x8x32xf32, #tpu.memory_space<vmem>>, %arg3: memref<1x1x8xi32, #tpu.memory_space<vmem>>, %arg4: memref<1x8x4xi32, #tpu.memory_space<vmem>>, %arg5: memref<1x8x4xf32, #tpu.memory_space<vmem>>, %arg6: memref<9x32xf32, #tpu.memory_space<vmem>>, %arg7: memref<1x32xf32, #tpu.memory_space<vmem>>, %arg8: memref<1x8x32xf32, #tpu.memory_space<vmem>>, %arg9: memref<18x18x33xf32, #tpu.memory_space<vmem>>, %arg10: memref<18x16x33xf32, #tpu.memory_space<vmem>>, %arg11: memref<18x18x32xf32, #tpu.memory_space<vmem>>, %arg12: memref<256x32xf32, #tpu.memory_space<vmem>>) attributes {dimension_semantics = [#tpu.dimension_semantics<parallel>, #tpu.dimension_semantics<parallel>], iteration_bounds = array<i64: 2, 1>, scalar_prefetch = 0 : i64, scratch_operands = 4 : i64, tpu.core_type = #tpu.core_type<tc>, window_params = [{transform_indices = @transform_0, window_bounds = array<i64: 1, 8, 32>}, {transform_indices = @transform_1, window_bounds = array<i64: 1, 1, 8>}, {transform_indices = @transform_2, window_bounds = array<i64: 1, 8, 4>}, {transform_indices = @transform_3, window_bounds = array<i64: 1, 8, 4>}, {transform_indices = @transform_4, window_bounds = array<i64: 9, 32>}, {transform_indices = @transform_5, window_bounds = array<i64: 1, 32>}, {transform_indices = @transform_6, window_bounds = array<i64: 1, 8, 32>}]} {
    %cst = arith.constant 0.000000e+00 : f32
    %0 = vector.broadcast %cst : f32 to vector<18x18x32xf32>
    %c0 = arith.constant 0 : index
    %c0_0 = arith.constant 0 : index
    %c0_1 = arith.constant 0 : index
    %1 = vector.load %arg11[%c0, %c0_0, %c0_1] : memref<18x18x32xf32, #tpu.memory_space<vmem>>, vector<18x18x32xf32>
    tpu.vector_store %arg11[%c0, %c0_0, %c0_1], %0 {strides = array<i32>} : memref<18x18x32xf32, #tpu.memory_space<vmem>>, vector<18x18x32xf32>,
    %cst_2 = arith.constant 0.000000e+00 : f32
    %2 = vector.broadcast %cst_2 : f32 to vector<18x18x33xf32>
    %c0_3 = arith.constant 0 : index
    %c0_4 = arith.constant 0 : index
    %c0_5 = arith.constant 0 : index
    %3 = vector.load %arg9[%c0_3, %c0_4, %c0_5] : memref<18x18x33xf32, #tpu.memory_space<vmem>>, vector<18x18x33xf32>
    tpu.vector_store %arg9[%c0_3, %c0_4, %c0_5], %2 {strides = array<i32>} : memref<18x18x33xf32, #tpu.memory_space<vmem>>, vector<18x18x33xf32>,
    %c0_6 = arith.constant 0 : index
    %c0_7 = arith.constant 0 : index
    %c0_8 = arith.constant 0 : index
    %4 = vector.load %arg2[%c0_6, %c0_7, %c0_8] : memref<1x8x32xf32, #tpu.memory_space<vmem>>, vector<1x8x32xf32>
    %5 = vector.shape_cast %4 : vector<1x8x32xf32> to vector<8x32xf32>
    %cst_9 = arith.constant 1.000000e+00 : f32
    %6 = vector.broadcast %cst_9 : f32 to vector<8x1xf32>
    %7 = tpu.concatenate %5, %6 in 1 : vector<8x32xf32>, vector<8x1xf32> -> vector<8x33xf32>
    %c0_10 = arith.constant 0 : index
    %c0_11 = arith.constant 0 : index
    %c0_12 = arith.constant 0 : index
    %8 = vector.load %arg3[%c0_10, %c0_11, %c0_12] : memref<1x1x8xi32, #tpu.memory_space<vmem>>, vector<1x1x8xi32>
    %9 = vector.shape_cast %8 : vector<1x1x8xi32> to vector<1x8xi32>
    %10 = tpu.iota {dimensions = array<i32: 0>} : vector<256x8xi32>
    %c0_i32 = arith.constant 0 : i32
    %11 = vector.broadcast %c0_i32 : i32 to vector<256x8xi32>
    %12 = arith.addi %10, %11 : vector<256x8xi32>
    %13 = vector.broadcast %9 : vector<1x8xi32> to vector<256x8xi32>
    %14 = arith.cmpi eq, %12, %13 : vector<256x8xi32>
    %15 = arith.extui %14 : vector<256x8xi1> to vector<256x8xi32>
    %16 = arith.sitofp %15 : vector<256x8xi32> to vector<256x8xf32>
    %cst_13 = arith.constant dense<0.000000e+00> : vector<256x33xf32>
    %17 = tpu.matmul %16, %7, %cst_13 {dimension_numbers = #tpu.dot_dimension_numbers<[1], [0], [0], [1], [0, 0, 1, 1], [], []>, precision = #tpu.contract_precision<fp32>} : vector<256x8xf32>, vector<8x33xf32>, vector<256x33xf32> -> vector<256x33xf32>
    %18 = vector.extract_strided_slice %17 {offsets = [0, 32], sizes = [256, 1], strides = [1, 1]} : vector<256x33xf32> to vector<256x1xf32>
    %cst_14 = arith.constant 0.000000e+00 : f32
    %19 = vector.broadcast %cst_14 : f32 to vector<256x1xf32>
    %20 = arith.cmpf ogt, %18, %19 : vector<256x1xf32>
    %21 = arith.extui %20 : vector<256x1xi1> to vector<256x1xi32>
    %22 = arith.sitofp %21 : vector<256x1xi32> to vector<256x1xf32>
    %23 = vector.extract_strided_slice %17 {offsets = [0, 0], sizes = [256, 32], strides = [1, 1]} : vector<256x33xf32> to vector<256x32xf32>
    %cst_15 = arith.constant 9.99999997E-7 : f32
    %24 = vector.broadcast %cst_15 : f32 to vector<256x1xf32>
    %25 = arith.addf %18, %24 : vector<256x1xf32>
    %26 = tpu.reciprocal %25 {approx = true} : vector<256x1xf32> -> vector<256x1xf32>
    %27 = arith.mulf %26, %22 : vector<256x1xf32>
    %28 = vector.broadcast %27 : vector<256x1xf32> to vector<256x32xf32>
    %29 = arith.mulf %23, %28 : vector<256x32xf32>
    %30 = tpu.concatenate %29, %22 in 1 : vector<256x32xf32>, vector<256x1xf32> -> vector<256x33xf32>
    %31 = vector.shape_cast %30 : vector<256x33xf32> to vector<16x16x33xf32>
    %c1 = arith.constant 1 : index
    %c1_16 = arith.constant 1 : index
    %c0_17 = arith.constant 0 : index
    %32 = vector.load %arg9[%c1, %c1_16, %c0_17] : memref<18x18x33xf32, #tpu.memory_space<vmem>>, vector<16x16x33xf32>
    tpu.vector_store %arg9[%c1, %c1_16, %c0_17], %31 {strides = array<i32>} : memref<18x18x33xf32, #tpu.memory_space<vmem>>, vector<16x16x33xf32>,
    %c0_18 = arith.constant 0 : index
    %c0_19 = arith.constant 0 : index
    %c0_20 = arith.constant 0 : index
    %33 = vector.load %arg9[%c0_18, %c0_19, %c0_20] : memref<18x18x33xf32, #tpu.memory_space<vmem>>, vector<18x16x33xf32>
    %cst_21 = arith.constant 0.319167763 : f32
    %34 = vector.broadcast %cst_21 : f32 to vector<18x16x33xf32>
    %35 = arith.mulf %34, %33 : vector<18x16x33xf32>
    %c0_22 = arith.constant 0 : index
    %c1_23 = arith.constant 1 : index
    %c0_24 = arith.constant 0 : index
    %36 = vector.load %arg9[%c0_22, %c1_23, %c0_24] : memref<18x18x33xf32, #tpu.memory_space<vmem>>, vector<18x16x33xf32>
    %cst_25 = arith.constant 0.361664474 : f32
    %37 = vector.broadcast %cst_25 : f32 to vector<18x16x33xf32>
    %38 = arith.mulf %37, %36 : vector<18x16x33xf32>
    %39 = arith.addf %35, %38 : vector<18x16x33xf32>
    %c0_26 = arith.constant 0 : index
    %c2 = arith.constant 2 : index
    %c0_27 = arith.constant 0 : index
    %40 = vector.load %arg9[%c0_26, %c2, %c0_27] : memref<18x18x33xf32, #tpu.memory_space<vmem>>, vector<18x16x33xf32>
    %cst_28 = arith.constant 0.319167763 : f32
    %41 = vector.broadcast %cst_28 : f32 to vector<18x16x33xf32>
    %42 = arith.mulf %41, %40 : vector<18x16x33xf32>
    %43 = arith.addf %39, %42 : vector<18x16x33xf32>
    %c0_29 = arith.constant 0 : index
    %c0_30 = arith.constant 0 : index
    %c0_31 = arith.constant 0 : index
    %44 = vector.load %arg10[%c0_29, %c0_30, %c0_31] : memref<18x16x33xf32, #tpu.memory_space<vmem>>, vector<18x16x33xf32>
    tpu.vector_store %arg10[%c0_29, %c0_30, %c0_31], %43 {strides = array<i32>} : memref<18x16x33xf32, #tpu.memory_space<vmem>>, vector<18x16x33xf32>,
    %c0_32 = arith.constant 0 : index
    %c0_33 = arith.constant 0 : index
    %c0_34 = arith.constant 0 : index
    %45 = vector.load %arg10[%c0_32, %c0_33, %c0_34] : memref<18x16x33xf32, #tpu.memory_space<vmem>>, vector<16x16x33xf32>
    %cst_35 = arith.constant 0.319167763 : f32
    %46 = vector.broadcast %cst_35 : f32 to vector<16x16x33xf32>
    %47 = arith.mulf %46, %45 : vector<16x16x33xf32>
    %c1_36 = arith.constant 1 : index
    %c0_37 = arith.constant 0 : index
    %c0_38 = arith.constant 0 : index
    %48 = vector.load %arg10[%c1_36, %c0_37, %c0_38] : memref<18x16x33xf32, #tpu.memory_space<vmem>>, vector<16x16x33xf32>
    %cst_39 = arith.constant 0.361664474 : f32
    %49 = vector.broadcast %cst_39 : f32 to vector<16x16x33xf32>
    %50 = arith.mulf %49, %48 : vector<16x16x33xf32>
    %51 = arith.addf %47, %50 : vector<16x16x33xf32>
    %c2_40 = arith.constant 2 : index
    %c0_41 = arith.constant 0 : index
    %c0_42 = arith.constant 0 : index
    %52 = vector.load %arg10[%c2_40, %c0_41, %c0_42] : memref<18x16x33xf32, #tpu.memory_space<vmem>>, vector<16x16x33xf32>
    %cst_43 = arith.constant 0.319167763 : f32
    %53 = vector.broadcast %cst_43 : f32 to vector<16x16x33xf32>
    %54 = arith.mulf %53, %52 : vector<16x16x33xf32>
    %55 = arith.addf %51, %54 : vector<16x16x33xf32>
    %56 = vector.extract_strided_slice %55 {offsets = [0, 0, 0], sizes = [16, 16, 32], strides = [1, 1, 1]} : vector<16x16x33xf32> to vector<16x16x32xf32>
    %57 = vector.extract_strided_slice %55 {offsets = [0, 0, 32], sizes = [16, 16, 1], strides = [1, 1, 1]} : vector<16x16x33xf32> to vector<16x16x1xf32>
    %cst_44 = arith.constant 0.000000e+00 : f32
    %58 = vector.broadcast %cst_44 : f32 to vector<16x16x1xf32>
    %59 = arith.cmpf ogt, %57, %58 : vector<16x16x1xf32>
    %60 = arith.extui %59 : vector<16x16x1xi1> to vector<16x16x1xi32>
    %61 = arith.sitofp %60 : vector<16x16x1xi32> to vector<16x16x1xf32>
    %cst_45 = arith.constant 9.99999997E-7 : f32
    %62 = vector.broadcast %cst_45 : f32 to vector<16x16x1xf32>
    %63 = arith.addf %57, %62 : vector<16x16x1xf32>
    %64 = tpu.reciprocal %63 {approx = true} : vector<16x16x1xf32> -> vector<16x16x1xf32>
    %65 = arith.mulf %64, %61 : vector<16x16x1xf32>
    %66 = vector.broadcast %65 : vector<16x16x1xf32> to vector<16x16x32xf32>
    %67 = arith.mulf %56, %66 : vector<16x16x32xf32>
    %c1_46 = arith.constant 1 : index
    %c1_47 = arith.constant 1 : index
    %c0_48 = arith.constant 0 : index
    %68 = vector.load %arg9[%c1_46, %c1_47, %c0_48] : memref<18x18x33xf32, #tpu.memory_space<vmem>>, vector<16x16x32xf32>
    %c1_49 = arith.constant 1 : index
    %c1_50 = arith.constant 1 : index
    %c32 = arith.constant 32 : index
    %69 = vector.load %arg9[%c1_49, %c1_50, %c32] : memref<18x18x33xf32, #tpu.memory_space<vmem>>, vector<16x16x1xf32>
    %cst_51 = arith.constant 1.000000e+00 : f32
    %70 = vector.broadcast %cst_51 : f32 to vector<16x16x1xf32>
    %71 = arith.subf %70, %69 : vector<16x16x1xf32>
    %72 = vector.broadcast %71 : vector<16x16x1xf32> to vector<16x16x32xf32>
    %73 = arith.mulf %72, %67 : vector<16x16x32xf32>
    %74 = arith.addf %68, %73 : vector<16x16x32xf32>
    %c1_52 = arith.constant 1 : index
    %c1_53 = arith.constant 1 : index
    %c0_54 = arith.constant 0 : index
    %75 = vector.load %arg11[%c1_52, %c1_53, %c0_54] : memref<18x18x32xf32, #tpu.memory_space<vmem>>, vector<16x16x32xf32>
    tpu.vector_store %arg11[%c1_52, %c1_53, %c0_54], %74 {strides = array<i32>} : memref<18x18x32xf32, #tpu.memory_space<vmem>>, vector<16x16x32xf32>,
    %c0_55 = arith.constant 0 : index
    %c0_56 = arith.constant 0 : index
    %76 = vector.load %arg6[%c0_55, %c0_56] : memref<9x32xf32, #tpu.memory_space<vmem>>, vector<9x32xf32>
    %77 = vector.extract_strided_slice %76 {offsets = [0, 0], sizes = [1, 32], strides = [1, 1]} : vector<9x32xf32> to vector<1x32xf32>
    %78 = vector.shape_cast %77 : vector<1x32xf32> to vector<32xf32>
    %79 = vector.shape_cast %78 : vector<32xf32> to vector<1x1x32xf32>
    %c0_57 = arith.constant 0 : index
    %c0_58 = arith.constant 0 : index
    %c0_59 = arith.constant 0 : index
    %80 = vector.load %arg11[%c0_57, %c0_58, %c0_59] : memref<18x18x32xf32, #tpu.memory_space<vmem>>, vector<16x16x32xf32>
    %81 = vector.broadcast %79 : vector<1x1x32xf32> to vector<16x16x32xf32>
    %82 = arith.mulf %80, %81 : vector<16x16x32xf32>
    %83 = vector.extract_strided_slice %76 {offsets = [1, 0], sizes = [1, 32], strides = [1, 1]} : vector<9x32xf32> to vector<1x32xf32>
    %84 = vector.shape_cast %83 : vector<1x32xf32> to vector<32xf32>
    %85 = vector.shape_cast %84 : vector<32xf32> to vector<1x1x32xf32>
    %c0_60 = arith.constant 0 : index
    %c1_61 = arith.constant 1 : index
    %c0_62 = arith.constant 0 : index
    %86 = vector.load %arg11[%c0_60, %c1_61, %c0_62] : memref<18x18x32xf32, #tpu.memory_space<vmem>>, vector<16x16x32xf32>
    %87 = vector.broadcast %85 : vector<1x1x32xf32> to vector<16x16x32xf32>
    %88 = arith.mulf %86, %87 : vector<16x16x32xf32>
    %89 = arith.addf %82, %88 : vector<16x16x32xf32>
    %90 = vector.extract_strided_slice %76 {offsets = [2, 0], sizes = [1, 32], strides = [1, 1]} : vector<9x32xf32> to vector<1x32xf32>
    %91 = vector.shape_cast %90 : vector<1x32xf32> to vector<32xf32>
    %92 = vector.shape_cast %91 : vector<32xf32> to vector<1x1x32xf32>
    %c0_63 = arith.constant 0 : index
    %c2_64 = arith.constant 2 : index
    %c0_65 = arith.constant 0 : index
    %93 = vector.load %arg11[%c0_63, %c2_64, %c0_65] : memref<18x18x32xf32, #tpu.memory_space<vmem>>, vector<16x16x32xf32>
    %94 = vector.broadcast %92 : vector<1x1x32xf32> to vector<16x16x32xf32>
    %95 = arith.mulf %93, %94 : vector<16x16x32xf32>
    %96 = arith.addf %89, %95 : vector<16x16x32xf32>
    %97 = vector.extract_strided_slice %76 {offsets = [3, 0], sizes = [1, 32], strides = [1, 1]} : vector<9x32xf32> to vector<1x32xf32>
    %98 = vector.shape_cast %97 : vector<1x32xf32> to vector<32xf32>
    %99 = vector.shape_cast %98 : vector<32xf32> to vector<1x1x32xf32>
    %c1_66 = arith.constant 1 : index
    %c0_67 = arith.constant 0 : index
    %c0_68 = arith.constant 0 : index
    %100 = vector.load %arg11[%c1_66, %c0_67, %c0_68] : memref<18x18x32xf32, #tpu.memory_space<vmem>>, vector<16x16x32xf32>
    %101 = vector.broadcast %99 : vector<1x1x32xf32> to vector<16x16x32xf32>
    %102 = arith.mulf %100, %101 : vector<16x16x32xf32>
    %103 = arith.addf %96, %102 : vector<16x16x32xf32>
    %104 = vector.extract_strided_slice %76 {offsets = [4, 0], sizes = [1, 32], strides = [1, 1]} : vector<9x32xf32> to vector<1x32xf32>
    %105 = vector.shape_cast %104 : vector<1x32xf32> to vector<32xf32>
    %106 = vector.shape_cast %105 : vector<32xf32> to vector<1x1x32xf32>
    %c1_69 = arith.constant 1 : index
    %c1_70 = arith.constant 1 : index
    %c0_71 = arith.constant 0 : index
    %107 = vector.load %arg11[%c1_69, %c1_70, %c0_71] : memref<18x18x32xf32, #tpu.memory_space<vmem>>, vector<16x16x32xf32>
    %108 = vector.broadcast %106 : vector<1x1x32xf32> to vector<16x16x32xf32>
    %109 = arith.mulf %107, %108 : vector<16x16x32xf32>
    %110 = arith.addf %103, %109 : vector<16x16x32xf32>
    %111 = vector.extract_strided_slice %76 {offsets = [5, 0], sizes = [1, 32], strides = [1, 1]} : vector<9x32xf32> to vector<1x32xf32>
    %112 = vector.shape_cast %111 : vector<1x32xf32> to vector<32xf32>
    %113 = vector.shape_cast %112 : vector<32xf32> to vector<1x1x32xf32>
    %c1_72 = arith.constant 1 : index
    %c2_73 = arith.constant 2 : index
    %c0_74 = arith.constant 0 : index
    %114 = vector.load %arg11[%c1_72, %c2_73, %c0_74] : memref<18x18x32xf32, #tpu.memory_space<vmem>>, vector<16x16x32xf32>
    %115 = vector.broadcast %113 : vector<1x1x32xf32> to vector<16x16x32xf32>
    %116 = arith.mulf %114, %115 : vector<16x16x32xf32>
    %117 = arith.addf %110, %116 : vector<16x16x32xf32>
    %118 = vector.extract_strided_slice %76 {offsets = [6, 0], sizes = [1, 32], strides = [1, 1]} : vector<9x32xf32> to vector<1x32xf32>
    %119 = vector.shape_cast %118 : vector<1x32xf32> to vector<32xf32>
    %120 = vector.shape_cast %119 : vector<32xf32> to vector<1x1x32xf32>
    %c2_75 = arith.constant 2 : index
    %c0_76 = arith.constant 0 : index
    %c0_77 = arith.constant 0 : index
    %121 = vector.load %arg11[%c2_75, %c0_76, %c0_77] : memref<18x18x32xf32, #tpu.memory_space<vmem>>, vector<16x16x32xf32>
    %122 = vector.broadcast %120 : vector<1x1x32xf32> to vector<16x16x32xf32>
    %123 = arith.mulf %121, %122 : vector<16x16x32xf32>
    %124 = arith.addf %117, %123 : vector<16x16x32xf32>
    %125 = vector.extract_strided_slice %76 {offsets = [7, 0], sizes = [1, 32], strides = [1, 1]} : vector<9x32xf32> to vector<1x32xf32>
    %126 = vector.shape_cast %125 : vector<1x32xf32> to vector<32xf32>
    %127 = vector.shape_cast %126 : vector<32xf32> to vector<1x1x32xf32>
    %c2_78 = arith.constant 2 : index
    %c1_79 = arith.constant 1 : index
    %c0_80 = arith.constant 0 : index
    %128 = vector.load %arg11[%c2_78, %c1_79, %c0_80] : memref<18x18x32xf32, #tpu.memory_space<vmem>>, vector<16x16x32xf32>
    %129 = vector.broadcast %127 : vector<1x1x32xf32> to vector<16x16x32xf32>
    %130 = arith.mulf %128, %129 : vector<16x16x32xf32>
    %131 = arith.addf %124, %130 : vector<16x16x32xf32>
    %132 = vector.extract_strided_slice %76 {offsets = [8, 0], sizes = [1, 32], strides = [1, 1]} : vector<9x32xf32> to vector<1x32xf32>
    %133 = vector.shape_cast %132 : vector<1x32xf32> to vector<32xf32>
    %134 = vector.shape_cast %133 : vector<32xf32> to vector<1x1x32xf32>
    %c2_81 = arith.constant 2 : index
    %c2_82 = arith.constant 2 : index
    %c0_83 = arith.constant 0 : index
    %135 = vector.load %arg11[%c2_81, %c2_82, %c0_83] : memref<18x18x32xf32, #tpu.memory_space<vmem>>, vector<16x16x32xf32>
    %136 = vector.broadcast %134 : vector<1x1x32xf32> to vector<16x16x32xf32>
    %137 = arith.mulf %135, %136 : vector<16x16x32xf32>
    %138 = arith.addf %131, %137 : vector<16x16x32xf32>
    %c0_84 = arith.constant 0 : index
    %c0_85 = arith.constant 0 : index
    %139 = vector.load %arg7[%c0_84, %c0_85] : memref<1x32xf32, #tpu.memory_space<vmem>>, vector<1x32xf32>
    %140 = vector.shape_cast %139 : vector<1x32xf32> to vector<1x1x32xf32>
    %141 = vector.broadcast %140 : vector<1x1x32xf32> to vector<16x16x32xf32>
    %142 = arith.addf %138, %141 : vector<16x16x32xf32>
    %143 = vector.shape_cast %142 : vector<16x16x32xf32> to vector<256x32xf32>
    %c0_86 = arith.constant 0 : index
    %c0_87 = arith.constant 0 : index
    %144 = vector.load %arg12[%c0_86, %c0_87] : memref<256x32xf32, #tpu.memory_space<vmem>>, vector<256x32xf32>
    tpu.vector_store %arg12[%c0_86, %c0_87], %143 {strides = array<i32>} : memref<256x32xf32, #tpu.memory_space<vmem>>, vector<256x32xf32>,
    %c0_88 = arith.constant 0 : index
    %c0_89 = arith.constant 0 : index
    %c0_90 = arith.constant 0 : index
    %145 = vector.load %arg4[%c0_88, %c0_89, %c0_90] : memref<1x8x4xi32, #tpu.memory_space<vmem>>, vector<1x8x4xi32>
    %146 = vector.shape_cast %145 : vector<1x8x4xi32> to vector<8x4xi32>
    %c0_91 = arith.constant 0 : index
    %c0_92 = arith.constant 0 : index
    %c0_93 = arith.constant 0 : index
    %147 = vector.load %arg5[%c0_91, %c0_92, %c0_93] : memref<1x8x4xf32, #tpu.memory_space<vmem>>, vector<1x8x4xf32>
    %148 = vector.shape_cast %147 : vector<1x8x4xf32> to vector<8x4xf32>
    %149 = tpu.iota {dimensions = array<i32: 1>} : vector<8x256xi32>
    %150 = vector.extract_strided_slice %146 {offsets = [0, 0], sizes = [8, 1], strides = [1, 1]} : vector<8x4xi32> to vector<8x1xi32>
    %151 = vector.broadcast %150 : vector<8x1xi32> to vector<8x256xi32>
    %152 = arith.cmpi eq, %149, %151 : vector<8x256xi32>
    %153 = vector.extract_strided_slice %148 {offsets = [0, 0], sizes = [8, 1], strides = [1, 1]} : vector<8x4xf32> to vector<8x1xf32>
    %cst_94 = arith.constant 0.000000e+00 : f32
    %154 = vector.shape_cast %153 : vector<8x1xf32> to vector<8x1xf32>
    %155 = vector.broadcast %154 : vector<8x1xf32> to vector<8x256xf32>
    %156 = vector.broadcast %cst_94 : f32 to vector<8x256xf32>
    %157 = arith.select %152, %155, %156 : vector<8x256xi1>, vector<8x256xf32>
    %158 = vector.extract_strided_slice %146 {offsets = [0, 1], sizes = [8, 1], strides = [1, 1]} : vector<8x4xi32> to vector<8x1xi32>
    %159 = vector.broadcast %158 : vector<8x1xi32> to vector<8x256xi32>
    %160 = arith.cmpi eq, %149, %159 : vector<8x256xi32>
    %161 = vector.extract_strided_slice %148 {offsets = [0, 1], sizes = [8, 1], strides = [1, 1]} : vector<8x4xf32> to vector<8x1xf32>
    %cst_95 = arith.constant 0.000000e+00 : f32
    %162 = vector.shape_cast %161 : vector<8x1xf32> to vector<8x1xf32>
    %163 = vector.broadcast %162 : vector<8x1xf32> to vector<8x256xf32>
    %164 = vector.broadcast %cst_95 : f32 to vector<8x256xf32>
    %165 = arith.select %160, %163, %164 : vector<8x256xi1>, vector<8x256xf32>
    %166 = arith.addf %157, %165 : vector<8x256xf32>
    %167 = vector.extract_strided_slice %146 {offsets = [0, 2], sizes = [8, 1], strides = [1, 1]} : vector<8x4xi32> to vector<8x1xi32>
    %168 = vector.broadcast %167 : vector<8x1xi32> to vector<8x256xi32>
    %169 = arith.cmpi eq, %149, %168 : vector<8x256xi32>
    %170 = vector.extract_strided_slice %148 {offsets = [0, 2], sizes = [8, 1], strides = [1, 1]} : vector<8x4xf32> to vector<8x1xf32>
    %cst_96 = arith.constant 0.000000e+00 : f32
    %171 = vector.shape_cast %170 : vector<8x1xf32> to vector<8x1xf32>
    %172 = vector.broadcast %171 : vector<8x1xf32> to vector<8x256xf32>
    %173 = vector.broadcast %cst_96 : f32 to vector<8x256xf32>
    %174 = arith.select %169, %172, %173 : vector<8x256xi1>, vector<8x256xf32>
    %175 = arith.addf %166, %174 : vector<8x256xf32>
    %176 = vector.extract_strided_slice %146 {offsets = [0, 3], sizes = [8, 1], strides = [1, 1]} : vector<8x4xi32> to vector<8x1xi32>
    %177 = vector.broadcast %176 : vector<8x1xi32> to vector<8x256xi32>
    %178 = arith.cmpi eq, %149, %177 : vector<8x256xi32>
    %179 = vector.extract_strided_slice %148 {offsets = [0, 3], sizes = [8, 1], strides = [1, 1]} : vector<8x4xf32> to vector<8x1xf32>
    %cst_97 = arith.constant 0.000000e+00 : f32
    %180 = vector.shape_cast %179 : vector<8x1xf32> to vector<8x1xf32>
    %181 = vector.broadcast %180 : vector<8x1xf32> to vector<8x256xf32>
    %182 = vector.broadcast %cst_97 : f32 to vector<8x256xf32>
    %183 = arith.select %178, %181, %182 : vector<8x256xi1>, vector<8x256xf32>
    %184 = arith.addf %175, %183 : vector<8x256xf32>
    %c0_98 = arith.constant 0 : index
    %c0_99 = arith.constant 0 : index
    %185 = vector.load %arg12[%c0_98, %c0_99] : memref<256x32xf32, #tpu.memory_space<vmem>>, vector<256x32xf32>
    %cst_100 = arith.constant dense<0.000000e+00> : vector<8x32xf32>
    %186 = tpu.matmul %184, %185, %cst_100 {dimension_numbers = #tpu.dot_dimension_numbers<[1], [0], [0], [1], [0, 0, 1, 1], [], []>, precision = #tpu.contract_precision<fp32>} : vector<8x256xf32>, vector<256x32xf32>, vector<8x32xf32> -> vector<8x32xf32>
    %c0_101 = arith.constant 0 : index
    %c0_102 = arith.constant 0 : index
    %c0_103 = arith.constant 0 : index
    %187 = vector.load %arg8[%c0_101, %c0_102, %c0_103] : memref<1x8x32xf32, #tpu.memory_space<vmem>>, vector<1x8x32xf32>
    %188 = vector.shape_cast %187 : vector<1x8x32xf32> to vector<8x32xf32>
    %189 = vector.shape_cast %186 : vector<8x32xf32> to vector<1x8x32xf32>
    tpu.vector_store %arg8[%c0_101, %c0_102, %c0_103], %189 {strides = array<i32>} : memref<1x8x32xf32, #tpu.memory_space<vmem>>, vector<1x8x32xf32>,
    return
  }
  func.func @transform_0(%arg0: i32, %arg1: i32) -> (i32, i32, i32) {
    %c0_i32 = arith.constant 0 : i32
    %c0_i32_0 = arith.constant 0 : i32
    return %arg0, %c0_i32, %arg1 : i32, i32, i32
  }
  func.func @transform_1(%arg0: i32, %arg1: i32) -> (i32, i32, i32) {
    %c0_i32 = arith.constant 0 : i32
    %c0_i32_0 = arith.constant 0 : i32
    %c0_i32_1 = arith.constant 0 : i32
    return %arg0, %c0_i32, %c0_i32_0 : i32, i32, i32
  }
  func.func @transform_2(%arg0: i32, %arg1: i32) -> (i32, i32, i32) {
    %c0_i32 = arith.constant 0 : i32
    %c0_i32_0 = arith.constant 0 : i32
    %c0_i32_1 = arith.constant 0 : i32
    return %arg0, %c0_i32, %c0_i32_0 : i32, i32, i32
  }
  func.func @transform_3(%arg0: i32, %arg1: i32) -> (i32, i32, i32) {
    %c0_i32 = arith.constant 0 : i32
    %c0_i32_0 = arith.constant 0 : i32
    %c0_i32_1 = arith.constant 0 : i32
    return %arg0, %c0_i32, %c0_i32_0 : i32, i32, i32
  }
  func.func @transform_4(%arg0: i32, %arg1: i32) -> (i32, i32) {
    %c0_i32 = arith.constant 0 : i32
    %c0_i32_0 = arith.constant 0 : i32
    return %c0_i32, %arg1 : i32, i32
  }
  func.func @transform_5(%arg0: i32, %arg1: i32) -> (i32, i32) {
    %c0_i32 = arith.constant 0 : i32
    %c0_i32_0 = arith.constant 0 : i32
    return %c0_i32, %arg1 : i32, i32
  }
  func.func @transform_6(%arg0: i32, %arg1: i32) -> (i32, i32, i32) {
    %c0_i32 = arith.constant 0 : i32
    %c0_i32_0 = arith.constant 0 : i32
    return %arg0, %c0_i32, %arg1 : i32, i32, i32
  }
}

</mosaic_0001>

<bundles_post_ra>
// kernel: tpu_custom_call.1
= control target key start
LH: loop header
LB: loop body
LE: loop exit
PB: predicated region body
PF: predicated region fallthrough
CT: control target
= control target key end

     0   :  { %11 = vsyncpa [#allocation7], 0  ;;  %s11259_s0 = inlined_call_operand.vmem [shape: f32[2,8,32], index: 0, kind: input, shape index: {}]   ;;  %s11260_s1 = inlined_call_operand.vmem [shape: s32[2,1,8], index: 1, kind: input, shape index: {}]   ;;  %s11261_s2 = inlined_call_operand.vmem [shape: s32[2,8,4], index: 2, kind: input, shape index: {}]   ;;  %s11262_s3 = inlined_call_operand.vmem [shape: f32[2,8,4], index: 3, kind: input, shape index: {}]   ;;  %s11263_s4 = inlined_call_operand.vmem [shape: f32[9,32], index: 4, kind: input, shape index: {}]   ;;  %s11264_s5 = inlined_call_operand.vmem [shape: f32[1,32], index: 5, kind: input, shape index: {}]   ;;  %s11265_s6 = inlined_call_operand.hbm [shape: f32[2,8,32], index: 6, kind: output, shape index: {}]  }
   0x1   :  { %13 = vsyncpa [#allocation7 + $0x1], 0  ;;  %s7519_s21 = smov 0   ;;  %s7521_s22 = smov 0  }
   0x2   :  { %s7523_s23 = smov 0   ;;  %s7525_s24 = smov 0  }
   0x3   :  { %s7527_s25 = smov 0   ;;  %s7529_s26 = smov 0  }
   0x4 LB: > { %s6250_s27 = sadd.s32 4294967295, %s7475_s26   ;;  %s6251_s28 = sadd.s32 4294967294, %s7475_s26   ;;  %s7475_s26 = sphi %s7529_s26, %s19_s26   ;;  %s7471_s25 = sphi %s7527_s25, %s11923_s25   ;;  %s7467_s24 = sphi %s7525_s24, %s11922_s24   ;;  %s7463_s23 = sphi %s7523_s23, %s11921_s23   ;;  %s7459_s22 = sphi %s7521_s22, %s11920_s22   ;;  %s7455_s21 = sphi %s7519_s21, %s11919_s21  }
   0x5   : > { %s31_s29 = sadd.s32 1, %s7471_s25  ;;  %s198_s30 = sadd.s32 1, %s7463_s23 }
   0x6   : > { %p33_p0 = scmp.ge.s32.totalorder %s31_s29, 2  ;;  %p208_p1 = scmp.ne.s32.totalorder %s7463_s23, %s7459_s22 }
   0x7   : > { %p209_p2 = scmp.eq.s32.totalorder %s6250_s27, 1  ;;  %p214_p3 = scmp.ne.s32.totalorder %s7459_s22, %s7455_s21 }
   0x8   : > { %s11925_s29 = smov (%p33_p0, %s31_s29), 0  ;;  %p215_p5 = scmp.eq.s32.totalorder %s6251_s28, 1 }
   0x9   : > { %p7559_p4 = por %p209_p2, %p208_p1  ;;  %s193_s8 = ssub.s32 %s7471_s25, %s11925_s29 }
   0xa   : > { %p6256_p6 = scmp.ge.s32.totalorder %s7475_s26, 1  ;;  %p196_p7 = scmp.eq.s32.totalorder %s193_s8, 0 }
   0xb   : > { %p7566_p8 = por %p215_p5, %p214_p3  ;;  %p276_p9 = scmp.lt.s32.totalorder %s7475_s26, 3 }
   0xc   : > { %s7572_s10 = scalar_select %p196_p7, %s7463_s23, %s198_s30  }
   0xd   : > { %p277_p10 = pnand %p6256_p6, %p276_p9 }
   0xf   : > { %280 = sbr.rel (%p277_p10) target bundleno = 1285 (0x505), region = 44 }
  0x14   : > { %p326_p11 = scmp.lt.s32.totalorder %s7467_s24, 1  ;;  %vm351_vm0 = vcmask 261120   ;;  %v11266_v0 = vlaneseq  ;;  %v11293_v1 = vmov 0.0   ;;  %vm599_vm1 = vcmask 64512   ;;  %s323_s19 = sand.u32 1, %s7459_s22  }
  0x15   : > { %352 = vst.msk [vmem:[#allocation4] sm:$0xff] %vm351_vm0, %v11293_v1  ;;  %353 = vst.msk [vmem:[#allocation4 + $0x8] sm:$0xff] %vm351_vm0, %v11293_v1  ;;  %s6257_s20 = sshll.u32 %s323_s19, 3  ;;  %s6105_s13 = scalar_lea.sflag [#allocation7], %s323_s19 }
  0x16   : > { %356 = vst.msk [vmem:[#allocation4 + $0x18] sm:$0xff] %vm351_vm0, %v11293_v1  ;;  %357 = vst.msk [vmem:[#allocation4 + $0x20] sm:$0xff] %vm351_vm0, %v11293_v1  ;;  %s327_s11 = scalar_select %p326_p11, %s7467_s24, 1  ;;  %v7651_v2 = vshrl.u32 %v11266_v0, 7 }
  0x17   : > { %359 = vst.msk [vmem:[#allocation4 + $0x30] sm:$0xff] %vm351_vm0, %v11293_v1  ;;  %360 = vst.msk [vmem:[#allocation4 + $0x38] sm:$0xff] %vm351_vm0, %v11293_v1  ;;  %s325_s28 = scalar_lea.vmem [#allocation6], %s6257_s20 }
  0x18   : > { %362 = vst.msk [vmem:[#allocation4 + $0x48] sm:$0xff] %vm351_vm0, %v11293_v1  ;;  %363 = vst.msk [vmem:[#allocation4 + $0x50] sm:$0xff] %vm351_vm0, %v11293_v1  ;;  %s7653_s12 = sshll.u32 %s327_s11, 3  ;;  %s335_s15 = scalar_lea.vmem %s11260_s1, %s327_s11  ;;  %v468_v3 = vadd.s32 8, %v7651_v2  ;;  %v469_v4 = vadd.s32 16, %v7651_v2  ;;  %v470_v5 = vadd.s32 24, %v7651_v2 }
  0x19   : > { %365 = vst.msk [vmem:[#allocation4 + $0x60] sm:$0xff] %vm351_vm0, %v11293_v1  ;;  %366 = vst.msk [vmem:[#allocation4 + $0x68] sm:$0xff] %vm351_vm0, %v11293_v1  ;;  %v471_v6 = vadd.s32 32, %v7651_v2  ;;  %s332_s18 = scalar_lea.vmem %s11259_s0, %s7653_s12  ;;  %v7666_v7 = vld [vmem:[%s335_s15] ss:$0 sm:$0xff]  ;;  %v472_v8 = vadd.s32 40, %v7651_v2  ;;  %s339_s27 = scalar_lea.vmem %s11261_s2, %s7653_s12 }
  0x1a   : > { %368 = vst.msk [vmem:[#allocation4 + $0x78] sm:$0xff] %vm351_vm0, %v11293_v1  ;;  %369 = vst.msk [vmem:[#allocation4 + $0x80] sm:$0xff] %vm351_vm0, %v11293_v1  ;;  %v473_v9 = vadd.s32 48, %v7651_v2  ;;  %v474_v10 = vadd.s32 56, %v7651_v2  ;;  %v475_v11 = vadd.s32 64, %v7651_v2  ;;  %v463_v12 = vld [vmem:[%s332_s18] sm:$0xff]  ;;  %vm503_vm2 = vcmp.eq.s32.totalorder %v7651_v2, %v7666_v7  ;;  %s343_s8 = scalar_lea.vmem %s11262_s3, %s7653_s12 }
  0x1b   : > { %371 = vst.msk [vmem:[#allocation4 + $0x90] sm:$0xff] %vm351_vm0, %v11293_v1  ;;  %372 = vst.msk [vmem:[#allocation4 + $0x98] sm:$0xff] %vm351_vm0, %v11293_v1  ;;  %vm504_vm3 = vcmp.eq.s32.totalorder %v468_v3, %v7666_v7  ;;  %vm505_vm4 = vcmp.eq.s32.totalorder %v469_v4, %v7666_v7  ;;  %vm506_vm5 = vcmp.eq.s32.totalorder %v470_v5, %v7666_v7  ;;  %v464_v13 = vsel %vm351_vm0, %v463_v12, 1.0  ;;  %s6119_s30 = sshll.u32 %s325_s28, 4  ;;  %s7483_s15 = smov [#allocation6]   ;;  %s6120_s30 = int_to_ptr.vmem [resolvable:$true] %s6119_s30 }
  0x1c   : > { %374 = vst.msk [vmem:[#allocation4 + $0xa8] sm:$0xff] %vm351_vm0, %v11293_v1  ;;  %375 = vst.msk [vmem:[#allocation4 + $0xb0] sm:$0xff] %vm351_vm0, %v11293_v1  ;;  %v7679_v14 = vsel %vm503_vm2, 1.0, %v11293_v1  ;;  %v7682_v15 = vsel %vm504_vm3, 1.0, %v11293_v1  ;;  %v7685_v16 = vsel %vm505_vm4, 1.0, %v11293_v1  ;;  %v7687_v17 = vand.u32 4294901760, %v464_v13 }
  0x1d   : > { %377 = vst.msk [vmem:[#allocation4 + $0xc0] sm:$0xff] %vm351_vm0, %v11293_v1  ;;  %378 = vst.msk [vmem:[#allocation4 + $0xc8] sm:$0xff] %vm351_vm0, %v11293_v1  ;;  %v601_v18 = vsel %vm599_vm1, %v7679_v14, 0  ;;  %v604_v19 = vsel %vm599_vm1, %v7682_v15, 0  ;;  %6920 = vmatprep.mubr.msk.f32.mxu1 %vm599_vm1, %v7679_v14  ;;  %v607_v20 = vsel %vm599_vm1, %v7685_v16, 0  ;;  %v7704_v24 = vsel %vm506_vm5, 1.0, %v11293_v1 }
  0x1e   : > { %380 = vst.msk [vmem:[#allocation4 + $0xd8] sm:$0xff] %vm351_vm0, %v11293_v1  ;;  %381 = vst.msk [vmem:[#allocation4 + $0xe0] sm:$0xff] %vm351_vm0, %v11293_v1  ;;  %v7697_v21 = vsub.f32 %v601_v18, %v601_v18  ;;  %v7699_v22 = vsub.f32 %v604_v19, %v604_v19  ;;  %v7701_v23 = vsub.f32 %v607_v20, %v607_v20  ;;  %6868 = vmatprep.subr.mxu0 %v7687_v17  ;;  %s7399_s14 = scalar_lea.vmem %s6120_s30, 128 }
  0x1f   : > { %383 = vst.msk [vmem:[#allocation4 + $0xf0] sm:$0xff] %vm351_vm0, %v11293_v1  ;;  %384 = vst.msk [vmem:[#allocation4 + $0xf8] sm:$0xff] %vm351_vm0, %v11293_v1  ;;  %v1114_v25 = vsub.f32 %v464_v13, %v7687_v17  ;;  %v610_v26 = vsel %vm599_vm1, %v7704_v24, 0  ;;  %vm507_vm6 = vcmp.eq.s32.totalorder %v471_v6, %v7666_v7  ;;  %vm508_vm7 = vcmp.eq.s32.totalorder %v472_v8, %v7666_v7  ;;  %p7400_p12 = scmp.ne.s32.totalorder %s6120_s30, %s7399_s14 }
  0x20   : > { %386 = vst.msk [vmem:[#allocation4 + $0x108] sm:$0xff] %vm351_vm0, %v11293_v1  ;;  %387 = vst.msk [vmem:[#allocation4 + $0x110] sm:$0xff] %vm351_vm0, %v11293_v1  ;;  %6869 = vmatpush3.msra.mxu0 %v7687_v17  ;;  %v11286_v27 = vand.u32 4294901760, %v7697_v21  ;;  %v11285_v28 = vand.u32 4294901760, %v7699_v22  ;;  %v11284_v29 = vand.u32 4294901760, %v7701_v23  ;;  %v7716_v30 = vsub.f32 %v610_v26, %v610_v26 }
  0x21   : > { %389 = vst.msk [vmem:[#allocation4 + $0x120] sm:$0xff] %vm351_vm0, %v11293_v1  ;;  %390 = vst.msk [vmem:[#allocation4 + $0x128] sm:$0xff] %vm351_vm0, %v11293_v1  ;;  %v7718_v31 = vand.u32 4294901760, %v1114_v25  ;;  %v7721_v32 = vsel %vm507_vm6, 1.0, %v11293_v1  ;;  %v7724_v33 = vsel %vm508_vm7, 1.0, %v11293_v1  ;;  %vm509_vm8 = vcmp.eq.s32.totalorder %v473_v9, %v7666_v7  ;;  %6968 = vmatprep.subr.mxu0 %v1114_v25  ;;  %p7401_p13 = pnand %p7400_p12, %p7559_p4 }
  0x22   : > { %392 = vst.msk [vmem:[#allocation4 + $0x138] sm:$0xff] %vm351_vm0, %v11293_v1  ;;  %393 = vst.msk [vmem:[#allocation4 + $0x140] sm:$0xff] %vm351_vm0, %v11293_v1  ;;  %v765_v34 = vsub.f32 %v7697_v21, %v11286_v27  ;;  %v775_v35 = vsub.f32 %v7699_v22, %v11285_v28  ;;  %v785_v36 = vsub.f32 %v7701_v23, %v11284_v29  ;;  %v11283_v37 = vand.u32 4294901760, %v7716_v30 }
  0x23   : > { %395 = vst.msk [vmem:[#allocation4 + $0x150] sm:$0xff] %vm351_vm0, %v11293_v1  ;;  %396 = vst.msk [vmem:[#allocation4 + $0x158] sm:$0xff] %vm351_vm0, %v11293_v1  ;;  %v1116_v38 = vsub.f32 %v1114_v25, %v7718_v31  ;;  %v613_v39 = vsel %vm599_vm1, %v7721_v32, 0  ;;  %v616_v40 = vsel %vm599_vm1, %v7724_v33, 0  ;;  %v7743_v41 = vsel %vm509_vm8, 1.0, %v11293_v1  ;;  %p7402_p0 = pneg %p7401_p13 }
  0x24   : > { %398 = vst.msk [vmem:[#allocation4 + $0x168] sm:$0xff] %vm351_vm0, %v11293_v1  ;;  %399 = vst.msk [vmem:[#allocation4 + $0x170] sm:$0xff] %vm351_vm0, %v11293_v1  ;;  %v766_v42 = vand.u32 4294901760, %v765_v34  ;;  %v776_v43 = vand.u32 4294901760, %v775_v35  ;;  %v786_v44 = vand.u32 4294901760, %v785_v36  ;;  %v795_v45 = vsub.f32 %v7716_v30, %v11283_v37 }
  0x25   : > { %401 = vst.msk [vmem:[#allocation4 + $0x180] sm:$0xff] %vm351_vm0, %v11293_v1  ;;  %402 = vst.msk [vmem:[#allocation4 + $0x188] sm:$0xff] %vm351_vm0, %v11293_v1  ;;  %v1117_v46 = vand.u32 4294901760, %v1116_v38  ;;  %v7748_v47 = vsub.f32 %v613_v39, %v613_v39  ;;  %v7750_v48 = vsub.f32 %v616_v40, %v616_v40  ;;  %v619_v49 = vsel %vm599_vm1, %v7743_v41, 0 }
  0x26   : > { %404 = vst.msk [vmem:[#allocation4 + $0x198] sm:$0xff] %vm351_vm0, %v11293_v1  ;;  %405 = vst.msk [vmem:[#allocation4 + $0x1a0] sm:$0xff] %vm351_vm0, %v11293_v1  ;;  %6870 = vmatprep.mubr.f32.mxu0 %v766_v42  ;;  %v796_v50 = vand.u32 4294901760, %v795_v45  ;;  %v7754_v51 = vsub.f32 %v619_v49, %v619_v49  ;;  %vm510_vm9 = vcmp.eq.s32.totalorder %v474_v10, %v7666_v7  ;;  %v476_v59 = vadd.s32 72, %v7651_v2 }
  0x27   : > { %11445 = vst [vmem:[#allocation9_spill] sm:$0xff] %v7651_v2  ;;  %vm511_vm10 = vcmp.eq.s32.totalorder %v475_v11, %v7666_v7  ;;  %6871 = vmatmul.mubr.f32.vlgmr.msra.gmra.mxu0 %v776_v43  ;;  %6918 = vmatprep.subr.mxu1 %v1117_v46  ;;  %v11281_v52 = vand.u32 4294901760, %v7748_v47  ;;  %v11279_v53 = vand.u32 4294901760, %v7750_v48  ;;  %v7761_v54 = vsel %vm510_vm9, 1.0, %v11293_v1 }
  0x28   : > { %v7764_v55 = vsel %vm511_vm10, 1.0, %v11293_v1  ;;  %6919 = vmatpush3.msra.mxu1 %v1117_v46  ;;  %6873 = vmatprep.mubr.f32.mxu0 %v786_v44  ;;  %v11278_v56 = vand.u32 4294901760, %v7754_v51  ;;  %v622_v57 = vsel %vm599_vm1, %v7761_v54, 0  ;;  %vm512_vm11 = vcmp.eq.s32.totalorder %v476_v59, %v7666_v7 }
  0x29   : > { %v625_v58 = vsel %vm599_vm1, %v7764_v55, 0  ;;  %6921 = vmatmul.mubr.msk.f32.vlgmr.msra.gmra.mxu1 %vm599_vm1, %v7682_v15  ;;  %v805_v60 = vsub.f32 %v7748_v47, %v11281_v52  ;;  %v815_v61 = vsub.f32 %v7750_v48, %v11279_v53  ;;  %v7780_v62 = vsub.f32 %v622_v57, %v622_v57  ;;  %6969 = vmatpush3.msra.mxu0 %v1114_v25 }
  0x2a   : > { %v7782_v63 = vsub.f32 %v625_v58, %v625_v58  ;;  %6923 = vmatprep.mubr.msk.f32.mxu1 %vm599_vm1, %v7685_v16  ;;  %v825_v3 = vsub.f32 %v7754_v51, %v11278_v56  ;;  %v477_v4 = vadd.s32 80, %v7651_v2  ;;  %v478_v5 = vadd.s32 88, %v7651_v2  ;;  %7018 = vmatprep.subr.mxu1 %v7687_v17 }
  0x2b   : > { %6874 = vmatmul.mubr.f32.gmra.mxu0 %v796_v50  ;;  %v806_v6 = vand.u32 4294901760, %v805_v60  ;;  %v816_v8 = vand.u32 4294901760, %v815_v61  ;;  %v11277_v9 = vand.u32 4294901760, %v7780_v62  ;;  %v7796_v12 = vsel %vm512_vm11, 1.0, %v11293_v1  ;;  %7019 = vmatpush3.msra.mxu1 %v7687_v17 }
  0x2c   : > { %v11276_v10 = vand.u32 4294901760, %v7782_v63  ;;  %v826_v11 = vand.u32 4294901760, %v825_v3  ;;  %vm513_vm12 = vcmp.eq.s32.totalorder %v477_v4, %v7666_v7  ;;  %vm514_vm13 = vcmp.eq.s32.totalorder %v478_v5, %v7666_v7  ;;  %7068 = vmatprep.subr.mxu0 %v7718_v31  ;;  %7118 = vmatprep.subr.mxu1 %v7687_v17 }
  0x2d   : > { %6924 = vmatmul.mubr.msk.f32.gmra.mxu1 %vm599_vm1, %v7704_v24  ;;  %6876 = vmatprep.mubr.f32.mxu0 %v806_v6  ;;  %v835_v13 = vsub.f32 %v7780_v62, %v11277_v9  ;;  %v628_v19 = vsel %vm599_vm1, %v7796_v12, 0  ;;  %v7813_v20 = vsel %vm513_vm12, 1.0, %v11293_v1  ;;  %v7822_v34 = vsel %vm514_vm13, 1.0, %v11293_v1 }
  0x2e   : > { %v845_v18 = vsub.f32 %v7782_v63, %v11276_v10  ;;  %6926 = vmatprep.mubr.msk.f32.mxu1 %vm599_vm1, %v7721_v32  ;;  %v7817_v25 = vsub.f32 %v628_v19, %v628_v19  ;;  %v631_v26 = vsel %vm599_vm1, %v7813_v20, 0  ;;  %11446 = vst [vmem:[#allocation10_spill] sm:$0xff] %v7822_v34  ;;  %v479_v35 = vadd.s32 96, %v7651_v2 }
  0x2f   : > { %6877 = vmatmul.mubr.f32.gmra.mxu0 %v816_v8  ;;  %v836_v36 = vand.u32 4294901760, %v835_v13  ;;  %v7826_v39 = vsub.f32 %v631_v26, %v631_v26  ;;  %v634_v40 = vsel %vm599_vm1, %v7822_v34, 0  ;;  %v480_v44 = vadd.s32 104, %v7651_v2 }
  0x30   : > { %v846_v38 = vand.u32 4294901760, %v845_v18  ;;  %6879 = vmatprep.mubr.f32.mxu0 %v826_v11  ;;  %v11273_v42 = vand.u32 4294901760, %v7817_v25  ;;  %v7831_v43 = vsub.f32 %v634_v40, %v634_v40  ;;  %vm515_vm14 = vcmp.eq.s32.totalorder %v479_v35, %v7666_v7 }
  0x31   : > { %6927 = vmatmul.mubr.msk.f32.gmra.mxu1 %vm599_vm1, %v7724_v33  ;;  %v11272_v45 = vand.u32 4294901760, %v7826_v39  ;;  %v7839_v46 = vsel %vm515_vm14, 1.0, %v11293_v1  ;;  %v481_v49 = vadd.s32 112, %v7651_v2  ;;  %v482_v50 = vadd.s32 120, %v7651_v2 }
  0x32   : > { %11447 = vst [vmem:[#allocation11_spill] sm:$0xff] %v7839_v46  ;;  %6929 = vmatprep.mubr.msk.f32.mxu1 %vm599_vm1, %v7743_v41  ;;  %v855_v57 = vsub.f32 %v7817_v25, %v11273_v42  ;;  %v11270_v58 = vand.u32 4294901760, %v7831_v43  ;;  %v637_v59 = vsel %vm599_vm1, %v7839_v46, 0  ;;  %vm516_vm15 = vcmp.eq.s32.totalorder %v480_v44, %v7666_v7 }
  0x33   : > { %6880 = vmatmul.mubr.f32.gmra.mxu0 %v836_v36  ;;  %v865_v60 = vsub.f32 %v7826_v39, %v11272_v45  ;;  %v7855_v61 = vsub.f32 %v637_v59, %v637_v59  ;;  %v7858_v3 = vsel %vm516_vm15, 1.0, %v11293_v1  ;;  %vm517_vm2 = vcmp.eq.s32.totalorder %v481_v49, %v7666_v7 }
  0x34   : > { %11448 = vst [vmem:[#allocation12_spill] sm:$0xff] %v7858_v3  ;;  %6882 = vmatprep.mubr.f32.mxu0 %v846_v38  ;;  %v856_v4 = vand.u32 4294901760, %v855_v57  ;;  %v875_v5 = vsub.f32 %v7831_v43, %v11270_v58  ;;  %v640_v6 = vsel %vm599_vm1, %v7858_v3, 0  ;;  %v7867_v8 = vsel %vm517_vm2, 1.0, %v11293_v1 }
  0x35   : > { %11449 = vst [vmem:[#allocation13_spill] sm:$0xff] %v7867_v8  ;;  %6930 = vmatmul.mubr.msk.f32.gmra.mxu1 %vm599_vm1, %v7761_v54  ;;  %v866_v11 = vand.u32 4294901760, %v865_v60  ;;  %v11269_v13 = vand.u32 4294901760, %v7855_v61  ;;  %v7872_v18 = vsub.f32 %v640_v6, %v640_v6  ;;  %v643_v19 = vsel %vm599_vm1, %v7867_v8, 0 }
  0x36   : > { %6932 = vmatprep.mubr.msk.f32.mxu1 %vm599_vm1, %v7764_v55  ;;  %v876_v26 = vand.u32 4294901760, %v875_v5  ;;  %v7878_v35 = vsub.f32 %v643_v19, %v643_v19  ;;  %vm518_vm3 = vcmp.eq.s32.totalorder %v482_v50, %v7666_v7  ;;  %v483_v36 = vadd.s32 128, %v7651_v2 }
  0x37   : > { %6883 = vmatmul.mubr.f32.gmra.mxu0 %v856_v4  ;;  %v885_v38 = vsub.f32 %v7855_v61, %v11269_v13  ;;  %v11267_v40 = vand.u32 4294901760, %v7872_v18  ;;  %v7887_v44 = vsel %vm518_vm3, 1.0, %v11293_v1  ;;  %v484_v49 = vadd.s32 136, %v7651_v2 }
  0x38   : > { %11450 = vst [vmem:[#allocation14_spill] sm:$0xff] %v7887_v44  ;;  %6885 = vmatprep.mubr.f32.mxu0 %v866_v11  ;;  %v11268_v57 = vand.u32 4294901760, %v7878_v35  ;;  %v646_v50 = vsel %vm599_vm1, %v7887_v44, 0  ;;  %vm519_vm4 = vcmp.eq.s32.totalorder %v483_v36, %v7666_v7  ;;  %v485_v59 = vadd.s32 144, %v7651_v2 }
  0x39   : > { %6933 = vmatmul.mubr.msk.f32.gmra.mxu1 %vm599_vm1, %v7796_v12  ;;  %v886_v60 = vand.u32 4294901760, %v885_v38  ;;  %v895_v4 = vsub.f32 %v7872_v18, %v11267_v40  ;;  %v7900_v5 = vsub.f32 %v646_v50, %v646_v50  ;;  %v7903_v6 = vsel %vm519_vm4, 1.0, %v11293_v1 }
  0x3a   : > { %11451 = vst [vmem:[#allocation15_spill] sm:$0xff] %v7903_v6  ;;  %6935 = vmatprep.mubr.msk.f32.mxu1 %vm599_vm1, %v7813_v20  ;;  %v905_v11 = vsub.f32 %v7878_v35, %v11268_v57  ;;  %v649_v19 = vsel %vm599_vm1, %v7903_v6, 0  ;;  %vm520_vm5 = vcmp.eq.s32.totalorder %v484_v49, %v7666_v7  ;;  %vm521_vm6 = vcmp.eq.s32.totalorder %v485_v59, %v7666_v7 }
  0x3b   : > { %6886 = vmatmul.mubr.f32.gmra.mxu0 %v876_v26  ;;  %v896_v36 = vand.u32 4294901760, %v895_v4  ;;  %v11271_v38 = vand.u32 4294901760, %v7900_v5  ;;  %v7915_v50 = vsub.f32 %v649_v19, %v649_v19  ;;  %v7918_v0 = vsel %vm520_vm5, 1.0, %v11293_v1 }
  0x3c   : > { %11452 = vst [vmem:[#allocation16_spill] sm:$0xff] %v7918_v0  ;;  %6888 = vmatprep.mubr.f32.mxu0 %v886_v60  ;;  %v906_v40 = vand.u32 4294901760, %v905_v11  ;;  %v652_v57 = vsel %vm599_vm1, %v7918_v0, 0  ;;  %v7923_v13 = vsel %vm521_vm6, 1.0, %v11293_v1  ;;  %v486_v49 = vadd.s32 152, %v7651_v2 }
  0x3d   : > { %11453 = vst [vmem:[#allocation17_spill] sm:$0xff] %v7923_v13  ;;  %6936 = vmatmul.mubr.msk.f32.gmra.mxu1 %vm599_vm1, %v7822_v34  ;;  %v915_v26 = vsub.f32 %v7900_v5, %v11271_v38  ;;  %v11274_v59 = vand.u32 4294901760, %v7915_v50  ;;  %v7932_v4 = vsub.f32 %v652_v57, %v652_v57  ;;  %v655_v60 = vsel %vm599_vm1, %v7923_v13, 0 }
  0x3e   : > { %6938 = vmatprep.mubr.msk.f32.mxu1 %vm599_vm1, %v7839_v46  ;;  %v7938_v11 = vsub.f32 %v655_v60, %v655_v60  ;;  %vm522_vm7 = vcmp.eq.s32.totalorder %v486_v49, %v7666_v7  ;;  %v487_v19 = vadd.s32 160, %v7651_v2  ;;  %v488_v58 = vadd.s32 168, %v7651_v2 }
  0x3f   : > { %6889 = vmatmul.mubr.f32.gmra.mxu0 %v896_v36  ;;  %v916_v38 = vand.u32 4294901760, %v915_v26  ;;  %v925_v57 = vsub.f32 %v7915_v50, %v11274_v59  ;;  %v11275_v45 = vand.u32 4294901760, %v7932_v4  ;;  %v7948_v42 = vsel %vm522_vm7, 1.0, %v11293_v1 }
  0x40   : > { %11454 = vst [vmem:[#allocation18_spill] sm:$0xff] %v7948_v42  ;;  %6891 = vmatprep.mubr.f32.mxu0 %v906_v40  ;;  %v11280_v60 = vand.u32 4294901760, %v7938_v11  ;;  %v658_v49 = vsel %vm599_vm1, %v7948_v42, 0  ;;  %vm523_vm8 = vcmp.eq.s32.totalorder %v487_v19, %v7666_v7  ;;  %vm524_vm9 = vcmp.eq.s32.totalorder %v488_v58, %v7666_v7 }
  0x41   : > { %6939 = vmatmul.mubr.msk.f32.gmra.mxu1 %vm599_vm1, %v7858_v3  ;;  %v926_v36 = vand.u32 4294901760, %v925_v57  ;;  %v935_v26 = vsub.f32 %v7932_v4, %v11275_v45  ;;  %v7960_v59 = vsub.f32 %v658_v49, %v658_v49  ;;  %v7963_v40 = vsel %vm523_vm8, 1.0, %v11293_v1 }
  0x42   : > { %11455 = vst [vmem:[#allocation19_spill] sm:$0xff] %v7963_v40  ;;  %6941 = vmatprep.mubr.msk.f32.mxu1 %vm599_vm1, %v7867_v8  ;;  %v945_v58 = vsub.f32 %v7938_v11, %v11280_v60  ;;  %v661_v19 = vsel %vm599_vm1, %v7963_v40, 0  ;;  %v7973_v57 = vsel %vm524_vm9, 1.0, %v11293_v1  ;;  %v489_v45 = vadd.s32 176, %v7651_v2 }
  0x43   : > { %11456 = vst [vmem:[#allocation20_spill] sm:$0xff] %v7973_v57  ;;  %6892 = vmatmul.mubr.f32.gmra.mxu0 %v916_v38  ;;  %v936_v49 = vand.u32 4294901760, %v935_v26  ;;  %v11282_v10 = vand.u32 4294901760, %v7960_v59  ;;  %v7977_v9 = vsub.f32 %v661_v19, %v661_v19  ;;  %v664_v56 = vsel %vm599_vm1, %v7973_v57, 0 }
  0x44   : > { %6894 = vmatprep.mubr.f32.mxu0 %v926_v36  ;;  %v946_v53 = vand.u32 4294901760, %v945_v58  ;;  %v7981_v60 = vsub.f32 %v664_v56, %v664_v56  ;;  %vm525_vm10 = vcmp.eq.s32.totalorder %v489_v45, %v7666_v7  ;;  %v490_v52 = vadd.s32 184, %v7651_v2 }
  0x45   : > { %6942 = vmatmul.mubr.msk.f32.gmra.mxu1 %vm599_vm1, %v7887_v44  ;;  %v955_v38 = vsub.f32 %v7960_v59, %v11282_v10  ;;  %v11288_v26 = vand.u32 4294901760, %v7977_v9  ;;  %v7992_v19 = vsel %vm525_vm10, 1.0, %v11293_v1  ;;  %v491_v36 = vadd.s32 192, %v7651_v2 }
  0x46   : > { %11457 = vst [vmem:[#allocation21_spill] sm:$0xff] %v7992_v19  ;;  %6944 = vmatprep.mubr.msk.f32.mxu1 %vm599_vm1, %v7903_v6  ;;  %v11287_v56 = vand.u32 4294901760, %v7981_v60  ;;  %v667_v45 = vsel %vm599_vm1, %v7992_v19, 0  ;;  %vm526_vm11 = vcmp.eq.s32.totalorder %v490_v52, %v7666_v7  ;;  %v492_v58 = vadd.s32 200, %v7651_v2 }
  0x47   : > { %6895 = vmatmul.mubr.f32.gmra.mxu0 %v936_v49  ;;  %v956_v10 = vand.u32 4294901760, %v955_v38  ;;  %v965_v37 = vsub.f32 %v7977_v9, %v11288_v26  ;;  %v8005_v29 = vsub.f32 %v667_v45, %v667_v45  ;;  %v8008_v28 = vsel %vm526_vm11, 1.0, %v11293_v1 }
  0x48   : > { %11458 = vst [vmem:[#allocation22_spill] sm:$0xff] %v8008_v28  ;;  %6897 = vmatprep.mubr.f32.mxu0 %v946_v53  ;;  %v975_v27 = vsub.f32 %v7981_v60, %v11287_v56  ;;  %v670_v52 = vsel %vm599_vm1, %v8008_v28, 0  ;;  %vm527_vm12 = vcmp.eq.s32.totalorder %v491_v36, %v7666_v7  ;;  %vm528_vm13 = vcmp.eq.s32.totalorder %v492_v58, %v7666_v7 }
  0x49   : > { %6945 = vmatmul.mubr.msk.f32.gmra.mxu1 %vm599_vm1, %v7918_v0  ;;  %v966_v49 = vand.u32 4294901760, %v965_v37  ;;  %v11295_v38 = vand.u32 4294901760, %v8005_v29  ;;  %v8020_v45 = vsub.f32 %v670_v52, %v670_v52  ;;  %v8023_v53 = vsel %vm527_vm12, 1.0, %v11293_v1 }
  0x4a   : > { %11459 = vst [vmem:[#allocation23_spill] sm:$0xff] %v8023_v53  ;;  %6947 = vmatprep.mubr.msk.f32.mxu1 %vm599_vm1, %v7923_v13  ;;  %v976_v56 = vand.u32 4294901760, %v975_v27  ;;  %v673_v36 = vsel %vm599_vm1, %v8023_v53, 0  ;;  %v8030_v58 = vsel %vm528_vm13, 1.0, %v11293_v1  ;;  %v493_v26 = vadd.s32 208, %v7651_v2 }
  0x4b   : > { %6898 = vmatmul.mubr.f32.gmra.mxu0 %v956_v10  ;;  %v985_v37 = vsub.f32 %v8005_v29, %v11295_v38  ;;  %v11300_v52 = vand.u32 4294901760, %v8020_v45  ;;  %v8037_v0 = vsub.f32 %v673_v36, %v673_v36  ;;  %v676_v27 = vsel %vm599_vm1, %v8030_v58, 0 }
  0x4c   : > { %6900 = vmatprep.mubr.f32.mxu0 %v966_v49  ;;  %v8041_v13 = vsub.f32 %v676_v27, %v676_v27  ;;  %vm529_vm14 = vcmp.eq.s32.totalorder %v493_v26, %v7666_v7  ;;  %v494_v1 = vadd.s32 216, %v7651_v2  ;;  %v495_v10 = vadd.s32 224, %v7651_v2 }
  0x4d   : > { %6948 = vmatmul.mubr.msk.f32.gmra.mxu1 %vm599_vm1, %v7948_v42  ;;  %v986_v38 = vand.u32 4294901760, %v985_v37  ;;  %v995_v36 = vsub.f32 %v8020_v45, %v11300_v52  ;;  %v11307_v6 = vand.u32 4294901760, %v8037_v0  ;;  %v11460_v44 = vmov 0.0  }
  0x4e   : > { %v8053_v49 = vsel %vm529_vm14, 1.0, %v11460_v44  ;;  %6950 = vmatprep.mubr.msk.f32.mxu1 %vm599_vm1, %v7963_v40  ;;  %v11308_v26 = vand.u32 4294901760, %v8041_v13  ;;  %vm530_vm15 = vcmp.eq.s32.totalorder %v494_v1, %v7666_v7  ;;  %vm531_vm2 = vcmp.eq.s32.totalorder %v495_v10, %v7666_v7 }
  0x4f   : > { %v679_v27 = vsel %vm599_vm1, %v8053_v49, 0  ;;  %6901 = vmatmul.mubr.f32.gmra.mxu0 %v976_v56  ;;  %v996_v37 = vand.u32 4294901760, %v995_v36  ;;  %v1005_v52 = vsub.f32 %v8037_v0, %v11307_v6  ;;  %v8068_v8 = vsel %vm530_vm15, 1.0, %v11460_v44 }
  0x50   : > { %v8065_v42 = vsub.f32 %v679_v27, %v679_v27  ;;  %6903 = vmatprep.mubr.f32.mxu0 %v986_v38  ;;  %v1015_v40 = vsub.f32 %v8041_v13, %v11308_v26  ;;  %v682_v1 = vsel %vm599_vm1, %v8068_v8, 0  ;;  %v8076_v56 = vsel %vm531_vm2, 1.0, %v11460_v44 }
  0x51   : > { %v496_v10 = vadd.s32 232, %v7651_v2  ;;  %6951 = vmatmul.mubr.msk.f32.gmra.mxu1 %vm599_vm1, %v7973_v57  ;;  %v1006_v36 = vand.u32 4294901760, %v1005_v52  ;;  %v8082_v6 = vsub.f32 %v682_v1, %v682_v1  ;;  %v685_v38 = vsel %vm599_vm1, %v8076_v56, 0 }
  0x52   : > { %v11317_v27 = vand.u32 4294901760, %v8065_v42  ;;  %6953 = vmatprep.mubr.msk.f32.mxu1 %vm599_vm1, %v7992_v19  ;;  %v1016_v26 = vand.u32 4294901760, %v1015_v40  ;;  %v8088_v3 = vsub.f32 %v685_v38, %v685_v38  ;;  %v497_v46 = vadd.s32 240, %v7651_v2 }
  0x53   : > { %vm532_vm3 = vcmp.eq.s32.totalorder %v496_v10, %v7666_v7  ;;  %6904 = vmatmul.mubr.f32.gmra.mxu0 %v996_v37  ;;  %v11320_v1 = vand.u32 4294901760, %v8082_v6  ;;  %v498_v34 = vadd.s32 248, %v7651_v2  ;;  %vm410_vm6 = vcmask 263168  }
  0x54   : > { %v1025_v52 = vsub.f32 %v8065_v42, %v11317_v27  ;;  %v8097_v57 = vsel %vm532_vm3, 1.0, %v11460_v44  ;;  %6906 = vmatprep.mubr.f32.mxu0 %v1006_v36  ;;  %v1044_v40 = vand.u32 4294901760, %v8088_v3  ;;  %vm533_vm4 = vcmp.eq.s32.totalorder %v497_v46, %v7666_v7  ;;  %420 = vst.msk [vmem:[#allocation2 + $0x58] sm:$0x3] %vm410_vm6, %v11460_v44  ;;  %411 = vst.msk [vmem:[#allocation2 + $0x10] sm:$0x3] %vm410_vm6, %v11460_v44 }
  0x55   : > { %v688_v10 = vsel %vm599_vm1, %v8097_v57, 0  ;;  %6954 = vmatmul.mubr.msk.f32.gmra.mxu1 %vm599_vm1, %v8008_v28  ;;  %v1035_v38 = vsub.f32 %v8082_v6, %v11320_v1  ;;  %v8112_v2 = vsel %vm533_vm4, 1.0, %v11460_v44  ;;  %vm534_vm5 = vcmp.eq.s32.totalorder %v498_v34, %v7666_v7  ;;  %414 = vst.msk [vmem:[#allocation2 + $0x28] sm:$0x3] %vm410_vm6, %v11460_v44  ;;  %417 = vst.msk [vmem:[#allocation2 + $0x40] sm:$0x3] %vm410_vm6, %v11460_v44 }
  0x56   : > { %v1026_v37 = vand.u32 4294901760, %v1025_v52  ;;  %v8109_v27 = vsub.f32 %v688_v10, %v688_v10  ;;  %6956 = vmatprep.mubr.msk.f32.mxu1 %vm599_vm1, %v8023_v53  ;;  %v1045_v46 = vsub.f32 %v8088_v3, %v1044_v40  ;;  %v691_v36 = vsel %vm599_vm1, %v8112_v2, 0  ;;  %423 = vst.msk [vmem:[#allocation2 + $0x70] sm:$0x3] %vm410_vm6, %v11460_v44  ;;  %426 = vst.msk [vmem:[#allocation2 + $0x88] sm:$0x3] %vm410_vm6, %v11460_v44 }
  0x57   : > { %6907 = vmatmul.mubr.f32.gmra.mxu0 %v1016_v26  ;;  %v1036_v52 = vand.u32 4294901760, %v1035_v38  ;;  %v8123_v1 = vsub.f32 %v691_v36, %v691_v36  ;;  %v8126_v28 = vsel %vm534_vm5, 1.0, %v11460_v44  ;;  %429 = vst.msk [vmem:[#allocation2 + $0xa0] sm:$0x3] %vm410_vm6, %v11460_v44  ;;  %432 = vst.msk [vmem:[#allocation2 + $0xb8] sm:$0x3] %vm410_vm6, %v11460_v44 }
  0x58   : > { %v1054_v10 = vand.u32 4294901760, %v8109_v27  ;;  %6909 = vmatprep.mubr.f32.mxu0 %v1026_v37  ;;  %v1046_v53 = vand.u32 4294901760, %v1045_v46  ;;  %v694_v19 = vsel %vm599_vm1, %v8126_v28, 0  ;;  %435 = vst.msk [vmem:[#allocation2 + $0xd0] sm:$0x3] %vm410_vm6, %v11460_v44 }
  0x59   : > { %6957 = vmatmul.mubr.msk.f32.gmra.mxu1 %vm599_vm1, %v8030_v58  ;;  %v1064_v34 = vand.u32 4294901760, %v8123_v1  ;;  %v8136_v26 = vsub.f32 %v694_v19, %v694_v19  ;;  %438 = vst.msk [vmem:[#allocation2 + $0xe8] sm:$0x3] %vm410_vm6, %v11460_v44  ;;  %441 = vst.msk [vmem:[#allocation2 + $0x100] sm:$0x3] %vm410_vm6, %v11460_v44 }
  0x5a   : > { %v1055_v7 = vsub.f32 %v8109_v27, %v1054_v10  ;;  %6959 = vmatprep.mubr.msk.f32.mxu1 %vm599_vm1, %v8053_v49  ;;  %444 = vst.msk [vmem:[#allocation2 + $0x118] sm:$0x3] %vm410_vm6, %v11460_v44  ;;  %447 = vst.msk [vmem:[#allocation2 + $0x130] sm:$0x3] %vm410_vm6, %v11460_v44 }
  0x5b   : > { %6910 = vmatmul.mubr.f32.gmra.mxu0 %v1036_v52  ;;  %v1065_v38 = vsub.f32 %v8123_v1, %v1064_v34  ;;  %v1074_v46 = vand.u32 4294901760, %v8136_v26  ;;  %450 = vst.msk [vmem:[#allocation2 + $0x148] sm:$0x3] %vm410_vm6, %v11460_v44  ;;  %453 = vst.msk [vmem:[#allocation2 + $0x160] sm:$0x3] %vm410_vm6, %v11460_v44 }
  0x5c   : > { %v1056_v37 = vand.u32 4294901760, %v1055_v7  ;;  %6912 = vmatprep.mubr.f32.mxu0 %v1046_v53  ;;  %v11461_v53 = vand.u32 4294901760, %v7697_v21  ;;  %v11462_v7 = vand.u32 4294901760, %v7699_v22  ;;  %456 = vst.msk [vmem:[#allocation2 + $0x178] sm:$0x3] %vm410_vm6, %v11460_v44 }
  0x5d   : > { %6960 = vmatmul.mubr.msk.f32.gmra.mxu1 %vm599_vm1, %v8068_v8  ;;  %v1066_v36 = vand.u32 4294901760, %v1065_v38  ;;  %v1075_v19 = vsub.f32 %v8136_v26, %v1074_v46  ;;  %v11465_v38 = vand.u32 4294901760, %v7748_v47  ;;  %459 = vst.msk [vmem:[#allocation2 + $0x190] sm:$0x3] %vm410_vm6, %v11460_v44  ;;  %462 = vst.msk [vmem:[#allocation2 + $0x1a8] sm:$0x3] %vm410_vm6, %v11460_v44 }
  0x5e   : > { %6962 = vmatprep.mubr.msk.f32.mxu1 %vm599_vm1, %v8076_v56 }
  0x5f   : > { %6913 = vmatmul.mubr.f32.gmra.mxu0 %v1056_v37  ;;  %v1076_v52 = vand.u32 4294901760, %v1075_v19  ;;  %v11463_v37 = vand.u32 4294901760, %v7701_v23 }
  0x60   : > { %6915 = vmatprep.mubr.f32.mxu0 %v1066_v36 }
  0x61   : > { %6963 = vmatmul.mubr.msk.f32.gmra.mxu1 %vm599_vm1, %v8097_v57 }
  0x62   : > { %6965 = vmatprep.mubr.msk.f32.mxu1 %vm599_vm1, %v8112_v2 }
  0x63   : > { %6916 = vmatmul.mubr.f32.gmra.mxu0 %v1076_v52 }
  0x64   : > { %6970 = vmatprep.mubr.f32.mxu0 %v7697_v21  ;;  %v11464_v21 = vand.u32 4294901760, %v7716_v30 }
  0x65   : > { %6966 = vmatmul.mubr.msk.f32.gmra.mxu1 %vm599_vm1, %v8126_v28 }
  0x66   : > { %7020 = vmatprep.mubr.f32.mxu1 %v11461_v53 }
  0x67   : > { %6971 = vmatmul.mubr.f32.vlgmr.msra.gmra.mxu0 %v7699_v22  ;;  %v11466_v22 = vand.u32 4294901760, %v7750_v48 }
  0x68   : > { %6973 = vmatprep.mubr.f32.mxu0 %v7701_v23  ;;  %7069 = vmatpush3.msra.mxu0 %v7718_v31  ;;  %v11467_v23 = vand.u32 4294901760, %v7754_v51  ;;  %v11470_v31 = vand.u32 4294901760, %v7817_v25 }
  0x69   : > { %7021 = vmatmul.mubr.f32.vlgmr.msra.gmra.mxu1 %v11462_v7 }
  0x6a   : > { %7023 = vmatprep.mubr.f32.mxu1 %v11463_v37  ;;  %7119 = vmatpush3.msra.mxu1 %v7687_v17  ;;  %v11468_v17 = vand.u32 4294901760, %v7780_v62 }
  0x6b   : > { %6974 = vmatmul.mubr.f32.gmra.mxu0 %v7716_v30  ;;  %v11469_v30 = vand.u32 4294901760, %v7782_v63 }
  0x6c   : > { %6976 = vmatprep.mubr.f32.mxu0 %v7748_v47  ;;  %v11471_v47 = vand.u32 4294901760, %v7826_v39 }
  0x6d   : > { %7024 = vmatmul.mubr.f32.gmra.mxu1 %v11464_v21 }
  0x6e   : > { %7026 = vmatprep.mubr.f32.mxu1 %v11465_v38 }
  0x6f   : > { %6977 = vmatmul.mubr.f32.gmra.mxu0 %v7750_v48  ;;  %v11472_v48 = vand.u32 4294901760, %v7831_v43 }
  0x70   : > { %6979 = vmatprep.mubr.f32.mxu0 %v7754_v51  ;;  %v11473_v51 = vand.u32 4294901760, %v7855_v61 }
  0x71   : > { %7027 = vmatmul.mubr.f32.gmra.mxu1 %v11466_v22 }
  0x72   : > { %7029 = vmatprep.mubr.f32.mxu1 %v11467_v23 }
  0x73   : > { %6980 = vmatmul.mubr.f32.gmra.mxu0 %v7780_v62  ;;  %v11474_v62 = vand.u32 4294901760, %v7872_v18 }
  0x74   : > { %6982 = vmatprep.mubr.f32.mxu0 %v7782_v63  ;;  %v11475_v63 = vand.u32 4294901760, %v7878_v35 }
  0x75   : > { %7030 = vmatmul.mubr.f32.gmra.mxu1 %v11468_v17 }
  0x76   : > { %7032 = vmatprep.mubr.f32.mxu1 %v11469_v30 }
  0x77   : > { %6983 = vmatmul.mubr.f32.gmra.mxu0 %v7817_v25  ;;  %v11476_v25 = vand.u32 4294901760, %v7900_v5 }
  0x78   : > { %6985 = vmatprep.mubr.f32.mxu0 %v7826_v39  ;;  %v11477_v39 = vand.u32 4294901760, %v7915_v50 }
  0x79   : > { %7033 = vmatmul.mubr.f32.gmra.mxu1 %v11470_v31 }
  0x7a   : > { %7035 = vmatprep.mubr.f32.mxu1 %v11471_v47 }
  0x7b   : > { %6986 = vmatmul.mubr.f32.gmra.mxu0 %v7831_v43  ;;  %v11478_v43 = vand.u32 4294901760, %v7932_v4 }
  0x7c   : > { %6988 = vmatprep.mubr.f32.mxu0 %v7855_v61  ;;  %v11479_v61 = vand.u32 4294901760, %v7938_v11 }
  0x7d   : > { %7036 = vmatmul.mubr.f32.gmra.mxu1 %v11472_v48 }
  0x7e   : > { %7038 = vmatprep.mubr.f32.mxu1 %v11473_v51 }
  0x7f   : > { %6989 = vmatmul.mubr.f32.gmra.mxu0 %v7872_v18  ;;  %v11480_v18 = vand.u32 4294901760, %v7960_v59 }
  0x80   : > { %6991 = vmatprep.mubr.f32.mxu0 %v7878_v35  ;;  %v11481_v35 = vand.u32 4294901760, %v7977_v9 }
  0x81   : > { %7039 = vmatmul.mubr.f32.gmra.mxu1 %v11474_v62 }
  0x82   : > { %7041 = vmatprep.mubr.f32.mxu1 %v11475_v63 }
  0x83   : > { %6992 = vmatmul.mubr.f32.gmra.mxu0 %v7900_v5  ;;  %v11482_v5 = vand.u32 4294901760, %v7981_v60 }
  0x84   : > { %6994 = vmatprep.mubr.f32.mxu0 %v7915_v50  ;;  %v11483_v50 = vand.u32 4294901760, %v8005_v29 }
  0x85   : > { %7042 = vmatmul.mubr.f32.gmra.mxu1 %v11476_v25 }
  0x86   : > { %7044 = vmatprep.mubr.f32.mxu1 %v11477_v39 }
  0x87   : > { %6995 = vmatmul.mubr.f32.gmra.mxu0 %v7932_v4  ;;  %v11486_v4 = vand.u32 4294901760, %v8041_v13 }
  0x88   : > { %6997 = vmatprep.mubr.f32.mxu0 %v7938_v11  ;;  %v11488_v11 = vand.u32 4294901760, %v8082_v6 }
  0x89   : > { %7045 = vmatmul.mubr.f32.gmra.mxu1 %v11478_v43 }
  0x8a   : > { %7047 = vmatprep.mubr.f32.mxu1 %v11479_v61 }
  0x8b   : > { %6998 = vmatmul.mubr.f32.gmra.mxu0 %v7960_v59  ;;  %v11484_v59 = vand.u32 4294901760, %v8020_v45 }
  0x8c   : > { %7000 = vmatprep.mubr.f32.mxu0 %v7977_v9  ;;  %v11485_v9 = vand.u32 4294901760, %v8037_v0 }
  0x8d   : > { %7048 = vmatmul.mubr.f32.gmra.mxu1 %v11480_v18 }
  0x8e   : > { %7050 = vmatprep.mubr.f32.mxu1 %v11481_v35 }
  0x8f   : > { %7001 = vmatmul.mubr.f32.gmra.mxu0 %v7981_v60 }
  0x90   : > { %7003 = vmatprep.mubr.f32.mxu0 %v8005_v29  ;;  %v11487_v29 = vand.u32 4294901760, %v8065_v42 }
  0x91   : > { %7051 = vmatmul.mubr.f32.gmra.mxu1 %v11482_v5 }
  0x92   : > { %7053 = vmatprep.mubr.f32.mxu1 %v11483_v50 }
  0x93   : > { %7004 = vmatmul.mubr.f32.gmra.mxu0 %v8020_v45 }
  0x94   : > { %7006 = vmatprep.mubr.f32.mxu0 %v8037_v0  ;;  %v11489_v0 = vld [vmem:[#allocation10_spill] sm:$0xff] }
  0x95   : > { %7054 = vmatmul.mubr.f32.gmra.mxu1 %v11484_v59 }
  0x96   : > { %7056 = vmatprep.mubr.f32.mxu1 %v11485_v9 }
  0x97   : > { %7007 = vmatmul.mubr.f32.gmra.mxu0 %v8041_v13 }
  0x98   : > { %7009 = vmatprep.mubr.f32.mxu0 %v8065_v42  ;;  %v11501_v42 = vld [vmem:[#allocation22_spill] sm:$0xff] }
  0x99   : > { %7057 = vmatmul.mubr.f32.gmra.mxu1 %v11486_v4  ;;  %v7478_v4 = vmov 32  }
  0x9a   : > { %7059 = vmatprep.mubr.f32.mxu1 %v11487_v29  ;;  %7229 = vset.pattern.permute.xlu1 %v7478_v4 }
  0x9b   : > { %7010 = vmatmul.mubr.f32.gmra.mxu0 %v8082_v6  ;;  %7230 = vset.pattern.permute.xlu0 %v7478_v4 }
  0x9c   : > { %7012 = vmatprep.mubr.f32.mxu0 %v8088_v3  ;;  %v11502_v3 = vld [vmem:[#allocation23_spill] sm:$0xff] }
  0x9d   : > { %7060 = vmatmul.mubr.f32.gmra.mxu1 %v11488_v11 }
  0x9e   : > { %7062 = vmatprep.mubr.f32.mxu1 %v1044_v40 }
  0x9f   : > { %7013 = vmatmul.mubr.f32.gmra.mxu0 %v8109_v27 }
  0xa0   : > { %7015 = vmatprep.mubr.f32.mxu0 %v8123_v1 }
  0xa1   : > { %7063 = vmatmul.mubr.f32.gmra.mxu1 %v1054_v10 }
  0xa2   : > { %7065 = vmatprep.mubr.f32.mxu1 %v1064_v34 }
  0xa3   : > { %7016 = vmatmul.mubr.f32.gmra.mxu0 %v8136_v26 }
  0xa4   : > { %7070 = vmatprep.mubr.msk.f32.mxu0 %vm599_vm1, %v7679_v14 }
  0xa5   : > { %7066 = vmatmul.mubr.f32.gmra.mxu1 %v1074_v46 }
  0xa6   : > { %7120 = vmatprep.mubr.msk.f32.mxu1 %vm599_vm1, %v7679_v14  ;;  %v11490_v14 = vld [vmem:[#allocation11_spill] sm:$0xff] }
  0xa7   : > { %7071 = vmatmul.mubr.msk.f32.vlgmr.msra.gmra.mxu0 %vm599_vm1, %v7682_v15 }
  0xa8   : > { %7073 = vmatprep.mubr.msk.f32.mxu0 %vm599_vm1, %v7685_v16 }
  0xa9   : > { %7121 = vmatmul.mubr.msk.f32.vlgmr.msra.gmra.mxu1 %vm599_vm1, %v7682_v15  ;;  %v11491_v15 = vld [vmem:[#allocation12_spill] sm:$0xff] }
  0xaa   : > { %7123 = vmatprep.mubr.msk.f32.mxu1 %vm599_vm1, %v7685_v16  ;;  %v11492_v16 = vld [vmem:[#allocation13_spill] sm:$0xff] }
  0xab   : > { %7074 = vmatmul.mubr.msk.f32.gmra.mxu0 %vm599_vm1, %v7704_v24 }
  0xac   : > { %7076 = vmatprep.mubr.msk.f32.mxu0 %vm599_vm1, %v7721_v32 }
  0xad   : > { %7124 = vmatmul.mubr.msk.f32.gmra.mxu1 %vm599_vm1, %v7704_v24  ;;  %v11493_v24 = vld [vmem:[#allocation14_spill] sm:$0xff] }
  0xae   : > { %7126 = vmatprep.mubr.msk.f32.mxu1 %vm599_vm1, %v7721_v32  ;;  %v11494_v32 = vld [vmem:[#allocation15_spill] sm:$0xff] }
  0xaf   : > { %7077 = vmatmul.mubr.msk.f32.gmra.mxu0 %vm599_vm1, %v7724_v33 }
  0xb0   : > { %7079 = vmatprep.mubr.msk.f32.mxu0 %vm599_vm1, %v7743_v41 }
  0xb1   : > { %7127 = vmatmul.mubr.msk.f32.gmra.mxu1 %vm599_vm1, %v7724_v33  ;;  %v11495_v33 = vld [vmem:[#allocation16_spill] sm:$0xff] }
  0xb2   : > { %7129 = vmatprep.mubr.msk.f32.mxu1 %vm599_vm1, %v7743_v41  ;;  %v11496_v41 = vld [vmem:[#allocation17_spill] sm:$0xff] }
  0xb3   : > { %7080 = vmatmul.mubr.msk.f32.gmra.mxu0 %vm599_vm1, %v7761_v54 }
  0xb4   : > { %7082 = vmatprep.mubr.msk.f32.mxu0 %vm599_vm1, %v7764_v55 }
  0xb5   : > { %7130 = vmatmul.mubr.msk.f32.gmra.mxu1 %vm599_vm1, %v7761_v54  ;;  %v11497_v54 = vld [vmem:[#allocation18_spill] sm:$0xff] }
  0xb6   : > { %7132 = vmatprep.mubr.msk.f32.mxu1 %vm599_vm1, %v7764_v55  ;;  %v11498_v55 = vld [vmem:[#allocation19_spill] sm:$0xff] }
  0xb7   : > { %7083 = vmatmul.mubr.msk.f32.gmra.mxu0 %vm599_vm1, %v7796_v12 }
  0xb8   : > { %7085 = vmatprep.mubr.msk.f32.mxu0 %vm599_vm1, %v7813_v20 }
  0xb9   : > { %7133 = vmatmul.mubr.msk.f32.gmra.mxu1 %vm599_vm1, %v7796_v12  ;;  %v11499_v12 = vld [vmem:[#allocation20_spill] sm:$0xff] }
  0xba   : > { %7135 = vmatprep.mubr.msk.f32.mxu1 %vm599_vm1, %v7813_v20  ;;  %v11500_v20 = vld [vmem:[#allocation21_spill] sm:$0xff] }
  0xbb   : > { %7086 = vmatmul.mubr.msk.f32.gmra.mxu0 %vm599_vm1, %v11489_v0 }
  0xbc   : > { %7088 = vmatprep.mubr.msk.f32.mxu0 %vm599_vm1, %v11490_v14 }
  0xbd   : > { %7136 = vmatmul.mubr.msk.f32.gmra.mxu1 %vm599_vm1, %v11489_v0 }
  0xbe   : > { %7138 = vmatprep.mubr.msk.f32.mxu1 %vm599_vm1, %v11490_v14 }
  0xbf   : > { %7089 = vmatmul.mubr.msk.f32.gmra.mxu0 %vm599_vm1, %v11491_v15 }
  0xc0   : > { %7091 = vmatprep.mubr.msk.f32.mxu0 %vm599_vm1, %v11492_v16 }
  0xc1   : > { %7139 = vmatmul.mubr.msk.f32.gmra.mxu1 %vm599_vm1, %v11491_v15 }
  0xc2   : > { %7141 = vmatprep.mubr.msk.f32.mxu1 %vm599_vm1, %v11492_v16 }
  0xc3   : > { %7092 = vmatmul.mubr.msk.f32.gmra.mxu0 %vm599_vm1, %v11493_v24 }
  0xc4   : > { %7094 = vmatprep.mubr.msk.f32.mxu0 %vm599_vm1, %v11494_v32 }
  0xc5   : > { %7142 = vmatmul.mubr.msk.f32.gmra.mxu1 %vm599_vm1, %v11493_v24 }
  0xc6   : > { %7144 = vmatprep.mubr.msk.f32.mxu1 %vm599_vm1, %v11494_v32 }
  0xc7   : > { %7095 = vmatmul.mubr.msk.f32.gmra.mxu0 %vm599_vm1, %v11495_v33 }
  0xc8   : > { %7097 = vmatprep.mubr.msk.f32.mxu0 %vm599_vm1, %v11496_v41 }
  0xc9   : > { %7145 = vmatmul.mubr.msk.f32.gmra.mxu1 %vm599_vm1, %v11495_v33 }
  0xca   : > { %7147 = vmatprep.mubr.msk.f32.mxu1 %vm599_vm1, %v11496_v41 }
  0xcb   : > { %7098 = vmatmul.mubr.msk.f32.gmra.mxu0 %vm599_vm1, %v11497_v54 }
  0xcc   : > { %7100 = vmatprep.mubr.msk.f32.mxu0 %vm599_vm1, %v11498_v55 }
  0xcd   : > { %7148 = vmatmul.mubr.msk.f32.gmra.mxu1 %vm599_vm1, %v11497_v54 }
  0xce   : > { %7150 = vmatprep.mubr.msk.f32.mxu1 %vm599_vm1, %v11498_v55 }
  0xcf   : > { %7101 = vmatmul.mubr.msk.f32.gmra.mxu0 %vm599_vm1, %v11499_v12 }
  0xd0   : > { %7103 = vmatprep.mubr.msk.f32.mxu0 %vm599_vm1, %v11500_v20 }
  0xd1   : > { %7151 = vmatmul.mubr.msk.f32.gmra.mxu1 %vm599_vm1, %v11499_v12 }
  0xd2   : > { %7153 = vmatprep.mubr.msk.f32.mxu1 %vm599_vm1, %v11500_v20 }
  0xd3   : > { %7104 = vmatmul.mubr.msk.f32.gmra.mxu0 %vm599_vm1, %v11501_v42 }
  0xd4   : > { %7106 = vmatprep.mubr.msk.f32.mxu0 %vm599_vm1, %v11502_v3 }
  0xd5   : > { %7154 = vmatmul.mubr.msk.f32.gmra.mxu1 %vm599_vm1, %v11501_v42 }
  0xd6   : > { %7156 = vmatprep.mubr.msk.f32.mxu1 %vm599_vm1, %v11502_v3 }
  0xd7   : > { %7107 = vmatmul.mubr.msk.f32.gmra.mxu0 %vm599_vm1, %v8030_v58 }
  0xd8   : > { %7109 = vmatprep.mubr.msk.f32.mxu0 %vm599_vm1, %v8053_v49 }
  0xd9   : > { %7157 = vmatmul.mubr.msk.f32.gmra.mxu1 %vm599_vm1, %v8030_v58 }
  0xda   : > { %7159 = vmatprep.mubr.msk.f32.mxu1 %vm599_vm1, %v8053_v49 }
  0xdb   : > { %7110 = vmatmul.mubr.msk.f32.gmra.mxu0 %vm599_vm1, %v8068_v8 }
  0xdc   : > { %7112 = vmatprep.mubr.msk.f32.mxu0 %vm599_vm1, %v8076_v56 }
  0xdd   : > { %7160 = vmatmul.mubr.msk.f32.gmra.mxu1 %vm599_vm1, %v8068_v8 }
  0xde   : > { %7162 = vmatprep.mubr.msk.f32.mxu1 %vm599_vm1, %v8076_v56 }
  0xdf   : > { %7113 = vmatmul.mubr.msk.f32.gmra.mxu0 %vm599_vm1, %v8097_v57 }
  0xe0   : > { %7115 = vmatprep.mubr.msk.f32.mxu0 %vm599_vm1, %v8112_v2 }
  0xe1   : > { %7163 = vmatmul.mubr.msk.f32.gmra.mxu1 %vm599_vm1, %v8097_v57 }
  0xe2   : > { %7165 = vmatprep.mubr.msk.f32.mxu1 %vm599_vm1, %v8112_v2 }
  0xe3   : > { %7116 = vmatmul.mubr.msk.f32.gmra.mxu0 %vm599_vm1, %v8126_v28 }
  0xe5   : > { %7166 = vmatmul.mubr.msk.f32.gmra.mxu1 %vm599_vm1, %v8126_v28  ;;  %vm407_vm1 = vcmask 269312  }
  0xe6   : > { %419 = vst.msk [vmem:[#allocation2 + $0x50] sm:$0xff] %vm407_vm1, %v11460_v44  ;;  %408 = vst.msk [vmem:[#allocation2] sm:$0xff] %vm407_vm1, %v11460_v44 }
  0xe7   : > { %v6872_v8 = vpop.f32.mrf.mxu0  ;;  %409 = vst.msk [vmem:[#allocation2 + $0x8] sm:$0xff] %vm407_vm1, %v11460_v44  ;;  %412 = vst.msk [vmem:[#allocation2 + $0x18] sm:$0xff] %vm407_vm1, %v11460_v44 }
  0xe8   : > { %413 = vst.msk [vmem:[#allocation2 + $0x20] sm:$0xff] %vm407_vm1, %v11460_v44  ;;  %415 = vst.msk [vmem:[#allocation2 + $0x30] sm:$0xff] %vm407_vm1, %v11460_v44 }
  0xe9   : > { %v768_v13 = vpop.f32.mrf.mxu0  ;;  %v6922_v6 = vpop.f32.mrf.mxu1  ;;  %416 = vst.msk [vmem:[#allocation2 + $0x38] sm:$0xff] %vm407_vm1, %v11460_v44  ;;  %418 = vst.msk [vmem:[#allocation2 + $0x48] sm:$0xff] %vm407_vm1, %v11460_v44 }
  0xea   : > { %v8383_v60 = vadd.f32 %v6922_v6, %v6872_v8  ;;  %421 = vst.msk [vmem:[#allocation2 + $0x60] sm:$0xff] %vm407_vm1, %v11460_v44  ;;  %422 = vst.msk [vmem:[#allocation2 + $0x68] sm:$0xff] %vm407_vm1, %v11460_v44 }
  0xeb   : > { %v6875_v45 = vpop.f32.mrf.mxu0  ;;  %v1154_v58 = vpop.f32.mrf.mxu1  ;;  %424 = vst.msk [vmem:[#allocation2 + $0x78] sm:$0xff] %vm407_vm1, %v11460_v44  ;;  %425 = vst.msk [vmem:[#allocation2 + $0x80] sm:$0xff] %vm407_vm1, %v11460_v44 }
  0xec   : > { %v8385_v49 = vadd.f32 %v1154_v58, %v768_v13  ;;  %427 = vst.msk [vmem:[#allocation2 + $0x90] sm:$0xff] %vm407_vm1, %v11460_v44  ;;  %428 = vst.msk [vmem:[#allocation2 + $0x98] sm:$0xff] %vm407_vm1, %v11460_v44 }
  0xed   : > { %v788_v56 = vpop.f32.mrf.mxu0  ;;  %v6925_v57 = vpop.f32.mrf.mxu1  ;;  %430 = vst.msk [vmem:[#allocation2 + $0xa8] sm:$0xff] %vm407_vm1, %v11460_v44  ;;  %431 = vst.msk [vmem:[#allocation2 + $0xb0] sm:$0xff] %vm407_vm1, %v11460_v44 }
  0xee   : > { %v8387_v27 = vadd.f32 %v6925_v57, %v6875_v45  ;;  %433 = vst.msk [vmem:[#allocation2 + $0xc0] sm:$0xff] %vm407_vm1, %v11460_v44  ;;  %434 = vst.msk [vmem:[#allocation2 + $0xc8] sm:$0xff] %vm407_vm1, %v11460_v44 }
  0xef   : > { %v6878_v2 = vpop.f32.mrf.mxu0  ;;  %v1166_v1 = vpop.f32.mrf.mxu1  ;;  %436 = vst.msk [vmem:[#allocation2 + $0xd8] sm:$0xff] %vm407_vm1, %v11460_v44  ;;  %437 = vst.msk [vmem:[#allocation2 + $0xe0] sm:$0xff] %vm407_vm1, %v11460_v44 }
  0xf0   : > { %v8389_v40 = vadd.f32 %v1166_v1, %v788_v56  ;;  %439 = vst.msk [vmem:[#allocation2 + $0xf0] sm:$0xff] %vm407_vm1, %v11460_v44  ;;  %440 = vst.msk [vmem:[#allocation2 + $0xf8] sm:$0xff] %vm407_vm1, %v11460_v44 }
  0xf1   : > { %v808_v10 = vpop.f32.mrf.mxu0  ;;  %v6928_v34 = vpop.f32.mrf.mxu1  ;;  %442 = vst.msk [vmem:[#allocation2 + $0x108] sm:$0xff] %vm407_vm1, %v11460_v44  ;;  %443 = vst.msk [vmem:[#allocation2 + $0x110] sm:$0xff] %vm407_vm1, %v11460_v44 }
  0xf2   : > { %v8391_v28 = vadd.f32 %v6928_v34, %v6878_v2  ;;  %445 = vst.msk [vmem:[#allocation2 + $0x120] sm:$0xff] %vm407_vm1, %v11460_v44  ;;  %446 = vst.msk [vmem:[#allocation2 + $0x128] sm:$0xff] %vm407_vm1, %v11460_v44 }
  0xf3   : > { %v6881_v26 = vpop.f32.mrf.mxu0  ;;  %v1178_v46 = vpop.f32.mrf.mxu1  ;;  %448 = vst.msk [vmem:[#allocation2 + $0x138] sm:$0xff] %vm407_vm1, %v11460_v44  ;;  %449 = vst.msk [vmem:[#allocation2 + $0x140] sm:$0xff] %vm407_vm1, %v11460_v44 }
  0xf4   : > { %v8393_v36 = vadd.f32 %v1178_v46, %v808_v10  ;;  %451 = vst.msk [vmem:[#allocation2 + $0x150] sm:$0xff] %vm407_vm1, %v11460_v44  ;;  %452 = vst.msk [vmem:[#allocation2 + $0x158] sm:$0xff] %vm407_vm1, %v11460_v44 }
  0xf5   : > { %v828_v19 = vpop.f32.mrf.mxu0  ;;  %v6931_v52 = vpop.f32.mrf.mxu1  ;;  %454 = vst.msk [vmem:[#allocation2 + $0x168] sm:$0xff] %vm407_vm1, %v11460_v44  ;;  %455 = vst.msk [vmem:[#allocation2 + $0x170] sm:$0xff] %vm407_vm1, %v11460_v44 }
  0xf6   : > { %v8395_v53 = vadd.f32 %v6931_v52, %v6881_v26  ;;  %457 = vst.msk [vmem:[#allocation2 + $0x180] sm:$0xff] %vm407_vm1, %v11460_v44  ;;  %458 = vst.msk [vmem:[#allocation2 + $0x188] sm:$0xff] %vm407_vm1, %v11460_v44 }
  0xf7   : > { %v6884_v7 = vpop.f32.mrf.mxu0  ;;  %v1190_v37 = vpop.f32.mrf.mxu1  ;;  %460 = vst.msk [vmem:[#allocation2 + $0x198] sm:$0xff] %vm407_vm1, %v11460_v44  ;;  %461 = vst.msk [vmem:[#allocation2 + $0x1a0] sm:$0xff] %vm407_vm1, %v11460_v44 }
  0xf8   : > { %v8397_v21 = vadd.f32 %v1190_v37, %v828_v19 }
  0xf9   : > { %v848_v38 = vpop.f32.mrf.mxu0  ;;  %v6934_v22 = vpop.f32.mrf.mxu1 }
  0xfa   : > { %v8399_v23 = vadd.f32 %v6934_v22, %v6884_v7 }
  0xfb   : > { %v6887_v17 = vpop.f32.mrf.mxu0  ;;  %v1202_v30 = vpop.f32.mrf.mxu1 }
  0xfc   : > { %v8401_v31 = vadd.f32 %v1202_v30, %v848_v38 }
  0xfd   : > { %v868_v47 = vpop.f32.mrf.mxu0  ;;  %v6937_v48 = vpop.f32.mrf.mxu1 }
  0xfe   : > { %v8403_v51 = vadd.f32 %v6937_v48, %v6887_v17 }
  0xff   : > { %v6890_v62 = vpop.f32.mrf.mxu0  ;;  %v1214_v63 = vpop.f32.mrf.mxu1 }
 0x100   : > { %v8405_v25 = vadd.f32 %v1214_v63, %v868_v47 }
 0x101   : > { %v888_v39 = vpop.f32.mrf.mxu0  ;;  %v6940_v43 = vpop.f32.mrf.mxu1 }
 0x102   : > { %v8407_v61 = vadd.f32 %v6940_v43, %v6890_v62 }
 0x103   : > { %v6893_v18 = vpop.f32.mrf.mxu0  ;;  %v1226_v35 = vpop.f32.mrf.mxu1 }
 0x104   : > { %v8409_v5 = vadd.f32 %v1226_v35, %v888_v39 }
 0x105   : > { %v908_v50 = vpop.f32.mrf.mxu0  ;;  %v6943_v59 = vpop.f32.mrf.mxu1 }
 0x106   : > { %v8411_v9 = vadd.f32 %v6943_v59, %v6893_v18 }
 0x107   : > { %v6896_v29 = vpop.f32.mrf.mxu0  ;;  %v1238_v11 = vpop.f32.mrf.mxu1 }
 0x108   : > { %v8413_v0 = vadd.f32 %v1238_v11, %v908_v50 }
 0x109   : > { %v928_v14 = vpop.f32.mrf.mxu0  ;;  %v6946_v15 = vpop.f32.mrf.mxu1 }
 0x10a   : > { %v8415_v16 = vadd.f32 %v6946_v15, %v6896_v29 }
 0x10b   : > { %v6899_v24 = vpop.f32.mrf.mxu0  ;;  %v1250_v32 = vpop.f32.mrf.mxu1 }
 0x10c   : > { %v8417_v33 = vadd.f32 %v1250_v32, %v928_v14 }
 0x10d   : > { %v948_v41 = vpop.f32.mrf.mxu0  ;;  %v6949_v54 = vpop.f32.mrf.mxu1 }
 0x10e   : > { %v8419_v55 = vadd.f32 %v6949_v54, %v6899_v24 }
 0x10f   : > { %v6902_v12 = vpop.f32.mrf.mxu0  ;;  %v1262_v20 = vpop.f32.mrf.mxu1 }
 0x110   : > { %v8421_v42 = vadd.f32 %v1262_v20, %v948_v41 }
 0x111   : > { %v968_v3 = vpop.f32.mrf.mxu0  ;;  %v6952_v8 = vpop.f32.mrf.mxu1 }
 0x112   : > { %v8423_v13 = vadd.f32 %v6952_v8, %v6902_v12 }
 0x113   : > { %v6905_v6 = vpop.f32.mrf.mxu0  ;;  %v1274_v45 = vpop.f32.mrf.mxu1 }
 0x114   : > { %11503 = vst [vmem:[#allocation10_spill] sm:$0xff] %v8423_v13  ;;  %v8425_v58 = vadd.f32 %v1274_v45, %v968_v3 }
 0x115   : > { %v988_v56 = vpop.f32.mrf.mxu0  ;;  %v6955_v57 = vpop.f32.mrf.mxu1 }
 0x116   : > { %11504 = vst [vmem:[#allocation11_spill] sm:$0xff] %v8425_v58  ;;  %v8427_v2 = vadd.f32 %v6955_v57, %v6905_v6 }
 0x117   : > { %v6908_v1 = vpop.f32.mrf.mxu0  ;;  %v1286_v10 = vpop.f32.mrf.mxu1 }
 0x118   : > { %11505 = vst [vmem:[#allocation12_spill] sm:$0xff] %v8427_v2  ;;  %v8429_v34 = vadd.f32 %v1286_v10, %v988_v56 }
 0x119   : > { %v1008_v26 = vpop.f32.mrf.mxu0  ;;  %v6958_v46 = vpop.f32.mrf.mxu1 }
 0x11a   : > { %11506 = vst [vmem:[#allocation13_spill] sm:$0xff] %v8429_v34  ;;  %v8431_v19 = vadd.f32 %v6958_v46, %v6908_v1 }
 0x11b   : > { %v6911_v52 = vpop.f32.mrf.mxu0  ;;  %v1298_v7 = vpop.f32.mrf.mxu1 }
 0x11c   : > { %11507 = vst [vmem:[#allocation14_spill] sm:$0xff] %v8431_v19  ;;  %v8433_v37 = vadd.f32 %v1298_v7, %v1008_v26 }
 0x11d   : > { %v1028_v38 = vpop.f32.mrf.mxu0  ;;  %v6961_v22 = vpop.f32.mrf.mxu1 }
 0x11e   : > { %11508 = vst [vmem:[#allocation15_spill] sm:$0xff] %v8433_v37  ;;  %v8435_v17 = vadd.f32 %v6961_v22, %v6911_v52 }
 0x11f   : > { %v6914_v30 = vpop.f32.mrf.mxu0  ;;  %v1310_v47 = vpop.f32.mrf.mxu1 }
 0x120   : > { %11509 = vst [vmem:[#allocation16_spill] sm:$0xff] %v8435_v17  ;;  %v8437_v48 = vadd.f32 %v1310_v47, %v1028_v38 }
 0x121   : > { %v1048_v62 = vpop.f32.mrf.mxu0  ;;  %v6964_v63 = vpop.f32.mrf.mxu1 }
 0x122   : > { %v8439_v39 = vadd.f32 %v6964_v63, %v6914_v30 }
 0x123   : > { %v6917_v43 = vpop.f32.mrf.mxu0  ;;  %v1322_v18 = vpop.f32.mrf.mxu1 }
 0x124   : > { %11510 = vst [vmem:[#allocation17_spill] sm:$0xff] %v8439_v39  ;;  %v8441_v35 = vadd.f32 %v1322_v18, %v1048_v62 }
 0x125   : > { %v1068_v50 = vpop.f32.mrf.mxu0  ;;  %v6967_v59 = vpop.f32.mrf.mxu1 }
 0x126   : > { %11511 = vst [vmem:[#allocation18_spill] sm:$0xff] %v8441_v35  ;;  %v8443_v4 = vadd.f32 %v6967_v59, %v6917_v43 }
 0x127   : > { %v1334_v29 = vpop.f32.mrf.mxu1  ;;  %v6972_v11 = vpop.f32.mrf.mxu0 }
 0x128   : > { %v8445_v14 = vadd.f32 %v1334_v29, %v1068_v50  ;;  %v1422_v15 = vadd.f32 %v6972_v11, %v8383_v60 }
 0x129   : > { %v1414_v24 = vpop.f32.mrf.mxu0  ;;  %v7022_v32 = vpop.f32.mrf.mxu1 }
 0x12a   : > { %11512 = vst [vmem:[#allocation19_spill] sm:$0xff] %v8445_v14  ;;  %v1415_v41 = vadd.f32 %v1414_v24, %v8385_v49  ;;  %v8449_v54 = vadd.f32 %v7022_v32, %v1422_v15 }
 0x12b   : > { %v6975_v12 = vpop.f32.mrf.mxu0  ;;  %v1705_v20 = vpop.f32.mrf.mxu1 }
 0x12c   : > { %v1436_v3 = vadd.f32 %v6975_v12, %v8387_v27  ;;  %v8452_v8 = vadd.f32 %v1705_v20, %v1415_v41 }
 0x12d   : > { %v1428_v6 = vpop.f32.mrf.mxu0  ;;  %v7025_v45 = vpop.f32.mrf.mxu1 }
 0x12e   : > { %v1429_v56 = vadd.f32 %v1428_v6, %v8389_v40  ;;  %v8455_v57 = vadd.f32 %v7025_v45, %v1436_v3 }
 0x12f   : > { %v8457_v1 = vpop.f32.mrf.mxu0  ;;  %v1721_v60 = vpop.f32.mrf.mxu1 }
 0x130   : > { %v8459_v10 = vadd.f32 %v1721_v60, %v1429_v56 }
 0x131   : > { %v8461_v49 = vpop.f32.mrf.mxu0  ;;  %v8463_v26 = vpop.f32.mrf.mxu1 }
 0x133   : > { %v8465_v46 = vpop.f32.mrf.mxu0  ;;  %v8467_v27 = vpop.f32.mrf.mxu1 }
 0x135   : > { %v8469_v52 = vpop.f32.mrf.mxu0  ;;  %v8471_v7 = vpop.f32.mrf.mxu1 }
 0x137   : > { %v8473_v40 = vpop.f32.mrf.mxu0  ;;  %v8475_v38 = vpop.f32.mrf.mxu1 }
 0x139   : > { %v8477_v22 = vpop.f32.mrf.mxu0  ;;  %v8479_v30 = vpop.f32.mrf.mxu1 }
 0x13b   : > { %v8481_v47 = vpop.f32.mrf.mxu0  ;;  %v8483_v62 = vpop.f32.mrf.mxu1 }
 0x13d   : > { %v8485_v63 = vpop.f32.mrf.mxu0  ;;  %v8487_v43 = vpop.f32.mrf.mxu1 }
 0x13f   : > { %v8489_v18 = vpop.f32.mrf.mxu0  ;;  %v8491_v50 = vpop.f32.mrf.mxu1 }
 0x141   : > { %v8493_v59 = vpop.f32.mrf.mxu0  ;;  %v8495_v29 = vpop.f32.mrf.mxu1 }
 0x143   : > { %v8497_v11 = vpop.f32.mrf.mxu0  ;;  %v8499_v15 = vpop.f32.mrf.mxu1 }
 0x145   : > { %v8501_v24 = vpop.f32.mrf.mxu0  ;;  %v8503_v32 = vpop.f32.mrf.mxu1 }
 0x147   : > { %v8505_v41 = vpop.f32.mrf.mxu0  ;;  %v8507_v12 = vpop.f32.mrf.mxu1 }
 0x149   : > { %v8509_v20 = vpop.f32.mrf.mxu0  ;;  %v8511_v3 = vpop.f32.mrf.mxu1 }
 0x14b   : > { %v6999_v6 = vpop.f32.mrf.mxu0  ;;  %v8513_v45 = vpop.f32.mrf.mxu1 }
 0x14c   : > { %v1548_v56 = vadd.f32 %v6999_v6, %v8419_v55 }
 0x14d   : > { %v1540_v55 = vpop.f32.mrf.mxu0  ;;  %v7049_v60 = vpop.f32.mrf.mxu1 }
 0x14e   : > { %v1541_v6 = vadd.f32 %v1540_v55, %v8421_v42  ;;  %v8625_v14 = vadd.f32 %v7049_v60, %v1548_v56 }
 0x14f   : > { %v8627_v35 = vpop.f32.mrf.mxu0  ;;  %v1849_v39 = vpop.f32.mrf.mxu1 }
 0x150   : > { %11513 = vst [vmem:[#allocation20_spill] sm:$0xff] %v8625_v14  ;;  %v8629_v17 = vadd.f32 %v1849_v39, %v1541_v6 }
 0x151   : > { %v8631_v37 = vpop.f32.mrf.mxu0  ;;  %v8633_v19 = vpop.f32.mrf.mxu1 }
 0x152   : > { %11514 = vst [vmem:[#allocation21_spill] sm:$0xff] %v8629_v17  ;;  %11515 = vst [vmem:[#allocation22_spill] sm:$0xff] %v8633_v19 }
 0x153   : > { %v8635_v34 = vpop.f32.mrf.mxu0  ;;  %v8637_v2 = vpop.f32.mrf.mxu1 }
 0x154   : > { %11516 = vst [vmem:[#allocation23_spill] sm:$0xff] %v8635_v34  ;;  %11517 = vst [vmem:[#allocation24_spill] sm:$0xff] %v8637_v2 }
 0x155   : > { %v8639_v58 = vpop.f32.mrf.mxu0  ;;  %v8641_v13 = vpop.f32.mrf.mxu1 }
 0x156   : > { %11518 = vst [vmem:[#allocation25_spill] sm:$0xff] %v8639_v58  ;;  %11519 = vst [vmem:[#allocation26_spill] sm:$0xff] %v8641_v13 }
 0x157   : > { %v8643_v42 = vpop.f32.mrf.mxu0  ;;  %v8645_v56 = vpop.f32.mrf.mxu1 }
 0x158   : > { %11520 = vst [vmem:[#allocation27_spill] sm:$0xff] %v8643_v42  ;;  %11521 = vst [vmem:[#allocation28_spill] sm:$0xff] %v8645_v56 }
 0x159   : > { %v8647_v55 = vpop.f32.mrf.mxu0  ;;  %v8649_v39 = vpop.f32.mrf.mxu1 }
 0x15a   : > { %11522 = vst [vmem:[#allocation29_spill] sm:$0xff] %v8647_v55  ;;  %11523 = vst [vmem:[#allocation30_spill] sm:$0xff] %v8649_v39 }
 0x15b   : > { %v8651_v60 = vpop.f32.mrf.mxu0  ;;  %v8653_v6 = vpop.f32.mrf.mxu1 }
 0x15c   : > { %11524 = vst [vmem:[#allocation31_spill] sm:$0xff] %v8651_v60  ;;  %11525 = vst [vmem:[#allocation32_spill] sm:$0xff] %v8653_v6 }
 0x15d   : > { %v1596_v14 = vpop.f32.mrf.mxu0  ;;  %v8655_v17 = vpop.f32.mrf.mxu1 }
 0x15e   : > { %11526 = vst [vmem:[#allocation33_spill] sm:$0xff] %v8655_v17  ;;  %v1597_v2 = vadd.f32 %v1596_v14, %v8437_v48 }
 0x15f   : > { %v8658_v58 = vpop.f32.mrf.mxu0  ;;  %v1913_v13 = vpop.f32.mrf.mxu1 }
 0x160   : > { %v8660_v34 = vadd.f32 %v1913_v13, %v1597_v2 }
 0x161   : > { %v8662_v42 = vpop.f32.mrf.mxu0  ;;  %v8664_v56 = vpop.f32.mrf.mxu1 }
 0x162   : > { %11527 = vst [vmem:[#allocation34_spill] sm:$0xff] %v8660_v34  ;;  %11528 = vst [vmem:[#allocation35_spill] sm:$0xff] %v8662_v42 }
 0x163   : > { %11529 = vst [vmem:[#allocation36_spill] sm:$0xff] %v8664_v56  ;;  %v7017_v55 = vpop.f32.mrf.mxu0  ;;  %v8666_v39 = vpop.f32.mrf.mxu1  ;;  %v1450_v56 = vadd.f32 %v8457_v1, %v8391_v28  ;;  %v1464_v28 = vadd.f32 %v8465_v46, %v8395_v53 }
 0x164   : > { %11530 = vst [vmem:[#allocation37_spill] sm:$0xff] %v8666_v39  ;;  %v1632_v60 = vadd.f32 %v7017_v55, %v8443_v4 }
 0x165   : > { %v8669_v6 = vpop.f32.mrf.mxu0  ;;  %v7067_v19 = vpop.f32.mrf.mxu1  ;;  %v1762_v53 = vadd.f32 %v8471_v7, %v1464_v28  ;;  %v1492_v7 = vadd.f32 %v8481_v47, %v8403_v51 }
 0x166   : > { %v8671_v17 = vadd.f32 %v7067_v19, %v1632_v60  ;;  %v1443_v19 = vadd.f32 %v8461_v49, %v8393_v36  ;;  %v1457_v36 = vadd.f32 %v8469_v52, %v8397_v21 }
 0x167   : > { %v8673_v48 = vpop.f32.mrf.mxu1  ;;  %v7072_v14 = vpop.f32.mrf.mxu0  ;;  %v1794_v51 = vadd.f32 %v8487_v43, %v1492_v7 }
 0x168   : > { %11531 = vst [vmem:[#allocation38_spill] sm:$0xff] %v8671_v17  ;;  %11532 = vst [vmem:[#allocation39_spill] sm:$0xff] %v8673_v48  ;;  %v2034_v13 = vadd.f32 %v7072_v14, %v8449_v54  ;;  %v1746_v14 = vadd.f32 %v8463_v26, %v1450_v56  ;;  %v1478_v26 = vadd.f32 %v8473_v40, %v8399_v23 }
 0x169   : > { %v2027_v2 = vpop.f32.mrf.mxu0  ;;  %v7122_v34 = vpop.f32.mrf.mxu1  ;;  %v1754_v21 = vadd.f32 %v8475_v38, %v1457_v36  ;;  %v1506_v36 = vadd.f32 %v8489_v18, %v8407_v61  ;;  %v1520_v61 = vadd.f32 %v8497_v11, %v8411_v9 }
 0x16a   : > { %v2028_v42 = vadd.f32 %v2027_v2, %v8452_v8  ;;  %v8679_v39 = vadd.f32 %v7122_v34, %v2034_v13  ;;  %v1738_v2 = vadd.f32 %v8467_v27, %v1443_v19  ;;  %v1778_v23 = vadd.f32 %v8479_v30, %v1478_v26 }
 0x16b   : > { %v7075_v4 = vpop.f32.mrf.mxu0  ;;  %v2285_v55 = vpop.f32.mrf.mxu1 }
 0x16c   : > { %11533 = vst [vmem:[#allocation40_spill] sm:$0xff] %v8679_v39  ;;  %v2046_v60 = vadd.f32 %v7075_v4, %v8455_v57  ;;  %v8684_v17 = vadd.f32 %v2285_v55, %v2028_v42 }
 0x16d   : > { %v2039_v48 = vpop.f32.mrf.mxu0  ;;  %v7125_v54 = vpop.f32.mrf.mxu1 }
 0x16e   : > { %11534 = vst [vmem:[#allocation41_spill] sm:$0xff] %v8684_v17  ;;  %v2040_v8 = vadd.f32 %v2039_v48, %v8459_v10  ;;  %v8690_v34 = vadd.f32 %v7125_v54, %v2046_v60  ;;  %v1471_v48 = vadd.f32 %v8477_v22, %v8401_v31 }
 0x16f   : > { %v7078_v1 = vpop.f32.mrf.mxu0  ;;  %v2297_v13 = vpop.f32.mrf.mxu1 }
 0x170   : > { %11535 = vst [vmem:[#allocation42_spill] sm:$0xff] %v8690_v34  ;;  %v2058_v57 = vadd.f32 %v7078_v1, %v1746_v14  ;;  %v8695_v49 = vadd.f32 %v2297_v13, %v2040_v8  ;;  %v1770_v38 = vadd.f32 %v8483_v62, %v1471_v48  ;;  %v1485_v8 = vadd.f32 %v8485_v63, %v8405_v25 }
 0x171   : > { %v2051_v42 = vpop.f32.mrf.mxu0  ;;  %v7128_v56 = vpop.f32.mrf.mxu1  ;;  %v1499_v25 = vadd.f32 %v8493_v59, %v8409_v5 }
 0x172   : > { %11536 = vst [vmem:[#allocation43_spill] sm:$0xff] %v8695_v49  ;;  %v2052_v10 = vadd.f32 %v2051_v42, %v1738_v2  ;;  %v8700_v46 = vadd.f32 %v7128_v56, %v2058_v57  ;;  %v1786_v43 = vadd.f32 %v8491_v50, %v1485_v8  ;;  %v1513_v50 = vadd.f32 %v8501_v24, %v8413_v0 }
 0x173   : > { %v7081_v27 = vpop.f32.mrf.mxu0  ;;  %v2309_v4 = vpop.f32.mrf.mxu1 }
 0x174   : > { %v2576_v52 = vadd.f32 1e-06, %v8700_v46  ;;  %v2070_v55 = vadd.f32 %v7081_v27, %v1762_v53  ;;  %v8706_v19 = vadd.f32 %v2309_v4, %v2052_v10  ;;  %v1810_v27 = vadd.f32 %v8495_v29, %v1506_v36 }
 0x175   : > { %v2063_v40 = vpop.f32.mrf.mxu0  ;;  %v7131_v60 = vpop.f32.mrf.mxu1  ;;  %v1802_v4 = vadd.f32 %v8499_v15, %v1499_v25  ;;  %vm2480_vm7 = vcmp.gt.f32.partialorder %v8700_v46, 0.0  ;;  %v1826_v29 = vadd.f32 %v8503_v32, %v1520_v61  ;;  %v1527_v32 = vadd.f32 %v8509_v20, %v8417_v33 }
 0x176   : > { %7238 = vrcp.f32 %v2576_v52  ;;  %v2575_v54 = vadd.f32 1e-06, %v8706_v19  ;;  %v2064_v31 = vadd.f32 %v2063_v40, %v1754_v21  ;;  %v8712_v22 = vadd.f32 %v7131_v60, %v2070_v55 }
 0x177   : > { %v7084_v14 = vpop.f32.mrf.mxu0  ;;  %v2321_v28 = vpop.f32.mrf.mxu1  ;;  %vm2479_vm8 = vcmp.gt.f32.partialorder %v8706_v19, 0.0 }
 0x178   : > { %7240 = vrcp.f32 %v2575_v54  ;;  %v2578_v30 = vadd.f32 1e-06, %v8712_v22  ;;  %v2082_v1 = vadd.f32 %v7084_v14, %v1778_v23  ;;  %v8719_v47 = vadd.f32 %v2321_v28, %v2064_v31 }
 0x179   : > { %v2075_v13 = vpop.f32.mrf.mxu0  ;;  %v7134_v2 = vpop.f32.mrf.mxu1  ;;  %v1534_v23 = vadd.f32 %v8505_v41, %v8415_v16  ;;  %v1818_v31 = vadd.f32 %v8507_v12, %v1513_v50  ;;  %v8758_v41 = vsel %vm2480_vm7, 1.0, %v11460_v44  ;;  %vm2482_vm9 = vcmp.gt.f32.partialorder %v8712_v22, 0.0 }
 0x17a   : > { %7242 = vrcp.f32 %v2578_v30  ;;  %v2076_v62 = vadd.f32 %v2075_v13, %v1770_v38  ;;  %v8723_v57 = vadd.f32 %v7134_v2, %v2082_v1  ;;  %v2577_v63 = vadd.f32 1e-06, %v8719_v47 }
 0x17b   : > { %v7087_v26 = vpop.f32.mrf.mxu0  ;;  %v2333_v42 = vpop.f32.mrf.mxu1  ;;  %v1842_v12 = vadd.f32 %v8511_v3, %v1534_v23  ;;  %v1834_v3 = vadd.f32 %v8513_v45, %v1527_v32  ;;  %vm2481_vm10 = vcmp.gt.f32.partialorder %v8719_v47, 0.0  ;;  %v11537_v45 = vld [vmem:[#allocation10_spill] sm:$0xff]  ;;  %v11541_v32 = vld [vmem:[#allocation23_spill] sm:$0xff] }
 0x17c   : > { %v2580_v56 = vadd.f32 1e-06, %v8723_v57  ;;  %v2094_v53 = vadd.f32 %v7087_v26, %v1794_v51  ;;  %v8730_v10 = vadd.f32 %v2333_v42, %v2076_v62  ;;  %7244 = vrcp.f32 %v2577_v63 }
 0x17d   : > { %v2087_v18 = vpop.f32.mrf.mxu0  ;;  %v7137_v48 = vpop.f32.mrf.mxu1  ;;  %v8769_v51 = vsel %vm2479_vm8, 1.0, %v11460_v44  ;;  %v8780_v42 = vsel %vm2482_vm9, 1.0, %v11460_v44  ;;  %vm2484_vm11 = vcmp.gt.f32.partialorder %v8723_v57, 0.0  ;;  %v1562_v61 = vadd.f32 %v8627_v35, %v11537_v45 }
 0x17e   : > { %7246 = vrcp.f32 %v2580_v56  ;;  %v2579_v5 = vadd.f32 1e-06, %v8730_v10  ;;  %v2088_v59 = vadd.f32 %v2087_v18, %v1786_v43  ;;  %v8739_v21 = vadd.f32 %v7137_v48, %v2094_v53  ;;  %v11538_v18 = vld [vmem:[#allocation11_spill] sm:$0xff] }
 0x17f   : > { %v7090_v52 = vpop.f32.mrf.mxu0  ;;  %v2345_v55 = vpop.f32.mrf.mxu1  ;;  %v1555_v48 = vadd.f32 %v8631_v37, %v11538_v18  ;;  %vm2483_vm12 = vcmp.gt.f32.partialorder %v8730_v10, 0.0 }
 0x180   : > { %7248 = vrcp.f32 %v2579_v5  ;;  %v2106_v9 = vadd.f32 %v7090_v52, %v1810_v27  ;;  %v8741_v11 = vadd.f32 %v2345_v55, %v2088_v59  ;;  %v2582_v15 = vadd.f32 1e-06, %v8739_v21 }
 0x181   : > { %v2099_v7 = vpop.f32.mrf.mxu0  ;;  %v7140_v40 = vpop.f32.mrf.mxu1  ;;  %v8795_v55 = vsel %vm2481_vm10, 1.0, %v11460_v44  ;;  %vm2486_vm13 = vcmp.gt.f32.partialorder %v8739_v21, 0.0 }
 0x182   : > { %v2581_v0 = vadd.f32 1e-06, %v8741_v11  ;;  %v2100_v24 = vadd.f32 %v2099_v7, %v1802_v4  ;;  %v8749_v60 = vadd.f32 %v7140_v40, %v2106_v9  ;;  %7250 = vrcp.f32 %v2582_v15 }
 0x183   : > { %v7239_v54 = vpop.eup %7238  ;;  %v7093_v38 = vpop.f32.mrf.mxu0  ;;  %v8806_v15 = vsel %vm2484_vm11, 1.0, %v11460_v44  ;;  %vm2485_vm14 = vcmp.gt.f32.partialorder %v8741_v11, 0.0 }
 0x184   : > { %v2357_v16 = vpop.f32.mrf.mxu1  ;;  %7252 = vrcp.f32 %v2581_v0  ;;  %v2584_v14 = vadd.f32 1e-06, %v8749_v60  ;;  %v2118_v28 = vadd.f32 %v7093_v38, %v1826_v29  ;;  %v2640_v1 = vmul.f32 %v7239_v54, %v8758_v41 }
 0x185   : > { %v7241_v8 = vpop.eup %7240  ;;  %v8763_v30 = vadd.f32 %v2357_v16, %v2100_v24  ;;  %v2111_v33 = vpop.f32.mrf.mxu0  ;;  %v11539_v24 = vld [vmem:[#allocation22_spill] sm:$0xff]  ;;  %vm2488_vm15 = vcmp.gt.f32.partialorder %v8749_v60, 0.0 }
 0x186   : > { %v7143_v20 = vpop.f32.mrf.mxu1  ;;  %7254 = vrcp.f32 %v2584_v14  ;;  %v2112_v13 = vadd.f32 %v2111_v33, %v1818_v31  ;;  %v2639_v36 = vmul.f32 %v7241_v8, %v8769_v51  ;;  %2694 = vperm.xlu1 %7229, %v2640_v1   ;;  %v1874_v54 = vadd.f32 %v11539_v24, %v1562_v61  ;;  %v11540_v31 = vld [vmem:[#allocation12_spill] sm:$0xff]  ;;  %v11543_v1 = vld [vmem:[#allocation13_spill] sm:$0xff] }
 0x187   : > { %v8771_v2 = vadd.f32 %v7143_v20, %v2118_v28  ;;  %v7243_v62 = vpop.eup %7242  ;;  %v2583_v25 = vadd.f32 1e-06, %v8763_v30  ;;  %v7096_v63 = vpop.f32.mrf.mxu0  ;;  %v1576_v38 = vadd.f32 %v11541_v32, %v11540_v31  ;;  %v11542_v8 = vld [vmem:[#allocation24_spill] sm:$0xff]  ;;  %v8826_v20 = vsel %vm2483_vm12, 1.0, %v11460_v44  ;;  %v11551_v32 = vld [vmem:[#allocation30_spill] sm:$0xff] }
 0x188   : > { %v2369_v26 = vpop.f32.mrf.mxu1  ;;  %v2130_v56 = vadd.f32 %v7096_v63, %v1842_v12  ;;  %2689 = vperm.xlu0 %7230, %v2639_v36   ;;  %v2642_v59 = vmul.f32 %v7243_v62, %v8780_v42  ;;  %v1866_v12 = vadd.f32 %v11542_v8, %v1555_v48  ;;  %v11545_v62 = vld [vmem:[#allocation14_spill] sm:$0xff]  ;;  %v8839_v61 = vsel %vm2486_vm13, 1.0, %v11460_v44 }
 0x189   : > { %v2586_v43 = vadd.f32 1e-06, %v8771_v2  ;;  %v8784_v53 = vadd.f32 %v2369_v26, %v2112_v13  ;;  %7256 = vrcp.f32 %v2583_v25  ;;  %v2123_v27 = vpop.f32.mrf.mxu0  ;;  %v7245_v4 = vpop.eup %7244  ;;  %v11544_v13 = vld [vmem:[#allocation25_spill] sm:$0xff]  ;;  %v11547_v48 = vld [vmem:[#allocation26_spill] sm:$0xff]  ;;  %vm2487_vm2 = vcmp.gt.f32.partialorder %v8763_v30, 0.0 }
 0x18a   : > { %v7146_v5 = vpop.f32.mrf.mxu1  ;;  %v2124_v52 = vadd.f32 %v2123_v27, %v1834_v3  ;;  %2704 = vperm.xlu1 %7229, %v2642_v59   ;;  %v2641_v23 = vmul.f32 %v7245_v4, %v8795_v55  ;;  %v1569_v36 = vadd.f32 %v11544_v13, %v11543_v1  ;;  %v11546_v3 = vld [vmem:[#allocation27_spill] sm:$0xff]  ;;  %v1890_v27 = vadd.f32 %v11547_v48, %v1576_v38  ;;  %v11549_v59 = vld [vmem:[#allocation29_spill] sm:$0xff] }
 0x18b   : > { %7258 = vrcp.f32 %v2586_v43  ;;  %v2585_v50 = vadd.f32 1e-06, %v8784_v53  ;;  %v7247_v9 = vpop.eup %7246  ;;  %v8798_v35 = vadd.f32 %v7146_v5, %v2130_v56  ;;  %v8800_v37 = vpop.f32.mrf.mxu0  ;;  %v1590_v25 = vadd.f32 %v11546_v3, %v11545_v62  ;;  %v11548_v5 = vld [vmem:[#allocation15_spill] sm:$0xff]  ;;  %v11552_v62 = vld [vmem:[#allocation16_spill] sm:$0xff] }
 0x18c   : > { %v2381_v29 = vpop.f32.mrf.mxu1  ;;  %v2644_v40 = vmul.f32 %v7247_v9, %v8806_v15  ;;  %2699 = vperm.xlu0 %7230, %v2641_v23   ;;  %v1583_v4 = vadd.f32 %v11549_v59, %v11548_v5  ;;  %vm2490_vm3 = vcmp.gt.f32.partialorder %v8771_v2, 0.0  ;;  %v11553_v3 = vld [vmem:[#allocation31_spill] sm:$0xff]  ;;  %vm2489_vm4 = vcmp.gt.f32.partialorder %v8784_v53, 0.0 }
 0x18d   : > { %7260 = vrcp.f32 %v2585_v50  ;;  %v8808_v7 = vadd.f32 %v2381_v29, %v2124_v52  ;;  %v7249_v0 = vpop.eup %7248  ;;  %v2588_v16 = vadd.f32 1e-06, %v8798_v35  ;;  %v8816_v14 = vpop.f32.mrf.mxu0  ;;  %v8848_v29 = vsel %vm2485_vm14, 1.0, %v11460_v44 }
 0x18e   : > { %v8818_v28 = vpop.f32.mrf.mxu1  ;;  %2714 = vperm.xlu1 %7229, %v2644_v40   ;;  %v2643_v43 = vmul.f32 %v7249_v0, %v8826_v20  ;;  %v1906_v38 = vadd.f32 %v11551_v32, %v1590_v25  ;;  %vm2492_vm5 = vcmp.gt.f32.partialorder %v8798_v35, 0.0 }
 0x18f   : > { %v2587_v33 = vadd.f32 1e-06, %v8808_v7  ;;  %7262 = vrcp.f32 %v2588_v16  ;;  %v7102_v63 = vpop.f32.mrf.mxu0  ;;  %v7251_v56 = vpop.eup %7250  ;;  %vm2491_vm6 = vcmp.gt.f32.partialorder %v8808_v7, 0.0 }
 0x190   : > { %v8832_v26 = vpop.f32.mrf.mxu1  ;;  %v2154_v45 = vadd.f32 %v7102_v63, %v1874_v54  ;;  %2709 = vperm.xlu0 %7230, %v2643_v43   ;;  %v2646_v9 = vmul.f32 %v7251_v56, %v8839_v61  ;;  %v11550_v54 = vld [vmem:[#allocation28_spill] sm:$0xff] }
 0x191   : > { %7264 = vrcp.f32 %v2587_v33  ;;  %v7253_v18 = vpop.eup %7252  ;;  %v2147_v50 = vpop.f32.mrf.mxu0  ;;  %v1882_v31 = vadd.f32 %v11550_v54, %v1569_v36  ;;  %v8859_v33 = vsel %vm2488_vm15, 1.0, %v11460_v44  ;;  %v1604_v36 = vadd.f32 %v11553_v3, %v11552_v62  ;;  %v11554_v63 = vld [vmem:[#allocation32_spill] sm:$0xff] }
 0x192   : > { %v7152_v52 = vpop.f32.mrf.mxu1  ;;  %v2148_v23 = vadd.f32 %v2147_v50, %v1866_v12  ;;  %v2645_v0 = vmul.f32 %v7253_v18, %v8848_v29  ;;  %2724 = vperm.xlu1 %7229, %v2646_v9   ;;  %v1898_v25 = vadd.f32 %v11554_v63, %v1583_v4  ;;  %v8872_v18 = vsel %vm2487_vm2, 1.0, %v11460_v44  ;;  %v11555_v50 = vld [vmem:[#allocation17_spill] sm:$0xff] }
 0x193   : > { %v8851_v40 = vadd.f32 %v7152_v52, %v2154_v45  ;;  %v7255_v24 = vpop.eup %7254  ;;  %v7105_v16 = vpop.f32.mrf.mxu0  ;;  %v1618_v4 = vadd.f32 %v8658_v58, %v11555_v50  ;;  %v11556_v58 = vld [vmem:[#allocation33_spill] sm:$0xff]  ;;  %v8895_v3 = vsel %vm2489_vm4, 1.0, %v11460_v44 }
 0x194   : > { %v2405_v8 = vpop.f32.mrf.mxu1  ;;  %v2166_v1 = vadd.f32 %v7105_v16, %v1890_v27  ;;  %2719 = vperm.xlu0 %7230, %v2645_v0   ;;  %v2648_v45 = vmul.f32 %v7255_v24, %v8859_v33  ;;  %v8884_v24 = vsel %vm2490_vm3, 1.0, %v11460_v44 }
 0x195   : > { %v2592_v12 = vadd.f32 1e-06, %v8851_v40  ;;  %v8863_v13 = vadd.f32 %v2405_v8, %v2148_v23  ;;  %v2159_v43 = vpop.f32.mrf.mxu0  ;;  %v1922_v8 = vadd.f32 %v11556_v58, %v1604_v36  ;;  %v11557_v36 = vld [vmem:[#allocation18_spill] sm:$0xff]  ;;  %v11560_v58 = vld [vmem:[#allocation19_spill] sm:$0xff]  ;;  %vm2496_vm7 = vcmp.gt.f32.partialorder %v8851_v40, 0.0 }
 0x196   : > { %v7155_v56 = vpop.f32.mrf.mxu1  ;;  %v7257_v48 = vpop.eup %7256  ;;  %v2160_v5 = vadd.f32 %v2159_v43, %v1882_v31  ;;  %2734 = vperm.xlu1 %7229, %v2648_v45  }
 0x197   : > { %7266 = vrcp.f32 %v2592_v12  ;;  %v2591_v27 = vadd.f32 1e-06, %v8863_v13  ;;  %v8878_v52 = vadd.f32 %v7155_v56, %v2166_v1  ;;  %v7108_v9 = vpop.f32.mrf.mxu0  ;;  %v2647_v0 = vmul.f32 %v7257_v48, %v8872_v18  ;;  %v11558_v56 = vld [vmem:[#allocation35_spill] sm:$0xff]  ;;  %v11559_v48 = vld [vmem:[#allocation36_spill] sm:$0xff] }
 0x198   : > { %v7259_v59 = vpop.eup %7258  ;;  %v2417_v23 = vpop.f32.mrf.mxu1  ;;  %v2178_v54 = vadd.f32 %v7108_v9, %v1906_v38  ;;  %v1611_v45 = vadd.f32 %v11558_v56, %v11557_v36  ;;  %vm2495_vm8 = vcmp.gt.f32.partialorder %v8863_v13, 0.0 }
 0x199   : > { %7268 = vrcp.f32 %v2591_v27  ;;  %v8886_v32 = vadd.f32 %v2417_v23, %v2160_v5  ;;  %v2650_v31 = vmul.f32 %v7259_v59, %v8884_v24  ;;  %v2594_v12 = vadd.f32 1e-06, %v8878_v52  ;;  %2729 = vperm.xlu0 %7230, %v2647_v0   ;;  %v2171_v1 = vpop.f32.mrf.mxu0 }
 0x19a   : > { %v7261_v16 = vpop.eup %7260  ;;  %v7158_v62 = vpop.f32.mrf.mxu1  ;;  %v2172_v63 = vadd.f32 %v2171_v1, %v1898_v25  ;;  %v1938_v27 = vadd.f32 %v11559_v48, %v1618_v4  ;;  %v8909_v25 = vsel %vm2492_vm5, 1.0, %v11460_v44  ;;  %v1625_v4 = vadd.f32 %v8669_v6, %v11560_v58  ;;  %v11563_v6 = vld [vmem:[#allocation37_spill] sm:$0xff] }
 0x19b   : > { %v2593_v38 = vadd.f32 1e-06, %v8886_v32  ;;  %v8899_v43 = vadd.f32 %v7158_v62, %v2178_v54  ;;  %7270 = vrcp.f32 %v2594_v12  ;;  %2744 = vperm.xlu1 %7229, %v2650_v31   ;;  %v7111_v5 = vpop.f32.mrf.mxu0  ;;  %v2649_v50 = vmul.f32 %v7261_v16, %v8895_v3  ;;  %v11562_v62 = vld [vmem:[#allocation34_spill] sm:$0xff] }
 0x19c   : > { %v2429_v59 = vpop.f32.mrf.mxu1  ;;  %v7263_v9 = vpop.eup %7262  ;;  %v2190_v0 = vadd.f32 %v7111_v5, %v1922_v8  ;;  %v8919_v8 = vsel %vm2491_vm6, 1.0, %v11460_v44  ;;  %vm2498_vm9 = vcmp.gt.f32.partialorder %v8878_v52, 0.0  ;;  %vm2497_vm10 = vcmp.gt.f32.partialorder %v8886_v32, 0.0 }
 0x19d   : > { %7272 = vrcp.f32 %v2593_v38  ;;  %v2596_v23 = vadd.f32 1e-06, %v8899_v43  ;;  %v8913_v12 = vadd.f32 %v2429_v59, %v2172_v63  ;;  %2739 = vperm.xlu0 %7230, %v2649_v50   ;;  %v2183_v31 = vpop.f32.mrf.mxu0  ;;  %v2652_v16 = vmul.f32 %v7263_v9, %v8909_v25  ;;  %11561 = vst [vmem:[#allocation10_spill] sm:$0xff] %v8919_v8 }
 0x19e   : > { %v7265_v54 = vpop.eup %7264  ;;  %v7161_v1 = vpop.f32.mrf.mxu1  ;;  %v2184_v38 = vadd.f32 %v2183_v31, %v11562_v62  ;;  %v1930_v63 = vadd.f32 %v11563_v6, %v1611_v45  ;;  %v11565_v31 = vld [vmem:[#allocation39_spill] sm:$0xff]  ;;  %v11566_v62 = vld [vmem:[#allocation21_spill] sm:$0xff]  ;;  %vm2500_vm11 = vcmp.gt.f32.partialorder %v8899_v43, 0.0 }
 0x19f   : > { %7274 = vrcp.f32 %v2596_v23  ;;  %v8922_v36 = vadd.f32 %v7161_v1, %v2190_v0  ;;  %v2651_v56 = vmul.f32 %v7265_v54, %v8919_v8  ;;  %v2595_v48 = vadd.f32 1e-06, %v8913_v12  ;;  %2754 = vperm.xlu1 %7229, %v2652_v16   ;;  %v7114_v5 = vpop.f32.mrf.mxu0 }
 0x1a0   : > { %v2441_v59 = vpop.f32.mrf.mxu1  ;;  %v2202_v9 = vadd.f32 %v7114_v5, %v1938_v27  ;;  %v1946_v54 = vadd.f32 %v11565_v31, %v1625_v4  ;;  %v2136_v6 = vadd.f32 %v8816_v14, %v11566_v62  ;;  %v11568_v4 = vld [vmem:[#allocation20_spill] sm:$0xff]  ;;  %v11569_v5 = vld [vmem:[#allocation38_spill] sm:$0xff]  ;;  %v8955_v31 = vsel %vm2495_vm8, 1.0, %v11460_v44 }
 0x1a1   : > { %v2598_v50 = vadd.f32 1e-06, %v8922_v36  ;;  %v8929_v58 = vadd.f32 %v2441_v59, %v2184_v38  ;;  %7276 = vrcp.f32 %v2595_v48  ;;  %2749 = vperm.xlu0 %7230, %v2651_v56   ;;  %v2195_v23 = vpop.f32.mrf.mxu0  ;;  %v8941_v56 = vsel %vm2496_vm7, 1.0, %v11460_v44 }
 0x1a2   : > { %v7164_v0 = vpop.f32.mrf.mxu1  ;;  %v2196_v1 = vadd.f32 %v2195_v23, %v1930_v63  ;;  %v2142_v48 = vadd.f32 %v8800_v37, %v11568_v4  ;;  %vm2499_vm12 = vcmp.gt.f32.partialorder %v8913_v12, 0.0  ;;  %vm2502_vm13 = vcmp.gt.f32.partialorder %v8922_v36, 0.0 }
 0x1a3   : > { %11564 = vst [vmem:[#allocation11_spill] sm:$0xff] %v8929_v58  ;;  %v2597_v45 = vadd.f32 1e-06, %v8929_v58  ;;  %7278 = vrcp.f32 %v2598_v50  ;;  %v8936_v8 = vadd.f32 %v7164_v0, %v2202_v9  ;;  %v7117_v27 = vpop.f32.mrf.mxu0  ;;  %vm2501_vm15 = vcmp.gt.f32.partialorder %v8929_v58, 0.0 }
 0x1a4   : > { %v7267_v16 = vpop.eup %7266  ;;  %v2453_v38 = vpop.f32.mrf.mxu1  ;;  %v2214_v59 = vadd.f32 %v7117_v27, %v11569_v5  ;;  %v8965_v5 = vadd.f32 %v8818_v28, %v2142_v48  ;;  %v8980_v28 = vsel %vm2497_vm10, 1.0, %v11460_v44  ;;  %vm2477_vm7 = vcmp.gt.f32.partialorder %v8695_v49, 0.0 }
 0x1a5   : > { %11567 = vst [vmem:[#allocation22_spill] sm:$0xff] %v8936_v8  ;;  %v8946_v63 = vadd.f32 %v2453_v38, %v2196_v1  ;;  %v2656_v23 = vmul.f32 %v7267_v16, %v8941_v56  ;;  %v2600_v50 = vadd.f32 1e-06, %v8936_v8  ;;  %v2207_v9 = vpop.f32.mrf.mxu0  ;;  %7280 = vrcp.f32 %v2597_v45 }
 0x1a6   : > { %v7269_v14 = vpop.eup %7268  ;;  %v7167_v0 = vpop.f32.mrf.mxu1  ;;  %v2208_v1 = vadd.f32 %v2207_v9, %v1946_v54  ;;  %v8961_v16 = vadd.f32 %v8832_v26, %v2136_v6  ;;  %11572 = vst [vmem:[#allocation24_spill] sm:$0xff] %v8965_v5  ;;  %v8973_v54 = vsel %vm2498_vm9, 1.0, %v11460_v44  ;;  %v8987_v9 = vsel %vm2500_vm11, 1.0, %v11460_v44 }
 0x1a7   : > { %v2599_v37 = vadd.f32 1e-06, %v8946_v63  ;;  %v8958_v62 = vadd.f32 %v7167_v0, %v2214_v59  ;;  %2774 = vperm.xlu1 %7229, %v2656_v23   ;;  %7282 = vrcp.f32 %v2600_v50  ;;  %v2655_v38 = vmul.f32 %v7269_v14, %v8955_v31 }
 0x1a8   : > { %11571 = vst [vmem:[#allocation23_spill] sm:$0xff] %v8961_v16  ;;  %v2465_v27 = vpop.f32.mrf.mxu1  ;;  %v7271_v4 = vpop.eup %7270  ;;  %v2589_v50 = vadd.f32 1e-06, %v8961_v16  ;;  %vm2504_vm14 = vcmp.gt.f32.partialorder %v8936_v8, 0.0  ;;  %vm2503_vm2 = vcmp.gt.f32.partialorder %v8946_v63, 0.0  ;;  %vm2493_vm5 = vcmp.gt.f32.partialorder %v8961_v16, 0.0 }
 0x1a9   : > { %11570 = vst [vmem:[#allocation12_spill] sm:$0xff] %v8958_v62  ;;  %v8968_v45 = vadd.f32 %v2465_v27, %v2208_v1  ;;  %7284 = vrcp.f32 %v2599_v37  ;;  %v2602_v26 = vadd.f32 1e-06, %v8958_v62  ;;  %2769 = vperm.xlu0 %7230, %v2655_v38   ;;  %v2658_v6 = vmul.f32 %v7271_v4, %v8973_v54 }
 0x1aa   : > { %v7273_v59 = vpop.eup %7272  ;;  %v2590_v37 = vadd.f32 1e-06, %v8965_v5  ;;  %v8992_v27 = vsel %vm2499_vm12, 1.0, %v11460_v44  ;;  %v2573_v38 = vadd.f32 1e-06, %v8695_v49  ;;  %v9017_v58 = vsel %vm2503_vm2, 1.0, %v11460_v44 }
 0x1ab   : > { %11573 = vst [vmem:[#allocation13_spill] sm:$0xff] %v8968_v45  ;;  %v2601_v48 = vadd.f32 1e-06, %v8968_v45  ;;  %v2657_v23 = vmul.f32 %v7273_v59, %v8980_v28  ;;  %2784 = vperm.xlu1 %7229, %v2658_v6   ;;  %v2574_v6 = vadd.f32 1e-06, %v8690_v34  ;;  %vm2505_vm3 = vcmp.gt.f32.partialorder %v8968_v45, 0.0 }
 0x1ac   : > { %v7275_v14 = vpop.eup %7274  ;;  %11574 = vst [vmem:[#allocation25_spill] sm:$0xff] %v9017_v58  ;;  %vm2506_vm4 = vcmp.gt.f32.partialorder %v8958_v62, 0.0  ;;  %vm2494_vm6 = vcmp.gt.f32.partialorder %v8965_v5, 0.0  ;;  %vm2478_vm8 = vcmp.gt.f32.partialorder %v8690_v34, 0.0  ;;  %vm2475_vm9 = vcmp.gt.f32.partialorder %v8684_v17, 0.0 }
 0x1ad   : > { %7286 = vrcp.f32 %v2601_v48  ;;  %v2660_v0 = vmul.f32 %v7275_v14, %v8987_v9  ;;  %2779 = vperm.xlu0 %7230, %v2657_v23   ;;  %v2571_v23 = vadd.f32 1e-06, %v8684_v17  ;;  %vm2476_vm10 = vcmp.gt.f32.partialorder %v8679_v39, 0.0  ;;  %v2958_v17 = vld [vmem:[#allocation2 + $0x198] sm:$0xff] }
 0x1ae   : > { %7288 = vrcp.f32 %v2602_v26  ;;  %v7277_v1 = vpop.eup %7276  ;;  %v9000_v26 = vsel %vm2502_vm13, 1.0, %v11460_v44 }
 0x1af   : > { %7290 = vrcp.f32 %v2589_v50  ;;  %2794 = vperm.xlu1 %7229, %v2660_v0   ;;  %v2659_v4 = vmul.f32 %v7277_v1, %v8992_v27  ;;  %v9006_v0 = vsel %vm2504_vm14, 1.0, %v11460_v44 }
 0x1b0   : > { %v7279_v59 = vpop.eup %7278  ;;  %7292 = vrcp.f32 %v2590_v37  ;;  %v2572_v37 = vadd.f32 1e-06, %v8679_v39  ;;  %v2994_v39 = vmul.f32 0.31916776, %v2958_v17 }
 0x1b1   : > { %2789 = vperm.xlu0 %7230, %v2659_v4   ;;  %7294 = vrcp.f32 %v2573_v38  ;;  %v2662_v14 = vmul.f32 %v7279_v59, %v9000_v26  ;;  %v9013_v38 = vsel %vm2501_vm15, 1.0, %v11460_v44 }
 0x1b2   : > { %v7281_v48 = vpop.eup %7280  ;;  %7296 = vrcp.f32 %v2574_v6 }
 0x1b3   : > { %7298 = vrcp.f32 %v2571_v23  ;;  %v2661_v59 = vmul.f32 %v7281_v48, %v9013_v38  ;;  %v9027_v23 = vsel %vm2506_vm4, 1.0, %v11460_v44 }
 0x1b4   : > { %v7283_v50 = vpop.eup %7282  ;;  %7300 = vrcp.f32 %v2572_v37  ;;  %11576 = vst [vmem:[#allocation27_spill] sm:$0xff] %v9027_v23 }
 0x1b5   : > { %2804 = vperm.xlu0 %7230, %v2662_v14   ;;  %v2664_v1 = vmul.f32 %v7283_v50, %v9006_v0  ;;  %v9022_v14 = vsel %vm2505_vm3, 1.0, %v11460_v44 }
 0x1b6   : > { %v7285_v4 = vpop.eup %7284  ;;  %11575 = vst [vmem:[#allocation14_spill] sm:$0xff] %v9022_v14 }
 0x1b7   : > { %2814 = vperm.xlu1 %7229, %v2664_v1   ;;  %v2663_v6 = vmul.f32 %v7285_v4, %v9017_v58  ;;  %v9032_v4 = vsel %vm2493_vm5, 1.0, %v11460_v44 }
 0x1b8   : > { %11577 = vst [vmem:[#allocation26_spill] sm:$0xff] %v9032_v4 }
 0x1b9   : > { %2799 = vperm.xlu0 %7230, %v2661_v59  }
 0x1ba   : > { %v7287_v8 = vpop.eup %7286 }
 0x1bb   : > { %v7289_v50 = vpop.eup %7288  ;;  %v2665_v45 = vmul.f32 %v7287_v8, %v9022_v14  ;;  %2809 = vperm.xlu1 %7229, %v2663_v6   ;;  %v9037_v6 = vsel %vm2494_vm6, 1.0, %v11460_v44  ;;  %v3139_v14 = vld [vmem:[#allocation2 + $0x1a2] sm:$0xff] }
 0x1bc   : > { %v7291_v48 = vpop.eup %7290  ;;  %v2666_v37 = vmul.f32 %v7289_v50, %v9027_v23  ;;  %11578 = vst [vmem:[#allocation15_spill] sm:$0xff] %v9037_v6  ;;  %v9042_v50 = vsel %vm2477_vm7, 1.0, %v11460_v44 }
 0x1bd   : > { %2819 = vperm.xlu0 %7230, %v2665_v45   ;;  %v7293_v1 = vpop.eup %7292  ;;  %v2653_v8 = vmul.f32 %v7291_v48, %v9032_v4  ;;  %11579 = vst [vmem:[#allocation29_spill] sm:$0xff] %v9042_v50  ;;  %v9047_v48 = vsel %vm2478_vm8, 1.0, %v11460_v44  ;;  %v2959_v4 = vld [vmem:[#allocation2 + $0x1a0] sm:$0xff] }
 0x1be   : > { %v7295_v59 = vpop.eup %7294  ;;  %v2654_v45 = vmul.f32 %v7293_v1, %v9037_v6  ;;  %11580 = vst [vmem:[#allocation28_spill] sm:$0xff] %v9047_v48  ;;  %v9052_v1 = vsel %vm2475_vm9, 1.0, %v11460_v44  ;;  %v2995_v16 = vmul.f32 0.31916776, %v2959_v4 }
 0x1bf   : > { %2824 = vperm.xlu1 %7229, %v2666_v37   ;;  %v7297_v5 = vpop.eup %7296  ;;  %v2637_v37 = vmul.f32 %v7295_v59, %v9042_v50  ;;  %11581 = vst [vmem:[#allocation30_spill] sm:$0xff] %v9052_v1  ;;  %v3030_v50 = vld [vmem:[#allocation2 + $0x199] sm:$0xff] }
 0x1c0   : > { %v7299_v49 = vpop.eup %7298 }
 0x1c1   : > { %2759 = vperm.xlu0 %7230, %v2653_v8   ;;  %v2638_v8 = vmul.f32 %v7297_v5, %v9047_v48  ;;  %v7301_v34 = vpop.eup %7300  ;;  %v2635_v6 = vmul.f32 %v7299_v49, %v9052_v1  ;;  %v3031_v5 = vld [vmem:[#allocation2 + $0x1a1] sm:$0xff]  ;;  %v3175_v1 = vmul.f32 0.31916776, %v3139_v14 }
 0x1c2   : > { %v3138_v48 = vld [vmem:[#allocation2 + $0x19a] sm:$0xff]  ;;  %v3067_v23 = vmul.f32 0.36166447, %v3031_v5 }
 0x1c3   : > { %2764 = vperm.xlu1 %7229, %v2654_v45   ;;  %v9056_v45 = vsel %vm2476_vm10, 1.0, %v11460_v44 }
 0x1c4   : > { %v2636_v59 = vmul.f32 %v7301_v34, %v9056_v45  ;;  %v3103_v49 = vadd.f32 %v3067_v23, %v2995_v16 }
 0x1c5   : > { %2679 = vperm.xlu0 %7230, %v2637_v37   ;;  %v3066_v37 = vmul.f32 0.36166447, %v3030_v50 }
 0x1c6   : > { %v3211_v58 = vadd.f32 %v3175_v1, %v3103_v49 }
 0x1c7   : > { %2684 = vperm.xlu1 %7229, %v2638_v8   ;;  %v3102_v62 = vadd.f32 %v3066_v37, %v2994_v39  ;;  %v3174_v8 = vmul.f32 0.31916776, %v3138_v48 }
 0x1c8   : > { %3247 = vst.msk [vmem:[#allocation3 + $0x118] sm:$0xff] %vm407_vm1, %v3211_v58 }
 0x1c9   : > { %2669 = vperm.xlu0 %7230, %v2635_v6   ;;  %v3210_v44 = vadd.f32 %v3174_v8, %v3102_v62 }
 0x1cb   : > { %2674 = vperm.xlu1 %7229, %v2636_v59   ;;  %3246 = vst.msk [vmem:[#allocation3 + $0x110] sm:$0xff] %vm407_vm1, %v3210_v44 }
 0x201   : > { %v2695_v34 = vpop.permute.xlu1 %2694 }
 0x202   : > { %v2832_v17 = vmul.f32 %v2695_v34, %v8700_v46 }
 0x203   : > { %v2690_v6 = vpop.permute.xlu0 %2689 }
 0x204   : > { %v2831_v50 = vmul.f32 %v2690_v6, %v8706_v19  ;;  %v2864_v4 = vsel %vm351_vm0, %v2832_v17, %v8758_v41 }
 0x205   : > { %2897 = vst.msk [vmem:[#allocation2 + $0x51] sm:$0xff] %vm407_vm1, %v2864_v4  ;;  %v2705_v62 = vpop.permute.xlu1 %2704 }
 0x206   : > { %v2863_v39 = vsel %vm351_vm0, %v2831_v50, %v8769_v51  ;;  %v2834_v44 = vmul.f32 %v2705_v62, %v8712_v22 }
 0x207   : > { %2896 = vst.msk [vmem:[#allocation2 + $0x49] sm:$0xff] %vm407_vm1, %v2863_v39  ;;  %v2700_v58 = vpop.permute.xlu0 %2699 }
 0x208   : > { %v2866_v46 = vsel %vm351_vm0, %v2834_v44, %v8780_v42  ;;  %v2833_v16 = vmul.f32 %v2700_v58, %v8719_v47 }
 0x209   : > { %2899 = vst.msk [vmem:[#allocation2 + $0x69] sm:$0xff] %vm407_vm1, %v2866_v46  ;;  %v2715_v19 = vpop.permute.xlu1 %2714 }
 0x20a   : > { %v2865_v41 = vsel %vm351_vm0, %v2833_v16, %v8795_v55  ;;  %v2836_v14 = vmul.f32 %v2715_v19, %v8723_v57 }
 0x20b   : > { %2898 = vst.msk [vmem:[#allocation2 + $0x61] sm:$0xff] %vm407_vm1, %v2865_v41  ;;  %v2710_v51 = vpop.permute.xlu0 %2709 }
 0x20c   : > { %v3003_v23 = vld [vmem:[#allocation2 + $0x51] sm:$0xff]  ;;  %v2868_v22 = vsel %vm351_vm0, %v2836_v14, %v8806_v15  ;;  %v2835_v48 = vmul.f32 %v2710_v51, %v8730_v10 }
 0x20d   : > { %v3039_v42 = vmul.f32 0.36166447, %v3003_v23  ;;  %v3111_v1 = vld [vmem:[#allocation2 + $0x52] sm:$0xff]  ;;  %2901 = vst.msk [vmem:[#allocation2 + $0x81] sm:$0xff] %vm407_vm1, %v2868_v22  ;;  %v2725_v37 = vpop.permute.xlu1 %2724  ;;  %v3927_v10 = vsub.f32 1.0, %v3003_v23 }
 0x20e   : > { %v2930_v47 = vld [vmem:[#allocation2 + $0x48] sm:$0xff]  ;;  %v2931_v59 = vld [vmem:[#allocation2 + $0x50] sm:$0xff]  ;;  %v2867_v49 = vsel %vm351_vm0, %v2835_v48, %v8826_v20  ;;  %v2838_v34 = vmul.f32 %v2725_v37, %v8739_v21  ;;  %v3147_v50 = vmul.f32 0.31916776, %v3111_v1 }
 0x20f   : > { %v2966_v5 = vmul.f32 0.31916776, %v2930_v47  ;;  %v2967_v55 = vmul.f32 0.31916776, %v2931_v59  ;;  %v3002_v8 = vld [vmem:[#allocation2 + $0x49] sm:$0xff]  ;;  %2900 = vst.msk [vmem:[#allocation2 + $0x79] sm:$0xff] %vm407_vm1, %v2867_v49  ;;  %v2720_v15 = vpop.permute.xlu0 %2719  ;;  %3981 = vperm.xlu1 %7229, %v3927_v10  }
 0x210   : > { %v3110_v57 = vld [vmem:[#allocation2 + $0x4a] sm:$0xff]  ;;  %v3038_v17 = vmul.f32 0.36166447, %v3002_v8  ;;  %v3926_v6 = vsub.f32 1.0, %v3002_v8  ;;  %v2870_v62 = vsel %vm351_vm0, %v2838_v34, %v8839_v61  ;;  %v2837_v44 = vmul.f32 %v2720_v15, %v8741_v11 }
 0x211   : > { %v3075_v4 = vadd.f32 %v3039_v42, %v2967_v55  ;;  %v3005_v39 = vld [vmem:[#allocation2 + $0x69] sm:$0xff]  ;;  %v3146_v46 = vmul.f32 0.31916776, %v3110_v57  ;;  %2903 = vst.msk [vmem:[#allocation2 + $0x99] sm:$0xff] %vm407_vm1, %v2870_v62  ;;  %v2735_v21 = vpop.permute.xlu1 %2734 }
 0x212   : > { %v3074_v58 = vadd.f32 %v3038_v17, %v2966_v5  ;;  %v3113_v16 = vld [vmem:[#allocation2 + $0x6a] sm:$0xff]  ;;  %3976 = vperm.xlu0 %7230, %v3926_v6   ;;  %v3929_v20 = vsub.f32 1.0, %v3005_v39  ;;  %v3041_v41 = vmul.f32 0.36166447, %v3005_v39  ;;  %v2932_v14 = vld [vmem:[#allocation2 + $0x60] sm:$0xff]  ;;  %v2869_v22 = vsel %vm351_vm0, %v2837_v44, %v8848_v29 }
 0x213   : > { %v3183_v19 = vadd.f32 %v3147_v50, %v3075_v4  ;;  %v2933_v51 = vld [vmem:[#allocation2 + $0x68] sm:$0xff]  ;;  %v2840_v61 = vmul.f32 %v2735_v21, %v8749_v60  ;;  %v2968_v48 = vmul.f32 0.31916776, %v2932_v14  ;;  %2902 = vst.msk [vmem:[#allocation2 + $0x91] sm:$0xff] %vm407_vm1, %v2869_v22  ;;  %v3149_v60 = vmul.f32 0.31916776, %v3113_v16 }
 0x214   : > { %v3004_v23 = vld [vmem:[#allocation2 + $0x61] sm:$0xff]  ;;  %v3182_v11 = vadd.f32 %v3146_v46, %v3074_v58  ;;  %v2969_v42 = vmul.f32 0.31916776, %v2933_v51  ;;  %v2730_v47 = vpop.permute.xlu0 %2729  ;;  %3991 = vperm.xlu1 %7229, %v3929_v20  }
 0x215   : > { %v3040_v1 = vmul.f32 0.36166447, %v3004_v23  ;;  %3219 = vst.msk [vmem:[#allocation3 + $0x38] sm:$0xff] %vm407_vm1, %v3183_v19  ;;  %v3112_v59 = vld [vmem:[#allocation2 + $0x62] sm:$0xff]  ;;  %v2872_v5 = vsel %vm351_vm0, %v2840_v61, %v8859_v33  ;;  %v2839_v55 = vmul.f32 %v2730_v47, %v8763_v30  ;;  %v3928_v8 = vsub.f32 1.0, %v3004_v23 }
 0x216   : > { %v3007_v37 = vld [vmem:[#allocation2 + $0x81] sm:$0xff]  ;;  %3218 = vst.msk [vmem:[#allocation3 + $0x30] sm:$0xff] %vm407_vm1, %v3182_v11  ;;  %v3077_v57 = vadd.f32 %v3041_v41, %v2969_v42  ;;  %v3148_v49 = vmul.f32 0.31916776, %v3112_v59  ;;  %2905 = vst.msk [vmem:[#allocation2 + $0xb1] sm:$0xff] %vm407_vm1, %v2872_v5  ;;  %v2745_v17 = vpop.permute.xlu1 %2744  ;;  %v2934_v15 = vld [vmem:[#allocation2 + $0x78] sm:$0xff] }
 0x217   : > { %v3076_v29 = vadd.f32 %v3040_v1, %v2968_v48  ;;  %v3115_v34 = vld [vmem:[#allocation2 + $0x82] sm:$0xff]  ;;  %v3043_v10 = vmul.f32 0.36166447, %v3007_v37  ;;  %v3006_v50 = vld [vmem:[#allocation2 + $0x79] sm:$0xff]  ;;  %v2871_v33 = vsel %vm351_vm0, %v2839_v55, %v8872_v18  ;;  %v2842_v30 = vmul.f32 %v2745_v17, %v8771_v2  ;;  %3986 = vperm.xlu0 %7230, %v3928_v8  }
 0x218   : > { %v2935_v6 = vld [vmem:[#allocation2 + $0x80] sm:$0xff]  ;;  %v3931_v4 = vsub.f32 1.0, %v3007_v37  ;;  %v3185_v62 = vadd.f32 %v3149_v60, %v3077_v57  ;;  %v2970_v44 = vmul.f32 0.31916776, %v2934_v15  ;;  %2904 = vst.msk [vmem:[#allocation2 + $0xa9] sm:$0xff] %vm407_vm1, %v2871_v33  ;;  %v2740_v16 = vpop.permute.xlu0 %2739  ;;  %v3930_v61 = vsub.f32 1.0, %v3006_v50 }
 0x219   : > { %v3184_v39 = vadd.f32 %v3148_v49, %v3076_v29  ;;  %v2971_v58 = vmul.f32 0.31916776, %v2935_v6  ;;  %v3114_v46 = vld [vmem:[#allocation2 + $0x7a] sm:$0xff]  ;;  %v3151_v21 = vmul.f32 0.31916776, %v3115_v34  ;;  %v2874_v41 = vsel %vm351_vm0, %v2842_v30, %v8884_v24 }
 0x21a   : > { %v3042_v20 = vmul.f32 0.36166447, %v3006_v50  ;;  %v3009_v19 = vld [vmem:[#allocation2 + $0x99] sm:$0xff]  ;;  %v2841_v18 = vmul.f32 %v2740_v16, %v8784_v53  ;;  %3221 = vst.msk [vmem:[#allocation3 + $0x48] sm:$0xff] %vm407_vm1, %v3185_v62  ;;  %v3150_v14 = vmul.f32 0.31916776, %v3114_v46  ;;  %4001 = vperm.xlu1 %7229, %v3931_v4   ;;  %v2755_v22 = vpop.permute.xlu1 %2754 }
 0x21b   : > { %3220 = vst.msk [vmem:[#allocation3 + $0x40] sm:$0xff] %vm407_vm1, %v3184_v39  ;;  %v3079_v2 = vadd.f32 %v3043_v10, %v2971_v58  ;;  %v3045_v51 = vmul.f32 0.36166447, %v3009_v19  ;;  %v3117_v23 = vld [vmem:[#allocation2 + $0x9a] sm:$0xff]  ;;  %2907 = vst.msk [vmem:[#allocation2 + $0xc9] sm:$0xff] %vm407_vm1, %v2874_v41  ;;  %v2936_v48 = vld [vmem:[#allocation2 + $0x90] sm:$0xff]  ;;  %v2844_v24 = vmul.f32 %v2755_v22, %v8798_v35  ;;  %3996 = vperm.xlu0 %7230, %v3930_v61  }
 0x21c   : > { %v3078_v11 = vadd.f32 %v3042_v20, %v2970_v44  ;;  %v2937_v42 = vld [vmem:[#allocation2 + $0x98] sm:$0xff]  ;;  %v2873_v53 = vsel %vm351_vm0, %v2841_v18, %v8895_v3  ;;  %v3933_v47 = vsub.f32 1.0, %v3009_v19  ;;  %v2972_v37 = vmul.f32 0.31916776, %v2936_v48  ;;  %v2750_v8 = vpop.permute.xlu0 %2749 }
 0x21d   : > { %v3008_v1 = vld [vmem:[#allocation2 + $0x91] sm:$0xff]  ;;  %v3187_v59 = vadd.f32 %v3151_v21, %v3079_v2  ;;  %v2973_v5 = vmul.f32 0.31916776, %v2937_v42  ;;  %2906 = vst.msk [vmem:[#allocation2 + $0xc1] sm:$0xff] %vm407_vm1, %v2873_v53  ;;  %v2876_v49 = vsel %vm351_vm0, %v2844_v24, %v8909_v25  ;;  %v2843_v34 = vmul.f32 %v2750_v8, %v8808_v7 }
 0x21e   : > { %v3044_v55 = vmul.f32 0.36166447, %v3008_v1  ;;  %v3186_v60 = vadd.f32 %v3150_v14, %v3078_v11  ;;  %v3116_v29 = vld [vmem:[#allocation2 + $0x92] sm:$0xff]  ;;  %v3932_v3 = vsub.f32 1.0, %v3008_v1  ;;  %v3153_v35 = vmul.f32 0.31916776, %v3117_v23  ;;  %4011 = vperm.xlu1 %7229, %v3933_v47  }
 0x21f   : > { %v3011_v57 = vld [vmem:[#allocation2 + $0xb1] sm:$0xff]  ;;  %3223 = vst.msk [vmem:[#allocation3 + $0x58] sm:$0xff] %vm407_vm1, %v3187_v59  ;;  %v3081_v10 = vadd.f32 %v3045_v51, %v2973_v5  ;;  %v3152_v15 = vmul.f32 0.31916776, %v3116_v29  ;;  %2909 = vst.msk [vmem:[#allocation2 + $0xe1] sm:$0xff] %vm407_vm1, %v2876_v49  ;;  %v2938_v33 = vld [vmem:[#allocation2 + $0xa8] sm:$0xff] }
 0x220   : > { %v3080_v17 = vadd.f32 %v3044_v55, %v2972_v37  ;;  %v3119_v6 = vld [vmem:[#allocation2 + $0xb2] sm:$0xff]  ;;  %3222 = vst.msk [vmem:[#allocation3 + $0x50] sm:$0xff] %vm407_vm1, %v3186_v60  ;;  %v3047_v50 = vmul.f32 0.36166447, %v3011_v57  ;;  %v3010_v4 = vld [vmem:[#allocation2 + $0xa9] sm:$0xff]  ;;  %v3935_v39 = vsub.f32 1.0, %v3011_v57  ;;  %4006 = vperm.xlu0 %7230, %v3932_v3  }
 0x221   : > { %v2939_v30 = vld [vmem:[#allocation2 + $0xb0] sm:$0xff]  ;;  %v11582_v25 = vld [vmem:[#allocation10_spill] sm:$0xff]  ;;  %v3189_v44 = vadd.f32 %v3153_v35, %v3081_v10  ;;  %v2974_v58 = vmul.f32 0.31916776, %v2938_v33  ;;  %v3155_v21 = vmul.f32 0.31916776, %v3119_v6 }
 0x222   : > { %v2875_v7 = vsel %vm351_vm0, %v2843_v34, %v11582_v25  ;;  %v3188_v62 = vadd.f32 %v3152_v15, %v3080_v17  ;;  %v2975_v46 = vmul.f32 0.31916776, %v2939_v30  ;;  %v3118_v16 = vld [vmem:[#allocation2 + $0xaa] sm:$0xff]  ;;  %v3046_v20 = vmul.f32 0.36166447, %v3010_v4  ;;  %v2775_v41 = vpop.permute.xlu1 %2774  ;;  %4021 = vperm.xlu1 %7229, %v3935_v39  }
 0x223   : > { %2908 = vst.msk [vmem:[#allocation2 + $0xd9] sm:$0xff] %vm407_vm1, %v2875_v7  ;;  %v3013_v19 = vld [vmem:[#allocation2 + $0xc9] sm:$0xff]  ;;  %3225 = vst.msk [vmem:[#allocation3 + $0x68] sm:$0xff] %vm407_vm1, %v3189_v44  ;;  %v3154_v2 = vmul.f32 0.31916776, %v3118_v16  ;;  %v2848_v23 = vmul.f32 %v2775_v41, %v8851_v40  ;;  %v3934_v42 = vsub.f32 1.0, %v3010_v4 }
 0x224   : > { %3224 = vst.msk [vmem:[#allocation3 + $0x60] sm:$0xff] %vm407_vm1, %v3188_v62  ;;  %v3083_v18 = vadd.f32 %v3047_v50, %v2975_v46  ;;  %v3049_v14 = vmul.f32 0.36166447, %v3013_v19  ;;  %v3121_v51 = vld [vmem:[#allocation2 + $0xca] sm:$0xff]  ;;  %v3082_v22 = vadd.f32 %v3046_v20, %v2974_v58  ;;  %v2940_v61 = vld [vmem:[#allocation2 + $0xc0] sm:$0xff]  ;;  %v3937_v1 = vsub.f32 1.0, %v3013_v19  ;;  %v2770_v37 = vpop.permute.xlu0 %2769 }
 0x225   : > { %v2941_v11 = vld [vmem:[#allocation2 + $0xc8] sm:$0xff]  ;;  %v2976_v24 = vmul.f32 0.31916776, %v2940_v61  ;;  %v2880_v60 = vsel %vm351_vm0, %v2848_v23, %v8941_v56  ;;  %4016 = vperm.xlu0 %7230, %v3934_v42   ;;  %v2847_v40 = vmul.f32 %v2770_v37, %v8863_v13  ;;  %v3157_v57 = vmul.f32 0.31916776, %v3121_v51 }
 0x226   : > { %v3012_v48 = vld [vmem:[#allocation2 + $0xc1] sm:$0xff]  ;;  %v3191_v53 = vadd.f32 %v3155_v21, %v3083_v18  ;;  %v2977_v47 = vmul.f32 0.31916776, %v2941_v11  ;;  %v3190_v5 = vadd.f32 %v3154_v2, %v3082_v22  ;;  %2913 = vst.msk [vmem:[#allocation2 + $0x111] sm:$0xff] %vm407_vm1, %v2880_v60  ;;  %4031 = vperm.xlu1 %7229, %v3937_v1   ;;  %v2785_v17 = vpop.permute.xlu1 %2784 }
 0x227   : > { %v3048_v59 = vmul.f32 0.36166447, %v3012_v48  ;;  %v3120_v55 = vld [vmem:[#allocation2 + $0xc2] sm:$0xff]  ;;  %v3936_v29 = vsub.f32 1.0, %v3012_v48  ;;  %v2879_v13 = vsel %vm351_vm0, %v2847_v40, %v8955_v31  ;;  %v2850_v50 = vmul.f32 %v2785_v17, %v8878_v52 }
 0x228   : > { %v3015_v8 = vld [vmem:[#allocation2 + $0xe1] sm:$0xff]  ;;  %3227 = vst.msk [vmem:[#allocation3 + $0x78] sm:$0xff] %vm407_vm1, %v3191_v53  ;;  %v3085_v34 = vadd.f32 %v3049_v14, %v2977_v47  ;;  %v3156_v3 = vmul.f32 0.31916776, %v3120_v55  ;;  %3226 = vst.msk [vmem:[#allocation3 + $0x70] sm:$0xff] %vm407_vm1, %v3190_v5  ;;  %v2780_v62 = vpop.permute.xlu0 %2779 }
 0x229   : > { %v3084_v49 = vadd.f32 %v3048_v59, %v2976_v24  ;;  %v3123_v35 = vld [vmem:[#allocation2 + $0xe2] sm:$0xff]  ;;  %v3051_v10 = vmul.f32 0.36166447, %v3015_v8  ;;  %v3939_v33 = vsub.f32 1.0, %v3015_v8  ;;  %2912 = vst.msk [vmem:[#allocation2 + $0x109] sm:$0xff] %vm407_vm1, %v2879_v13  ;;  %v2882_v58 = vsel %vm351_vm0, %v2850_v50, %v8973_v54  ;;  %4026 = vperm.xlu0 %7230, %v3936_v29  }
 0x22a   : > { %v2942_v15 = vld [vmem:[#allocation2 + $0xd8] sm:$0xff]  ;;  %v2943_v56 = vld [vmem:[#allocation2 + $0xe0] sm:$0xff]  ;;  %v3193_v4 = vadd.f32 %v3157_v57, %v3085_v34  ;;  %v2849_v46 = vmul.f32 %v2780_v62, %v8886_v32  ;;  %v3159_v52 = vmul.f32 0.31916776, %v3123_v35  ;;  %2915 = vst.msk [vmem:[#allocation2 + $0x129] sm:$0xff] %vm407_vm1, %v2882_v58  ;;  %v2795_v16 = vpop.permute.xlu1 %2794 }
 0x22b   : > { %v3014_v6 = vld [vmem:[#allocation2 + $0xd9] sm:$0xff]  ;;  %v3192_v30 = vadd.f32 %v3156_v3, %v3084_v49  ;;  %v2978_v25 = vmul.f32 0.31916776, %v2942_v15  ;;  %v2979_v7 = vmul.f32 0.31916776, %v2943_v56  ;;  %4041 = vperm.xlu1 %7229, %v3939_v33   ;;  %v2852_v54 = vmul.f32 %v2795_v16, %v8899_v43 }
 0x22c   : > { %v3122_v39 = vld [vmem:[#allocation2 + $0xda] sm:$0xff]  ;;  %v3050_v44 = vmul.f32 0.36166447, %v3014_v6  ;;  %3229 = vst.msk [vmem:[#allocation3 + $0x88] sm:$0xff] %vm407_vm1, %v3193_v4  ;;  %v3938_v21 = vsub.f32 1.0, %v3014_v6  ;;  %v2881_v41 = vsel %vm351_vm0, %v2849_v46, %v8980_v28  ;;  %v2790_v32 = vpop.permute.xlu0 %2789 }
 0x22d   : > { %3228 = vst.msk [vmem:[#allocation3 + $0x80] sm:$0xff] %vm407_vm1, %v3192_v30  ;;  %v3087_v31 = vadd.f32 %v3051_v10, %v2979_v7  ;;  %v3158_v19 = vmul.f32 0.31916776, %v3122_v39  ;;  %2914 = vst.msk [vmem:[#allocation2 + $0x121] sm:$0xff] %vm407_vm1, %v2881_v41  ;;  %v3019_v14 = vld [vmem:[#allocation2 + $0x111] sm:$0xff]  ;;  %v2884_v51 = vsel %vm351_vm0, %v2852_v54, %v8987_v9  ;;  %v2851_v23 = vmul.f32 %v2790_v32, %v8913_v12 }
 0x22e   : > { %v3086_v20 = vadd.f32 %v3050_v44, %v2978_v25  ;;  %4036 = vperm.xlu0 %7230, %v3938_v21   ;;  %v3127_v22 = vld [vmem:[#allocation2 + $0x112] sm:$0xff]  ;;  %2917 = vst.msk [vmem:[#allocation2 + $0x141] sm:$0xff] %vm407_vm1, %v2884_v51  ;;  %v3943_v28 = vsub.f32 1.0, %v3019_v14  ;;  %v3055_v43 = vmul.f32 0.36166447, %v3019_v14 }
 0x22f   : > { %v3195_v18 = vadd.f32 %v3159_v52, %v3087_v31  ;;  %v2883_v42 = vsel %vm351_vm0, %v2851_v23, %v8992_v27  ;;  %v3163_v5 = vmul.f32 0.31916776, %v3127_v22  ;;  %v11583_v35 = vld [vmem:[#allocation22_spill] sm:$0xff]  ;;  %v11585_v22 = vld [vmem:[#allocation25_spill] sm:$0xff] }
 0x230   : > { %v3194_v2 = vadd.f32 %v3158_v19, %v3086_v20  ;;  %v2946_v61 = vld [vmem:[#allocation2 + $0x108] sm:$0xff]  ;;  %v2947_v11 = vld [vmem:[#allocation2 + $0x110] sm:$0xff]  ;;  %2916 = vst.msk [vmem:[#allocation2 + $0x139] sm:$0xff] %vm407_vm1, %v2883_v42  ;;  %4061 = vperm.xlu1 %7229, %v3943_v28   ;;  %v2805_v12 = vpop.permute.xlu0 %2804 }
 0x231   : > { %3231 = vst.msk [vmem:[#allocation3 + $0x98] sm:$0xff] %vm407_vm1, %v3195_v18  ;;  %v3018_v48 = vld [vmem:[#allocation2 + $0x109] sm:$0xff]  ;;  %v2982_v1 = vmul.f32 0.31916776, %v2946_v61  ;;  %v2983_v9 = vmul.f32 0.31916776, %v2947_v11  ;;  %v2854_v59 = vmul.f32 %v2805_v12, %v8922_v36 }
 0x232   : > { %3230 = vst.msk [vmem:[#allocation3 + $0x90] sm:$0xff] %vm407_vm1, %v3194_v2  ;;  %v3054_v53 = vmul.f32 0.36166447, %v3018_v48  ;;  %v3126_v24 = vld [vmem:[#allocation2 + $0x10a] sm:$0xff]  ;;  %v3942_v37 = vsub.f32 1.0, %v3018_v48  ;;  %v2815_v29 = vpop.permute.xlu1 %2814 }
 0x233   : > { %v3021_v47 = vld [vmem:[#allocation2 + $0x129] sm:$0xff]  ;;  %v3091_v8 = vadd.f32 %v3055_v43, %v2983_v9  ;;  %v3162_v60 = vmul.f32 0.31916776, %v3126_v24  ;;  %v2886_v3 = vsel %vm351_vm0, %v2854_v59, %v9000_v26  ;;  %v2856_v17 = vmul.f32 %v2815_v29, %v11583_v35  ;;  %v11584_v26 = vld [vmem:[#allocation11_spill] sm:$0xff]  ;;  %v11587_v9 = vld [vmem:[#allocation14_spill] sm:$0xff] }
 0x234   : > { %v3090_v55 = vadd.f32 %v3054_v53, %v2982_v1  ;;  %v3129_v40 = vld [vmem:[#allocation2 + $0x12a] sm:$0xff]  ;;  %v3057_v57 = vmul.f32 0.36166447, %v3021_v47  ;;  %v2948_v27 = vld [vmem:[#allocation2 + $0x120] sm:$0xff]  ;;  %4056 = vperm.xlu0 %7230, %v3942_v37   ;;  %v3945_v10 = vsub.f32 1.0, %v3021_v47  ;;  %2919 = vst.msk [vmem:[#allocation2 + $0x159] sm:$0xff] %vm407_vm1, %v2886_v3  ;;  %v2800_v50 = vpop.permute.xlu0 %2799 }
 0x235   : > { %v2949_v49 = vld [vmem:[#allocation2 + $0x128] sm:$0xff]  ;;  %v3199_v36 = vadd.f32 %v3163_v5, %v3091_v8  ;;  %v2984_v56 = vmul.f32 0.31916776, %v2948_v27  ;;  %v3165_v33 = vmul.f32 0.31916776, %v3129_v40  ;;  %v2888_v25 = vsel %vm351_vm0, %v2856_v17, %v9006_v0  ;;  %v11586_v43 = vld [vmem:[#allocation13_spill] sm:$0xff] }
 0x236   : > { %v3020_v34 = vld [vmem:[#allocation2 + $0x121] sm:$0xff]  ;;  %v3198_v15 = vadd.f32 %v3162_v60, %v3090_v55  ;;  %v2985_v6 = vmul.f32 0.31916776, %v2949_v49  ;;  %4071 = vperm.xlu1 %7229, %v3945_v10   ;;  %v2853_v7 = vmul.f32 %v2800_v50, %v11584_v26  ;;  %2921 = vst.msk [vmem:[#allocation2 + $0x171] sm:$0xff] %vm407_vm1, %v2888_v25  ;;  %v2810_v46 = vpop.permute.xlu1 %2809  ;;  %v11591_v10 = vld [vmem:[#allocation26_spill] sm:$0xff] }
 0x237   : > { %v3128_v13 = vld [vmem:[#allocation2 + $0x122] sm:$0xff]  ;;  %v3056_v30 = vmul.f32 0.36166447, %v3020_v34  ;;  %3235 = vst.msk [vmem:[#allocation3 + $0xb8] sm:$0xff] %vm407_vm1, %v3199_v36  ;;  %v3944_v52 = vsub.f32 1.0, %v3020_v34  ;;  %v2950_v16 = vld [vmem:[#allocation2 + $0x138] sm:$0xff]  ;;  %v2855_v19 = vmul.f32 %v2810_v46, %v8946_v63 }
 0x238   : > { %v3023_v4 = vld [vmem:[#allocation2 + $0x141] sm:$0xff]  ;;  %3234 = vst.msk [vmem:[#allocation3 + $0xb0] sm:$0xff] %vm407_vm1, %v3198_v15  ;;  %v3093_v39 = vadd.f32 %v3057_v57, %v2985_v6  ;;  %v3164_v62 = vmul.f32 0.31916776, %v3128_v13  ;;  %v9166_v20 = vld [vmem:[#allocation2 + $0x139] sm:$0xff]  ;;  %v2885_v0 = vsel %vm351_vm0, %v2853_v7, %v9013_v38  ;;  %v2820_v14 = vpop.permute.xlu0 %2819 }
 0x239   : > { %v3059_v44 = vmul.f32 0.36166447, %v3023_v4  ;;  %v3131_v58 = vld [vmem:[#allocation2 + $0x142] sm:$0xff]  ;;  %v3092_v31 = vadd.f32 %v3056_v30, %v2984_v56  ;;  %v3947_v41 = vsub.f32 1.0, %v3023_v4  ;;  %v2986_v18 = vmul.f32 0.31916776, %v2950_v16  ;;  %4066 = vperm.xlu0 %7230, %v3944_v52  }
 0x23a   : > { %v2951_v21 = vld [vmem:[#allocation2 + $0x140] sm:$0xff]  ;;  %v3201_v54 = vadd.f32 %v3165_v33, %v3093_v39  ;;  %v3058_v2 = vmul.f32 0.36166447, %v9166_v20  ;;  %2918 = vst.msk [vmem:[#allocation2 + $0x151] sm:$0xff] %vm407_vm1, %v2885_v0  ;;  %v2887_v28 = vsel %vm351_vm0, %v2855_v19, %v11585_v22  ;;  %v2857_v38 = vmul.f32 %v2820_v14, %v11586_v43  ;;  %v2825_v42 = vpop.permute.xlu1 %2824  ;;  %v11588_v12 = vld [vmem:[#allocation12_spill] sm:$0xff] }
 0x23b   : > { %v2987_v32 = vmul.f32 0.31916776, %v2951_v21  ;;  %v3200_v51 = vadd.f32 %v3164_v62, %v3092_v31  ;;  %v3130_v23 = vld [vmem:[#allocation2 + $0x13a] sm:$0xff]  ;;  %4081 = vperm.xlu1 %7229, %v3947_v41   ;;  %v3167_v63 = vmul.f32 0.31916776, %v3131_v58  ;;  %2920 = vst.msk [vmem:[#allocation2 + $0x169] sm:$0xff] %vm407_vm1, %v2887_v28  ;;  %v2858_v24 = vmul.f32 %v2825_v42, %v11588_v12 }
 0x23c   : > { %3237 = vst.msk [vmem:[#allocation3 + $0xc8] sm:$0xff] %vm407_vm1, %v3201_v54  ;;  %v3094_v61 = vadd.f32 %v3058_v2, %v2986_v18  ;;  %v3166_v48 = vmul.f32 0.31916776, %v3130_v23  ;;  %v9179_v1 = vld [vmem:[#allocation2 + $0x159] sm:$0xff]  ;;  %v2889_v53 = vsel %vm351_vm0, %v2857_v38, %v11587_v9  ;;  %v2760_v5 = vpop.permute.xlu0 %2759  ;;  %v11592_v36 = vld [vmem:[#allocation24_spill] sm:$0xff]  ;;  %v11595_v18 = vld [vmem:[#allocation29_spill] sm:$0xff] }
 0x23d   : > { %v3095_v11 = vadd.f32 %v3059_v44, %v2987_v32  ;;  %3236 = vst.msk [vmem:[#allocation3 + $0xc0] sm:$0xff] %vm407_vm1, %v3200_v51  ;;  %v3133_v37 = vld [vmem:[#allocation2 + $0x15a] sm:$0xff]  ;;  %2922 = vst.msk [vmem:[#allocation2 + $0x181] sm:$0xff] %vm407_vm1, %v2889_v53  ;;  %v3061_v29 = vmul.f32 0.36166447, %v9179_v1  ;;  %v9191_v57 = vld [vmem:[#allocation2 + $0x171] sm:$0xff] }
 0x23e   : > { %v3202_v47 = vadd.f32 %v3166_v48, %v3094_v61  ;;  %v11589_v55 = vld [vmem:[#allocation27_spill] sm:$0xff]  ;;  %v3135_v27 = vld [vmem:[#allocation2 + $0x172] sm:$0xff]  ;;  %v2765_v49 = vpop.permute.xlu1 %2764  ;;  %v3169_v34 = vmul.f32 0.31916776, %v3133_v37  ;;  %v3063_v30 = vmul.f32 0.36166447, %v9191_v57 }
 0x23f   : > { %v3203_v59 = vadd.f32 %v3167_v63, %v3095_v11  ;;  %v2890_v8 = vsel %vm351_vm0, %v2858_v24, %v11589_v55  ;;  %v11590_v60 = vld [vmem:[#allocation23_spill] sm:$0xff]  ;;  %v2846_v56 = vmul.f32 %v2765_v49, %v11592_v36  ;;  %v3171_v19 = vmul.f32 0.31916776, %v3135_v27  ;;  %v11596_v28 = vld [vmem:[#allocation42_spill] sm:$0xff] }
 0x240   : > { %v2845_v40 = vmul.f32 %v2760_v5, %v11590_v60  ;;  %3238 = vst.msk [vmem:[#allocation3 + $0xd0] sm:$0xff] %vm407_vm1, %v3202_v47  ;;  %2923 = vst.msk [vmem:[#allocation2 + $0x189] sm:$0xff] %vm407_vm1, %v2890_v8  ;;  %v2680_v33 = vpop.permute.xlu0 %2679  ;;  %v11593_v7 = vld [vmem:[#allocation15_spill] sm:$0xff]  ;;  %v11598_v5 = vld [vmem:[#allocation41_spill] sm:$0xff] }
 0x241   : > { %3239 = vst.msk [vmem:[#allocation3 + $0xd8] sm:$0xff] %vm407_vm1, %v3203_v59  ;;  %v2952_v3 = vld [vmem:[#allocation2 + $0x150] sm:$0xff]  ;;  %v2953_v35 = vld [vmem:[#allocation2 + $0x158] sm:$0xff]  ;;  %v2878_v39 = vsel %vm351_vm0, %v2846_v56, %v11593_v7  ;;  %v11594_v62 = vld [vmem:[#allocation43_spill] sm:$0xff] }
 0x242   : > { %v9194_v17 = vld [vmem:[#allocation2 + $0x151] sm:$0xff]  ;;  %v2877_v15 = vsel %vm351_vm0, %v2845_v40, %v11591_v10  ;;  %v2988_v6 = vmul.f32 0.31916776, %v2952_v3  ;;  %v2989_v13 = vmul.f32 0.31916776, %v2953_v35  ;;  %v2954_v25 = vld [vmem:[#allocation2 + $0x168] sm:$0xff]  ;;  %v2829_v44 = vmul.f32 %v2680_v33, %v11594_v62  ;;  %v2685_v0 = vpop.permute.xlu1 %2684 }
 0x243   : > { %v3060_v50 = vmul.f32 0.36166447, %v9194_v17  ;;  %2910 = vst.msk [vmem:[#allocation2 + $0xf1] sm:$0xff] %vm407_vm1, %v2877_v15  ;;  %v3132_v4 = vld [vmem:[#allocation2 + $0x152] sm:$0xff]  ;;  %v2990_v31 = vmul.f32 0.31916776, %v2954_v25  ;;  %v2830_v43 = vmul.f32 %v2685_v0, %v11596_v28 }
 0x244   : > { %v2955_v26 = vld [vmem:[#allocation2 + $0x170] sm:$0xff]  ;;  %v3097_v46 = vadd.f32 %v3061_v29, %v2989_v13  ;;  %v3168_v52 = vmul.f32 0.31916776, %v3132_v4  ;;  %2911 = vst.msk [vmem:[#allocation2 + $0xf9] sm:$0xff] %vm407_vm1, %v2878_v39  ;;  %v2861_v32 = vsel %vm351_vm0, %v2829_v44, %v11595_v18  ;;  %v2956_v23 = vld [vmem:[#allocation2 + $0x180] sm:$0xff]  ;;  %v2670_v38 = vpop.permute.xlu0 %2669  ;;  %v11597_v59 = vld [vmem:[#allocation28_spill] sm:$0xff] }
 0x245   : > { %v3096_v58 = vadd.f32 %v3060_v50, %v2988_v6  ;;  %v9205_v16 = vld [vmem:[#allocation2 + $0x169] sm:$0xff]  ;;  %v2991_v41 = vmul.f32 0.31916776, %v2955_v26  ;;  %v9211_v22 = vld [vmem:[#allocation2 + $0x181] sm:$0xff]  ;;  %2894 = vst.msk [vmem:[#allocation2 + $0x31] sm:$0xff] %vm407_vm1, %v2861_v32  ;;  %v2862_v37 = vsel %vm351_vm0, %v2830_v43, %v11597_v59  ;;  %v2827_v55 = vmul.f32 %v2670_v38, %v11598_v5  ;;  %v11599_v50 = vld [vmem:[#allocation30_spill] sm:$0xff] }
 0x246   : > { %v3134_v21 = vld [vmem:[#allocation2 + $0x16a] sm:$0xff]  ;;  %v3062_v54 = vmul.f32 0.36166447, %v9205_v16  ;;  %v3205_v14 = vadd.f32 %v3169_v34, %v3097_v46  ;;  %v2992_v11 = vmul.f32 0.31916776, %v2956_v23  ;;  %v2675_v8 = vpop.permute.xlu1 %2674  ;;  %2895 = vst.msk [vmem:[#allocation2 + $0x39] sm:$0xff] %vm407_vm1, %v2862_v37 }
 0x247   : > { %v3204_v2 = vadd.f32 %v3168_v52, %v3096_v58  ;;  %v3170_v51 = vmul.f32 0.31916776, %v3134_v21  ;;  %v3099_v61 = vadd.f32 %v3063_v30, %v2991_v41  ;;  %v3064_v48 = vmul.f32 0.36166447, %v9211_v22  ;;  %v2957_v42 = vld [vmem:[#allocation2 + $0x188] sm:$0xff] }
 0x248   : > { %v3098_v63 = vadd.f32 %v3062_v54, %v2990_v31  ;;  %v9216_v9 = vld [vmem:[#allocation2 + $0x189] sm:$0xff]  ;;  %3241 = vst.msk [vmem:[#allocation3 + $0xe8] sm:$0xff] %vm407_vm1, %v3205_v14  ;;  %v2993_v53 = vmul.f32 0.31916776, %v2957_v42  ;;  %v2859_v33 = vsel %vm351_vm0, %v2827_v55, %v11599_v50 }
 0x249   : > { %3240 = vst.msk [vmem:[#allocation3 + $0xe0] sm:$0xff] %vm407_vm1, %v3204_v2  ;;  %v3065_v12 = vmul.f32 0.36166447, %v9216_v9  ;;  %v3136_v24 = vld [vmem:[#allocation2 + $0x182] sm:$0xff]  ;;  %v3137_v47 = vld [vmem:[#allocation2 + $0x18a] sm:$0xff]  ;;  %v3207_v40 = vadd.f32 %v3171_v19, %v3099_v61  ;;  %v3100_v29 = vadd.f32 %v3064_v48, %v2992_v11  ;;  %2892 = vst.msk [vmem:[#allocation2 + $0x19] sm:$0xff] %vm407_vm1, %v2859_v33 }
 0x24a   : > { %v3206_v60 = vadd.f32 %v3170_v51, %v3098_v63  ;;  %v3172_v27 = vmul.f32 0.31916776, %v3136_v24  ;;  %v2944_v49 = vld [vmem:[#allocation2 + $0xf0] sm:$0xff]  ;;  %v3173_v35 = vmul.f32 0.31916776, %v3137_v47  ;;  %v11600_v30 = vld [vmem:[#allocation40_spill] sm:$0xff] }
 0x24b   : > { %v3016_v34 = vld [vmem:[#allocation2 + $0xf1] sm:$0xff]  ;;  %v3101_v3 = vadd.f32 %v3065_v12, %v2993_v53  ;;  %v2980_v10 = vmul.f32 0.31916776, %v2944_v49  ;;  %3243 = vst.msk [vmem:[#allocation3 + $0xf8] sm:$0xff] %vm407_vm1, %v3207_v40  ;;  %v3017_v6 = vld [vmem:[#allocation2 + $0xf9] sm:$0xff]  ;;  %v2828_v4 = vmul.f32 %v2675_v8, %v11600_v30 }
 0x24c   : > { %v3052_v15 = vmul.f32 0.36166447, %v3016_v34  ;;  %3242 = vst.msk [vmem:[#allocation3 + $0xf0] sm:$0xff] %vm407_vm1, %v3206_v60  ;;  %v3208_v36 = vadd.f32 %v3172_v27, %v3100_v29  ;;  %v2945_v56 = vld [vmem:[#allocation2 + $0xf8] sm:$0xff]  ;;  %v3053_v39 = vmul.f32 0.36166447, %v3017_v6 }
 0x24d   : > { %v3124_v13 = vld [vmem:[#allocation2 + $0xf2] sm:$0xff]  ;;  %v3209_v25 = vadd.f32 %v3173_v35, %v3101_v3  ;;  %v2981_v7 = vmul.f32 0.31916776, %v2945_v56  ;;  %v3125_v62 = vld [vmem:[#allocation2 + $0xfa] sm:$0xff]  ;;  %v2860_v52 = vsel %vm351_vm0, %v2828_v4, %v9056_v45  ;;  %v3417_v6 = vld [vmem:[#allocation3 + $0x58] sm:$0xff] }
 0x24e   : > { %v3088_v26 = vadd.f32 %v3052_v15, %v2980_v10  ;;  %3244 = vst.msk [vmem:[#allocation3 + $0x100] sm:$0xff] %vm407_vm1, %v3208_v36  ;;  %v3160_v44 = vmul.f32 0.31916776, %v3124_v13  ;;  %v2928_v58 = vld [vmem:[#allocation2 + $0x30] sm:$0xff]  ;;  %v3161_v21 = vmul.f32 0.31916776, %v3125_v62 }
 0x24f   : > { %v3000_v46 = vld [vmem:[#allocation2 + $0x31] sm:$0xff]  ;;  %3245 = vst.msk [vmem:[#allocation3 + $0x108] sm:$0xff] %vm407_vm1, %v3209_v25  ;;  %v3089_v31 = vadd.f32 %v3053_v39, %v2981_v7  ;;  %v2964_v0 = vmul.f32 0.31916776, %v2928_v58  ;;  %2893 = vst.msk [vmem:[#allocation2 + $0x21] sm:$0xff] %vm407_vm1, %v2860_v52  ;;  %v3001_v2 = vld [vmem:[#allocation2 + $0x39] sm:$0xff] }
 0x250   : > { %v3036_v19 = vmul.f32 0.36166447, %v3000_v46  ;;  %v3196_v41 = vadd.f32 %v3160_v44, %v3088_v26  ;;  %v2929_v32 = vld [vmem:[#allocation2 + $0x38] sm:$0xff]  ;;  %v3037_v23 = vmul.f32 0.36166447, %v3001_v2  ;;  %v3414_v60 = vld [vmem:[#allocation3 + $0x40] sm:$0xff] }
 0x251   : > { %v3197_v54 = vadd.f32 %v3161_v21, %v3089_v31  ;;  %v3108_v14 = vld [vmem:[#allocation2 + $0x32] sm:$0xff]  ;;  %v2965_v51 = vmul.f32 0.31916776, %v2929_v32  ;;  %v3109_v28 = vld [vmem:[#allocation2 + $0x3a] sm:$0xff]  ;;  %v3351_v10 = vmul.f32 0.36166447, %v3414_v60 }
 0x252   : > { %v3072_v18 = vadd.f32 %v3036_v19, %v2964_v0  ;;  %3232 = vst.msk [vmem:[#allocation3 + $0xa0] sm:$0xff] %vm407_vm1, %v3196_v41  ;;  %v3144_v45 = vmul.f32 0.31916776, %v3108_v14  ;;  %v3145_v38 = vmul.f32 0.31916776, %v3109_v28  ;;  %v2926_v63 = vld [vmem:[#allocation2 + $0x18] sm:$0xff] }
 0x253   : > { %3233 = vst.msk [vmem:[#allocation3 + $0xa8] sm:$0xff] %vm407_vm1, %v3197_v54  ;;  %v3073_v43 = vadd.f32 %v3037_v23, %v2965_v51  ;;  %v2998_v61 = vld [vmem:[#allocation2 + $0x19] sm:$0xff]  ;;  %v2962_v48 = vmul.f32 0.31916776, %v2926_v63  ;;  %v3318_v15 = vld [vmem:[#allocation3 + $0x38] sm:$0xff]  ;;  %v3418_v54 = vld [vmem:[#allocation3 + $0x60] sm:$0xff] }
 0x254   : > { %v3180_v11 = vadd.f32 %v3144_v45, %v3072_v18  ;;  %v3034_v42 = vmul.f32 0.36166447, %v2998_v61  ;;  %v3317_v49 = vld [vmem:[#allocation3 + $0x30] sm:$0xff]  ;;  %v3415_v35 = vld [vmem:[#allocation3 + $0x48] sm:$0xff]  ;;  %v3350_v25 = vmul.f32 0.36166447, %v3318_v15 }
 0x255   : > { %v3181_v53 = vadd.f32 %v3145_v38, %v3073_v43  ;;  %v3416_v34 = vld [vmem:[#allocation3 + $0x50] sm:$0xff]  ;;  %v9242_v36 = vmul.f32 0.31916776, %v3317_v49  ;;  %v3349_v50 = vmul.f32 0.36166447, %v3317_v49  ;;  %v3419_v51 = vld [vmem:[#allocation3 + $0x68] sm:$0xff] }
 0x256   : > { %v2927_v12 = vld [vmem:[#allocation2 + $0x20] sm:$0xff]  ;;  %3216 = vst.msk [vmem:[#allocation3 + $0x20] sm:$0xff] %vm407_vm1, %v3180_v11  ;;  %v3070_v59 = vadd.f32 %v3034_v42, %v2962_v48  ;;  %v9244_v56 = vmul.f32 0.31916776, %v3416_v34  ;;  %v3352_v33 = vmul.f32 0.36166447, %v3415_v35 }
 0x257   : > { %v2999_v24 = vld [vmem:[#allocation2 + $0x21] sm:$0xff]  ;;  %v2963_v37 = vmul.f32 0.31916776, %v2927_v12  ;;  %3217 = vst.msk [vmem:[#allocation3 + $0x28] sm:$0xff] %vm407_vm1, %v3181_v53  ;;  %v3383_v26 = vadd.f32 %v3351_v10, %v9242_v36  ;;  %v9255_v39 = vmul.f32 0.31916776, %v3318_v15 }
 0x258   : > { %v3106_v47 = vld [vmem:[#allocation2 + $0x1a] sm:$0xff]  ;;  %v3035_v5 = vmul.f32 0.36166447, %v2999_v24  ;;  %v3107_v55 = vld [vmem:[#allocation2 + $0x22] sm:$0xff]  ;;  %v3449_v62 = vmul.f32 0.31916776, %v3417_v6 }
 0x259   : > { %v3142_v8 = vmul.f32 0.31916776, %v3106_v47  ;;  %v3143_v29 = vmul.f32 0.31916776, %v3107_v55  ;;  %v3446_v58 = vmul.f32 0.31916776, %v3414_v60  ;;  %v9258_v46 = vadd.f32 %v9244_v56, %v3383_v26 }
 0x25a   : > { %v3071_v40 = vadd.f32 %v3035_v5, %v2963_v37  ;;  %v3447_v31 = vmul.f32 0.31916776, %v3415_v35  ;;  %v3384_v21 = vadd.f32 %v3352_v33, %v9255_v39  ;;  %v3353_v2 = vmul.f32 0.36166447, %v3416_v34  ;;  %v3440_v63 = vld [vmem:[#allocation3 + $0x110] sm:$0xff]  ;;  %v3421_v61 = vld [vmem:[#allocation3 + $0x78] sm:$0xff] }
 0x25b   : > { %v3178_v27 = vadd.f32 %v3142_v8, %v3070_v59  ;;  %v3608_v32 = vadd.f32 1e-06, %v9258_v46  ;;  %v3450_v23 = vmul.f32 0.31916776, %v3418_v54  ;;  %v3354_v28 = vmul.f32 0.36166447, %v3417_v6 }
 0x25c   : > { %v3179_v3 = vadd.f32 %v3143_v29, %v3071_v40  ;;  %v9266_v41 = vadd.f32 %v3449_v62, %v3384_v21  ;;  %v3385_v43 = vadd.f32 %v3446_v58, %v3353_v2  ;;  %v3451_v38 = vmul.f32 0.31916776, %v3419_v51  ;;  %v3441_v11 = vld [vmem:[#allocation3 + $0x118] sm:$0xff]  ;;  %v2924_v12 = vld [vmem:[#allocation2] sm:$0xff]  ;;  %v3423_v8 = vld [vmem:[#allocation3 + $0x88] sm:$0xff] }
 0x25d   : > { %3214 = vst.msk [vmem:[#allocation3 + $0x10] sm:$0xff] %vm407_vm1, %v3178_v27  ;;  %v9246_v13 = vld [vmem:[#allocation3 + $0x20] sm:$0xff]  ;;  %v3386_v42 = vadd.f32 %v3447_v31, %v3354_v28  ;;  %v3356_v53 = vmul.f32 0.36166447, %v3419_v51  ;;  %v9274_v24 = vmul.f32 0.31916776, %v3440_v63 }
 0x25e   : > { %3215 = vst.msk [vmem:[#allocation3 + $0x18] sm:$0xff] %vm407_vm1, %v3179_v3  ;;  %v3284_v30 = vmul.f32 0.31916776, %v9246_v13  ;;  %v9249_v4 = vld [vmem:[#allocation3 + $0x28] sm:$0xff]  ;;  %v3609_v45 = vadd.f32 1e-06, %v9266_v41  ;;  %v9272_v48 = vadd.f32 %v3450_v23, %v3385_v43 }
 0x25f   : > { %v9253_v7 = vmul.f32 0.31916776, %v9249_v4  ;;  %v9276_v47 = vadd.f32 %v3451_v38, %v3386_v42  ;;  %v3453_v59 = vmul.f32 0.31916776, %v3421_v61  ;;  %v3420_v37 = vld [vmem:[#allocation3 + $0x70] sm:$0xff]  ;;  %v3388_v29 = vadd.f32 %v3449_v62, %v3356_v53  ;;  %v3422_v49 = vld [vmem:[#allocation3 + $0x80] sm:$0xff] }
 0x260   : > { %v3381_v44 = vadd.f32 %v3349_v50, %v3284_v30  ;;  %v9278_v5 = vmul.f32 0.31916776, %v3441_v11  ;;  %v3355_v55 = vmul.f32 0.36166447, %v3418_v54  ;;  %v9280_v60 = vmul.f32 0.31916776, %v2924_v12 }
 0x261   : > { %v3382_v52 = vadd.f32 %v3350_v25, %v9253_v7  ;;  %11601 = vst [vmem:[#allocation16_spill] sm:$0xff] %v9276_v47  ;;  %v3610_v40 = vadd.f32 1e-06, %v9272_v48  ;;  %v3358_v27 = vmul.f32 0.36166447, %v3421_v61  ;;  %v3946_v34 = vsub.f32 1.0, %v9166_v20 }
 0x262   : > { %v9262_v0 = vadd.f32 %v3446_v58, %v3381_v44  ;;  %v9284_v3 = vmul.f32 0.31916776, %v3420_v37  ;;  %v3357_v35 = vmul.f32 0.36166447, %v3420_v37  ;;  %v3611_v10 = vadd.f32 1e-06, %v9276_v47 }
 0x263   : > { %v9264_v19 = vadd.f32 %v3447_v31, %v3382_v52  ;;  %v9288_v15 = vadd.f32 %v3453_v59, %v3388_v29  ;;  %v9290_v6 = vmul.f32 0.31916776, %v3423_v8  ;;  %v3425_v50 = vld [vmem:[#allocation3 + $0x98] sm:$0xff]  ;;  %v3387_v33 = vadd.f32 %v9244_v56, %v3355_v55  ;;  %v3424_v11 = vld [vmem:[#allocation3 + $0x90] sm:$0xff] }
 0x264   : > { %v3606_v18 = vadd.f32 1e-06, %v9262_v0  ;;  %vm3510_vm11 = vcmp.gt.f32.partialorder %v9262_v0, 0.0  ;;  %v9294_v30 = vmul.f32 0.31916776, %v3422_v49  ;;  %vm3512_vm13 = vcmp.gt.f32.partialorder %v9258_v46, 0.0 }
 0x265   : > { %v3607_v14 = vadd.f32 1e-06, %v9264_v19  ;;  %11602 = vst [vmem:[#allocation31_spill] sm:$0xff] %v9288_v15  ;;  %vm3511_vm12 = vcmp.gt.f32.partialorder %v9264_v19, 0.0  ;;  %v3360_v25 = vmul.f32 0.36166447, %v3423_v8  ;;  %v3390_v20 = vadd.f32 %v3451_v38, %v3358_v27 }
 0x266   : > { %7302 = vrcp.f32 %v3606_v18  ;;  %vm3513_vm14 = vcmp.gt.f32.partialorder %v9266_v41, 0.0  ;;  %v11603_v62 = vmov 0.0   ;;  %v9300_v58 = vadd.f32 %v9284_v3, %v3387_v33  ;;  %v3334_v33 = vld [vmem:[#allocation3 + $0xb8] sm:$0xff] }
 0x267   : > { %7304 = vrcp.f32 %v3607_v14  ;;  %v6426_v44 = vsel %vm3510_vm11, 1.0, %v11603_v62  ;;  %v3389_v52 = vadd.f32 %v3450_v23, %v3357_v35  ;;  %v9302_v31 = vmul.f32 0.31916776, %v3425_v50 }
 0x268   : > { %7306 = vrcp.f32 %v3608_v32  ;;  %11604 = vst [vmem:[#allocation32_spill] sm:$0xff] %v9300_v58  ;;  %v6427_v54 = vsel %vm3511_vm12, 1.0, %v11603_v62  ;;  %v9306_v18 = vadd.f32 %v9290_v6, %v3390_v20  ;;  %v3613_v14 = vadd.f32 1e-06, %v9288_v15 }
 0x269   : > { %7308 = vrcp.f32 %v3609_v45  ;;  %v9310_v51 = vadd.f32 %v9294_v30, %v3389_v52  ;;  %v3392_v28 = vadd.f32 %v3453_v59, %v3360_v25  ;;  %v3949_v23 = vsub.f32 1.0, %v9179_v1  ;;  %v9328_v59 = vld [vmem:[#allocation3 + $0xa8] sm:$0xff] }
 0x26a   : > { %7310 = vrcp.f32 %v3610_v40  ;;  %11605 = vst [vmem:[#allocation17_spill] sm:$0xff] %v9306_v18  ;;  %v6428_v45 = vsel %vm3512_vm13, 1.0, %v11603_v62  ;;  %v3948_v43 = vsub.f32 1.0, %v9194_v17  ;;  %v3951_v38 = vsub.f32 1.0, %v9191_v57 }
 0x26b   : > { %7312 = vrcp.f32 %v3611_v10  ;;  %11606 = vst [vmem:[#allocation33_spill] sm:$0xff] %v9310_v51  ;;  %vm3514_vm15 = vcmp.gt.f32.partialorder %v9272_v48, 0.0  ;;  %vm3515_vm2 = vcmp.gt.f32.partialorder %v9276_v47, 0.0  ;;  %v3612_v63 = vadd.f32 1e-06, %v9300_v58 }
 0x26c   : > { %v9322_v61 = vadd.f32 %v9302_v31, %v3392_v28  ;;  %v6429_v53 = vsel %vm3513_vm14, 1.0, %v11603_v62  ;;  %v3615_v17 = vadd.f32 1e-06, %v9306_v18  ;;  %v3359_v12 = vmul.f32 0.36166447, %v3422_v49 }
 0x26d   : > { %v3950_v37 = vsub.f32 1.0, %v9205_v16  ;;  %7314 = vrcp.f32 %v3613_v14  ;;  %v3614_v55 = vadd.f32 1e-06, %v9310_v51  ;;  %v3362_v8 = vmul.f32 0.36166447, %v3425_v50  ;;  %v3430_v14 = vld [vmem:[#allocation3 + $0xc0] sm:$0xff] }
 0x26e   : > { %11607 = vst [vmem:[#allocation18_spill] sm:$0xff] %v9322_v61  ;;  %v6430_v40 = vsel %vm3514_vm15, 1.0, %v11603_v62  ;;  %v6431_v29 = vsel %vm3515_vm2, 1.0, %v11603_v62  ;;  %vm3517_vm3 = vcmp.gt.f32.partialorder %v9288_v15, 0.0  ;;  %v9339_v27 = vmul.f32 0.31916776, %v3424_v11 }
 0x26f   : > { %7316 = vrcp.f32 %v3612_v63  ;;  %v3617_v35 = vadd.f32 1e-06, %v9322_v61  ;;  %v3459_v10 = vmul.f32 0.31916776, %v9328_v59  ;;  %vm3516_vm4 = vcmp.gt.f32.partialorder %v9300_v58, 0.0  ;;  %v3439_v15 = vld [vmem:[#allocation3 + $0x108] sm:$0xff] }
 0x270   : > { %vm3519_vm5 = vcmp.gt.f32.partialorder %v9306_v18, 0.0  ;;  %7318 = vrcp.f32 %v3615_v17  ;;  %v3391_v50 = vadd.f32 %v9284_v3, %v3359_v12  ;;  %vm3518_vm6 = vcmp.gt.f32.partialorder %v9310_v51, 0.0  ;;  %v3432_v12 = vld [vmem:[#allocation3 + $0xd0] sm:$0xff] }
 0x271   : > { %7320 = vrcp.f32 %v3614_v55  ;;  %v3394_v25 = vadd.f32 %v9290_v6, %v3362_v8  ;;  %v3361_v20 = vmul.f32 0.36166447, %v3424_v11  ;;  %v6432_v28 = vsel %vm3516_vm4, 1.0, %v11603_v62  ;;  %v3433_v11 = vld [vmem:[#allocation3 + $0xd8] sm:$0xff] }
 0x272   : > { %7322 = vrcp.f32 %v3617_v35  ;;  %vm3521_vm7 = vcmp.gt.f32.partialorder %v9322_v61, 0.0  ;;  %v3367_v35 = vmul.f32 0.36166447, %v3430_v14  ;;  %v9382_v52 = vmul.f32 0.31916776, %v3334_v33 }
 0x273   : > { %v7303_v26 = vpop.eup %7302  ;;  %v9359_v6 = vadd.f32 %v3459_v10, %v3394_v25  ;;  %v11612_v47 = vsub.f32 1.0, %v9211_v22  ;;  %vm354_vm12 = vcmask 254976  }
 0x274   : > { %v7305_v21 = vpop.eup %7304  ;;  %v3670_v56 = vmul.f32 %v7303_v26, %v6426_v44  ;;  %v3333_v26 = vld [vmem:[#allocation3 + $0xb0] sm:$0xff]  ;;  %v3465_v44 = vmul.f32 0.31916776, %v3433_v11  ;;  %364 = vst.msk [vmem:[#allocation4 + $0x58] sm:$0x3] %vm354_vm12, %v11603_v62 }
 0x275   : > { %v7307_v32 = vpop.eup %7306  ;;  %v3671_v2 = vmul.f32 %v7305_v21, %v6427_v54  ;;  %v9353_v21 = vadd.f32 %v9339_v27, %v3391_v50  ;;  %v3431_v54 = vld [vmem:[#allocation3 + $0xc8] sm:$0xff]  ;;  %11609 = vst [vmem:[#allocation36_spill] sm:$0xff] %v9359_v6  ;;  %v3365_v63 = vmul.f32 0.36166447, %v3333_v26  ;;  %v3619_v50 = vadd.f32 1e-06, %v9359_v6 }
 0x276   : > { %3720 = vperm.xlu0 %7230, %v3670_v56   ;;  %v7309_v1 = vpop.eup %7308  ;;  %v3672_v42 = vmul.f32 %v7307_v32, %v6428_v45  ;;  %v6433_v32 = vsel %vm3517_vm3, 1.0, %v11603_v62  ;;  %v9372_v45 = vsel %vm3518_vm6, 1.0, %v11603_v62  ;;  %v3368_v17 = vmul.f32 0.36166447, %v3431_v54  ;;  %355 = vst.msk [vmem:[#allocation4 + $0x10] sm:$0x3] %vm354_vm12, %v11603_v62 }
 0x277   : > { %3725 = vperm.xlu1 %7229, %v3671_v2   ;;  %v3673_v49 = vmul.f32 %v7309_v1, %v6429_v53  ;;  %11608 = vst [vmem:[#allocation35_spill] sm:$0xff] %v9353_v21  ;;  %v7311_v3 = vpop.eup %7310  ;;  %v3366_v2 = vmul.f32 0.36166447, %v3334_v33  ;;  %v3616_v55 = vadd.f32 1e-06, %v9353_v21  ;;  %vm3520_vm8 = vcmp.gt.f32.partialorder %v9353_v21, 0.0 }
 0x278   : > { %v7313_v1 = vpop.eup %7312  ;;  %v3463_v8 = vmul.f32 0.31916776, %v3431_v54  ;;  %v3400_v57 = vadd.f32 %v3368_v17, %v9382_v52  ;;  %vm3523_vm9 = vcmp.gt.f32.partialorder %v9359_v6, 0.0  ;;  %v3369_v17 = vmul.f32 0.36166447, %v3432_v12  ;;  %v3436_v21 = vld [vmem:[#allocation3 + $0xf0] sm:$0xff] }
 0x279   : > { %v3398_v53 = vadd.f32 %v3459_v10, %v3366_v2  ;;  %v3462_v10 = vmul.f32 0.31916776, %v3430_v14  ;;  %v3675_v2 = vmul.f32 %v7313_v1, %v6431_v29  ;;  %7324 = vrcp.f32 %v3616_v55  ;;  %v3434_v14 = vld [vmem:[#allocation3 + $0xe0] sm:$0xff]  ;;  %358 = vst.msk [vmem:[#allocation4 + $0x28] sm:$0x3] %vm354_vm12, %v11603_v62 }
 0x27a   : > { %4076 = vperm.xlu0 %7230, %v3946_v34   ;;  %v9343_v34 = vld [vmem:[#allocation3 + $0xa0] sm:$0xff]  ;;  %v6437_v29 = vsel %vm3521_vm7, 1.0, %v11603_v62  ;;  %7326 = vrcp.f32 %v3619_v50  ;;  %v3466_v61 = vmul.f32 0.31916776, %v3434_v14  ;;  %v3468_v58 = vmul.f32 0.31916776, %v3436_v21 }
 0x27b   : > { %4091 = vperm.xlu1 %7229, %v3949_v23   ;;  %v3458_v56 = vmul.f32 0.31916776, %v9343_v34  ;;  %v9367_v23 = vsel %vm3519_vm5, 1.0, %v11603_v62  ;;  %v9387_v54 = vadd.f32 %v3463_v8, %v3398_v53  ;;  %361 = vst.msk [vmem:[#allocation4 + $0x40] sm:$0x3] %vm354_vm12, %v11603_v62 }
 0x27c   : > { %367 = vst.msk [vmem:[#allocation4 + $0x70] sm:$0x3] %vm354_vm12, %v11603_v62  ;;  %370 = vst.msk [vmem:[#allocation4 + $0x88] sm:$0x3] %vm354_vm12, %v11603_v62 }
 0x27d   : > { %vm3527_vm11 = vcmp.gt.f32.partialorder %v9387_v54, 0.0  ;;  %373 = vst.msk [vmem:[#allocation4 + $0xa0] sm:$0x3] %vm354_vm12, %v11603_v62  ;;  %376 = vst.msk [vmem:[#allocation4 + $0xb8] sm:$0x3] %vm354_vm12, %v11603_v62 }
 0x27e   : > { %3730 = vperm.xlu0 %7230, %v3672_v42   ;;  %v3393_v42 = vadd.f32 %v9294_v30, %v3361_v20  ;;  %v3674_v30 = vmul.f32 %v7311_v3, %v6430_v40  ;;  %v9384_v20 = vmul.f32 0.31916776, %v3333_v26  ;;  %v3370_v40 = vmul.f32 0.36166447, %v3433_v11  ;;  %379 = vst.msk [vmem:[#allocation4 + $0xd0] sm:$0x3] %vm354_vm12, %v11603_v62 }
 0x27f   : > { %3735 = vperm.xlu1 %7229, %v3673_v49   ;;  %v3397_v49 = vadd.f32 %v3458_v56, %v3365_v63  ;;  %v7315_v63 = vpop.eup %7314  ;;  %v9397_v3 = vadd.f32 %v3465_v44, %v3400_v57  ;;  %382 = vst.msk [vmem:[#allocation4 + $0xe8] sm:$0x3] %vm354_vm12, %v11603_v62  ;;  %385 = vst.msk [vmem:[#allocation4 + $0x100] sm:$0x3] %vm354_vm12, %v11603_v62 }
 0x280   : > { %v9380_v25 = vadd.f32 %v3458_v56, %v3393_v42  ;;  %v3399_v33 = vadd.f32 %v3367_v35, %v9384_v20  ;;  %v7317_v1 = vpop.eup %7316  ;;  %v3677_v11 = vmul.f32 %v7315_v63, %v6433_v32  ;;  %v3623_v35 = vadd.f32 1e-06, %v9387_v54  ;;  %388 = vst.msk [vmem:[#allocation4 + $0x118] sm:$0x3] %vm354_vm12, %v11603_v62  ;;  %391 = vst.msk [vmem:[#allocation4 + $0x130] sm:$0x3] %vm354_vm12, %v11603_v62 }
 0x281   : > { %v9390_v56 = vadd.f32 %v3462_v10, %v3397_v49  ;;  %v7319_v55 = vpop.eup %7318  ;;  %v9405_v49 = vsel %vm3520_vm8, 1.0, %v11603_v62  ;;  %v3676_v32 = vmul.f32 %v7317_v1, %v6432_v28  ;;  %v9414_v63 = vsel %vm3523_vm9, 1.0, %v11603_v62  ;;  %v2925_v1 = vld [vmem:[#allocation2 + $0x8] sm:$0xff]  ;;  %394 = vst.msk [vmem:[#allocation4 + $0x148] sm:$0x3] %vm354_vm12, %v11603_v62 }
 0x282   : > { %4086 = vperm.xlu0 %7230, %v3948_v43   ;;  %v3464_v43 = vmul.f32 0.31916776, %v3432_v12  ;;  %v3618_v26 = vadd.f32 1e-06, %v9380_v25  ;;  %v3371_v12 = vmul.f32 0.36166447, %v3434_v14  ;;  %v3679_v16 = vmul.f32 %v7319_v55, %v9367_v23 }
 0x283   : > { %4101 = vperm.xlu1 %7229, %v3951_v38   ;;  %v3435_v38 = vld [vmem:[#allocation3 + $0xe8] sm:$0xff]  ;;  %v3622_v57 = vadd.f32 1e-06, %v9390_v56  ;;  %v3105_v23 = vld [vmem:[#allocation2 + $0xa] sm:$0xff]  ;;  %v2996_v55 = vld [vmem:[#allocation2 + $0x1] sm:$0xff]  ;;  %vm3522_vm10 = vcmp.gt.f32.partialorder %v9380_v25, 0.0 }
 0x284   : > { %v9400_v42 = vadd.f32 %v3464_v43, %v3399_v33  ;;  %v3467_v53 = vmul.f32 0.31916776, %v3435_v38  ;;  %v3372_v50 = vmul.f32 0.36166447, %v3435_v38  ;;  %v3402_v33 = vadd.f32 %v3463_v8, %v3370_v40  ;;  %397 = vst.msk [vmem:[#allocation4 + $0x160] sm:$0x3] %vm354_vm12, %v11603_v62 }
 0x285   : > { %7328 = vrcp.f32 %v3618_v26  ;;  %v3625_v38 = vadd.f32 1e-06, %v9397_v3  ;;  %v3401_v8 = vadd.f32 %v3462_v10, %v3369_v17  ;;  %v3403_v6 = vadd.f32 %v3464_v43, %v3371_v12  ;;  %400 = vst.msk [vmem:[#allocation4 + $0x178] sm:$0x3] %vm354_vm12, %v11603_v62  ;;  %403 = vst.msk [vmem:[#allocation4 + $0x190] sm:$0x3] %vm354_vm12, %v11603_v62 }
 0x286   : > { %3740 = vperm.xlu0 %7230, %v3674_v30   ;;  %v3437_v30 = vld [vmem:[#allocation3 + $0xf8] sm:$0xff]  ;;  %v9419_v18 = vadd.f32 %v3467_v53, %v3402_v33  ;;  %7330 = vrcp.f32 %v3623_v35  ;;  %v3404_v28 = vadd.f32 %v3465_v44, %v3372_v50  ;;  %v11610_v33 = vsub.f32 1.0, %v9216_v9  ;;  %v3438_v44 = vld [vmem:[#allocation3 + $0x100] sm:$0xff]  ;;  %406 = vst.msk [vmem:[#allocation4 + $0x1a8] sm:$0x3] %vm354_vm12, %v11603_v62 }
 0x287   : > { %3745 = vperm.xlu1 %7229, %v3675_v2   ;;  %v7321_v2 = vpop.eup %7320  ;;  %v3469_v14 = vmul.f32 0.31916776, %v3437_v30  ;;  %7332 = vrcp.f32 %v3622_v57  ;;  %v9422_v26 = vadd.f32 %v3466_v61, %v3401_v8  ;;  %v3373_v17 = vmul.f32 0.36166447, %v3436_v21  ;;  %v3104_v35 = vld [vmem:[#allocation2 + $0x2] sm:$0xff] }
 0x288   : > { %v7323_v51 = vpop.eup %7322  ;;  %v3678_v40 = vmul.f32 %v7321_v2, %v9372_v45  ;;  %7334 = vrcp.f32 %v3625_v38  ;;  %v3374_v45 = vmul.f32 0.36166447, %v3437_v30  ;;  %v3627_v50 = vadd.f32 1e-06, %v9419_v18 }
 0x289   : > { %v3681_v10 = vmul.f32 %v7323_v51, %v6437_v29  ;;  %v2961_v2 = vmul.f32 0.31916776, %v2925_v1  ;;  %v3471_v43 = vmul.f32 0.31916776, %v3439_v15  ;;  %v3376_v12 = vmul.f32 0.36166447, %v3439_v15  ;;  %v7325_v30 = vpop.eup %7324 }
 0x28a   : > { %4096 = vperm.xlu0 %7230, %v3950_v37   ;;  %v3624_v37 = vadd.f32 1e-06, %v9400_v42  ;;  %v3141_v8 = vmul.f32 0.31916776, %v3105_v23  ;;  %v3626_v9 = vadd.f32 1e-06, %v9422_v26  ;;  %v9432_v51 = vadd.f32 %v3468_v58, %v3403_v6 }
 0x28b   : > { %3755 = vperm.xlu1 %7229, %v3677_v11   ;;  %v2997_v11 = vld [vmem:[#allocation2 + $0x9] sm:$0xff]  ;;  %v3032_v29 = vmul.f32 0.36166447, %v2996_v55  ;;  %v3406_v38 = vadd.f32 %v3467_v53, %v3374_v45  ;;  %v3470_v1 = vmul.f32 0.31916776, %v3438_v44  ;;  %v3408_v6 = vadd.f32 %v3469_v14, %v3376_v12 }
 0x28c   : > { %7336 = vrcp.f32 %v3624_v37  ;;  %v3033_v57 = vmul.f32 0.36166447, %v2997_v11  ;;  %11613 = vst [vmem:[#allocation34_spill] sm:$0xff] %v9432_v51  ;;  %v3405_v37 = vadd.f32 %v3466_v61, %v3373_v17  ;;  %v3140_v11 = vmul.f32 0.31916776, %v3104_v35  ;;  %v9439_v55 = vld [vmem:[#allocation3 + $0x18] sm:$0xff] }
 0x28d   : > { %7338 = vrcp.f32 %v3627_v50  ;;  %v3068_v23 = vadd.f32 %v3032_v29, %v9280_v60  ;;  %v3680_v61 = vmul.f32 %v7325_v30, %v9405_v49  ;;  %v3283_v49 = vmul.f32 0.31916776, %v9439_v55 }
 0x28e   : > { %3750 = vperm.xlu0 %7230, %v3676_v32   ;;  %v9427_v32 = vadd.f32 %v3469_v14, %v3404_v28  ;;  %v3069_v21 = vadd.f32 %v3033_v57, %v2961_v2  ;;  %v7327_v28 = vpop.eup %7326  ;;  %v3364_v2 = vmul.f32 0.36166447, %v9328_v59  ;;  %7340 = vrcp.f32 %v3626_v9 }
 0x28f   : > { %4111 = vperm.xlu1 %7229, %v11610_v33   ;;  %v3375_v33 = vmul.f32 0.36166447, %v3438_v44  ;;  %v3176_v53 = vadd.f32 %v3140_v11, %v3068_v23  ;;  %v3683_v60 = vmul.f32 %v7327_v28, %v9414_v63  ;;  %v9447_v14 = vadd.f32 %v3470_v1, %v3405_v37  ;;  %v9457_v44 = vld [vmem:[#allocation3 + $0x10] sm:$0xff] }
 0x290   : > { %11611 = vst [vmem:[#allocation19_spill] sm:$0xff] %v9427_v32  ;;  %v3177_v15 = vadd.f32 %v3141_v8, %v3069_v21  ;;  %v3629_v22 = vadd.f32 1e-06, %v9427_v32  ;;  %v3396_v63 = vadd.f32 %v9302_v31, %v3364_v2  ;;  %v6443_v31 = vsel %vm3527_vm11, 1.0, %v11603_v62 }
 0x291   : > { %11615 = vst [vmem:[#allocation39_spill] sm:$0xff] %v9447_v14  ;;  %v3407_v45 = vadd.f32 %v3468_v58, %v3375_v33  ;;  %3212 = vst.msk [vmem:[#allocation3] sm:$0xff] %vm407_vm1, %v3176_v53  ;;  %v6438_v58 = vsel %vm3522_vm10, 1.0, %v11603_v62  ;;  %vm3529_vm13 = vcmp.gt.f32.partialorder %v9397_v3, 0.0  ;;  %v3630_v57 = vadd.f32 1e-06, %v9447_v14 }
 0x292   : > { %4106 = vperm.xlu0 %7230, %v11612_v47   ;;  %v9436_v47 = vadd.f32 %v3471_v43, %v3406_v38  ;;  %3213 = vst.msk [vmem:[#allocation3 + $0x8] sm:$0xff] %vm407_vm1, %v3177_v15  ;;  %v7329_v59 = vpop.eup %7328  ;;  %7342 = vrcp.f32 %v3629_v22  ;;  %vm3526_vm1 = vcmp.gt.f32.partialorder %v9390_v56, 0.0  ;;  %v3282_v21 = vmul.f32 0.31916776, %v9457_v44 }
 0x293   : > { %3765 = vperm.xlu1 %7229, %v3679_v16   ;;  %v3628_v16 = vadd.f32 1e-06, %v9432_v51  ;;  %v3682_v50 = vmul.f32 %v7329_v59, %v6438_v58  ;;  %v9506_v12 = vadd.f32 %v9274_v24, %v3407_v45  ;;  %v9512_v38 = vadd.f32 %v3396_v63, %v9382_v52 }
 0x294   : > { %11614 = vst [vmem:[#allocation37_spill] sm:$0xff] %v9436_v47  ;;  %v3631_v17 = vadd.f32 1e-06, %v9436_v47  ;;  %v6442_v37 = vsel %vm3526_vm1, 1.0, %v11603_v62  ;;  %v6445_v24 = vsel %vm3529_vm13, 1.0, %v11603_v62  ;;  %vm3528_vm14 = vcmp.gt.f32.partialorder %v9400_v42, 0.0 }
 0x295   : > { %7344 = vrcp.f32 %v3628_v16  ;;  %11617 = vst [vmem:[#allocation20_spill] sm:$0xff] %v9506_v12  ;;  %11618 = vst [vmem:[#allocation38_spill] sm:$0xff] %v9512_v38  ;;  %vm3531_vm15 = vcmp.gt.f32.partialorder %v9419_v18, 0.0  ;;  %v3632_v11 = vadd.f32 1e-06, %v9506_v12  ;;  %v6444_v22 = vsel %vm3528_vm14, 1.0, %v11603_v62 }
 0x296   : > { %3760 = vperm.xlu0 %7230, %v3678_v40   ;;  %v3363_v40 = vmul.f32 0.36166447, %v9343_v34  ;;  %v3348_v34 = vmul.f32 0.36166447, %v9249_v4  ;;  %7346 = vrcp.f32 %v3631_v17  ;;  %vm3530_vm2 = vcmp.gt.f32.partialorder %v9422_v26, 0.0 }
 0x297   : > { %3775 = vperm.xlu1 %7229, %v3681_v10   ;;  %v9454_v10 = vadd.f32 %v9278_v5, %v3408_v6  ;;  %v7331_v5 = vpop.eup %7330  ;;  %7348 = vrcp.f32 %v3630_v57  ;;  %vm3533_vm3 = vcmp.gt.f32.partialorder %v9427_v32, 0.0  ;;  %v3346_v45 = vmul.f32 0.36166447, %v9439_v55 }
 0x298   : > { %v7333_v35 = vpop.eup %7332  ;;  %v3395_v8 = vadd.f32 %v9339_v27, %v3363_v40  ;;  %v3380_v9 = vadd.f32 %v3348_v34, %v3283_v49  ;;  %v3687_v30 = vmul.f32 %v7331_v5, %v6443_v31  ;;  %v3347_v27 = vmul.f32 0.36166447, %v9246_v13  ;;  %v3248_v40 = vld [vmem:[#allocation3] sm:$0xff] }
 0x299   : > { %11616 = vst [vmem:[#allocation21_spill] sm:$0xff] %v9454_v10  ;;  %v7335_v43 = vpop.eup %7334  ;;  %v3633_v4 = vadd.f32 1e-06, %v9454_v10  ;;  %v3686_v1 = vmul.f32 %v7333_v35, %v6442_v37  ;;  %v3621_v13 = vadd.f32 1e-06, %v9512_v38  ;;  %v3249_v6 = vld [vmem:[#allocation3 + $0x8] sm:$0xff] }
 0x29a   : > { %3770 = vperm.xlu0 %7230, %v3680_v61   ;;  %v7337_v29 = vpop.eup %7336  ;;  %v9523_v52 = vadd.f32 %v3395_v8, %v9384_v20  ;;  %v9526_v28 = vadd.f32 %v3380_v9, %v9255_v39  ;;  %v3379_v33 = vadd.f32 %v3347_v27, %v3282_v21  ;;  %v3689_v23 = vmul.f32 %v7335_v43, %v6445_v24  ;;  %v3410_v8 = vld [vmem:[#allocation3 + $0x20] sm:$0xff] }
 0x29b   : > { %3785 = vperm.xlu1 %7229, %v3683_v60   ;;  %v7339_v15 = vpop.eup %7338  ;;  %7350 = vrcp.f32 %v3633_v4  ;;  %v3688_v2 = vmul.f32 %v7337_v29, %v6444_v22  ;;  %v6447_v61 = vsel %vm3531_vm15, 1.0, %v11603_v62  ;;  %v3281_v59 = vmul.f32 0.31916776, %v3249_v6 }
 0x29c   : > { %11619 = vst [vmem:[#allocation10_spill] sm:$0xff] %v9523_v52  ;;  %11620 = vst [vmem:[#allocation22_spill] sm:$0xff] %v9526_v28  ;;  %v7341_v39 = vpop.eup %7340  ;;  %7352 = vrcp.f32 %v3632_v11  ;;  %v3620_v20 = vadd.f32 1e-06, %v9523_v52  ;;  %v3605_v53 = vadd.f32 1e-06, %v9526_v28  ;;  %v9536_v60 = vadd.f32 %v3379_v33, %v9242_v36 }
 0x29d   : > { %v3691_v16 = vmul.f32 %v7339_v15, %v6447_v61  ;;  %7354 = vrcp.f32 %v3621_v13  ;;  %v6446_v17 = vsel %vm3530_vm2, 1.0, %v11603_v62  ;;  %v6449_v5 = vsel %vm3533_vm3, 1.0, %v11603_v62 }
 0x29e   : > { %3780 = vperm.xlu0 %7230, %v3682_v50   ;;  %11621 = vst [vmem:[#allocation11_spill] sm:$0xff] %v9536_v60  ;;  %v3690_v63 = vmul.f32 %v7341_v39, %v6446_v17  ;;  %vm3532_vm4 = vcmp.gt.f32.partialorder %v9432_v51, 0.0  ;;  %vm3535_vm5 = vcmp.gt.f32.partialorder %v9436_v47, 0.0  ;;  %7356 = vrcp.f32 %v3620_v20  ;;  %v3909_v17 = vld [vmem:[#allocation2 + $0xf9] sm:$0xff] }
 0x29f   : > { %3805 = vperm.xlu1 %7229, %v3687_v30   ;;  %v7343_v49 = vpop.eup %7342  ;;  %v3604_v58 = vadd.f32 1e-06, %v9536_v60  ;;  %v3280_v55 = vmul.f32 0.31916776, %v3248_v40  ;;  %v3345_v31 = vmul.f32 0.36166447, %v9457_v44  ;;  %7358 = vrcp.f32 %v3605_v53 }
 0x2a0   : > { %v3693_v34 = vmul.f32 %v7343_v49, %v6449_v5  ;;  %v3378_v35 = vadd.f32 %v3346_v45, %v3281_v59  ;;  %v6448_v57 = vsel %vm3532_vm4, 1.0, %v11603_v62  ;;  %v6451_v43 = vsel %vm3535_vm5, 1.0, %v11603_v62  ;;  %v9569_v49 = vpop.permute.xlu1 %3981 }
 0x2a1   : > { %vm3534_vm6 = vcmp.gt.f32.partialorder %v9447_v14, 0.0  ;;  %7360 = vrcp.f32 %v3604_v58  ;;  %v3377_v29 = vadd.f32 %v3345_v31, %v3280_v55  ;;  %vm3537_vm7 = vcmp.gt.f32.partialorder %v9454_v10, 0.0  ;;  %v3908_v58 = vld [vmem:[#allocation2 + $0xf1] sm:$0xff]  ;;  %v3893_v55 = vld [vmem:[#allocation2 + $0x39] sm:$0xff]  ;;  %v9572_v31 = vpop.permute.xlu0 %3976 }
 0x2a2   : > { %3800 = vperm.xlu0 %7230, %v3686_v1   ;;  %v7345_v36 = vpop.eup %7344  ;;  %v9552_v44 = vadd.f32 %v3378_v35, %v9253_v7  ;;  %v3442_v37 = vmul.f32 0.31916776, %v3410_v8  ;;  %v6450_v24 = vsel %vm3534_vm6, 1.0, %v11603_v62  ;;  %v6453_v1 = vsel %vm3537_vm7, 1.0, %v11603_v62 }
 0x2a3   : > { %3815 = vperm.xlu1 %7229, %v3689_v23   ;;  %v7347_v50 = vpop.eup %7346  ;;  %v3692_v21 = vmul.f32 %v7345_v36, %v6448_v57  ;;  %vm3536_vm8 = vcmp.gt.f32.partialorder %v9506_v12, 0.0  ;;  %vm3525_vm9 = vcmp.gt.f32.partialorder %v9512_v38, 0.0  ;;  %vm3524_vm10 = vcmp.gt.f32.partialorder %v9523_v52, 0.0  ;;  %v3892_v57 = vld [vmem:[#allocation2 + $0x31] sm:$0xff] }
 0x2a4   : > { %v7349_v9 = vpop.eup %7348  ;;  %v3695_v30 = vmul.f32 %v7347_v50, %v6451_v43  ;;  %11622 = vst [vmem:[#allocation25_spill] sm:$0xff] %v9552_v44  ;;  %v9557_v11 = vadd.f32 %v3442_v37, %v3377_v29  ;;  %v3603_v7 = vadd.f32 1e-06, %v9552_v44  ;;  %v6452_v13 = vsel %vm3536_vm8, 1.0, %v11603_v62  ;;  %v3891_v37 = vld [vmem:[#allocation2 + $0x21] sm:$0xff] }
 0x2a5   : > { %v3694_v27 = vmul.f32 %v7349_v9, %v6450_v24  ;;  %v6441_v6 = vsel %vm3525_vm9, 1.0, %v11603_v62  ;;  %vm3509_vm11 = vcmp.gt.f32.partialorder %v9526_v28, 0.0  ;;  %v6440_v53 = vsel %vm3524_vm10, 1.0, %v11603_v62  ;;  %v9579_v29 = vpop.permute.xlu0 %3986 }
 0x2a6   : > { %3810 = vperm.xlu0 %7230, %v3688_v2   ;;  %11623 = vst [vmem:[#allocation13_spill] sm:$0xff] %v9557_v11  ;;  %v3602_v2 = vadd.f32 1e-06, %v9557_v11  ;;  %7362 = vrcp.f32 %v3603_v7  ;;  %v6425_v59 = vsel %vm3509_vm11, 1.0, %v11603_v62  ;;  %vm3508_vm12 = vcmp.gt.f32.partialorder %v9536_v60, 0.0 }
 0x2a7   : > { %3825 = vperm.xlu1 %7229, %v3691_v16   ;;  %v3941_v36 = vsub.f32 1.0, %v3909_v17  ;;  %v3940_v35 = vsub.f32 1.0, %v3908_v58  ;;  %v3925_v50 = vsub.f32 1.0, %v3893_v55  ;;  %vm3507_vm1 = vcmp.gt.f32.partialorder %v9552_v44, 0.0 }
 0x2a8   : > { %v7351_v4 = vpop.eup %7350  ;;  %7364 = vrcp.f32 %v3602_v2  ;;  %v3924_v8 = vsub.f32 1.0, %v3892_v57  ;;  %v6423_v9 = vsel %vm3507_vm1, 1.0, %v11603_v62  ;;  %vm3506_vm13 = vcmp.gt.f32.partialorder %v9557_v11, 0.0  ;;  %v5154_v2 = vld [vmem:[%s343_s8] sm:$0xff] }
 0x2a9   : > { %v7353_v33 = vpop.eup %7352  ;;  %v3697_v15 = vmul.f32 %v7351_v4, %v6453_v1  ;;  %v6422_v24 = vsel %vm3506_vm13, 1.0, %v11603_v62  ;;  %v3923_v1 = vsub.f32 1.0, %v3891_v37 }
 0x2aa   : > { %3820 = vperm.xlu0 %7230, %v3690_v63   ;;  %v7355_v23 = vpop.eup %7354  ;;  %v3696_v22 = vmul.f32 %v7353_v33, %v6452_v13  ;;  %v6424_v63 = vsel %vm3508_vm12, 1.0, %v11603_v62  ;;  %v3890_v33 = vld [vmem:[#allocation2 + $0x19] sm:$0xff] }
 0x2ab   : > { %3835 = vperm.xlu1 %7229, %v3693_v34   ;;  %v7357_v61 = vpop.eup %7356  ;;  %v3685_v39 = vmul.f32 %v7355_v23, %v6441_v6  ;;  %v9574_v34 = vpop.permute.xlu1 %3991  ;;  %v3922_v23 = vsub.f32 1.0, %v3890_v33  ;;  %v5153_v13 = vld [vmem:[%s339_s27] sm:$0xff]  ;;  %s6457_s27 = sshll.u32 %s7467_s24, 7  ;;  %s7403_s24 = sshll.u32 %s7483_s15, 4  ;;  %s7404_s24 = int_to_ptr.vmem [resolvable:$false] %s7403_s24 }
 0x2ac   : > { %v7359_v20 = vpop.eup %7358  ;;  %v3684_v16 = vmul.f32 %v7357_v61, %v6440_v53  ;;  %v7480_v61 = vmov 0   ;;  %v7481_v53 = vmov 2   ;;  %s6117_s12 = scalar_lea.hbm %s11265_s6, %s6457_s27  ;;  %s7405_s16 = scalar_lea.vmem %s7404_s24, 256 }
 0x2ad   : > { %v3669_v40 = vmul.f32 %v7359_v20, %v6425_v59  ;;  %p7406_p1 = scmp.lt.s32.totalorder %s6120_s30, %s7404_s24  ;;  %p7407_p2 = scmp.lt.s32.totalorder %s7405_s16, %s7399_s14 }
 0x2ae   : > { %3830 = vperm.xlu0 %7230, %v3692_v21   ;;  %v7361_v45 = vpop.eup %7360 }
 0x2af   : > { %3845 = vperm.xlu1 %7229, %v3695_v30   ;;  %v3668_v5 = vmul.f32 %v7361_v45, %v6424_v63  ;;  %v9581_v4 = vpop.permute.xlu1 %4001  ;;  %p7408_p3 = por %p7407_p2, %p7406_p1 }
 0x2b1   : > { %p7409_p5 = pnand %p7408_p3, %p7402_p0 }
 0x2b2   : > { %3840 = vperm.xlu0 %7230, %v3694_v27  }
 0x2b3   : > { %3855 = vperm.xlu1 %7229, %v3697_v15   ;;  %v7363_v43 = vpop.eup %7362  ;;  %v9588_v15 = vpop.permute.xlu0 %3996 }
 0x2b4   : > { %v3667_v30 = vmul.f32 %v7363_v43, %v6423_v9  ;;  %v9590_v7 = vpop.permute.xlu1 %4011 }
 0x2b5   : > { %v7365_v21 = vpop.eup %7364 }
 0x2b6   : > { %3850 = vperm.xlu0 %7230, %v3696_v22   ;;  %v3666_v27 = vmul.f32 %v7365_v21, %v6422_v24  ;;  %v7479_v22 = vmov 1   ;;  %v7366_v21 = vld [vmem:[#allocation2 + $0x49] sm:$0xff]  ;;  %v7367_v24 = vld [vmem:[#allocation2 + $0x51] sm:$0xff] }
 0x2b7   : > { %3795 = vperm.xlu1 %7229, %v3685_v39   ;;  %v9596_v62 = vpop.permute.xlu0 %4006 }
 0x2b8   : > { %v9598_v6 = vpop.permute.xlu1 %4021 }
 0x2ba   : > { %3790 = vperm.xlu0 %7230, %v3684_v16   ;;  %v7482_v16 = vmov 3  }
 0x2bb   : > { %3715 = vperm.xlu1 %7229, %v3669_v40   ;;  %v9600_v39 = vpop.permute.xlu0 %4016 }
 0x2bc   : > { %v9602_v20 = vpop.permute.xlu1 %4031 }
 0x2be   : > { %3710 = vperm.xlu0 %7230, %v3668_v5  }
 0x2bf   : > { %4051 = vperm.xlu1 %7229, %v3941_v36   ;;  %v9604_v59 = vpop.permute.xlu0 %4026 }
 0x2c0   : > { %v9606_v45 = vpop.permute.xlu1 %4041 }
 0x2c2   : > { %4046 = vperm.xlu0 %7230, %v3940_v35  }
 0x2c3   : > { %3971 = vperm.xlu1 %7229, %v3925_v50   ;;  %v9610_v17 = vpop.permute.xlu0 %4036 }
 0x2c4   : > { %v9608_v40 = vpop.permute.xlu1 %4061 }
 0x2c6   : > { %3966 = vperm.xlu0 %7230, %v3924_v8  }
 0x2c7   : > { %3705 = vperm.xlu1 %7229, %v3667_v30   ;;  %v9612_v63 = vpop.permute.xlu0 %4056 }
 0x2c8   : > { %v9614_v5 = vpop.permute.xlu1 %4071 }
 0x2ca   : > { %3700 = vperm.xlu0 %7230, %v3666_v27  }
 0x2cb   : > { %3961 = vperm.xlu1 %7229, %v3923_v1   ;;  %v9616_v36 = vpop.permute.xlu0 %4066  ;;  %v11626_v1 = vld [vmem:[#allocation9_spill] sm:$0xff] }
 0x2cc   : > { %v9618_v58 = vpop.permute.xlu1 %4081  ;;  %v4247_v33 = vsub.s32 0, %v11626_v1 }
 0x2ce   : > { %3956 = vperm.xlu0 %7230, %v3922_v23   ;;  %v4315_v23 = vsub.s32 1, %v11626_v1 }
 0x2cf   : > { %7232 = vset.pattern.permute.xlu1 %v7479_v22 }
 0x2d0   : > { %5171 = vperm.xlu1 %7232, %v5153_v13  }
 0x2d2   : > { %7231 = vset.pattern.permute.xlu0 %v7480_v61 }
 0x2d3   : > { %5159 = vperm.xlu0 %7231, %v5153_v13  }
 0x2d4   : > { %7233 = vset.pattern.permute.xlu1 %v7480_v61 }
 0x2d5   : > { %5165 = vperm.xlu1 %7233, %v5154_v2  }
 0x2d7   : > { %7234 = vset.pattern.permute.xlu0 %v7479_v22 }
 0x2d8   : > { %5176 = vperm.xlu0 %7234, %v5154_v2  }
 0x2d9   : > { %7235 = vset.pattern.permute.xlu1 %v7481_v53  ;;  %v4415_v53 = vsub.s32 2, %v11626_v1 }
 0x2da   : > { %5184 = vperm.xlu1 %7235, %v5153_v13  }
 0x2dc   : > { %7236 = vset.pattern.permute.xlu0 %v7482_v16 }
 0x2dd   : > { %5197 = vperm.xlu0 %7236, %v5153_v13   ;;  %v4515_v13 = vsub.s32 3, %v11626_v1 }
 0x2de   : > { %5189 = vperm.xlu1 %7235, %v5154_v2  }
 0x2e2   : > { %7237 = vset.pattern.permute.xlu1 %v7482_v16 }
 0x2e3   : > { %5202 = vperm.xlu1 %7237, %v5154_v2  }
 0x2f1   : > { %v3721_v55 = vpop.permute.xlu0 %3720 }
 0x2f2   : > { %v3862_v35 = vmul.f32 %v3721_v55, %v9262_v0  ;;  %v3726_v50 = vpop.permute.xlu1 %3725  ;;  %v4211_v0 = vld [vmem:[%s11263_s4] sm:$0xff]  ;;  %v4615_v55 = vsub.s32 4, %v11626_v1 }
 0x2f3   : > { %v3863_v57 = vmul.f32 %v3726_v50, %v9264_v19  ;;  %v9638_v2 = vrot.slane %v4211_v0, %v4247_v33  ;;  %v9640_v61 = vrot.slane %v4211_v0, %v4315_v23  ;;  %v4916_v50 = vsub.s32 7, %v11626_v1 }
 0x2f4   : > { %v4118_v43 = vmul.f32 %v9572_v31, %v3862_v35  ;;  %v4816_v35 = vsub.s32 6, %v11626_v1 }
 0x2f5   : > { %v4119_v8 = vmul.f32 %v9569_v49, %v3863_v57  ;;  %v9624_v9 = vpop.permute.xlu0 %4076  ;;  %11627 = vst [vmem:[#allocation27_spill] sm:$0xff] %v9638_v2 }
 0x2f6   : > { %11624 = vst [vmem:[#allocation14_spill] sm:$0xff] %v9624_v9  ;;  %v4150_v30 = vadd.f32 %v7366_v21, %v4118_v43  ;;  %v9626_v37 = vpop.permute.xlu1 %4091  ;;  %v7368_v43 = vld [vmem:[#allocation2 + $0x61] sm:$0xff] }
 0x2f7   : > { %11625 = vst [vmem:[#allocation12_spill] sm:$0xff] %v9626_v37  ;;  %v4151_v27 = vadd.f32 %v7367_v24, %v4119_v8  ;;  %v4715_v24 = vsub.s32 5, %v11626_v1  ;;  %v11651_v37 = vld [vmem:[#allocation17_spill] sm:$0xff] }
 0x2f8   : > { %4183 = vst.msk [vmem:[#allocation4 + $0x49] sm:$0xff] %vm351_vm0, %v4150_v30 }
 0x2f9   : > { %4184 = vst.msk [vmem:[#allocation4 + $0x51] sm:$0xff] %vm351_vm0, %v4151_v27  ;;  %v3731_v19 = vpop.permute.xlu0 %3730  ;;  %v7369_v27 = vld [vmem:[#allocation2 + $0x69] sm:$0xff]  ;;  %v9669_v44 = vrot.slane %v4211_v0, %v4715_v24 }
 0x2fa   : > { %v3864_v49 = vmul.f32 %v3731_v19, %v9258_v46  ;;  %v3736_v31 = vpop.permute.xlu1 %3735  ;;  %v9655_v19 = vrot.slane %v4211_v0, %v4415_v53 }
 0x2fb   : > { %v3865_v22 = vmul.f32 %v3736_v31, %v9266_v41  ;;  %v9658_v31 = vrot.slane %v4211_v0, %v4515_v13 }
 0x2fc   : > { %v4120_v16 = vmul.f32 %v9579_v29, %v3864_v49 }
 0x2fd   : > { %v4121_v46 = vmul.f32 %v9574_v34, %v3865_v22  ;;  %v9648_v57 = vpop.permute.xlu0 %4086  ;;  %11630 = vst [vmem:[#allocation24_spill] sm:$0xff] %v9658_v31  ;;  %v9660_v22 = vrot.slane %v4211_v0, %v4615_v55 }
 0x2fe   : > { %11628 = vst [vmem:[#allocation23_spill] sm:$0xff] %v9648_v57  ;;  %v4152_v41 = vadd.f32 %v7368_v43, %v4120_v16  ;;  %v9650_v8 = vpop.permute.xlu1 %4101  ;;  %v9662_v16 = vrot.slane %v4211_v0, %v4816_v35  ;;  %v9664_v43 = vrot.slane %v4211_v0, %v4916_v50 }
 0x2ff   : > { %11629 = vst [vmem:[#allocation26_spill] sm:$0xff] %v9650_v8  ;;  %v4219_v21 = vld [vmem:[#allocation4 + $0x48] sm:$0xff]  ;;  %v4153_v29 = vadd.f32 %v7369_v27, %v4121_v46 }
 0x300   : > { %v4287_v30 = vld [vmem:[#allocation4 + $0x49] sm:$0xff]  ;;  %v4255_v33 = vmul.f32 %v9638_v2, %v4219_v21  ;;  %v4288_v34 = vld [vmem:[#allocation4 + $0x51] sm:$0xff]  ;;  %4185 = vst.msk [vmem:[#allocation4 + $0x61] sm:$0xff] %vm351_vm0, %v4152_v41  ;;  %v9673_v35 = vmul.f32 %v9658_v31, %v4219_v21 }
 0x301   : > { %v4323_v23 = vmul.f32 %v9640_v61, %v4287_v30  ;;  %v4220_v49 = vld [vmem:[#allocation4 + $0x50] sm:$0xff]  ;;  %4186 = vst.msk [vmem:[#allocation4 + $0x69] sm:$0xff] %vm351_vm0, %v4153_v29  ;;  %v3741_v46 = vpop.permute.xlu0 %3740  ;;  %v4324_v53 = vmul.f32 %v9640_v61, %v4288_v34  ;;  %v9676_v50 = vmul.f32 %v9660_v22, %v4287_v30  ;;  %v9679_v29 = vmul.f32 %v9662_v16, %v4219_v21 }
 0x302   : > { %v4387_v1 = vld [vmem:[#allocation4 + $0x4a] sm:$0xff]  ;;  %v4256_v27 = vmul.f32 %v9638_v2, %v4220_v49  ;;  %v3746_v11 = vpop.permute.xlu1 %3745  ;;  %v4388_v41 = vld [vmem:[#allocation4 + $0x52] sm:$0xff]  ;;  %11631 = vst [vmem:[#allocation15_spill] sm:$0xff] %v9673_v35  ;;  %v9682_v60 = vmul.f32 %v9664_v43, %v4287_v30  ;;  %v9695_v21 = vmul.f32 %v9658_v31, %v4220_v49  ;;  %v9698_v30 = vmul.f32 %v9660_v22, %v4288_v34 }
 0x303   : > { %v4355_v13 = vadd.f32 %v4323_v23, %v4255_v33  ;;  %v4423_v55 = vmul.f32 %v9655_v19, %v4387_v1  ;;  %11632 = vst [vmem:[#allocation43_spill] sm:$0xff] %v9676_v50  ;;  %11633 = vst [vmem:[#allocation29_spill] sm:$0xff] %v9679_v29  ;;  %v4424_v24 = vmul.f32 %v9655_v19, %v4388_v41  ;;  %v11636_v23 = vld [vmem:[#allocation16_spill] sm:$0xff] }
 0x304   : > { %11634 = vst [vmem:[#allocation42_spill] sm:$0xff] %v9682_v60  ;;  %v4356_v0 = vadd.f32 %v4324_v53, %v4256_v27  ;;  %v3866_v33 = vmul.f32 %v3741_v46, %v9272_v48  ;;  %v3867_v52 = vmul.f32 %v3746_v11, %v11636_v23  ;;  %v9692_v50 = vld [vmem:[%s11263_s4 + $0x8] ss:$0 sm:$0xff]  ;;  %11637 = vst [vmem:[#allocation41_spill] sm:$0xff] %v9695_v21 }
 0x305   : > { %v9684_v28 = vpop.permute.xlu0 %4096  ;;  %11638 = vst [vmem:[#allocation30_spill] sm:$0xff] %v9698_v30  ;;  %v9701_v27 = vmul.f32 %v9669_v44, %v4387_v1  ;;  %v9704_v53 = vmul.f32 %v9669_v44, %v4388_v41  ;;  %v4455_v46 = vadd.f32 %v4423_v55, %v4355_v13  ;;  %v9714_v30 = vmul.f32 %v9662_v16, %v4220_v49 }
 0x306   : > { %11635 = vst [vmem:[#allocation28_spill] sm:$0xff] %v9684_v28  ;;  %v3756_v38 = vpop.permute.xlu1 %3755  ;;  %v4456_v28 = vadd.f32 %v4424_v24, %v4356_v0  ;;  %v9724_v8 = vmul.f32 %v9692_v50, %v4387_v1  ;;  %v4122_v49 = vmul.f32 %v9588_v15, %v3866_v33  ;;  %v11646_v24 = vld [vmem:[#allocation31_spill] sm:$0xff] }
 0x307   : > { %11639 = vst [vmem:[#allocation40_spill] sm:$0xff] %v9701_v27  ;;  %11640 = vst [vmem:[#allocation9_spill] sm:$0xff] %v9704_v53  ;;  %v4221_v48 = vld [vmem:[#allocation4 + $0x60] sm:$0xff]  ;;  %v9717_v27 = vmul.f32 %v9664_v43, %v4288_v34  ;;  %v4123_v34 = vmul.f32 %v9581_v4, %v3867_v52  ;;  %v3869_v1 = vmul.f32 %v3756_v38, %v11646_v24  ;;  %v4214_v24 = vld [vmem:[#allocation4 + $0x8] sm:$0xff] }
 0x308   : > { %v4289_v11 = vld [vmem:[#allocation4 + $0x61] sm:$0xff]  ;;  %v4257_v23 = vmul.f32 %v9638_v2, %v4221_v48  ;;  %v4523_v29 = vmul.f32 %v9658_v31, %v4221_v48  ;;  %v9711_v21 = vld [vmem:[#allocation4 + $0x69] sm:$0xff]  ;;  %11641 = vst [vmem:[#allocation16_spill] sm:$0xff] %v9714_v30  ;;  %11643 = vst [vmem:[#allocation45_spill] sm:$0xff] %v9724_v8  ;;  %v9735_v30 = vmul.f32 %v9692_v50, %v4388_v41 }
 0x309   : > { %v4325_v60 = vmul.f32 %v9640_v61, %v4289_v11  ;;  %v9709_v35 = vld [vmem:[#allocation4 + $0x68] sm:$0xff]  ;;  %11642 = vst [vmem:[#allocation44_spill] sm:$0xff] %v9717_v27  ;;  %v4326_v13 = vmul.f32 %v9640_v61, %v9711_v21  ;;  %v3751_v55 = vpop.permute.xlu0 %3750  ;;  %v4623_v14 = vmul.f32 %v9660_v22, %v4289_v11  ;;  %v9742_v47 = vmul.f32 %v9662_v16, %v4221_v48 }
 0x30a   : > { %v4258_v53 = vmul.f32 %v9638_v2, %v9709_v35  ;;  %v9726_v57 = vld [vmem:[#allocation4 + $0x62] sm:$0xff]  ;;  %v9728_v12 = vld [vmem:[#allocation4 + $0x6a] sm:$0xff]  ;;  %v9732_v27 = vpop.permute.xlu1 %4111  ;;  %11645 = vst [vmem:[#allocation47_spill] sm:$0xff] %v9735_v30  ;;  %v4555_v10 = vadd.f32 %v4523_v29, %v4455_v46  ;;  %v4524_v0 = vmul.f32 %v9658_v31, %v9709_v35  ;;  %v9745_v15 = vmul.f32 %v9664_v43, %v4289_v11 }
 0x30b   : > { %11644 = vst [vmem:[#allocation46_spill] sm:$0xff] %v9732_v27  ;;  %v4357_v8 = vadd.f32 %v4325_v60, %v4257_v23  ;;  %11647 = vst [vmem:[#allocation31_spill] sm:$0xff] %v9742_v47  ;;  %v4425_v4 = vmul.f32 %v9655_v19, %v9726_v57  ;;  %v4426_v41 = vmul.f32 %v9655_v19, %v9728_v12  ;;  %v7370_v48 = vld [vmem:[#allocation2 + $0x79] sm:$0xff]  ;;  %v7371_v11 = vld [vmem:[#allocation2 + $0x81] sm:$0xff] }
 0x30c   : > { %11648 = vst [vmem:[#allocation48_spill] sm:$0xff] %v9745_v15  ;;  %v4358_v52 = vadd.f32 %v4326_v13, %v4258_v53  ;;  %v4624_v29 = vmul.f32 %v9660_v22, %v9711_v21  ;;  %v4556_v60 = vadd.f32 %v4524_v0, %v4456_v28  ;;  %v4723_v33 = vmul.f32 %v9669_v44, %v9726_v57  ;;  %v4213_v13 = vld [vmem:[#allocation4] sm:$0xff]  ;;  %v11650_v27 = vld [vmem:[#allocation32_spill] sm:$0xff] }
 0x30d   : > { %v9753_v38 = vpop.permute.xlu0 %4106  ;;  %v4154_v46 = vadd.f32 %v7370_v48, %v4122_v49  ;;  %v4155_v23 = vadd.f32 %v7371_v11, %v4123_v34  ;;  %v4281_v30 = vld [vmem:[#allocation4 + $0x1] sm:$0xff]  ;;  %v4655_v15 = vadd.f32 %v4623_v14, %v4555_v10  ;;  %v4125_v47 = vmul.f32 %v9590_v7, %v3869_v1  ;;  %v7372_v7 = vld [vmem:[#allocation2 + $0x99] sm:$0xff] }
 0x30e   : > { %11649 = vst [vmem:[#allocation49_spill] sm:$0xff] %v9753_v38  ;;  %v3766_v53 = vpop.permute.xlu1 %3765  ;;  %v3868_v51 = vmul.f32 %v3751_v55, %v11650_v27  ;;  %v4282_v38 = vld [vmem:[#allocation4 + $0x9] sm:$0xff]  ;;  %v4249_v28 = vmul.f32 %v9638_v2, %v4213_v13  ;;  %v4250_v49 = vmul.f32 %v9638_v2, %v4214_v24  ;;  %v4317_v34 = vmul.f32 %v9640_v61, %v4281_v30 }
 0x30f   : > { %v3871_v9 = vmul.f32 %v3766_v53, %v11651_v37  ;;  %4187 = vst.msk [vmem:[#allocation4 + $0x79] sm:$0xff] %vm351_vm0, %v4154_v46  ;;  %4188 = vst.msk [vmem:[#allocation4 + $0x81] sm:$0xff] %vm351_vm0, %v4155_v23  ;;  %v4318_v0 = vmul.f32 %v9640_v61, %v4282_v38  ;;  %v4381_v14 = vld [vmem:[#allocation4 + $0x2] sm:$0xff]  ;;  %v9766_v10 = vadd.f32 %v4425_v4, %v4357_v8  ;;  %v4382_v48 = vld [vmem:[#allocation4 + $0xa] sm:$0xff] }
 0x310   : > { %v4157_v27 = vadd.f32 %v7372_v7, %v4125_v47  ;;  %v4124_v37 = vmul.f32 %v9596_v62, %v3868_v51  ;;  %v4656_v46 = vadd.f32 %v4624_v29, %v4556_v60  ;;  %v4724_v11 = vmul.f32 %v9669_v44, %v9728_v12  ;;  %v11652_v23 = vld [vmem:[#allocation33_spill] sm:$0xff]  ;;  %v11653_v24 = vld [vmem:[#allocation18_spill] sm:$0xff] }
 0x311   : > { %v4127_v55 = vmul.f32 %v9598_v6, %v3871_v9  ;;  %v3761_v1 = vpop.permute.xlu0 %3760  ;;  %v4349_v13 = vadd.f32 %v4317_v34, %v4249_v28  ;;  %v7373_v8 = vld [vmem:[#allocation2 + $0x91] sm:$0xff]  ;;  %v4417_v62 = vmul.f32 %v9655_v19, %v4381_v14  ;;  %v9778_v6 = vmul.f32 %v9662_v16, %v9709_v35 }
 0x312   : > { %v3870_v53 = vmul.f32 %v3761_v1, %v11652_v23  ;;  %v3776_v30 = vpop.permute.xlu1 %3775  ;;  %4190 = vst.msk [vmem:[#allocation4 + $0x99] sm:$0xff] %vm351_vm0, %v4157_v27  ;;  %v4156_v4 = vadd.f32 %v7373_v8, %v4124_v37  ;;  %v7374_v38 = vld [vmem:[#allocation2 + $0xb1] sm:$0xff]  ;;  %v4350_v29 = vadd.f32 %v4318_v0, %v4250_v49  ;;  %v4418_v60 = vmul.f32 %v9655_v19, %v4382_v48 }
 0x313   : > { %v4159_v47 = vadd.f32 %v7374_v38, %v4127_v55  ;;  %v3873_v51 = vmul.f32 %v3776_v30, %v11653_v24  ;;  %11654 = vst [vmem:[#allocation32_spill] sm:$0xff] %v9778_v6  ;;  %v4813_v28 = vld [vmem:[#allocation4 + $0x1a0] sm:$0xff]  ;;  %v4458_v7 = vadd.f32 %v4426_v41, %v4358_v52  ;;  %v9784_v27 = vmul.f32 %v9664_v43, %v9711_v21 }
 0x314   : > { %v4126_v9 = vmul.f32 %v9600_v39, %v3870_v53  ;;  %v4913_v34 = vld [vmem:[#allocation4 + $0x1a1] sm:$0xff]  ;;  %v9788_v37 = vmul.f32 %v9692_v50, %v9726_v57  ;;  %4189 = vst.msk [vmem:[#allocation4 + $0x91] sm:$0xff] %vm351_vm0, %v4156_v4  ;;  %v4755_v49 = vadd.f32 %v4723_v33, %v4655_v15  ;;  %v9793_v0 = vadd.f32 %v4724_v11, %v4656_v46  ;;  %v7375_v21 = vld [vmem:[#allocation2 + $0xa9] sm:$0xff] }
 0x315   : > { %11655 = vst [vmem:[#allocation17_spill] sm:$0xff] %v9784_v27  ;;  %4192 = vst.msk [vmem:[#allocation4 + $0xb1] sm:$0xff] %vm351_vm0, %v4159_v47  ;;  %v4129_v39 = vmul.f32 %v9602_v20, %v3873_v51  ;;  %v3771_v35 = vpop.permute.xlu0 %3770  ;;  %v9797_v52 = vmul.f32 %v9692_v50, %v9728_v12  ;;  %v5013_v55 = vld [vmem:[#allocation4 + $0x1a2] sm:$0xff]  ;;  %v4812_v57 = vld [vmem:[#allocation4 + $0x198] sm:$0xff]  ;;  %v9799_v8 = vadd.f32 %v4417_v62, %v4349_v13 }
 0x316   : > { %11656 = vst [vmem:[#allocation33_spill] sm:$0xff] %v9788_v37  ;;  %v4158_v41 = vadd.f32 %v7375_v21, %v4126_v9  ;;  %v3786_v14 = vpop.permute.xlu1 %3785  ;;  %v4223_v1 = vld [vmem:[#allocation4 + $0x78] sm:$0xff]  ;;  %v4224_v23 = vld [vmem:[#allocation4 + $0x80] sm:$0xff]  ;;  %v9802_v20 = vmul.f32 %v9662_v16, %v4813_v28  ;;  %v9805_v15 = vmul.f32 %v9664_v43, %v4913_v34  ;;  %v9811_v38 = vadd.f32 %v4418_v60, %v4350_v29  ;;  %v11664_v21 = vld [vmem:[#allocation35_spill] sm:$0xff] }
 0x317   : > { %11657 = vst [vmem:[#allocation18_spill] sm:$0xff] %v9797_v52  ;;  %v4291_v48 = vld [vmem:[#allocation4 + $0x79] sm:$0xff]  ;;  %11658 = vst [vmem:[#allocation50_spill] sm:$0xff] %v9799_v8  ;;  %v4259_v12 = vmul.f32 %v9638_v2, %v4223_v1  ;;  %v4525_v46 = vmul.f32 %v9658_v31, %v4223_v1  ;;  %v4292_v11 = vld [vmem:[#allocation4 + $0x81] sm:$0xff]  ;;  %v4260_v13 = vmul.f32 %v9638_v2, %v4224_v23 }
 0x318   : > { %v7376_v53 = vld [vmem:[#allocation2 + $0xc9] sm:$0xff]  ;;  %11659 = vst [vmem:[#allocation51_spill] sm:$0xff] %v9802_v20  ;;  %11660 = vst [vmem:[#allocation52_spill] sm:$0xff] %v9805_v15  ;;  %v4327_v33 = vmul.f32 %v9640_v61, %v4291_v48  ;;  %v4328_v47 = vmul.f32 %v9640_v61, %v4292_v11  ;;  %v9819_v51 = vmul.f32 %v9692_v50, %v5013_v55 }
 0x319   : > { %v4161_v30 = vadd.f32 %v7376_v53, %v4129_v39  ;;  %v4391_v4 = vld [vmem:[#allocation4 + $0x7a] sm:$0xff]  ;;  %4191 = vst.msk [vmem:[#allocation4 + $0xa9] sm:$0xff] %vm351_vm0, %v4158_v41  ;;  %11661 = vst [vmem:[#allocation53_spill] sm:$0xff] %v9811_v38  ;;  %v9816_v24 = vpop.permute.xlu0 %3780  ;;  %v9822_v62 = vmul.f32 %v9662_v16, %v4812_v57  ;;  %v4557_v34 = vadd.f32 %v4525_v46, %v9766_v10  ;;  %v4392_v39 = vld [vmem:[#allocation4 + $0x82] sm:$0xff] }
 0x31a   : > { %11662 = vst [vmem:[#allocation54_spill] sm:$0xff] %v9819_v51  ;;  %v4912_v9 = vld [vmem:[#allocation4 + $0x199] sm:$0xff]  ;;  %v4625_v29 = vmul.f32 %v9660_v22, %v4291_v48  ;;  %v4824_v60 = vmul.f32 %v9662_v16, %v4223_v1  ;;  %v9828_v41 = vmul.f32 %v3771_v35, %v11664_v21  ;;  %v9830_v53 = vpop.permute.xlu1 %3805  ;;  %v4360_v55 = vadd.f32 %v4328_v47, %v4260_v13 }
 0x31b   : > { %4194 = vst.msk [vmem:[#allocation4 + $0xc9] sm:$0xff] %vm351_vm0, %v4161_v30  ;;  %11663 = vst [vmem:[#allocation55_spill] sm:$0xff] %v9822_v62  ;;  %v5012_v28 = vld [vmem:[#allocation4 + $0x19a] sm:$0xff]  ;;  %v4359_v30 = vadd.f32 %v4327_v33, %v4259_v12  ;;  %v4427_v37 = vmul.f32 %v9655_v19, %v4391_v4  ;;  %v4526_v57 = vmul.f32 %v9658_v31, %v4224_v23  ;;  %v4225_v33 = vld [vmem:[#allocation4 + $0x90] sm:$0xff]  ;;  %v11668_v47 = vlaneseq }
 0x31c   : > { %v4657_v52 = vadd.f32 %v4625_v29, %v4557_v34  ;;  %v11665_v27 = vld [vmem:[#allocation36_spill] sm:$0xff]  ;;  %v9838_v10 = vmul.f32 %v9664_v43, %v4912_v9  ;;  %v9841_v1 = vmul.f32 %v9692_v50, %v5012_v28  ;;  %v4428_v35 = vmul.f32 %v9655_v19, %v4392_v39 }
 0x31d   : > { %v9835_v6 = vmul.f32 %v3786_v14, %v11665_v27  ;;  %v4558_v46 = vadd.f32 %v4526_v57, %v4458_v7  ;;  %v4626_v12 = vmul.f32 %v9660_v22, %v4292_v11  ;;  %v9845_v13 = vpop.permute.xlu0 %3800  ;;  %v9848_v21 = vand.u32 127, %v11668_v47  ;;  %v4294_v28 = vld [vmem:[#allocation4 + $0x99] sm:$0xff]  ;;  %v4293_v7 = vld [vmem:[#allocation4 + $0x91] sm:$0xff] }
 0x31e   : > { %11666 = vst [vmem:[#allocation35_spill] sm:$0xff] %v9838_v10  ;;  %11667 = vst [vmem:[#allocation36_spill] sm:$0xff] %v9841_v1  ;;  %v9850_v34 = vadd.f32 %v4824_v60, %v4755_v49  ;;  %v9853_v27 = vmul.f32 %v9664_v43, %v4291_v48  ;;  %v4725_v14 = vmul.f32 %v9669_v44, %v4391_v4  ;;  %v4226_v29 = vld [vmem:[#allocation4 + $0x98] sm:$0xff]  ;;  %v9857_v57 = vpop.permute.xlu1 %3815 }
 0x31f   : > { %11669 = vst [vmem:[#allocation56_spill] sm:$0xff] %v9848_v21  ;;  %v4825_v9 = vmul.f32 %v9662_v16, %v4224_v23  ;;  %v4459_v38 = vadd.f32 %v4427_v37, %v4359_v30  ;;  %v4460_v8 = vadd.f32 %v4428_v35, %v4360_v55  ;;  %v4658_v1 = vadd.f32 %v4626_v12, %v4558_v46  ;;  %v4394_v21 = vld [vmem:[#allocation4 + $0x9a] sm:$0xff] }
 0x320   : > { %11670 = vst [vmem:[#allocation57_spill] sm:$0xff] %v9850_v34  ;;  %11671 = vst [vmem:[#allocation58_spill] sm:$0xff] %v9853_v27  ;;  %v4726_v47 = vmul.f32 %v9669_v44, %v4392_v39  ;;  %v4757_v49 = vadd.f32 %v4725_v14, %v4657_v52  ;;  %v9861_v60 = vmul.f32 %v9664_v43, %v4292_v11 }
 0x321   : > { %v9864_v48 = vmul.f32 %v9692_v50, %v4391_v4  ;;  %v4261_v23 = vmul.f32 %v9638_v2, %v4225_v33  ;;  %v9868_v27 = vmul.f32 %v9692_v50, %v4392_v39  ;;  %v4330_v34 = vmul.f32 %v9640_v61, %v4294_v28  ;;  %v9873_v55 = vpop.permute.xlu0 %3810  ;;  %v4393_v4 = vld [vmem:[#allocation4 + $0x92] sm:$0xff] }
 0x322   : > { %11672 = vst [vmem:[#allocation59_spill] sm:$0xff] %v9861_v60  ;;  %v4262_v37 = vmul.f32 %v9638_v2, %v4226_v29  ;;  %v4329_v30 = vmul.f32 %v9640_v61, %v4293_v7  ;;  %v9876_v52 = vadd.f32 %v4825_v9, %v9793_v0  ;;  %v4430_v11 = vmul.f32 %v9655_v19, %v4394_v21  ;;  %v9881_v39 = vpop.permute.xlu1 %3825 }
 0x323   : > { %11673 = vst [vmem:[#allocation60_spill] sm:$0xff] %v9864_v48  ;;  %11674 = vst [vmem:[#allocation61_spill] sm:$0xff] %v9868_v27  ;;  %v4527_v35 = vmul.f32 %v9658_v31, %v4225_v33  ;;  %v4528_v46 = vmul.f32 %v9658_v31, %v4226_v29  ;;  %v4758_v12 = vadd.f32 %v4726_v47, %v4658_v1  ;;  %v4227_v47 = vld [vmem:[#allocation4 + $0xa8] sm:$0xff] }
 0x324   : > { %11675 = vst [vmem:[#allocation62_spill] sm:$0xff] %v9876_v52  ;;  %v4361_v14 = vadd.f32 %v4329_v30, %v4261_v23  ;;  %v4826_v48 = vmul.f32 %v9662_v16, %v4225_v33  ;;  %v4827_v27 = vmul.f32 %v9662_v16, %v4226_v29  ;;  %v4628_v60 = vmul.f32 %v9660_v22, %v4294_v28  ;;  %v4296_v52 = vld [vmem:[#allocation4 + $0xb1] sm:$0xff]  ;;  %v4295_v23 = vld [vmem:[#allocation4 + $0xa9] sm:$0xff] }
 0x325   : > { %v4362_v51 = vadd.f32 %v4330_v34, %v4262_v37  ;;  %v4559_v0 = vadd.f32 %v4527_v35, %v4459_v38  ;;  %v4560_v9 = vadd.f32 %v4528_v46, %v4460_v8  ;;  %v4728_v10 = vmul.f32 %v9669_v44, %v4394_v21  ;;  %v9894_v33 = vpop.permute.xlu0 %3820 }
 0x326   : > { %v9888_v15 = vmul.f32 %v9664_v43, %v4294_v28  ;;  %v9891_v62 = vmul.f32 %v9692_v50, %v4394_v21  ;;  %v4429_v1 = vmul.f32 %v9655_v19, %v4393_v4  ;;  %v4627_v29 = vmul.f32 %v9660_v22, %v4293_v7  ;;  %v4228_v28 = vld [vmem:[#allocation4 + $0xb0] sm:$0xff]  ;;  %v9904_v37 = vpop.permute.xlu1 %3835 }
 0x327   : > { %v4727_v34 = vmul.f32 %v9669_v44, %v4393_v4  ;;  %v9899_v8 = vmul.f32 %v9664_v43, %v4293_v7  ;;  %v9902_v38 = vmul.f32 %v9692_v50, %v4393_v4  ;;  %v9906_v30 = vadd.f32 %v4826_v48, %v4757_v49 }
 0x328   : > { %11676 = vst [vmem:[#allocation63_spill] sm:$0xff] %v9888_v15  ;;  %11677 = vst [vmem:[#allocation64_spill] sm:$0xff] %v9891_v62  ;;  %v4461_v21 = vadd.f32 %v4429_v1, %v4361_v14  ;;  %v9908_v35 = vadd.f32 %v4827_v27, %v4758_v12  ;;  %v4332_v46 = vmul.f32 %v9640_v61, %v4296_v52  ;;  %v4396_v62 = vld [vmem:[#allocation4 + $0xb2] sm:$0xff] }
 0x329   : > { %11678 = vst [vmem:[#allocation65_spill] sm:$0xff] %v9899_v8  ;;  %11679 = vst [vmem:[#allocation66_spill] sm:$0xff] %v9902_v38  ;;  %v4659_v15 = vadd.f32 %v4627_v29, %v4559_v0  ;;  %v4660_v20 = vadd.f32 %v4628_v60, %v4560_v9  ;;  %v4462_v32 = vadd.f32 %v4430_v11, %v4362_v51  ;;  %v9916_v49 = vpop.permute.xlu0 %3830  ;;  %v4395_v51 = vld [vmem:[#allocation4 + $0xaa] sm:$0xff] }
 0x32a   : > { %11680 = vst [vmem:[#allocation67_spill] sm:$0xff] %v9906_v30  ;;  %11681 = vst [vmem:[#allocation68_spill] sm:$0xff] %v9908_v35  ;;  %v4263_v7 = vmul.f32 %v9638_v2, %v4227_v47  ;;  %v4264_v4 = vmul.f32 %v9638_v2, %v4228_v28  ;;  %v4331_v38 = vmul.f32 %v9640_v61, %v4295_v23  ;;  %v9926_v12 = vpop.permute.xlu1 %3845  ;;  %v9929_v30 = vld [vmem:[#allocation4 + $0xc9] sm:$0xff] }
 0x32b   : > { %v4529_v8 = vmul.f32 %v9658_v31, %v4227_v47  ;;  %v4530_v14 = vmul.f32 %v9658_v31, %v4228_v28  ;;  %v9919_v27 = vmul.f32 %v9655_v19, %v4396_v62  ;;  %v4630_v48 = vmul.f32 %v9660_v22, %v4296_v52 }
 0x32c   : > { %v9923_v60 = vmul.f32 %v9669_v44, %v4396_v62  ;;  %v4828_v11 = vmul.f32 %v9662_v16, %v4227_v47  ;;  %v4363_v0 = vadd.f32 %v4331_v38, %v4263_v7  ;;  %v4829_v29 = vmul.f32 %v9662_v16, %v4228_v28 }
 0x32d   : > { %11682 = vst [vmem:[#allocation69_spill] sm:$0xff] %v9919_v27  ;;  %v4561_v9 = vadd.f32 %v4529_v8, %v4461_v21  ;;  %v4562_v1 = vadd.f32 %v4530_v14, %v4462_v32  ;;  %v4759_v35 = vadd.f32 %v4727_v34, %v4659_v15  ;;  %v9932_v31 = vmul.f32 %v9664_v43, %v4296_v52  ;;  %v3841_v8 = vpop.permute.xlu0 %3840 }
 0x32e   : > { %11683 = vst [vmem:[#allocation70_spill] sm:$0xff] %v9923_v60  ;;  %v9935_v2 = vmul.f32 %v9692_v50, %v4396_v62  ;;  %v4760_v60 = vadd.f32 %v4728_v10, %v4660_v20  ;;  %v9937_v27 = vadd.f32 %v4332_v46, %v4264_v4  ;;  %v4431_v47 = vmul.f32 %v9655_v19, %v4395_v51  ;;  %v3856_v62 = vpop.permute.xlu1 %3855 }
 0x32f   : > { %11684 = vst [vmem:[#allocation71_spill] sm:$0xff] %v9932_v31  ;;  %v4629_v38 = vmul.f32 %v9660_v22, %v4295_v23  ;;  %v9942_v32 = vmul.f32 %v9669_v44, %v4395_v51  ;;  %v9944_v28 = vadd.f32 %v4828_v11, %v4759_v35  ;;  %v9947_v15 = vmul.f32 %v9664_v43, %v4295_v23  ;;  %v7381_v11 = vld [vmem:[#allocation2 + $0x109] sm:$0xff] }
 0x330   : > { %11685 = vst [vmem:[#allocation72_spill] sm:$0xff] %v9935_v2  ;;  %v9950_v52 = vmul.f32 %v9692_v50, %v4395_v51  ;;  %v9954_v20 = vmul.f32 %v9640_v61, %v9929_v30  ;;  %v9956_v10 = vadd.f32 %v4431_v47, %v4363_v0  ;;  %v9960_v21 = vadd.f32 %v4630_v48, %v4562_v1  ;;  %v7378_v51 = vld [vmem:[#allocation2 + $0xe1] sm:$0xff]  ;;  %v7382_v0 = vld [vmem:[#allocation2 + $0x129] sm:$0xff] }
 0x331   : > { %11686 = vst [vmem:[#allocation73_spill] sm:$0xff] %v9944_v28  ;;  %11687 = vst [vmem:[#allocation74_spill] sm:$0xff] %v9947_v15  ;;  %v9958_v34 = vadd.f32 %v4629_v38, %v4561_v9  ;;  %v9962_v46 = vadd.f32 %v4829_v29, %v4760_v60  ;;  %v4128_v23 = vmul.f32 %v9604_v59, %v9828_v41  ;;  %v3851_v41 = vpop.permute.xlu0 %3850  ;;  %v7383_v9 = vld [vmem:[#allocation2 + $0x121] sm:$0xff]  ;;  %v11691_v38 = vld [vmem:[#allocation14_spill] sm:$0xff] }
 0x332   : > { %11688 = vst [vmem:[#allocation75_spill] sm:$0xff] %v9950_v52  ;;  %v4131_v35 = vmul.f32 %v9606_v45, %v9835_v6  ;;  %v3874_v7 = vmul.f32 %v9816_v24, %v9380_v25  ;;  %v3879_v4 = vmul.f32 %v9830_v53, %v9387_v54  ;;  %v3878_v14 = vmul.f32 %v9845_v13, %v9390_v56  ;;  %v7377_v45 = vld [vmem:[#allocation2 + $0xc1] sm:$0xff]  ;;  %v9982_v53 = vpop.permute.xlu1 %3795 }
 0x333   : > { %11689 = vst [vmem:[#allocation76_spill] sm:$0xff] %v9962_v46  ;;  %v3881_v48 = vmul.f32 %v9857_v57, %v9397_v3  ;;  %v3880_v60 = vmul.f32 %v9873_v55, %v9400_v42  ;;  %v3883_v59 = vmul.f32 %v9881_v39, %v9419_v18  ;;  %v4160_v6 = vadd.f32 %v7377_v45, %v4128_v23  ;;  %v9988_v18 = vld [vmem:[#allocation4 + $0xca] sm:$0xff]  ;;  %v7380_v55 = vld [vmem:[#allocation2 + $0x111] sm:$0xff] }
 0x334   : > { %v4163_v25 = vadd.f32 %v7378_v51, %v4131_v35  ;;  %v4130_v24 = vmul.f32 %v9610_v17, %v3874_v7  ;;  %v4135_v54 = vmul.f32 %v9608_v40, %v3879_v4  ;;  %v4134_v56 = vmul.f32 %v9612_v63, %v3878_v14  ;;  %v7379_v57 = vld [vmem:[#allocation2 + $0xd9] sm:$0xff]  ;;  %v7384_v29 = vld [vmem:[#allocation2 + $0x141] sm:$0xff] }
 0x335   : > { %v4137_v3 = vmul.f32 %v9614_v5, %v3881_v48  ;;  %v4136_v42 = vmul.f32 %v9616_v36, %v3880_v60  ;;  %v4139_v13 = vmul.f32 %v9618_v58, %v3883_v59  ;;  %4193 = vst.msk [vmem:[#allocation4 + $0xc1] sm:$0xff] %vm351_vm0, %v4160_v6  ;;  %v3882_v39 = vmul.f32 %v9894_v33, %v9422_v26  ;;  %v11690_v63 = vld [vmem:[#allocation19_spill] sm:$0xff]  ;;  %v11692_v35 = vld [vmem:[#allocation12_spill] sm:$0xff]  ;;  %v11693_v26 = vld [vmem:[#allocation34_spill] sm:$0xff]  ;;  %v3791_v51 = vpop.permute.xlu0 %3790 }
 0x336   : > { %4196 = vst.msk [vmem:[#allocation4 + $0xe1] sm:$0xff] %vm351_vm0, %v4163_v25  ;;  %v4162_v17 = vadd.f32 %v7379_v57, %v4130_v24  ;;  %v4167_v40 = vadd.f32 %v7380_v55, %v4135_v54  ;;  %v3885_v5 = vmul.f32 %v9904_v37, %v11690_v63  ;;  %v4166_v36 = vadd.f32 %v7381_v11, %v4134_v56  ;;  %v11694_v37 = vld [vmem:[#allocation37_spill] sm:$0xff]  ;;  %v11695_v48 = vld [vmem:[#allocation39_spill] sm:$0xff]  ;;  %v3716_v57 = vpop.permute.xlu1 %3715  ;;  %v11700_v55 = vld [vmem:[#allocation28_spill] sm:$0xff] }
 0x337   : > { %v4169_v58 = vadd.f32 %v7382_v0, %v4137_v3  ;;  %v4168_v1 = vadd.f32 %v7383_v9, %v4136_v42  ;;  %v4171_v47 = vadd.f32 %v7384_v29, %v4139_v13  ;;  %v4138_v23 = vmul.f32 %v11691_v38, %v3882_v39  ;;  %v11696_v59 = vld [vmem:[#allocation21_spill] sm:$0xff]  ;;  %v7386_v24 = vld [vmem:[#allocation2 + $0x159] sm:$0xff] }
 0x338   : > { %4195 = vst.msk [vmem:[#allocation4 + $0xd9] sm:$0xff] %vm351_vm0, %v4162_v17  ;;  %4200 = vst.msk [vmem:[#allocation4 + $0x111] sm:$0xff] %vm351_vm0, %v4167_v40  ;;  %v4141_v7 = vmul.f32 %v11692_v35, %v3885_v5  ;;  %v3884_v33 = vmul.f32 %v9916_v49, %v11693_v26  ;;  %v3887_v4 = vmul.f32 %v9926_v12, %v11694_v37  ;;  %v11697_v49 = vld [vmem:[#allocation20_spill] sm:$0xff]  ;;  %v7385_v12 = vld [vmem:[#allocation2 + $0x139] sm:$0xff] }
 0x339   : > { %v10006_v14 = vmul.f32 %v9655_v19, %v9988_v18  ;;  %4199 = vst.msk [vmem:[#allocation4 + $0x109] sm:$0xff] %vm351_vm0, %v4166_v36  ;;  %4202 = vst.msk [vmem:[#allocation4 + $0x129] sm:$0xff] %vm351_vm0, %v4169_v58  ;;  %v3886_v60 = vmul.f32 %v3841_v8, %v11695_v48  ;;  %v3889_v45 = vmul.f32 %v3856_v62, %v11696_v59  ;;  %v11698_v56 = vld [vmem:[#allocation23_spill] sm:$0xff]  ;;  %v11699_v42 = vld [vmem:[#allocation26_spill] sm:$0xff] }
 0x33a   : > { %4201 = vst.msk [vmem:[#allocation4 + $0x121] sm:$0xff] %vm351_vm0, %v4168_v1  ;;  %4204 = vst.msk [vmem:[#allocation4 + $0x141] sm:$0xff] %vm351_vm0, %v4171_v47  ;;  %v3888_v6 = vmul.f32 %v3851_v41, %v11697_v49  ;;  %v4170_v25 = vadd.f32 %v7385_v12, %v4138_v23  ;;  %v4173_v54 = vadd.f32 %v7386_v24, %v4141_v7  ;;  %v11701_v40 = vld [vmem:[#allocation46_spill] sm:$0xff]  ;;  %v11702_v39 = vld [vmem:[#allocation49_spill] sm:$0xff] }
 0x33b   : > { %v4140_v3 = vmul.f32 %v11698_v56, %v3884_v33  ;;  %v4143_v13 = vmul.f32 %v11699_v42, %v3887_v4  ;;  %v10019_v17 = vmul.f32 %v9660_v22, %v9929_v30  ;;  %v4142_v8 = vmul.f32 %v11700_v55, %v3886_v60  ;;  %v7387_v11 = vld [vmem:[#allocation2 + $0x151] sm:$0xff]  ;;  %v7389_v23 = vld [vmem:[#allocation2 + $0x169] sm:$0xff]  ;;  %v11704_v37 = vld [vmem:[#allocation27_spill] sm:$0xff] }
 0x33c   : > { %v4145_v62 = vmul.f32 %v11701_v40, %v3889_v45  ;;  %v4144_v41 = vmul.f32 %v11702_v39, %v3888_v6  ;;  %v10026_v63 = vmul.f32 %v9669_v44, %v9988_v18  ;;  %v10030_v5 = vmul.f32 %v9664_v43, %v9929_v30  ;;  %4203 = vst.msk [vmem:[#allocation4 + $0x139] sm:$0xff] %vm351_vm0, %v4170_v25  ;;  %v7388_v0 = vld [vmem:[#allocation2 + $0x171] sm:$0xff]  ;;  %v7390_v7 = vld [vmem:[#allocation2 + $0x189] sm:$0xff]  ;;  %v7391_v30 = vld [vmem:[#allocation2 + $0x181] sm:$0xff] }
 0x33d   : > { %4206 = vst.msk [vmem:[#allocation4 + $0x159] sm:$0xff] %vm351_vm0, %v4173_v54  ;;  %v4172_v36 = vadd.f32 %v7387_v11, %v4140_v3  ;;  %v4175_v58 = vadd.f32 %v7388_v0, %v4143_v13  ;;  %v11703_v9 = vld [vmem:[#allocation69_spill] sm:$0xff]  ;;  %v4230_v47 = vld [vmem:[#allocation4 + $0xc8] sm:$0xff]  ;;  %v4174_v35 = vadd.f32 %v7389_v23, %v4142_v8  ;;  %v11705_v45 = vld [vmem:[#allocation24_spill] sm:$0xff]  ;;  %v10046_v6 = vmul.f32 %v9692_v50, %v9988_v18  ;;  %v3711_v54 = vpop.permute.xlu0 %3710  ;;  %v4052_v18 = vpop.permute.xlu1 %4051 }
 0x33e   : > { %v4464_v1 = vadd.f32 %v11703_v9, %v9937_v27  ;;  %v4229_v29 = vld [vmem:[#allocation4 + $0xc0] sm:$0xff]  ;;  %v4177_v26 = vadd.f32 %v7390_v7, %v4145_v62  ;;  %v4176_v33 = vadd.f32 %v7391_v30, %v4144_v41  ;;  %v4266_v48 = vmul.f32 %v11704_v37, %v4230_v47  ;;  %v11707_v12 = vld [vmem:[#allocation70_spill] sm:$0xff]  ;;  %v11711_v0 = vld [vmem:[#allocation11_spill] sm:$0xff] }
 0x33f   : > { %v4297_v38 = vld [vmem:[#allocation4 + $0xc1] sm:$0xff]  ;;  %v4265_v4 = vmul.f32 %v11704_v37, %v4229_v29  ;;  %v4531_v49 = vmul.f32 %v11705_v45, %v4229_v29  ;;  %4205 = vst.msk [vmem:[#allocation4 + $0x151] sm:$0xff] %vm351_vm0, %v4172_v36  ;;  %4208 = vst.msk [vmem:[#allocation4 + $0x171] sm:$0xff] %vm351_vm0, %v4175_v58  ;;  %v4761_v27 = vadd.f32 %v9942_v32, %v9958_v34  ;;  %v4231_v11 = vld [vmem:[#allocation4 + $0xd8] sm:$0xff] }
 0x340   : > { %v4333_v60 = vmul.f32 %v9640_v61, %v4297_v38  ;;  %v4397_v59 = vld [vmem:[#allocation4 + $0xc2] sm:$0xff]  ;;  %11706 = vst [vmem:[#allocation19_spill] sm:$0xff] %v10046_v6  ;;  %v4762_v25 = vadd.f32 %v11707_v12, %v9960_v21  ;;  %v4532_v24 = vmul.f32 %v11705_v45, %v4230_v47  ;;  %4207 = vst.msk [vmem:[#allocation4 + $0x169] sm:$0xff] %vm351_vm0, %v4174_v35 }
 0x341   : > { %4210 = vst.msk [vmem:[#allocation4 + $0x189] sm:$0xff] %vm351_vm0, %v4177_v26  ;;  %4209 = vst.msk [vmem:[#allocation4 + $0x181] sm:$0xff] %vm351_vm0, %v4176_v33  ;;  %v4366_v3 = vadd.f32 %v9954_v20, %v4266_v48  ;;  %v4433_v32 = vmul.f32 %v9655_v19, %v4397_v59  ;;  %v4563_v34 = vadd.f32 %v4531_v49, %v9956_v10  ;;  %v4300_v13 = vld [vmem:[#allocation4 + $0xe1] sm:$0xff] }
 0x342   : > { %v4365_v56 = vadd.f32 %v4333_v60, %v4265_v4  ;;  %v4564_v42 = vadd.f32 %v4532_v24, %v4464_v1  ;;  %v4631_v21 = vmul.f32 %v9660_v22, %v4297_v38  ;;  %v11708_v55 = vld [vmem:[#allocation38_spill] sm:$0xff]  ;;  %v4830_v41 = vmul.f32 %v9662_v16, %v4229_v29  ;;  %v4232_v23 = vld [vmem:[#allocation4 + $0xe0] sm:$0xff] }
 0x343   : > { %v3877_v8 = vmul.f32 %v9982_v53, %v11708_v55  ;;  %v11709_v40 = vld [vmem:[#allocation10_spill] sm:$0xff]  ;;  %v10068_v10 = vmul.f32 %v3711_v54, %v11711_v0  ;;  %v4731_v9 = vmul.f32 %v9669_v44, %v4397_v59  ;;  %v4831_v1 = vmul.f32 %v9662_v16, %v4230_v47  ;;  %v4299_v53 = vld [vmem:[#allocation4 + $0xd9] sm:$0xff]  ;;  %v4236_v55 = vld [vmem:[#allocation4 + $0x110] sm:$0xff] }
 0x344   : > { %v10061_v62 = vmul.f32 %v3791_v51, %v11709_v40  ;;  %v4465_v39 = vadd.f32 %v4433_v32, %v4365_v56  ;;  %v11710_v20 = vld [vmem:[#allocation22_spill] sm:$0xff]  ;;  %v4663_v58 = vadd.f32 %v4631_v21, %v4563_v34  ;;  %v10074_v51 = vadd.f32 %v4830_v41, %v4761_v27  ;;  %v4304_v21 = vld [vmem:[#allocation4 + $0x111] sm:$0xff]  ;;  %v4310_v6 = vld [vmem:[#allocation4 + $0x159] sm:$0xff] }
 0x345   : > { %v10065_v36 = vmul.f32 %v3716_v57, %v11710_v20  ;;  %v10072_v35 = vmul.f32 %v4052_v18, %v3877_v8  ;;  %v10077_v29 = vmul.f32 %v9664_v43, %v4297_v38  ;;  %v10080_v57 = vmul.f32 %v9692_v50, %v4397_v59  ;;  %v4400_v26 = vld [vmem:[#allocation4 + $0xe2] sm:$0xff]  ;;  %v4399_v38 = vld [vmem:[#allocation4 + $0xda] sm:$0xff]  ;;  %v4404_v20 = vld [vmem:[#allocation4 + $0x112] sm:$0xff] }
 0x346   : > { %11712 = vst [vmem:[#allocation14_spill] sm:$0xff] %v10074_v51  ;;  %v4336_v7 = vmul.f32 %v9640_v61, %v4300_v13  ;;  %v4664_v30 = vadd.f32 %v10019_v17, %v4564_v42  ;;  %v10084_v33 = vadd.f32 %v4831_v1, %v4762_v25  ;;  %v4466_v47 = vadd.f32 %v10006_v14, %v4366_v3  ;;  %v4235_v3 = vld [vmem:[#allocation4 + $0x108] sm:$0xff] }
 0x347   : > { %11713 = vst [vmem:[#allocation12_spill] sm:$0xff] %v10077_v29  ;;  %11714 = vst [vmem:[#allocation34_spill] sm:$0xff] %v10080_v57  ;;  %v4267_v4 = vmul.f32 %v11704_v37, %v4231_v11  ;;  %v4268_v48 = vmul.f32 %v11704_v37, %v4232_v23  ;;  %v4335_v60 = vmul.f32 %v9640_v61, %v4299_v53 }
 0x348   : > { %v4533_v49 = vmul.f32 %v11705_v45, %v4231_v11  ;;  %v4534_v59 = vmul.f32 %v11705_v45, %v4232_v23  ;;  %v4763_v27 = vadd.f32 %v4731_v9, %v4663_v58  ;;  %v10093_v12 = vmul.f32 %v9655_v19, %v4400_v26  ;;  %v4403_v9 = vld [vmem:[#allocation4 + $0x10a] sm:$0xff] }
 0x349   : > { %v10096_v17 = vmul.f32 %v9660_v22, %v4300_v13  ;;  %v10099_v14 = vmul.f32 %v9669_v44, %v4400_v26  ;;  %v10102_v25 = vmul.f32 %v9664_v43, %v4300_v13  ;;  %v4633_v56 = vmul.f32 %v9660_v22, %v4299_v53  ;;  %v4303_v13 = vld [vmem:[#allocation4 + $0x109] sm:$0xff] }
 0x34a   : > { %v4565_v24 = vadd.f32 %v4533_v49, %v4465_v39  ;;  %v10104_v54 = vadd.f32 %v4534_v59, %v4466_v47  ;;  %v10108_v32 = vmul.f32 %v9692_v50, %v4400_v26  ;;  %v4764_v34 = vadd.f32 %v10026_v63, %v4664_v30 }
 0x34b   : > { %v10112_v18 = vmul.f32 %v9655_v19, %v4399_v38  ;;  %v4832_v42 = vmul.f32 %v9662_v16, %v4231_v11  ;;  %v10115_v8 = vadd.f32 %v4335_v60, %v4267_v4  ;;  %v10117_v40 = vadd.f32 %v4336_v7, %v4268_v48  ;;  %v4306_v48 = vld [vmem:[#allocation4 + $0x129] sm:$0xff] }
 0x34c   : > { %v10119_v39 = vadd.f32 %v4633_v56, %v4565_v24  ;;  %v10122_v41 = vmul.f32 %v9669_v44, %v4399_v38  ;;  %v4833_v63 = vmul.f32 %v9662_v16, %v4232_v23  ;;  %v10128_v58 = vmul.f32 %v9664_v43, %v4299_v53  ;;  %v4238_v24 = vld [vmem:[#allocation4 + $0x128] sm:$0xff] }
 0x34d   : > { %v10125_v0 = vadd.f32 %v4832_v42, %v4763_v27  ;;  %v4271_v11 = vmul.f32 %v11704_v37, %v4235_v3  ;;  %v10132_v1 = vmul.f32 %v9692_v50, %v4399_v38  ;;  %v4340_v7 = vmul.f32 %v9640_v61, %v4304_v21  ;;  %v4237_v27 = vld [vmem:[#allocation4 + $0x120] sm:$0xff] }
 0x34e   : > { %v4272_v26 = vmul.f32 %v11704_v37, %v4236_v55  ;;  %v4339_v30 = vmul.f32 %v9640_v61, %v4303_v13  ;;  %v10137_v47 = vadd.f32 %v4833_v63, %v4764_v34  ;;  %v4440_v23 = vmul.f32 %v9655_v19, %v4404_v20  ;;  %v4305_v56 = vld [vmem:[#allocation4 + $0x121] sm:$0xff] }
 0x34f   : > { %v10141_v4 = vmul.f32 %v9660_v22, %v4304_v21  ;;  %v10144_v53 = vmul.f32 %v9669_v44, %v4404_v20  ;;  %v10147_v60 = vmul.f32 %v9664_v43, %v4304_v21  ;;  %v4439_v59 = vmul.f32 %v9655_v19, %v4403_v9 }
 0x350   : > { %v4371_v38 = vadd.f32 %v4339_v30, %v4271_v11  ;;  %v4372_v49 = vadd.f32 %v4340_v7, %v4272_v26  ;;  %v10151_v34 = vmul.f32 %v9692_v50, %v4404_v20  ;;  %v10154_v42 = vmul.f32 %v11705_v45, %v4235_v3  ;;  %v4406_v20 = vld [vmem:[#allocation4 + $0x12a] sm:$0xff] }
 0x351   : > { %11715 = vst [vmem:[#allocation37_spill] sm:$0xff] %v10141_v4  ;;  %11716 = vst [vmem:[#allocation39_spill] sm:$0xff] %v10144_v53  ;;  %v10157_v63 = vmul.f32 %v11705_v45, %v4236_v55  ;;  %v10160_v53 = vmul.f32 %v9660_v22, %v4303_v13  ;;  %v10163_v11 = vmul.f32 %v9669_v44, %v4403_v9 }
 0x352   : > { %11717 = vst [vmem:[#allocation21_spill] sm:$0xff] %v10147_v60  ;;  %11718 = vst [vmem:[#allocation20_spill] sm:$0xff] %v10151_v34  ;;  %v4471_v21 = vadd.f32 %v4439_v59, %v4371_v38  ;;  %v10166_v7 = vmul.f32 %v9662_v16, %v4235_v3  ;;  %v4342_v26 = vmul.f32 %v9640_v61, %v4306_v48  ;;  %v4405_v59 = vld [vmem:[#allocation4 + $0x122] sm:$0xff] }
 0x353   : > { %11719 = vst [vmem:[#allocation23_spill] sm:$0xff] %v10154_v42  ;;  %11720 = vst [vmem:[#allocation26_spill] sm:$0xff] %v10157_v63  ;;  %v4472_v30 = vadd.f32 %v4440_v23, %v4372_v49  ;;  %v4273_v34 = vmul.f32 %v11704_v37, %v4237_v27  ;;  %v4274_v60 = vmul.f32 %v11704_v37, %v4238_v24 }
 0x354   : > { %11721 = vst [vmem:[#allocation28_spill] sm:$0xff] %v10160_v53  ;;  %11722 = vst [vmem:[#allocation46_spill] sm:$0xff] %v10163_v11  ;;  %v4341_v52 = vmul.f32 %v9640_v61, %v4305_v56  ;;  %v10173_v15 = vmul.f32 %v9662_v16, %v4236_v55  ;;  %v10176_v38 = vmul.f32 %v9664_v43, %v4303_v13  ;;  %v4239_v13 = vld [vmem:[#allocation4 + $0x138] sm:$0xff] }
 0x355   : > { %11723 = vst [vmem:[#allocation49_spill] sm:$0xff] %v10166_v7  ;;  %v4539_v3 = vmul.f32 %v11705_v45, %v4237_v27  ;;  %v4540_v11 = vmul.f32 %v11705_v45, %v4238_v24  ;;  %v10181_v28 = vmul.f32 %v9692_v50, %v4403_v9  ;;  %v4442_v23 = vmul.f32 %v9655_v19, %v4406_v20 }
 0x356   : > { %11724 = vst [vmem:[#allocation69_spill] sm:$0xff] %v10173_v15  ;;  %11725 = vst [vmem:[#allocation27_spill] sm:$0xff] %v10176_v38  ;;  %v4373_v49 = vadd.f32 %v4341_v52, %v4273_v34  ;;  %v4374_v2 = vadd.f32 %v4342_v26, %v4274_v60  ;;  %v4640_v57 = vmul.f32 %v9660_v22, %v4306_v48  ;;  %v4307_v52 = vld [vmem:[#allocation4 + $0x139] sm:$0xff]  ;;  %v4308_v26 = vld [vmem:[#allocation4 + $0x141] sm:$0xff] }
 0x357   : > { %11726 = vst [vmem:[#allocation24_spill] sm:$0xff] %v10181_v28  ;;  %v4571_v7 = vadd.f32 %v4539_v3, %v4471_v21  ;;  %v4572_v55 = vadd.f32 %v4540_v11, %v4472_v30  ;;  %v4639_v15 = vmul.f32 %v9660_v22, %v4305_v56  ;;  %v4740_v38 = vmul.f32 %v9669_v44, %v4406_v20  ;;  %v4240_v28 = vld [vmem:[#allocation4 + $0x140] sm:$0xff] }
 0x358   : > { %v10188_v4 = vmul.f32 %v9664_v43, %v4306_v48  ;;  %v10191_v53 = vmul.f32 %v9692_v50, %v4406_v20  ;;  %v4441_v9 = vmul.f32 %v9655_v19, %v4405_v59  ;;  %v4739_v34 = vmul.f32 %v9669_v44, %v4405_v59  ;;  %v4408_v30 = vld [vmem:[#allocation4 + $0x142] sm:$0xff] }
 0x359   : > { %v4671_v60 = vadd.f32 %v4639_v15, %v4571_v7  ;;  %v10196_v21 = vmul.f32 %v9662_v16, %v4237_v27  ;;  %v10199_v11 = vmul.f32 %v9662_v16, %v4238_v24  ;;  %v4672_v3 = vadd.f32 %v4640_v57, %v4572_v55 }
 0x35a   : > { %11727 = vst [vmem:[#allocation70_spill] sm:$0xff] %v10188_v4  ;;  %11728 = vst [vmem:[#allocation38_spill] sm:$0xff] %v10191_v53  ;;  %v4473_v48 = vadd.f32 %v4441_v9, %v4373_v49  ;;  %v4474_v4 = vadd.f32 %v4442_v23, %v4374_v2  ;;  %v4275_v20 = vmul.f32 %v11704_v37, %v4239_v13 }
 0x35b   : > { %11729 = vst [vmem:[#allocation10_spill] sm:$0xff] %v10196_v21  ;;  %11730 = vst [vmem:[#allocation22_spill] sm:$0xff] %v10199_v11  ;;  %v10203_v53 = vmul.f32 %v9664_v43, %v4305_v56  ;;  %v10206_v15 = vmul.f32 %v9692_v50, %v4405_v59  ;;  %v4276_v7 = vmul.f32 %v11704_v37, %v4240_v28  ;;  %v4407_v11 = vld [vmem:[#allocation4 + $0x13a] sm:$0xff] }
 0x35c   : > { %v4343_v27 = vmul.f32 %v9640_v61, %v4307_v52  ;;  %v4344_v24 = vmul.f32 %v9640_v61, %v4308_v26  ;;  %v4444_v21 = vmul.f32 %v9655_v19, %v4408_v30  ;;  %v4541_v57 = vmul.f32 %v11705_v45, %v4239_v13 }
 0x35d   : > { %11731 = vst [vmem:[#allocation11_spill] sm:$0xff] %v10203_v53  ;;  %11732 = vst [vmem:[#allocation77_spill] sm:$0xff] %v10206_v15  ;;  %v4542_v2 = vmul.f32 %v11705_v45, %v4240_v28  ;;  %v4771_v23 = vadd.f32 %v4739_v34, %v4671_v60  ;;  %v4642_v56 = vmul.f32 %v9660_v22, %v4308_v26  ;;  %v4241_v60 = vld [vmem:[#allocation4 + $0x150] sm:$0xff] }
 0x35e   : > { %v4742_v49 = vmul.f32 %v9669_v44, %v4408_v30  ;;  %v4375_v59 = vadd.f32 %v4343_v27, %v4275_v20  ;;  %v4772_v55 = vadd.f32 %v4740_v38, %v4672_v3  ;;  %v4573_v9 = vadd.f32 %v4541_v57, %v4473_v48  ;;  %v4242_v48 = vld [vmem:[#allocation4 + $0x158] sm:$0xff] }
 0x35f   : > { %v4574_v15 = vadd.f32 %v4542_v2, %v4474_v4  ;;  %v4641_v53 = vmul.f32 %v9660_v22, %v4307_v52  ;;  %v10218_v31 = vmul.f32 %v9664_v43, %v4308_v26  ;;  %v4376_v46 = vadd.f32 %v4344_v24, %v4276_v7  ;;  %v4309_v3 = vld [vmem:[#allocation4 + $0x151] sm:$0xff] }
 0x360   : > { %v4443_v63 = vmul.f32 %v9655_v19, %v4407_v11  ;;  %v4840_v42 = vmul.f32 %v9662_v16, %v4239_v13  ;;  %v10223_v34 = vmul.f32 %v9692_v50, %v4408_v30  ;;  %v4741_v38 = vmul.f32 %v9669_v44, %v4407_v11  ;;  %v4410_v13 = vld [vmem:[#allocation4 + $0x15a] sm:$0xff] }
 0x361   : > { %11733 = vst [vmem:[#allocation78_spill] sm:$0xff] %v10218_v31  ;;  %v4673_v29 = vadd.f32 %v4641_v53, %v4573_v9  ;;  %v4841_v4 = vmul.f32 %v9662_v16, %v4240_v28  ;;  %v4674_v26 = vadd.f32 %v4642_v56, %v4574_v15  ;;  %v10230_v7 = vmul.f32 %v9664_v43, %v4307_v52  ;;  %v4409_v56 = vld [vmem:[#allocation4 + $0x152] sm:$0xff] }
 0x362   : > { %11734 = vst [vmem:[#allocation79_spill] sm:$0xff] %v10223_v34  ;;  %v4475_v20 = vadd.f32 %v4443_v63, %v4375_v59  ;;  %v10227_v27 = vadd.f32 %v4840_v42, %v4771_v23  ;;  %v10235_v30 = vmul.f32 %v9692_v50, %v4407_v11  ;;  %v4346_v53 = vmul.f32 %v9640_v61, %v4310_v6  ;;  %v10245_v59 = vpop.permute.xlu0 %4046 }
 0x363   : > { %11736 = vst [vmem:[#allocation81_spill] sm:$0xff] %v10230_v7  ;;  %v10232_v24 = vadd.f32 %v4841_v4, %v4772_v55  ;;  %v4277_v57 = vmul.f32 %v11704_v37, %v4241_v60  ;;  %v4476_v28 = vadd.f32 %v4444_v21, %v4376_v46  ;;  %v4278_v2 = vmul.f32 %v11704_v37, %v4242_v48  ;;  %v4312_v7 = vld [vmem:[#allocation4 + $0x171] sm:$0xff] }
 0x364   : > { %11735 = vst [vmem:[#allocation80_spill] sm:$0xff] %v10227_v27  ;;  %11738 = vst [vmem:[#allocation83_spill] sm:$0xff] %v10235_v30  ;;  %v4345_v63 = vmul.f32 %v9640_v61, %v4309_v3  ;;  %v4543_v42 = vmul.f32 %v11705_v45, %v4241_v60  ;;  %v4773_v15 = vadd.f32 %v4741_v38, %v4673_v29 }
 0x365   : > { %11737 = vst [vmem:[#allocation82_spill] sm:$0xff] %v10232_v24  ;;  %v4446_v52 = vmul.f32 %v9655_v19, %v4410_v13  ;;  %v4644_v23 = vmul.f32 %v9660_v22, %v4310_v6  ;;  %v4544_v11 = vmul.f32 %v11705_v45, %v4242_v48  ;;  %v4774_v55 = vadd.f32 %v4742_v49, %v4674_v26  ;;  %v4243_v26 = vld [vmem:[#allocation4 + $0x168] sm:$0xff] }
 0x366   : > { %v4377_v9 = vadd.f32 %v4345_v63, %v4277_v57  ;;  %v4378_v4 = vadd.f32 %v4346_v53, %v4278_v2  ;;  %v4575_v46 = vadd.f32 %v4543_v42, %v4475_v20  ;;  %v4744_v21 = vmul.f32 %v9669_v44, %v4410_v13  ;;  %v4244_v20 = vld [vmem:[#allocation4 + $0x170] sm:$0xff] }
 0x367   : > { %v10249_v30 = vmul.f32 %v9664_v43, %v4310_v6  ;;  %v10252_v29 = vmul.f32 %v9692_v50, %v4410_v13  ;;  %v4842_v38 = vmul.f32 %v9662_v16, %v4241_v60  ;;  %v4445_v27 = vmul.f32 %v9655_v19, %v4409_v56  ;;  %v4311_v53 = vld [vmem:[#allocation4 + $0x169] sm:$0xff]  ;;  %v4412_v2 = vld [vmem:[#allocation4 + $0x172] sm:$0xff] }
 0x368   : > { %v4576_v34 = vadd.f32 %v4544_v11, %v4476_v28  ;;  %v4643_v31 = vmul.f32 %v9660_v22, %v4309_v3  ;;  %v4843_v49 = vmul.f32 %v9662_v16, %v4242_v48  ;;  %v4743_v57 = vmul.f32 %v9669_v44, %v4409_v56  ;;  %v4411_v48 = vld [vmem:[#allocation4 + $0x16a] sm:$0xff] }
 0x369   : > { %11739 = vst [vmem:[#allocation84_spill] sm:$0xff] %v10249_v30  ;;  %11740 = vst [vmem:[#allocation85_spill] sm:$0xff] %v10252_v29  ;;  %v10259_v6 = vadd.f32 %v4842_v38, %v4773_v15  ;;  %v10262_v13 = vmul.f32 %v9664_v43, %v4309_v3  ;;  %v10265_v60 = vmul.f32 %v9692_v50, %v4409_v56  ;;  %v3972_v3 = vpop.permute.xlu1 %3971  ;;  %v10279_v30 = vld [vmem:[#allocation4 + $0x180] sm:$0xff] }
 0x36a   : > { %v4477_v63 = vadd.f32 %v4445_v27, %v4377_v9  ;;  %v4675_v28 = vadd.f32 %v4643_v31, %v4575_v46  ;;  %v10267_v42 = vadd.f32 %v4843_v49, %v4774_v55  ;;  %v4478_v11 = vadd.f32 %v4446_v52, %v4378_v4 }
 0x36b   : > { %11741 = vst [vmem:[#allocation86_spill] sm:$0xff] %v10259_v6  ;;  %11742 = vst [vmem:[#allocation87_spill] sm:$0xff] %v10262_v13  ;;  %v4348_v24 = vmul.f32 %v9640_v61, %v4312_v7  ;;  %v4279_v29 = vmul.f32 %v11704_v37, %v4243_v26  ;;  %v4280_v15 = vmul.f32 %v11704_v37, %v4244_v20  ;;  %v3967_v13 = vpop.permute.xlu0 %3966 }
 0x36c   : > { %11743 = vst [vmem:[#allocation88_spill] sm:$0xff] %v10265_v60  ;;  %11744 = vst [vmem:[#allocation89_spill] sm:$0xff] %v10267_v42  ;;  %v4347_v38 = vmul.f32 %v9640_v61, %v4311_v53  ;;  %v4676_v6 = vadd.f32 %v4644_v23, %v4576_v34  ;;  %v4448_v50 = vmul.f32 %v9655_v19, %v4412_v2  ;;  %v10287_v23 = vld [vmem:[%s11263_s4 + $0x8] ss:$0 sm:$0xff] }
 0x36d   : > { %v4545_v27 = vmul.f32 %v11705_v45, %v4243_v26  ;;  %v4546_v31 = vmul.f32 %v11705_v45, %v4244_v20  ;;  %v4646_v52 = vmul.f32 %v9660_v22, %v4312_v7  ;;  %v4380_v55 = vadd.f32 %v4348_v24, %v4280_v15 }
 0x36e   : > { %v4379_v56 = vadd.f32 %v4347_v38, %v4279_v29  ;;  %v4447_v9 = vmul.f32 %v9655_v19, %v4411_v48  ;;  %v4775_v4 = vadd.f32 %v4743_v57, %v4675_v28  ;;  %v4746_v46 = vmul.f32 %v9669_v44, %v4412_v2  ;;  %v4512_v28 = vld [vmem:[#allocation4 + $0x188] sm:$0xff] }
 0x36f   : > { %v4577_v49 = vadd.f32 %v4545_v27, %v4477_v63  ;;  %v4578_v60 = vadd.f32 %v4546_v31, %v4478_v11  ;;  %v10282_v34 = vmul.f32 %v9664_v43, %v4312_v7  ;;  %v10290_v29 = vmul.f32 %v10287_v23, %v4412_v2  ;;  %v4612_v7 = vld [vmem:[#allocation4 + $0x189] sm:$0xff]  ;;  %v10295_v27 = vld [vmem:[#allocation4 + $0x181] sm:$0xff] }
 0x370   : > { %v4479_v24 = vadd.f32 %v4447_v9, %v4379_v56  ;;  %v4645_v57 = vmul.f32 %v9660_v22, %v4311_v53  ;;  %v4776_v15 = vadd.f32 %v4744_v21, %v4676_v6  ;;  %v4745_v11 = vmul.f32 %v9669_v44, %v4411_v48  ;;  %v3706_v56 = vpop.permute.xlu1 %3705  ;;  %v3701_v9 = vpop.permute.xlu0 %3700  ;;  %v4712_v6 = vld [vmem:[#allocation4 + $0x18a] sm:$0xff] }
 0x371   : > { %11745 = vst [vmem:[#allocation90_spill] sm:$0xff] %v10282_v34  ;;  %11746 = vst [vmem:[#allocation91_spill] sm:$0xff] %v10290_v29  ;;  %v4678_v63 = vadd.f32 %v4646_v52, %v4578_v60  ;;  %v4844_v38 = vmul.f32 %v9662_v16, %v4243_v26  ;;  %v4845_v42 = vmul.f32 %v9662_v16, %v4244_v20  ;;  %v4711_v52 = vld [vmem:[#allocation4 + $0x182] sm:$0xff] }
 0x372   : > { %v4677_v31 = vadd.f32 %v4645_v57, %v4577_v49  ;;  %v4480_v34 = vadd.f32 %v4448_v50, %v4380_v55  ;;  %v4547_v2 = vmul.f32 %v11705_v45, %v10279_v30  ;;  %v10303_v21 = vmul.f32 %v9664_v43, %v4311_v53 }
 0x373   : > { %v10300_v29 = vadd.f32 %v4844_v38, %v4775_v4  ;;  %v4778_v60 = vadd.f32 %v4746_v46, %v4678_v63  ;;  %v4548_v26 = vmul.f32 %v11705_v45, %v4512_v28  ;;  %v10307_v49 = vmul.f32 %v10287_v23, %v4411_v48  ;;  %v7393_v38 = vld [vmem:[#allocation2 + $0xf9] sm:$0xff] }
 0x374   : > { %11748 = vst [vmem:[#allocation93_spill] sm:$0xff] %v10303_v21  ;;  %v4648_v20 = vmul.f32 %v9660_v22, %v4612_v7  ;;  %v4579_v50 = vadd.f32 %v4547_v2, %v4479_v24  ;;  %v4647_v55 = vmul.f32 %v9660_v22, %v10295_v27  ;;  %v10312_v57 = vadd.f32 %v4845_v42, %v4776_v15 }
 0x375   : > { %11747 = vst [vmem:[#allocation92_spill] sm:$0xff] %v10300_v29  ;;  %11749 = vst [vmem:[#allocation94_spill] sm:$0xff] %v10307_v49  ;;  %v4580_v4 = vadd.f32 %v4548_v26, %v4480_v34  ;;  %v4847_v53 = vmul.f32 %v9662_v16, %v4512_v28  ;;  %v4165_v46 = vadd.f32 %v7393_v38, %v10072_v35 }
 0x376   : > { %v4777_v63 = vadd.f32 %v4745_v11, %v4677_v31  ;;  %v4748_v21 = vmul.f32 %v9669_v44, %v4712_v6  ;;  %v4679_v29 = vadd.f32 %v4647_v55, %v4579_v50  ;;  %v4747_v48 = vmul.f32 %v9669_v44, %v4711_v52  ;;  %v3962_v11 = vpop.permute.xlu1 %3961  ;;  %v3957_v31 = vpop.permute.xlu0 %3956  ;;  %v7396_v55 = vld [vmem:[#allocation2 + $0x31] sm:$0xff] }
 0x377   : > { %v4680_v49 = vadd.f32 %v4648_v20, %v4580_v4  ;;  %v4879_v51 = vadd.f32 %v4847_v53, %v4778_v60  ;;  %4198 = vst.msk [vmem:[#allocation4 + $0xf9] sm:$0xff] %vm351_vm0, %v4165_v46  ;;  %v4666_v42 = vadd.f32 %v10096_v17, %v10104_v54  ;;  %v10323_v34 = vadd.f32 %v10122_v41, %v10119_v39  ;;  %v11750_v60 = vld [vmem:[#allocation25_spill] sm:$0xff]  ;;  %v7398_v53 = vld [vmem:[#allocation2 + $0x19] sm:$0xff]  ;;  %v11754_v46 = vld [vmem:[#allocation52_spill] sm:$0xff] }
 0x378   : > { %v4779_v24 = vadd.f32 %v4747_v48, %v4679_v29  ;;  %v4132_v35 = vmul.f32 %v10245_v59, %v10061_v62  ;;  %v4117_v28 = vmul.f32 %v3972_v3, %v10065_v36  ;;  %v4116_v15 = vmul.f32 %v3967_v13, %v10068_v10  ;;  %v11751_v17 = vld [vmem:[#allocation13_spill] sm:$0xff]  ;;  %v7395_v29 = vld [vmem:[#allocation2 + $0x39] sm:$0xff] }
 0x379   : > { %v10330_v2 = vadd.f32 %v10099_v14, %v4666_v42  ;;  %v3859_v26 = vmul.f32 %v3706_v56, %v11750_v60  ;;  %v3858_v54 = vmul.f32 %v3701_v9, %v11751_v17  ;;  %v4780_v20 = vadd.f32 %v4748_v21, %v4680_v49  ;;  %v7394_v39 = vld [vmem:[#allocation2 + $0xf1] sm:$0xff]  ;;  %v11752_v13 = vld [vmem:[#allocation51_spill] sm:$0xff] }
 0x37a   : > { %v4164_v41 = vadd.f32 %v7394_v39, %v4132_v35  ;;  %v4149_v50 = vadd.f32 %v7395_v29, %v4117_v28  ;;  %v4148_v62 = vadd.f32 %v7396_v55, %v4116_v15  ;;  %v4965_v36 = vadd.f32 %v10102_v25, %v10137_v47  ;;  %v11753_v14 = vld [vmem:[#allocation55_spill] sm:$0xff] }
 0x37b   : > { %v4115_v10 = vmul.f32 %v3962_v11, %v3859_v26  ;;  %v4114_v59 = vmul.f32 %v3957_v31, %v3858_v54  ;;  %v4881_v3 = vadd.f32 %v11752_v13, %v4780_v20  ;;  %v4880_v4 = vadd.f32 %v11753_v14, %v4779_v24  ;;  %v7397_v47 = vld [vmem:[#allocation2 + $0x21] sm:$0xff]  ;;  %v11756_v26 = vld [vmem:[#allocation54_spill] sm:$0xff] }
 0x37c   : > { %v4947_v56 = vmul.f32 %v9664_v43, %v4612_v7  ;;  %v4846_v9 = vmul.f32 %v9662_v16, %v10279_v30  ;;  %4197 = vst.msk [vmem:[#allocation4 + $0xf1] sm:$0xff] %vm351_vm0, %v4164_v41  ;;  %4182 = vst.msk [vmem:[#allocation4 + $0x39] sm:$0xff] %vm351_vm0, %v4149_v50  ;;  %v5065_v21 = vadd.f32 %v10108_v32, %v4965_v36  ;;  %v10351_v30 = vld [vmem:[%s11264_s5] ss:$0 sm:$0xff] }
 0x37d   : > { %4181 = vst.msk [vmem:[#allocation4 + $0x31] sm:$0xff] %vm351_vm0, %v4148_v62  ;;  %v4964_v25 = vadd.f32 %v10128_v58, %v10125_v0  ;;  %v4147_v49 = vadd.f32 %v7397_v47, %v4115_v10  ;;  %v4146_v38 = vadd.f32 %v7398_v53, %v4114_v59  ;;  %v4981_v7 = vadd.f32 %v11754_v46, %v4881_v3  ;;  %v11755_v48 = vld [vmem:[#allocation35_spill] sm:$0xff] }
 0x37e   : > { %v4980_v42 = vadd.f32 %v11755_v48, %v4880_v4  ;;  %v5047_v24 = vmul.f32 %v10287_v23, %v4712_v6  ;;  %v4302_v35 = vld [vmem:[#allocation4 + $0xf9] sm:$0xff]  ;;  %v5104_v28 = vadd.f32 %v10351_v30, %v5065_v21  ;;  %v4979_v58 = vadd.f32 %v4947_v56, %v4879_v51 }
 0x37f   : > { %v4402_v32 = vld [vmem:[#allocation4 + $0xfa] sm:$0xff]  ;;  %v5064_v0 = vadd.f32 %v10132_v1, %v4964_v25  ;;  %v4878_v15 = vadd.f32 %v4846_v9, %v4777_v63  ;;  %v4946_v11 = vmul.f32 %v9664_v43, %v10295_v27  ;;  %v5046_v31 = vmul.f32 %v10287_v23, %v4711_v52  ;;  %4180 = vst.msk [vmem:[#allocation4 + $0x21] sm:$0xff] %vm351_vm0, %v4147_v49 }
 0x380   : > { %v4467_v60 = vadd.f32 %v10112_v18, %v10115_v8  ;;  %4179 = vst.msk [vmem:[#allocation4 + $0x19] sm:$0xff] %vm351_vm0, %v4146_v38  ;;  %v4468_v6 = vadd.f32 %v10093_v12, %v10117_v40  ;;  %v5081_v17 = vadd.f32 %v11756_v26, %v4981_v7  ;;  %5136 = vst.msk [vmem:[#allocation5 + $0x78] sm:$0xff] %vm351_vm0, %v5104_v28  ;;  %v11757_v51 = vld [vmem:[#allocation36_spill] sm:$0xff]  ;;  %v11759_v7 = vld [vmem:[#allocation14_spill] sm:$0xff] }
 0x381   : > { %v5080_v1 = vadd.f32 %v11757_v51, %v4980_v42  ;;  %v11758_v63 = vld [vmem:[#allocation56_spill] sm:$0xff]  ;;  %v4338_v52 = vmul.f32 %v9640_v61, %v4302_v35  ;;  %v4438_v18 = vmul.f32 %v9655_v19, %v4402_v32  ;;  %v5103_v8 = vadd.f32 %v10351_v30, %v5064_v0  ;;  %v11762_v26 = vld [vmem:[#allocation90_spill] sm:$0xff]  ;;  %v11763_v51 = vld [vmem:[#allocation23_spill] sm:$0xff] }
 0x382   : > { %v10370_v27 = vadd.s32 128, %v11758_v63  ;;  %v5079_v54 = vadd.f32 %v5047_v24, %v4979_v58  ;;  %v4636_v20 = vmul.f32 %v9660_v22, %v4302_v35  ;;  %v4736_v12 = vmul.f32 %v9669_v44, %v4402_v32  ;;  %v11760_v48 = vld [vmem:[#allocation12_spill] sm:$0xff] }
 0x383   : > { %v5120_v40 = vadd.f32 %v10351_v30, %v5081_v17  ;;  %v5119_v39 = vadd.f32 %v10351_v30, %v5080_v1  ;;  %v10380_v41 = vmul.f32 %v9664_v43, %v4302_v35  ;;  %v10383_v29 = vmul.f32 %v10287_v23, %v4402_v32  ;;  %v4233_v50 = vld [vmem:[#allocation4 + $0xf0] sm:$0xff]  ;;  %v4234_v55 = vld [vmem:[#allocation4 + $0xf8] sm:$0xff]  ;;  %5135 = vst.msk [vmem:[#allocation5 + $0x70] sm:$0xff] %vm351_vm0, %v5103_v8 }
 0x384   : > { %v4301_v62 = vld [vmem:[#allocation4 + $0xf1] sm:$0xff]  ;;  %v5118_v36 = vadd.f32 %v10351_v30, %v5079_v54  ;;  %v4963_v10 = vadd.f32 %v10030_v5, %v10084_v33  ;;  %v4269_v59 = vmul.f32 %v11704_v37, %v4233_v50  ;;  %v4270_v13 = vmul.f32 %v11704_v37, %v4234_v55  ;;  %v4286_v0 = vld [vmem:[#allocation4 + $0x39] sm:$0xff] }
 0x385   : > { %v4337_v3 = vmul.f32 %v9640_v61, %v4301_v62  ;;  %v4401_v14 = vld [vmem:[#allocation4 + $0xf2] sm:$0xff]  ;;  %v4535_v4 = vmul.f32 %v11705_v45, %v4233_v50  ;;  %5152 = vst.msk [vmem:[#allocation5 + $0xf8] sm:$0xff] %vm351_vm0, %v5120_v40  ;;  %5151 = vst.msk [vmem:[#allocation5 + $0xf0] sm:$0xff] %vm351_vm0, %v5119_v39  ;;  %v4536_v9 = vmul.f32 %v11705_v45, %v4234_v55 }
 0x386   : > { %v4437_v56 = vmul.f32 %v9655_v19, %v4401_v14  ;;  %v4635_v21 = vmul.f32 %v9660_v22, %v4301_v62  ;;  %5150 = vst.msk [vmem:[#allocation5 + $0xe8] sm:$0xff] %vm351_vm0, %v5118_v36  ;;  %v4978_v5 = vadd.f32 %v4946_v11, %v4878_v15  ;;  %v4370_v25 = vadd.f32 %v4338_v52, %v4270_v13  ;;  %v4386_v15 = vld [vmem:[#allocation4 + $0x3a] sm:$0xff]  ;;  %v11761_v11 = vld [vmem:[#allocation19_spill] sm:$0xff]  ;;  %v11764_v52 = vld [vmem:[#allocation26_spill] sm:$0xff] }
 0x387   : > { %v4369_v33 = vadd.f32 %v4337_v3, %v4269_v59  ;;  %v4567_v47 = vadd.f32 %v4535_v4, %v4467_v60  ;;  %v4834_v49 = vmul.f32 %v9662_v16, %v4233_v50  ;;  %v4568_v53 = vadd.f32 %v4536_v9, %v4468_v6  ;;  %v4218_v40 = vld [vmem:[#allocation4 + $0x38] sm:$0xff] }
 0x388   : > { %v4735_v38 = vmul.f32 %v9669_v44, %v4401_v14  ;;  %v4835_v46 = vmul.f32 %v9662_v16, %v4234_v55  ;;  %v10404_v42 = vadd.f32 %v11760_v48, %v11759_v7  ;;  %v4470_v35 = vadd.f32 %v4438_v18, %v4370_v25  ;;  %v11766_v55 = vld [vmem:[#allocation71_spill] sm:$0xff]  ;;  %v11767_v9 = vld [vmem:[#allocation28_spill] sm:$0xff] }
 0x389   : > { %v4469_v24 = vadd.f32 %v4437_v56, %v4369_v33  ;;  %v4667_v32 = vadd.f32 %v4635_v21, %v4567_v47  ;;  %v4866_v28 = vadd.f32 %v4834_v49, %v10323_v34  ;;  %v4668_v58 = vadd.f32 %v4636_v20, %v4568_v53  ;;  %v4217_v34 = vld [vmem:[#allocation4 + $0x30] sm:$0xff]  ;;  %v11768_v21 = vld [vmem:[#allocation37_spill] sm:$0xff]  ;;  %v4215_v48 = vld [vmem:[#allocation4 + $0x18] sm:$0xff] }
 0x38a   : > { %v10408_v60 = vadd.f32 %v11761_v11, %v4963_v10  ;;  %v10410_v6 = vadd.f32 %v5046_v31, %v4978_v5  ;;  %v10414_v17 = vadd.f32 %v11762_v26, %v10312_v57  ;;  %v4570_v8 = vadd.f32 %v11764_v52, %v4470_v35  ;;  %v4285_v20 = vld [vmem:[#allocation4 + $0x31] sm:$0xff]  ;;  %v11769_v33 = vld [vmem:[#allocation49_spill] sm:$0xff] }
 0x38b   : > { %v4569_v1 = vadd.f32 %v11763_v51, %v4469_v24  ;;  %v4767_v18 = vadd.f32 %v4735_v38, %v4667_v32  ;;  %v4934_v54 = vmul.f32 %v9664_v43, %v4301_v62  ;;  %v10420_v39 = vadd.f32 %v4835_v46, %v10330_v2  ;;  %v11765_v57 = vld [vmem:[#allocation76_spill] sm:$0xff]  ;;  %v4284_v49 = vld [vmem:[#allocation4 + $0x21] sm:$0xff] }
 0x38c   : > { %v10423_v31 = vmul.f32 %v10287_v23, %v4401_v14  ;;  %v4322_v50 = vmul.f32 %v9640_v61, %v4286_v0  ;;  %v10428_v36 = vadd.f32 %v11766_v55, %v11765_v57  ;;  %v10430_v10 = vadd.f32 %v4736_v12, %v4668_v58  ;;  %v4385_v2 = vld [vmem:[#allocation4 + $0x32] sm:$0xff]  ;;  %v4216_v24 = vld [vmem:[#allocation4 + $0x20] sm:$0xff] }
 0x38d   : > { %v10432_v59 = vadd.f32 %v4934_v54, %v4866_v28  ;;  %v4422_v62 = vmul.f32 %v9655_v19, %v4386_v15  ;;  %v10436_v13 = vmul.f32 %v9660_v22, %v4286_v0  ;;  %v10439_v3 = vmul.f32 %v9669_v44, %v4386_v15  ;;  %v4283_v35 = vld [vmem:[#allocation4 + $0x19] sm:$0xff] }
 0x38e   : > { %v4253_v14 = vmul.f32 %v11704_v37, %v4217_v34  ;;  %v4254_v4 = vmul.f32 %v11704_v37, %v4218_v40  ;;  %v4321_v56 = vmul.f32 %v9640_v61, %v4285_v20  ;;  %v10445_v12 = vadd.f32 %v11767_v9, %v4569_v1  ;;  %v4383_v11 = vld [vmem:[#allocation4 + $0x1a] sm:$0xff] }
 0x38f   : > { %v10448_v5 = vadd.f32 %v11768_v21, %v4570_v8  ;;  %v10451_v25 = vadd.f32 %v11769_v33, %v4767_v18  ;;  %v10454_v47 = vmul.f32 %v9664_v43, %v4286_v0  ;;  %v10457_v53 = vmul.f32 %v10287_v23, %v4386_v15  ;;  %v4384_v8 = vld [vmem:[#allocation4 + $0x22] sm:$0xff] }
 0x390   : > { %v4353_v38 = vadd.f32 %v4321_v56, %v4253_v14  ;;  %v4354_v46 = vadd.f32 %v4322_v50, %v4254_v4  ;;  %v4421_v7 = vmul.f32 %v9655_v19, %v4385_v2  ;;  %v4519_v32 = vmul.f32 %v11705_v45, %v4217_v34  ;;  %v11770_v14 = vld [vmem:[#allocation15_spill] sm:$0xff]  ;;  %v11771_v56 = vld [vmem:[#allocation41_spill] sm:$0xff] }
 0x391   : > { %v4520_v28 = vmul.f32 %v11705_v45, %v4218_v40  ;;  %v10463_v58 = vmul.f32 %v9660_v22, %v4285_v20  ;;  %v10466_v0 = vmul.f32 %v9669_v44, %v4385_v2  ;;  %v10469_v51 = vmul.f32 %v9662_v16, %v4217_v34 }
 0x392   : > { %v4453_v15 = vadd.f32 %v4421_v7, %v4353_v38  ;;  %v4454_v26 = vadd.f32 %v4422_v62, %v4354_v46  ;;  %v10472_v1 = vmul.f32 %v9662_v16, %v4218_v40  ;;  %v4320_v52 = vmul.f32 %v9640_v61, %v4284_v49  ;;  %v5240_v16 = vld [vmem:[#allocation5 + $0xf8] sm:$0xff]  ;;  %v11773_v38 = vld [vmem:[#allocation53_spill] sm:$0xff] }
 0x393   : > { %v4251_v18 = vmul.f32 %v11704_v37, %v4215_v48  ;;  %v4252_v54 = vmul.f32 %v11704_v37, %v4216_v24  ;;  %v4319_v50 = vmul.f32 %v9640_v61, %v4283_v35  ;;  %v10479_v57 = vmul.f32 %v9664_v43, %v4285_v20  ;;  %v5224_v40 = vld [vmem:[#allocation5 + $0x78] sm:$0xff]  ;;  %v5239_v7 = vld [vmem:[#allocation5 + $0xf0] sm:$0xff] }
 0x394   : > { %v4419_v55 = vmul.f32 %v9655_v19, %v4383_v11  ;;  %v4517_v34 = vmul.f32 %v11705_v45, %v4215_v48  ;;  %v4518_v62 = vmul.f32 %v11705_v45, %v4216_v24  ;;  %v4553_v4 = vadd.f32 %v11770_v14, %v4453_v15  ;;  %v11772_v43 = vld [vmem:[#allocation50_spill] sm:$0xff] }
 0x395   : > { %v4554_v9 = vadd.f32 %v11771_v56, %v4454_v26  ;;  %v4351_v21 = vadd.f32 %v4319_v50, %v4251_v18  ;;  %v4352_v33 = vadd.f32 %v4320_v52, %v4252_v54  ;;  %v10487_v37 = vmul.f32 %v10287_v23, %v4385_v2  ;;  %v5223_v26 = vld [vmem:[#allocation5 + $0x70] sm:$0xff]  ;;  %v5238_v2 = vld [vmem:[#allocation5 + $0xe8] sm:$0xff]  ;;  %v11776_v54 = vld [vmem:[#allocation43_spill] sm:$0xff] }
 0x396   : > { %v4420_v61 = vmul.f32 %v9655_v19, %v4384_v8  ;;  %v4549_v20 = vadd.f32 %v4517_v34, %v11772_v43  ;;  %v4550_v46 = vadd.f32 %v4518_v62, %v11773_v38  ;;  %v4618_v45 = vmul.f32 %v9660_v22, %v4284_v49  ;;  %v11777_v34 = vld [vmem:[#allocation30_spill] sm:$0xff] }
 0x397   : > { %v4451_v48 = vadd.f32 %v4419_v55, %v4351_v21  ;;  %v10493_v24 = vand.u32 4294901760, %v5240_v16  ;;  %v10495_v15 = vand.u32 4294901760, %v5224_v40  ;;  %v4718_v52 = vmul.f32 %v9669_v44, %v4384_v8  ;;  %v11781_v56 = vld [vmem:[#allocation34_spill] sm:$0xff] }
 0x398   : > { %v4452_v18 = vadd.f32 %v4420_v61, %v4352_v33  ;;  %v4617_v23 = vmul.f32 %v9660_v22, %v4283_v35  ;;  %v4717_v19 = vmul.f32 %v9669_v44, %v4383_v11  ;;  %v10501_v50 = vadd.f32 %v11776_v54, %v4553_v4  ;;  %v10513_v22 = vpop.permute.xlu1 %5171  ;;  %v11782_v33 = vld [vmem:[#allocation91_spill] sm:$0xff]  ;;  %v11783_v61 = vld [vmem:[#allocation72_spill] sm:$0xff] }
 0x399   : > { %11774 = vst [vmem:[#allocation25_spill] sm:$0xff] %v10493_v24  ;;  %11775 = vst [vmem:[#allocation13_spill] sm:$0xff] %v10495_v15  ;;  %v10504_v62 = vadd.f32 %v11777_v34, %v4554_v9  ;;  %6658 = vmatprep.subr.mxu0 %v10493_v24  ;;  %v10508_v49 = vsub.f32 %v5224_v40, %v10495_v15  ;;  %v10510_v55 = vand.u32 4294901760, %v5239_v7  ;;  %v10515_v44 = vand.u32 4294901760, %v5223_v26 }
 0x39a   : > { %v4649_v8 = vadd.f32 %v4617_v23, %v4549_v20  ;;  %v4650_v14 = vadd.f32 %v4618_v45, %v4550_v46  ;;  %6659 = vmatpush3.msra.mxu0 %v10495_v15  ;;  %v5102_v35 = vadd.f32 %v10351_v30, %v10408_v60  ;;  %v4551_v11 = vadd.f32 %v4519_v32, %v4451_v48  ;;  %v11785_v20 = vld [vmem:[#allocation93_spill] sm:$0xff] }
 0x39b   : > { %11778 = vst [vmem:[#allocation51_spill] sm:$0xff] %v10510_v55  ;;  %11779 = vst [vmem:[#allocation55_spill] sm:$0xff] %v10515_v44  ;;  %6660 = vmatprep.subr.mxu0 %v10510_v55  ;;  %v10520_v4 = vand.u32 4294901760, %v5238_v2  ;;  %v5117_v40 = vadd.f32 %v10351_v30, %v10410_v6  ;;  %v5062_v9 = vadd.f32 %v11781_v56, %v10404_v42  ;;  %v11374_v6 = vand.u32 4294901760, %v10508_v49  ;;  %v11788_v56 = vld [vmem:[#allocation74_spill] sm:$0xff] }
 0x39c   : > { %v10526_v21 = vadd.f32 %v4520_v28, %v4452_v18  ;;  %6661 = vmatpush3.msra.mxu0 %v10515_v44  ;;  %5134 = vst.msk [vmem:[#allocation5 + $0x68] sm:$0xff] %vm351_vm0, %v5102_v35  ;;  %v5077_v60 = vadd.f32 %v11782_v33, %v10414_v17  ;;  %v10533_v32 = vsub.f32 %v5240_v16, %v10493_v24  ;;  %v11784_v28 = vld [vmem:[#allocation92_spill] sm:$0xff]  ;;  %v11786_v18 = vld [vmem:[#allocation94_spill] sm:$0xff] }
 0x39d   : > { %11780 = vst [vmem:[#allocation52_spill] sm:$0xff] %v10520_v4  ;;  %v5061_v43 = vadd.f32 %v11783_v61, %v10428_v36  ;;  %6662 = vmatprep.subr.mxu0 %v10520_v4  ;;  %5149 = vst.msk [vmem:[#allocation5 + $0xe0] sm:$0xff] %vm351_vm0, %v5117_v40  ;;  %v5101_v42 = vadd.f32 %v10351_v30, %v5062_v9  ;;  %v4976_v38 = vadd.f32 %v11785_v20, %v11784_v28  ;;  %v11787_v40 = vld [vmem:[#allocation73_spill] sm:$0xff]  ;;  %v11790_v61 = vld [vmem:[#allocation84_spill] sm:$0xff] }
 0x39e   : > { %v10544_v46 = vsub.f32 %v5239_v7, %v10510_v55  ;;  %vm5174_vm14 = vcmp.eq.s32.totalorder %v10370_v27, %v10513_v22  ;;  %v10549_v17 = vsub.f32 %v5223_v26, %v10515_v44  ;;  %v5116_v36 = vadd.f32 %v10351_v30, %v5077_v60  ;;  %v10562_v26 = vpop.permute.xlu0 %5159  ;;  %v11789_v60 = vld [vmem:[#allocation89_spill] sm:$0xff] }
 0x39f   : > { %v11377_v16 = vand.u32 4294901760, %v10533_v32  ;;  %v5100_v45 = vadd.f32 %v10351_v30, %v5061_v43  ;;  %v10554_v48 = vadd.f32 %v4717_v19, %v4649_v8  ;;  %5133 = vst.msk [vmem:[#allocation5 + $0x60] sm:$0xff] %vm351_vm0, %v5101_v42  ;;  %v5357_v7 = vsub.f32 %v10508_v49, %v11374_v6  ;;  %v10571_v19 = vpop.permute.xlu1 %5165 }
 0x3a0   : > { %v5076_v23 = vadd.f32 %v11786_v18, %v4976_v38  ;;  %v11372_v54 = vand.u32 4294901760, %v10544_v46  ;;  %v10565_v34 = vadd.f32 %v10463_v58, %v4551_v11  ;;  %v10567_v35 = vadd.f32 %v4718_v52, %v4650_v14  ;;  %5148 = vst.msk [vmem:[#allocation5 + $0xd8] sm:$0xff] %vm351_vm0, %v5116_v36  ;;  %v11792_v38 = vld [vmem:[#allocation68_spill] sm:$0xff]  ;;  %v11793_v36 = vld [vmem:[#allocation63_spill] sm:$0xff] }
 0x3a1   : > { %vm5173_vm15 = vcmp.eq.s32.totalorder %v11758_v63, %v10513_v22  ;;  %v5469_v8 = vsub.f32 %v10533_v32, %v11377_v16  ;;  %5132 = vst.msk [vmem:[#allocation5 + $0x58] sm:$0xff] %vm351_vm0, %v5100_v45  ;;  %vm5161_vm2 = vcmp.eq.s32.totalorder %v11758_v63, %v10562_v26  ;;  %v5358_v58 = vand.u32 4294901760, %v5357_v7  ;;  %v11794_v7 = vld [vmem:[#allocation86_spill] sm:$0xff]  ;;  %v11795_v18 = vld [vmem:[#allocation87_spill] sm:$0xff] }
 0x3a2   : > { %v5115_v52 = vadd.f32 %v10351_v30, %v5076_v23  ;;  %v5476_v14 = vsub.f32 %v10544_v46, %v11372_v54  ;;  %vm5162_vm3 = vcmp.eq.s32.totalorder %v10370_v27, %v10562_v26  ;;  %v4960_v9 = vadd.f32 %v11788_v56, %v11787_v40  ;;  %v11797_v56 = vld [vmem:[#allocation75_spill] sm:$0xff] }
 0x3a3   : > { %v5470_v11 = vand.u32 4294901760, %v5469_v8  ;;  %v11373_v33 = vand.u32 4294901760, %v10549_v17  ;;  %v4975_v43 = vadd.f32 %v11790_v61, %v11789_v60  ;;  %v5222_v42 = vld [vmem:[#allocation5 + $0x68] sm:$0xff]  ;;  %v10593_v20 = vsub.f32 %v5238_v2, %v10520_v4  ;;  %v11810_v4 = vld [vmem:[#allocation78_spill] sm:$0xff] }
 0x3a4   : > { %5147 = vst.msk [vmem:[#allocation5 + $0xd0] sm:$0xff] %vm351_vm0, %v5115_v52  ;;  %v5477_v28 = vand.u32 4294901760, %v5476_v14  ;;  %v4959_v45 = vadd.f32 %v11793_v36, %v11792_v38  ;;  %v4974_v23 = vadd.f32 %v11795_v18, %v11794_v7  ;;  %v10599_v8 = vand.u32 4294901760, %v5222_v42  ;;  %v5237_v40 = vld [vmem:[#allocation5 + $0xe0] sm:$0xff]  ;;  %v11798_v14 = vld [vmem:[#allocation85_spill] sm:$0xff]  ;;  %v11800_v38 = vld [vmem:[#allocation64_spill] sm:$0xff] }
 0x3a5   : > { %11791 = vst [vmem:[#allocation35_spill] sm:$0xff] %v10593_v20  ;;  %6693 = vmatprep.subr.mxu1 %v5470_v11  ;;  %v5060_v54 = vadd.f32 %v11797_v56, %v4960_v9  ;;  %v5364_v52 = vsub.f32 %v10549_v17, %v11373_v33  ;;  %v5075_v60 = vadd.f32 %v11798_v14, %v4975_v43  ;;  %v10606_v2 = vand.u32 4294901760, %v5237_v40  ;;  %v11801_v7 = vld [vmem:[#allocation88_spill] sm:$0xff]  ;;  %v10615_v56 = vpop.permute.xlu1 %5184  ;;  %v5177_v33 = vpop.permute.xlu0 %5176 }
 0x3a6   : > { %11796 = vst [vmem:[#allocation54_spill] sm:$0xff] %v10599_v8  ;;  %6694 = vmatpush3.msra.mxu1 %v5358_v58  ;;  %v11375_v61 = vand.u32 4294901760, %v10593_v20  ;;  %v5059_v36 = vadd.f32 %v11800_v38, %v4959_v45  ;;  %v5074_v18 = vadd.f32 %v11801_v7, %v4974_v23  ;;  %6663 = vmatpush3.msra.mxu0 %v10599_v8  ;;  %v5221_v9 = vld [vmem:[#allocation5 + $0x60] sm:$0xff] }
 0x3a7   : > { %11799 = vst [vmem:[#allocation36_spill] sm:$0xff] %v10606_v2  ;;  %v10613_v11 = vsub.f32 %v5222_v42, %v10599_v8  ;;  %6695 = vmatprep.subr.mxu1 %v5477_v28  ;;  %v5099_v43 = vadd.f32 %v10351_v30, %v5060_v54  ;;  %v5365_v14 = vand.u32 4294901760, %v5364_v52  ;;  %v5114_v58 = vadd.f32 %v10351_v30, %v5075_v60  ;;  %v5236_v23 = vld [vmem:[#allocation5 + $0xd8] sm:$0xff] }
 0x3a8   : > { %6664 = vmatprep.subr.mxu0 %v10606_v2  ;;  %v10620_v45 = vand.u32 4294901760, %v5221_v9  ;;  %v5220_v38 = vld [vmem:[#allocation5 + $0x58] sm:$0xff]  ;;  %v5483_v42 = vsub.f32 %v10593_v20, %v11375_v61  ;;  %v5098_v28 = vadd.f32 %v10351_v30, %v5059_v36  ;;  %v5113_v7 = vadd.f32 %v10351_v30, %v5074_v18 }
 0x3a9   : > { %11802 = vst [vmem:[#allocation56_spill] sm:$0xff] %v10613_v11  ;;  %v10627_v6 = vand.u32 4294901760, %v5236_v23  ;;  %v10629_v54 = vand.u32 4294901760, %v5220_v38  ;;  %5131 = vst.msk [vmem:[#allocation5 + $0x50] sm:$0xff] %vm351_vm0, %v5099_v43  ;;  %6696 = vmatpush3.msra.mxu1 %v5365_v14  ;;  %v11376_v52 = vand.u32 4294901760, %v10613_v11  ;;  %v10635_v60 = vsub.f32 %v5237_v40, %v10606_v2  ;;  %v11808_v2 = vld [vmem:[#allocation65_spill] sm:$0xff] }
 0x3aa   : > { %11803 = vst [vmem:[#allocation14_spill] sm:$0xff] %v10620_v45  ;;  %5146 = vst.msk [vmem:[#allocation5 + $0xc8] sm:$0xff] %vm351_vm0, %v5114_v58  ;;  %6665 = vmatpush3.msra.mxu0 %v10620_v45  ;;  %v10639_v36 = vsub.f32 %v5221_v9, %v10620_v45  ;;  %v5169_v18 = vsel %vm5162_vm3, %v10571_v19, 0.0  ;;  %v5484_v61 = vand.u32 4294901760, %v5483_v42  ;;  %v5180_v40 = vsel %vm5174_vm14, %v5177_v33, 0.0  ;;  %v11807_v45 = vld [vmem:[#allocation67_spill] sm:$0xff] }
 0x3ab   : > { %11804 = vst [vmem:[#allocation12_spill] sm:$0xff] %v10627_v6  ;;  %11805 = vst [vmem:[#allocation19_spill] sm:$0xff] %v10629_v54  ;;  %6666 = vmatprep.subr.mxu0 %v10627_v6  ;;  %v10652_v43 = vsub.f32 %v5220_v38, %v10629_v54  ;;  %v5235_v9 = vld [vmem:[#allocation5 + $0xd0] sm:$0xff]  ;;  %vm5187_vm4 = vcmp.eq.s32.totalorder %v10370_v27, %v10615_v56  ;;  %v5371_v14 = vsub.f32 %v10613_v11, %v11376_v52 }
 0x3ac   : > { %11806 = vst [vmem:[#allocation90_spill] sm:$0xff] %v10635_v60  ;;  %5130 = vst.msk [vmem:[#allocation5 + $0x48] sm:$0xff] %vm351_vm0, %v5098_v28  ;;  %v11390_v58 = vand.u32 4294901760, %v10635_v60  ;;  %6667 = vmatpush3.msra.mxu0 %v10629_v54  ;;  %v10661_v42 = vand.u32 4294901760, %v5235_v9  ;;  %v5168_v38 = vsel %vm5161_vm2, %v10571_v19, 0.0  ;;  %vm5186_vm5 = vcmp.eq.s32.totalorder %v11758_v63, %v10615_v56  ;;  %6697 = vmatprep.subr.mxu1 %v5484_v61  ;;  %v5190_v54 = vpop.permute.xlu1 %5189  ;;  %v11809_v61 = vld [vmem:[#allocation82_spill] sm:$0xff] }
 0x3ad   : > { %5145 = vst.msk [vmem:[#allocation5 + $0xc0] sm:$0xff] %vm351_vm0, %v5113_v7  ;;  %v5179_v28 = vsel %vm5173_vm15, %v5177_v33, 0.0  ;;  %v5372_v7 = vand.u32 4294901760, %v5371_v14  ;;  %v5182_v16 = vadd.f32 %v5180_v40, %v5169_v18  ;;  %v4958_v8 = vadd.f32 %v11808_v2, %v11807_v45  ;;  %v11811_v14 = vld [vmem:[#allocation66_spill] sm:$0xff]  ;;  %v11813_v40 = vld [vmem:[#allocation59_spill] sm:$0xff]  ;;  %v11817_v2 = vld [vmem:[#allocation61_spill] sm:$0xff] }
 0x3ae   : > { %v5490_v52 = vsub.f32 %v10635_v60, %v11390_v58  ;;  %6668 = vmatprep.subr.mxu0 %v10661_v42  ;;  %v5193_v26 = vsel %vm5187_vm4, %v5190_v54, 0.0  ;;  %v11405_v19 = vand.u32 4294901760, %v10639_v36  ;;  %v4973_v44 = vadd.f32 %v11810_v4, %v11809_v61  ;;  %v11812_v18 = vld [vmem:[#allocation62_spill] sm:$0xff]  ;;  %v11814_v60 = vld [vmem:[#allocation79_spill] sm:$0xff]  ;;  %v11815_v61 = vld [vmem:[#allocation80_spill] sm:$0xff] }
 0x3af   : > { %v10682_v22 = vsub.f32 %v5236_v23, %v10627_v6  ;;  %6698 = vmatpush3.msra.mxu1 %v5372_v7  ;;  %v5058_v58 = vadd.f32 %v11811_v14, %v4958_v8  ;;  %v4957_v55 = vadd.f32 %v11813_v40, %v11812_v18  ;;  %v11816_v7 = vld [vmem:[#allocation81_spill] sm:$0xff]  ;;  %v5195_v18 = vadd.f32 %v5193_v26, %v5182_v16  ;;  %v5198_v23 = vpop.permute.xlu0 %5197  ;;  %v11823_v56 = vld [vmem:[#allocation58_spill] sm:$0xff] }
 0x3b0   : > { %v5491_v33 = vand.u32 4294901760, %v5490_v52  ;;  %v5219_v45 = vld [vmem:[#allocation5 + $0x50] sm:$0xff]  ;;  %v5378_v24 = vsub.f32 %v10639_v36, %v11405_v19  ;;  %v5073_v4 = vadd.f32 %v11814_v60, %v4973_v44  ;;  %v4972_v52 = vadd.f32 %v11816_v7, %v11815_v61 }
 0x3b1   : > { %v5234_v15 = vld [vmem:[#allocation5 + $0xc8] sm:$0xff]  ;;  %v10695_v6 = vand.u32 4294901760, %v5219_v45  ;;  %v5097_v40 = vadd.f32 %v10351_v30, %v5058_v58  ;;  %v5057_v11 = vadd.f32 %v11817_v2, %v4957_v55  ;;  %v11819_v16 = vand.u32 4294901760, %v10682_v22 }
 0x3b2   : > { %6699 = vmatprep.subr.mxu1 %v5491_v33  ;;  %v10701_v20 = vand.u32 4294901760, %v5234_v15  ;;  %v5379_v44 = vand.u32 4294901760, %v5378_v24  ;;  %v5112_v60 = vadd.f32 %v10351_v30, %v5073_v4  ;;  %v11820_v26 = vand.u32 4294901760, %v10652_v43  ;;  %v5203_v33 = vpop.permute.xlu1 %5202  ;;  %v11821_v4 = vld [vmem:[#allocation83_spill] sm:$0xff] }
 0x3b3   : > { %v5218_v8 = vld [vmem:[#allocation5 + $0x48] sm:$0xff]  ;;  %6669 = vmatpush3.msra.mxu0 %v10695_v6  ;;  %v10708_v61 = vsub.f32 %v5219_v45, %v10695_v6  ;;  %5129 = vst.msk [vmem:[#allocation5 + $0x40] sm:$0xff] %vm351_vm0, %v5097_v40  ;;  %v5497_v58 = vsub.f32 %v10682_v22, %v11819_v16  ;;  %v5096_v55 = vadd.f32 %v10351_v30, %v5057_v11 }
 0x3b4   : > { %v10697_v14 = vld [vmem:[#allocation5 + $0xc0] sm:$0xff]  ;;  %v10703_v19 = vand.u32 4294901760, %v5218_v8  ;;  %v5385_v24 = vsub.f32 %v10652_v43, %v11820_v26  ;;  %v10720_v2 = vadd.f32 %v10436_v13, %v10526_v21  ;;  %6670 = vmatprep.subr.mxu0 %v10701_v20  ;;  %6700 = vmatpush3.msra.mxu1 %v5379_v44  ;;  %5144 = vst.msk [vmem:[#allocation5 + $0xb8] sm:$0xff] %vm351_vm0, %v5112_v60  ;;  %v5192_v13 = vsel %vm5186_vm5, %v5190_v54, 0.0 }
 0x3b5   : > { %v10724_v45 = vand.u32 4294901760, %v10697_v14  ;;  %v5072_v7 = vadd.f32 %v11821_v4, %v4972_v52  ;;  %v10729_v11 = vsub.f32 %v5235_v9, %v10661_v42  ;;  %v5181_v40 = vadd.f32 %v5179_v28, %v5168_v38  ;;  %5128 = vst.msk [vmem:[#allocation5 + $0x38] sm:$0xff] %vm351_vm0, %v5096_v55  ;;  %v11822_v28 = vld [vmem:[#allocation57_spill] sm:$0xff] }
 0x3b6   : > { %11818 = vst [vmem:[#allocation23_spill] sm:$0xff] %v10703_v19  ;;  %6671 = vmatpush3.msra.mxu0 %v10703_v19  ;;  %v5498_v21 = vand.u32 4294901760, %v5497_v58  ;;  %vm5200_vm6 = vcmp.eq.s32.totalorder %v10370_v27, %v5198_v23  ;;  %v5386_v44 = vand.u32 4294901760, %v5385_v24  ;;  %vm5199_vm7 = vcmp.eq.s32.totalorder %v11758_v63, %v5198_v23  ;;  %v11824_v58 = vld [vmem:[#allocation39_spill] sm:$0xff] }
 0x3b7   : > { %6672 = vmatprep.subr.mxu0 %v10724_v45  ;;  %v5111_v52 = vadd.f32 %v10351_v30, %v5072_v7  ;;  %v11406_v9 = vand.u32 4294901760, %v10729_v11  ;;  %v5206_v60 = vsel %vm5200_vm6, %v5203_v33, 0.0  ;;  %v4956_v54 = vadd.f32 %v11823_v56, %v11822_v28 }
 0x3b8   : > { %6701 = vmatprep.subr.mxu1 %v5498_v21  ;;  %v5208_v38 = vadd.f32 %v5206_v60, %v5195_v18  ;;  %v11409_v16 = vand.u32 4294901760, %v10708_v61  ;;  %v4770_v55 = vadd.f32 %v11824_v58, %v10448_v5  ;;  %v10751_v26 = vsub.f32 %v5234_v15, %v10701_v20  ;;  %v11825_v18 = vld [vmem:[#allocation9_spill] sm:$0xff]  ;;  %v11828_v21 = vld [vmem:[#allocation60_spill] sm:$0xff]  ;;  %v11829_v5 = vld [vmem:[#allocation22_spill] sm:$0xff] }
 0x3b9   : > { %6702 = vmatpush3.msra.mxu1 %v5386_v44  ;;  %5143 = vst.msk [vmem:[#allocation5 + $0xb0] sm:$0xff] %vm351_vm0, %v5111_v52  ;;  %v5504_v27 = vsub.f32 %v10729_v11, %v11406_v9  ;;  %v4754_v24 = vadd.f32 %v11825_v18, %v10504_v62  ;;  %v10756_v4 = vsub.f32 %v5218_v8, %v10703_v19  ;;  %v11830_v58 = vld [vmem:[#allocation32_spill] sm:$0xff]  ;;  %v5205_v19 = vsel %vm5199_vm7, %v5203_v33, 0.0  ;;  %v11832_v33 = vld [vmem:[#allocation17_spill] sm:$0xff] }
 0x3ba   : > { %v10758_v7 = vand.u32 4294901760, %v5208_v38  ;;  %v5056_v44 = vadd.f32 %v11828_v21, %v4956_v54  ;;  %v5392_v52 = vsub.f32 %v10708_v61, %v11409_v16  ;;  %v5217_v60 = vld [vmem:[#allocation5 + $0x40] sm:$0xff]  ;;  %v4871_v56 = vadd.f32 %v11829_v5, %v4770_v55  ;;  %v11831_v5 = vld [vmem:[#allocation70_spill] sm:$0xff] }
 0x3bb   : > { %11826 = vst [vmem:[#allocation26_spill] sm:$0xff] %v10756_v4  ;;  %v5505_v28 = vand.u32 4294901760, %v5504_v27  ;;  %v11412_v15 = vand.u32 4294901760, %v10751_v26  ;;  %v4855_v9 = vadd.f32 %v11830_v58, %v4754_v24  ;;  %v5194_v62 = vadd.f32 %v5192_v13, %v5181_v40  ;;  %v5232_v8 = vld [vmem:[#allocation5 + $0xb8] sm:$0xff] }
 0x3bc   : > { %11827 = vst [vmem:[#allocation76_spill] sm:$0xff] %v10758_v7  ;;  %v10767_v18 = vand.u32 4294901760, %v5217_v60  ;;  %v5095_v54 = vadd.f32 %v10351_v30, %v5056_v44  ;;  %5578 = vmatprep.mubr.f32.mxu1 %v10758_v7  ;;  %v10773_v21 = vand.u32 4294901760, %v5232_v8  ;;  %v5216_v27 = vld [vmem:[#allocation5 + $0x38] sm:$0xff]  ;;  %v5393_v55 = vand.u32 4294901760, %v5392_v52 }
 0x3bd   : > { %6703 = vmatprep.subr.mxu1 %v5505_v28  ;;  %v4971_v16 = vadd.f32 %v11831_v5, %v4871_v56  ;;  %v5511_v40 = vsub.f32 %v10751_v26, %v11412_v15  ;;  %v10781_v13 = vadd.f32 %v10469_v51, %v10554_v48  ;;  %v10787_v23 = vand.u32 4294901760, %v5216_v27  ;;  %v11833_v44 = vld [vmem:[#allocation38_spill] sm:$0xff] }
 0x3be   : > { %6673 = vmatpush3.msra.mxu0 %v10767_v18  ;;  %v10785_v63 = vsub.f32 %v5217_v60, %v10767_v18  ;;  %5127 = vst.msk [vmem:[#allocation5 + $0x30] sm:$0xff] %vm351_vm0, %v5095_v54  ;;  %v4955_v24 = vadd.f32 %v11832_v33, %v4855_v9  ;;  %6704 = vmatpush3.msra.mxu1 %v5393_v55  ;;  %v11411_v51 = vand.u32 4294901760, %v10756_v4  ;;  %v11834_v48 = vld [vmem:[#allocation46_spill] sm:$0xff] }
 0x3bf   : > { %6674 = vmatprep.subr.mxu0 %v10773_v21  ;;  %v5071_v52 = vadd.f32 %v11833_v44, %v4971_v16  ;;  %v5512_v28 = vand.u32 4294901760, %v5511_v40  ;;  %v4769_v56 = vadd.f32 %v11834_v48, %v10445_v12  ;;  %v10798_v60 = vsub.f32 %v5216_v27, %v10787_v23  ;;  %v11836_v9 = vld [vmem:[#allocation18_spill] sm:$0xff] }
 0x3c0   : > { %6675 = vmatpush3.msra.mxu0 %v10787_v23  ;;  %v5231_v58 = vld [vmem:[#allocation5 + $0xb0] sm:$0xff]  ;;  %v10800_v54 = vadd.f32 %v5205_v19, %v5194_v62  ;;  %v5055_v5 = vadd.f32 %v11836_v9, %v4955_v24  ;;  %v10805_v55 = vsub.f32 %v10697_v14, %v10724_v45  ;;  %v5399_v12 = vsub.f32 %v10756_v4, %v11411_v51  ;;  %v11837_v27 = vld [vmem:[#allocation10_spill] sm:$0xff]  ;;  %v11838_v14 = vld [vmem:[#allocation40_spill] sm:$0xff] }
 0x3c1   : > { %11835 = vst [vmem:[#allocation71_spill] sm:$0xff] %v10798_v60  ;;  %v10807_v16 = vand.u32 4294901760, %v5231_v58  ;;  %v5110_v40 = vadd.f32 %v10351_v30, %v5071_v52  ;;  %6705 = vmatprep.subr.mxu1 %v5512_v28  ;;  %v4870_v33 = vadd.f32 %v11837_v27, %v4769_v56  ;;  %v10815_v19 = vsub.f32 %v5208_v38, %v10758_v7  ;;  %v11839_v28 = vld [vmem:[#allocation11_spill] sm:$0xff]  ;;  %v11840_v56 = vld [vmem:[#allocation69_spill] sm:$0xff] }
 0x3c2   : > { %v5094_v62 = vadd.f32 %v10351_v30, %v5055_v5  ;;  %v11410_v24 = vand.u32 4294901760, %v10805_v55  ;;  %v4753_v44 = vadd.f32 %v11838_v14, %v10501_v50  ;;  %v5400_v52 = vand.u32 4294901760, %v5399_v12  ;;  %v11841_v27 = vld [vmem:[#allocation31_spill] sm:$0xff] }
 0x3c3   : > { %6676 = vmatprep.subr.mxu0 %v10807_v16  ;;  %5142 = vst.msk [vmem:[#allocation5 + $0xa8] sm:$0xff] %vm351_vm0, %v5110_v40  ;;  %v4970_v48 = vadd.f32 %v11839_v28, %v4870_v33  ;;  %v11415_v9 = vand.u32 4294901760, %v10785_v63  ;;  %v4869_v38 = vadd.f32 %v11840_v56, %v10430_v10  ;;  %v10833_v14 = vsub.f32 %v5232_v8, %v10773_v21  ;;  %v11842_v33 = vld [vmem:[#allocation77_spill] sm:$0xff]  ;;  %v11844_v8 = vld [vmem:[#allocation48_spill] sm:$0xff] }
 0x3c4   : > { %5126 = vst.msk [vmem:[#allocation5 + $0x28] sm:$0xff] %vm351_vm0, %v5094_v62  ;;  %v5518_v5 = vsub.f32 %v10805_v55, %v11410_v24  ;;  %v4854_v50 = vadd.f32 %v11841_v27, %v4753_v44  ;;  %6706 = vmatpush3.msra.mxu1 %v5400_v52  ;;  %v11843_v62 = vld [vmem:[#allocation21_spill] sm:$0xff]  ;;  %v4752_v24 = vadd.f32 %v10439_v3, %v10720_v2  ;;  %v11846_v7 = vand.u32 4294901760, %v10798_v60 }
 0x3c5   : > { %v5215_v12 = vld [vmem:[#allocation5 + $0x30] sm:$0xff]  ;;  %v5070_v28 = vadd.f32 %v11842_v33, %v4970_v48  ;;  %v5406_v10 = vsub.f32 %v10785_v63, %v11415_v9  ;;  %v4969_v56 = vadd.f32 %v11843_v62, %v4869_v38  ;;  %v11416_v15 = vand.u32 4294901760, %v10833_v14  ;;  %v11845_v48 = vld [vmem:[#allocation20_spill] sm:$0xff] }
 0x3c6   : > { %v10843_v51 = vand.u32 4294901760, %v5215_v12  ;;  %v5519_v44 = vand.u32 4294901760, %v5518_v5  ;;  %v4954_v27 = vadd.f32 %v11844_v8, %v4854_v50  ;;  %v5413_v9 = vsub.f32 %v10798_v60, %v11846_v7  ;;  %v11848_v2 = vld [vmem:[#allocation33_spill] sm:$0xff] }
 0x3c7   : > { %v5109_v52 = vadd.f32 %v10351_v30, %v5070_v28  ;;  %v5407_v40 = vand.u32 4294901760, %v5406_v10  ;;  %v5069_v33 = vadd.f32 %v11845_v48, %v4969_v56  ;;  %v10853_v38 = vand.u32 4294901760, %v10800_v54  ;;  %v11849_v10 = vld [vmem:[#allocation16_spill] sm:$0xff] }
 0x3c8   : > { %6677 = vmatpush3.msra.mxu0 %v10843_v51  ;;  %v10857_v3 = vsub.f32 %v5215_v12, %v10843_v51  ;;  %6707 = vmatprep.subr.mxu1 %v5519_v44  ;;  %v5054_v5 = vadd.f32 %v11848_v2, %v4954_v27  ;;  %v5525_v50 = vsub.f32 %v10833_v14, %v11416_v15  ;;  %v5414_v28 = vand.u32 4294901760, %v5413_v9  ;;  %v11850_v27 = vld [vmem:[#allocation27_spill] sm:$0xff]  ;;  %v11851_v9 = vld [vmem:[#allocation44_spill] sm:$0xff] }
 0x3c9   : > { %11847 = vst [vmem:[#allocation28_spill] sm:$0xff] %v10853_v38  ;;  %5141 = vst.msk [vmem:[#allocation5 + $0xa0] sm:$0xff] %vm351_vm0, %v5109_v52  ;;  %6708 = vmatpush3.msra.mxu1 %v5407_v40  ;;  %v5108_v7 = vadd.f32 %v10351_v30, %v5069_v33  ;;  %v4853_v62 = vadd.f32 %v11849_v10, %v4752_v24  ;;  %v10867_v56 = vsub.f32 %v5231_v58, %v10807_v16  ;;  %v11854_v10 = vld [vmem:[#allocation47_spill] sm:$0xff] }
 0x3ca   : > { %v5230_v12 = vld [vmem:[#allocation5 + $0xa8] sm:$0xff]  ;;  %v5093_v44 = vadd.f32 %v10351_v30, %v5054_v5  ;;  %v5526_v8 = vand.u32 4294901760, %v5525_v50  ;;  %v4968_v48 = vadd.f32 %v11850_v27, %v10451_v25  ;;  %v11422_v2 = vand.u32 4294901760, %v10857_v3 }
 0x3cb   : > { %v10873_v15 = vand.u32 4294901760, %v5230_v12  ;;  %v5214_v40 = vld [vmem:[#allocation5 + $0x28] sm:$0xff]  ;;  %5140 = vst.msk [vmem:[#allocation5 + $0x98] sm:$0xff] %vm351_vm0, %v5108_v7  ;;  %v4953_v52 = vadd.f32 %v11851_v9, %v4853_v62  ;;  %v11424_v24 = vand.u32 4294901760, %v10867_v56  ;;  %v4751_v58 = vadd.f32 %v10466_v0, %v10565_v34  ;;  %v11855_v34 = vld [vmem:[#allocation29_spill] sm:$0xff] }
 0x3cc   : > { %v10880_v33 = vand.u32 4294901760, %v5214_v40  ;;  %5125 = vst.msk [vmem:[#allocation5 + $0x20] sm:$0xff] %vm351_vm0, %v5093_v44  ;;  %6709 = vmatprep.subr.mxu1 %v5526_v8  ;;  %v11853_v25 = vld [vmem:[#allocation24_spill] sm:$0xff]  ;;  %v5420_v50 = vsub.f32 %v10857_v3, %v11422_v2  ;;  %v4967_v7 = vadd.f32 %v10380_v41, %v10420_v39  ;;  %v11427_v8 = vand.u32 4294901760, %v10815_v19 }
 0x3cd   : > { %v5068_v5 = vadd.f32 %v11853_v25, %v4968_v48  ;;  %6678 = vmatprep.subr.mxu0 %v10873_v15  ;;  %6710 = vmatpush3.msra.mxu1 %v5414_v28  ;;  %v5053_v62 = vadd.f32 %v11854_v10, %v4953_v52  ;;  %v5532_v0 = vsub.f32 %v10867_v56, %v11424_v24  ;;  %v11856_v52 = vld [vmem:[#allocation42_spill] sm:$0xff] }
 0x3ce   : > { %11852 = vst [vmem:[#allocation37_spill] sm:$0xff] %v10880_v33  ;;  %v4852_v44 = vadd.f32 %v11855_v34, %v4751_v58  ;;  %6679 = vmatpush3.msra.mxu0 %v10880_v33  ;;  %v10898_v27 = vsub.f32 %v5214_v40, %v10880_v33  ;;  %v5421_v39 = vand.u32 4294901760, %v5420_v50  ;;  %v10902_v28 = vsub.f32 %v5230_v12, %v10873_v15 }
 0x3cf   : > { %v5107_v41 = vadd.f32 %v10351_v30, %v5068_v5  ;;  %v5092_v48 = vadd.f32 %v10351_v30, %v5053_v62  ;;  %v5533_v9 = vand.u32 4294901760, %v5532_v0  ;;  %v5067_v58 = vadd.f32 %v10383_v29, %v4967_v7  ;;  %v11857_v62 = vld [vmem:[#allocation45_spill] sm:$0xff] }
 0x3d0   : > { %v4952_v25 = vadd.f32 %v11856_v52, %v4852_v44  ;;  %v5229_v10 = vld [vmem:[#allocation5 + $0xa0] sm:$0xff]  ;;  %v11421_v34 = vand.u32 4294901760, %v10902_v28  ;;  %v11420_v40 = vand.u32 4294901760, %v10898_v27  ;;  %v4851_v5 = vadd.f32 %v10472_v1, %v10567_v35 }
 0x3d1   : > { %5139 = vst.msk [vmem:[#allocation5 + $0x90] sm:$0xff] %vm351_vm0, %v5107_v41  ;;  %v5066_v12 = vadd.f32 %v10423_v31, %v10432_v59  ;;  %v10914_v50 = vand.u32 4294901760, %v5229_v10  ;;  %5124 = vst.msk [vmem:[#allocation5 + $0x18] sm:$0xff] %vm351_vm0, %v5092_v48  ;;  %6711 = vmatprep.subr.mxu1 %v5533_v9  ;;  %v5106_v7 = vadd.f32 %v10351_v30, %v5067_v58 }
 0x3d2   : > { %v5052_v29 = vadd.f32 %v11857_v62, %v4952_v25  ;;  %v4950_v0 = vadd.f32 %v10479_v57, %v10781_v13  ;;  %v5228_v44 = vld [vmem:[#allocation5 + $0x98] sm:$0xff]  ;;  %6712 = vmatpush3.msra.mxu1 %v5421_v39  ;;  %v5539_v1 = vsub.f32 %v10902_v28, %v11421_v34  ;;  %v5427_v31 = vsub.f32 %v10898_v27, %v11420_v40 }
 0x3d3   : > { %v4951_v59 = vadd.f32 %v10454_v47, %v4851_v5  ;;  %v5105_v35 = vadd.f32 %v10351_v30, %v5066_v12  ;;  %6680 = vmatprep.subr.mxu0 %v10914_v50  ;;  %v5213_v41 = vld [vmem:[#allocation5 + $0x20] sm:$0xff]  ;;  %v10930_v48 = vand.u32 4294901760, %v5228_v44  ;;  %5138 = vst.msk [vmem:[#allocation5 + $0x88] sm:$0xff] %vm351_vm0, %v5106_v7  ;;  %v10935_v13 = vsub.f32 %v5229_v10, %v10914_v50 }
 0x3d4   : > { %v5091_v57 = vadd.f32 %v10351_v30, %v5052_v29  ;;  %v5050_v39 = vadd.f32 %v10487_v37, %v4950_v0  ;;  %v10938_v9 = vand.u32 4294901760, %v5213_v41  ;;  %v5540_v52 = vand.u32 4294901760, %v5539_v1 }
 0x3d5   : > { %11858 = vst [vmem:[#allocation49_spill] sm:$0xff] %v10930_v48  ;;  %v5428_v47 = vand.u32 4294901760, %v5427_v31  ;;  %v5051_v25 = vadd.f32 %v10457_v53, %v4951_v59  ;;  %5137 = vst.msk [vmem:[#allocation5 + $0x80] sm:$0xff] %vm351_vm0, %v5105_v35  ;;  %v11419_v58 = vand.u32 4294901760, %v10935_v13  ;;  %v10946_v12 = vsub.f32 %v5228_v44, %v10930_v48 }
 0x3d6   : > { %11859 = vst [vmem:[#allocation15_spill] sm:$0xff] %v10938_v9  ;;  %5123 = vst.msk [vmem:[#allocation5 + $0x10] sm:$0xff] %vm351_vm0, %v5091_v57  ;;  %v5089_v5 = vadd.f32 %v10351_v30, %v5050_v39  ;;  %v5340_v37 = vsub.f32 %v10815_v19, %v11427_v8  ;;  %v10953_v10 = vsub.f32 %v10800_v54, %v10853_v38  ;;  %6681 = vmatpush3.msra.mxu0 %v10938_v9 }
 0x3d7   : > { %v10957_v53 = vsub.f32 %v5213_v41, %v10938_v9  ;;  %6713 = vmatprep.subr.mxu1 %v5540_v52  ;;  %v5090_v62 = vadd.f32 %v10351_v30, %v5051_v25  ;;  %6682 = vmatprep.subr.mxu0 %v10930_v48  ;;  %v5546_v7 = vsub.f32 %v10935_v13, %v11419_v58  ;;  %v11417_v54 = vand.u32 4294901760, %v10946_v12 }
 0x3d8   : > { %v5227_v29 = vld [vmem:[#allocation5 + $0x90] sm:$0xff]  ;;  %6714 = vmatpush3.msra.mxu1 %v5428_v47  ;;  %5121 = vst.msk [vmem:[#allocation5] sm:$0xff] %vm351_vm0, %v5089_v5  ;;  %v5341_v0 = vand.u32 4294901760, %v5340_v37  ;;  %v5212_v44 = vld [vmem:[#allocation5 + $0x18] sm:$0xff]  ;;  %v11425_v41 = vand.u32 4294901760, %v10953_v10 }
 0x3d9   : > { %v10966_v1 = vand.u32 4294901760, %v5227_v29  ;;  %5122 = vst.msk [vmem:[#allocation5 + $0x8] sm:$0xff] %vm351_vm0, %v5090_v62  ;;  %v11418_v30 = vand.u32 4294901760, %v10957_v53  ;;  %v10970_v31 = vand.u32 4294901760, %v5212_v44  ;;  %v5547_v59 = vand.u32 4294901760, %v5546_v7 }
 0x3da   : > { %v5553_v35 = vsub.f32 %v10946_v12, %v11417_v54  ;;  %5342 = vmatprep.mubr.f32.mxu0 %v5341_v0  ;;  %v5226_v57 = vld [vmem:[#allocation5 + $0x88] sm:$0xff] }
 0x3db   : > { %v5434_v39 = vsub.f32 %v10957_v53, %v11418_v30  ;;  %v10980_v52 = vsub.f32 %v5227_v29, %v10966_v1  ;;  %6683 = vmatpush3.msra.mxu0 %v10970_v31  ;;  %v10984_v47 = vsub.f32 %v5212_v44, %v10970_v31  ;;  %v10986_v25 = vand.u32 4294901760, %v5226_v57  ;;  %6715 = vmatprep.subr.mxu1 %v5547_v59 }
 0x3dc   : > { %v5225_v5 = vld [vmem:[#allocation5 + $0x80] sm:$0xff]  ;;  %6684 = vmatprep.subr.mxu0 %v10966_v1  ;;  %v5554_v29 = vand.u32 4294901760, %v5553_v35  ;;  %v5346_v59 = vsub.f32 %v10953_v10, %v11425_v41 }
 0x3dd   : > { %11860 = vst [vmem:[#allocation41_spill] sm:$0xff] %v10986_v25  ;;  %v5211_v37 = vld [vmem:[#allocation5 + $0x10] sm:$0xff]  ;;  %v10989_v62 = vand.u32 4294901760, %v5225_v5  ;;  %v5435_v7 = vand.u32 4294901760, %v5434_v39  ;;  %v11423_v0 = vand.u32 4294901760, %v10980_v52  ;;  %v11426_v30 = vand.u32 4294901760, %v10984_v47 }
 0x3de   : > { %v10992_v54 = vand.u32 4294901760, %v5211_v37  ;;  %v10996_v44 = vsub.f32 %v5226_v57, %v10986_v25 }
 0x3df   : > { %6716 = vmatpush3.msra.mxu1 %v5435_v7  ;;  %v5209_v58 = vld [vmem:[#allocation5] sm:$0xff]  ;;  %v5560_v39 = vsub.f32 %v10980_v52, %v11423_v0  ;;  %v11005_v40 = vsub.f32 %v5225_v5, %v10989_v62  ;;  %v5441_v7 = vsub.f32 %v10984_v47, %v11426_v30 }
 0x3e0   : > { %6685 = vmatpush3.msra.mxu0 %v10992_v54  ;;  %v11009_v35 = vsub.f32 %v5211_v37, %v10992_v54  ;;  %v5210_v57 = vld [vmem:[#allocation5 + $0x8] sm:$0xff]  ;;  %v11011_v34 = vand.u32 4294901760, %v5209_v58  ;;  %6717 = vmatprep.subr.mxu1 %v5554_v29  ;;  %v11430_v2 = vand.u32 4294901760, %v10996_v44 }
 0x3e1   : > { %6686 = vmatprep.subr.mxu0 %v10986_v25  ;;  %v11018_v0 = vand.u32 4294901760, %v5210_v57  ;;  %v5442_v24 = vand.u32 4294901760, %v5441_v7  ;;  %v11431_v41 = vand.u32 4294901760, %v11005_v40  ;;  %v5561_v30 = vand.u32 4294901760, %v5560_v39 }
 0x3e2   : > { %v11021_v5 = vsub.f32 %v5209_v58, %v11011_v34  ;;  %v11433_v37 = vand.u32 4294901760, %v11009_v35  ;;  %v5567_v8 = vsub.f32 %v10996_v44, %v11430_v2  ;;  %v5347_v25 = vand.u32 4294901760, %v5346_v59 }
 0x3e3   : > { %6687 = vmatpush3.msra.mxu0 %v11018_v0  ;;  %v11027_v29 = vsub.f32 %v5210_v57, %v11018_v0  ;;  %6718 = vmatpush3.msra.mxu1 %v5442_v24  ;;  %v5574_v59 = vsub.f32 %v11005_v40, %v11431_v41  ;;  %v11863_v41 = vld [vmem:[#allocation56_spill] sm:$0xff] }
 0x3e4   : > { %11861 = vst [vmem:[#allocation50_spill] sm:$0xff] %v11021_v5  ;;  %6688 = vmatprep.subr.mxu0 %v10989_v62  ;;  %v5448_v58 = vsub.f32 %v11009_v35, %v11433_v37  ;;  %v11434_v7 = vand.u32 4294901760, %v11021_v5  ;;  %6719 = vmatprep.subr.mxu1 %v5561_v30  ;;  %v5568_v24 = vand.u32 4294901760, %v5567_v8  ;;  %v11864_v37 = vld [vmem:[#allocation90_spill] sm:$0xff] }
 0x3e5   : > { %6689 = vmatpush3.msra.mxu0 %v11011_v34  ;;  %v11432_v57 = vand.u32 4294901760, %v11027_v29  ;;  %v5575_v8 = vand.u32 4294901760, %v5574_v59  ;;  %v11867_v59 = vld [vmem:[#allocation51_spill] sm:$0xff] }
 0x3e6   : > { %6728 = vmatprep.subr.mxu0 %v10533_v32  ;;  %5348 = vmatmul.mubr.f32.vlgmr.msra.gmra.mxu0 %v5347_v25  ;;  %v5449_v39 = vand.u32 4294901760, %v5448_v58  ;;  %v5462_v30 = vsub.f32 %v11021_v5, %v11434_v7  ;;  %v11862_v58 = vld [vmem:[#allocation35_spill] sm:$0xff]  ;;  %v11873_v7 = vld [vmem:[#allocation12_spill] sm:$0xff] }
 0x3e7   : > { %6729 = vmatpush3.msra.mxu0 %v10508_v49  ;;  %v5455_v2 = vsub.f32 %v11027_v29, %v11432_v57  ;;  %5715 = vmatprep.mubr.f32.mxu0 %v10815_v19 }
 0x3e8   : > { %6730 = vmatprep.subr.mxu0 %v10544_v46  ;;  %6720 = vmatpush3.msra.mxu1 %v5449_v39  ;;  %v5463_v57 = vand.u32 4294901760, %v5462_v30  ;;  %v11865_v39 = vld [vmem:[#allocation25_spill] sm:$0xff]  ;;  %v11870_v30 = vld [vmem:[#allocation54_spill] sm:$0xff] }
 0x3e9   : > { %6731 = vmatpush3.msra.mxu0 %v10549_v17  ;;  %6721 = vmatprep.subr.mxu1 %v5568_v24  ;;  %v5456_v25 = vand.u32 4294901760, %v5455_v2  ;;  %v11866_v2 = vld [vmem:[#allocation13_spill] sm:$0xff]  ;;  %v11868_v24 = vld [vmem:[#allocation55_spill] sm:$0xff] }
 0x3ea   : > { %6732 = vmatprep.subr.mxu0 %v11862_v58 }
 0x3eb   : > { %6722 = vmatpush3.msra.mxu1 %v5456_v25  ;;  %6733 = vmatpush3.msra.mxu0 %v11863_v41  ;;  %v11871_v25 = vld [vmem:[#allocation36_spill] sm:$0xff] }
 0x3ec   : > { %6723 = vmatprep.subr.mxu1 %v5575_v8  ;;  %6734 = vmatprep.subr.mxu0 %v11864_v37  ;;  %v11872_v8 = vld [vmem:[#allocation14_spill] sm:$0xff] }
 0x3ed   : > { %6724 = vmatpush3.msra.mxu1 %v5463_v57  ;;  %6735 = vmatpush3.msra.mxu0 %v10639_v36  ;;  %v11869_v57 = vld [vmem:[#allocation52_spill] sm:$0xff] }
 0x3ee   : > { %6736 = vmatprep.subr.mxu0 %v10682_v22  ;;  %6763 = vmatprep.subr.mxu1 %v11865_v39 }
 0x3ef   : > { %5580 = vmatmul.mubr.f32.vlgmr.msra.gmra.mxu1 %v10853_v38  ;;  %6737 = vmatpush3.msra.mxu0 %v10652_v43  ;;  %v11874_v38 = vld [vmem:[#allocation19_spill] sm:$0xff] }
 0x3f0   : > { %6764 = vmatpush3.msra.mxu1 %v11866_v2  ;;  %6738 = vmatprep.subr.mxu0 %v10729_v11 }
 0x3f1   : > { %6765 = vmatprep.subr.mxu1 %v11867_v59  ;;  %6739 = vmatpush3.msra.mxu0 %v10708_v61 }
 0x3f2   : > { %6766 = vmatpush3.msra.mxu1 %v11868_v24  ;;  %6740 = vmatprep.subr.mxu0 %v10751_v26 }
 0x3f3   : > { %6767 = vmatprep.subr.mxu1 %v11869_v57  ;;  %6741 = vmatpush3.msra.mxu0 %v10756_v4  ;;  %v11875_v4 = vand.u32 4294901760, %v10815_v19  ;;  %v11878_v19 = vand.u32 4294901760, %v10508_v49  ;;  %v11884_v49 = vand.u32 4294901760, %v11863_v41  ;;  %v11889_v41 = vand.u32 4294901760, %v10652_v43  ;;  %v11893_v43 = vld [vmem:[#allocation26_spill] sm:$0xff] }
 0x3f4   : > { %6768 = vmatpush3.msra.mxu1 %v11870_v30  ;;  %6742 = vmatprep.subr.mxu0 %v10805_v55 }
 0x3f5   : > { %6769 = vmatprep.subr.mxu1 %v11871_v25  ;;  %6743 = vmatpush3.msra.mxu0 %v10785_v63 }
 0x3f6   : > { %6770 = vmatpush3.msra.mxu1 %v11872_v8  ;;  %6744 = vmatprep.subr.mxu0 %v10833_v14 }
 0x3f7   : > { %6771 = vmatprep.subr.mxu1 %v11873_v7  ;;  %6745 = vmatpush3.msra.mxu0 %v10798_v60  ;;  %v11876_v60 = vld [vmem:[#allocation23_spill] sm:$0xff] }
 0x3f8   : > { %6772 = vmatpush3.msra.mxu1 %v11874_v38  ;;  %5822 = vmatprep.mubr.f32.mxu1 %v11875_v4  ;;  %v11877_v4 = vand.u32 4294901760, %v10533_v32  ;;  %v11883_v32 = vand.u32 4294901760, %v11862_v58 }
 0x3f9   : > { %6746 = vmatprep.subr.mxu0 %v10867_v56  ;;  %6773 = vmatprep.subr.mxu1 %v10661_v42 }
 0x3fa   : > { %6747 = vmatpush3.msra.mxu0 %v10857_v3  ;;  %6774 = vmatpush3.msra.mxu1 %v10695_v6 }
 0x3fb   : > { %6748 = vmatprep.subr.mxu0 %v10902_v28  ;;  %6775 = vmatprep.subr.mxu1 %v10701_v20 }
 0x3fc   : > { %6749 = vmatpush3.msra.mxu0 %v10898_v27  ;;  %6776 = vmatpush3.msra.mxu1 %v11876_v60 }
 0x3fd   : > { %6750 = vmatprep.subr.mxu0 %v10935_v13  ;;  %6777 = vmatprep.subr.mxu1 %v10724_v45 }
 0x3fe   : > { %6751 = vmatpush3.msra.mxu0 %v10957_v53  ;;  %6778 = vmatpush3.msra.mxu1 %v10767_v18 }
 0x3ff   : > { %6752 = vmatprep.subr.mxu0 %v10946_v12  ;;  %6779 = vmatprep.subr.mxu1 %v10773_v21 }
 0x400   : > { %6753 = vmatpush3.msra.mxu0 %v10984_v47  ;;  %6780 = vmatpush3.msra.mxu1 %v10787_v23 }
 0x401   : > { %6754 = vmatprep.subr.mxu0 %v10980_v52  ;;  %6781 = vmatprep.subr.mxu1 %v10807_v16 }
 0x402   : > { %6755 = vmatpush3.msra.mxu0 %v11009_v35  ;;  %6782 = vmatpush3.msra.mxu1 %v10843_v51 }
 0x403   : > { %6756 = vmatprep.subr.mxu0 %v10996_v44  ;;  %6783 = vmatprep.subr.mxu1 %v10873_v15 }
 0x404   : > { %6757 = vmatpush3.msra.mxu0 %v11027_v29  ;;  %6784 = vmatpush3.msra.mxu1 %v10880_v33  ;;  %v11879_v33 = vld [vmem:[#allocation76_spill] sm:$0xff] }
 0x405   : > { %6758 = vmatprep.subr.mxu0 %v11005_v40  ;;  %6785 = vmatprep.subr.mxu1 %v10914_v50 }
 0x406   : > { %6759 = vmatpush3.msra.mxu0 %v11021_v5  ;;  %6786 = vmatpush3.msra.mxu1 %v10938_v9  ;;  %v11880_v5 = vand.u32 4294901760, %v10544_v46  ;;  %v11881_v9 = vand.u32 4294901760, %v10549_v17  ;;  %v11885_v46 = vand.u32 4294901760, %v11864_v37  ;;  %v11886_v17 = vand.u32 4294901760, %v10639_v36 }
 0x407   : > { %5718 = vmatmul.mubr.f32.vlgmr.msra.gmra.mxu0 %v10953_v10  ;;  %6787 = vmatprep.subr.mxu1 %v10930_v48  ;;  %v11882_v48 = vld [vmem:[#allocation41_spill] sm:$0xff]  ;;  %v11890_v37 = vand.u32 4294901760, %v10729_v11  ;;  %v11891_v36 = vand.u32 4294901760, %v10708_v61  ;;  %v11895_v11 = vand.u32 4294901760, %v10805_v55  ;;  %v11896_v61 = vand.u32 4294901760, %v10785_v63 }
 0x408   : > { %6798 = vmatprep.subr.mxu0 %v11877_v4  ;;  %6788 = vmatpush3.msra.mxu1 %v10970_v31  ;;  %v11900_v55 = vand.u32 4294901760, %v10867_v56  ;;  %v11901_v63 = vand.u32 4294901760, %v10857_v3  ;;  %v11912_v3 = vld [vmem:[#allocation37_spill] sm:$0xff] }
 0x409   : > { %6799 = vmatpush3.msra.mxu0 %v11878_v19  ;;  %5992 = vmatprep.mubr.f32.mxu0 %v11879_v33 }
 0x40a   : > { %6789 = vmatprep.subr.mxu1 %v10966_v1  ;;  %6800 = vmatprep.subr.mxu0 %v11880_v5  ;;  %v11888_v5 = vand.u32 4294901760, %v10682_v22  ;;  %v11892_v22 = vand.u32 4294901760, %v10751_v26  ;;  %v11897_v26 = vand.u32 4294901760, %v10833_v14  ;;  %v11902_v14 = vand.u32 4294901760, %v10902_v28  ;;  %v11918_v28 = vld [vmem:[#allocation49_spill] sm:$0xff] }
 0x40b   : > { %6790 = vmatpush3.msra.mxu1 %v10992_v54  ;;  %6801 = vmatpush3.msra.mxu0 %v11881_v9  ;;  %v11887_v9 = vand.u32 4294901760, %v10953_v10  ;;  %v11894_v10 = vand.u32 4294901760, %v11893_v43 }
 0x40c   : > { %6791 = vmatprep.subr.mxu1 %v11882_v48  ;;  %6802 = vmatprep.subr.mxu0 %v11883_v32 }
 0x40d   : > { %6792 = vmatpush3.msra.mxu1 %v11018_v0  ;;  %6803 = vmatpush3.msra.mxu0 %v11884_v49 }
 0x40e   : > { %6793 = vmatprep.subr.mxu1 %v10989_v62  ;;  %6804 = vmatprep.subr.mxu0 %v11885_v46 }
 0x40f   : > { %6794 = vmatpush3.msra.mxu1 %v11011_v34  ;;  %6805 = vmatpush3.msra.mxu0 %v11886_v17 }
 0x410   : > { %5826 = vmatmul.mubr.f32.vlgmr.msra.gmra.mxu1 %v11887_v9  ;;  %6806 = vmatprep.subr.mxu0 %v11888_v5 }
 0x411   : > { %6833 = vmatprep.subr.mxu1 %v11865_v39  ;;  %6807 = vmatpush3.msra.mxu0 %v11889_v41 }
 0x412   : > { %6834 = vmatpush3.msra.mxu1 %v11866_v2  ;;  %6096 = vmatprep.mubr.f32.mxu1 %v11879_v33  ;;  %v11898_v33 = vld [vmem:[#allocation71_spill] sm:$0xff] }
 0x413   : > { %6808 = vmatprep.subr.mxu0 %v11890_v37  ;;  %6835 = vmatprep.subr.mxu1 %v11867_v59  ;;  %v11899_v58 = vand.u32 4294901760, %v11898_v33 }
 0x414   : > { %6809 = vmatpush3.msra.mxu0 %v11891_v36  ;;  %6836 = vmatpush3.msra.mxu1 %v11868_v24 }
 0x415   : > { %6810 = vmatprep.subr.mxu0 %v11892_v22  ;;  %6837 = vmatprep.subr.mxu1 %v11869_v57 }
 0x416   : > { %6811 = vmatpush3.msra.mxu0 %v11894_v10  ;;  %6838 = vmatpush3.msra.mxu1 %v11870_v30 }
 0x417   : > { %6812 = vmatprep.subr.mxu0 %v11895_v11  ;;  %6839 = vmatprep.subr.mxu1 %v11871_v25 }
 0x418   : > { %6813 = vmatpush3.msra.mxu0 %v11896_v61  ;;  %6840 = vmatpush3.msra.mxu1 %v11872_v8 }
 0x419   : > { %6814 = vmatprep.subr.mxu0 %v11897_v26  ;;  %6841 = vmatprep.subr.mxu1 %v11873_v7  ;;  %v11903_v7 = vand.u32 4294901760, %v10898_v27  ;;  %v11916_v27 = vld [vmem:[#allocation15_spill] sm:$0xff] }
 0x41a   : > { %6815 = vmatpush3.msra.mxu0 %v11899_v58  ;;  %6842 = vmatpush3.msra.mxu1 %v11874_v38  ;;  %v11904_v38 = vand.u32 4294901760, %v10935_v13 }
 0x41b   : > { %6816 = vmatprep.subr.mxu0 %v11900_v55  ;;  %6843 = vmatprep.subr.mxu1 %v10661_v42  ;;  %v11905_v42 = vand.u32 4294901760, %v10957_v53 }
 0x41c   : > { %6817 = vmatpush3.msra.mxu0 %v11901_v63  ;;  %6844 = vmatpush3.msra.mxu1 %v10695_v6  ;;  %v11906_v6 = vand.u32 4294901760, %v10946_v12 }
 0x41d   : > { %6818 = vmatprep.subr.mxu0 %v11902_v14  ;;  %6845 = vmatprep.subr.mxu1 %v10701_v20  ;;  %v11907_v20 = vand.u32 4294901760, %v10984_v47 }
 0x41e   : > { %6819 = vmatpush3.msra.mxu0 %v11903_v7  ;;  %6846 = vmatpush3.msra.mxu1 %v11876_v60  ;;  %v11908_v60 = vand.u32 4294901760, %v10980_v52 }
 0x41f   : > { %6820 = vmatprep.subr.mxu0 %v11904_v38  ;;  %6847 = vmatprep.subr.mxu1 %v10724_v45  ;;  %v11909_v45 = vand.u32 4294901760, %v11009_v35 }
 0x420   : > { %6821 = vmatpush3.msra.mxu0 %v11905_v42  ;;  %6848 = vmatpush3.msra.mxu1 %v10767_v18  ;;  %v11910_v18 = vand.u32 4294901760, %v10996_v44 }
 0x421   : > { %6822 = vmatprep.subr.mxu0 %v11906_v6  ;;  %6849 = vmatprep.subr.mxu1 %v10773_v21  ;;  %v11911_v21 = vand.u32 4294901760, %v11027_v29 }
 0x422   : > { %6823 = vmatpush3.msra.mxu0 %v11907_v20  ;;  %6850 = vmatpush3.msra.mxu1 %v10787_v23  ;;  %v11913_v23 = vand.u32 4294901760, %v11005_v40 }
 0x423   : > { %6824 = vmatprep.subr.mxu0 %v11908_v60  ;;  %6851 = vmatprep.subr.mxu1 %v10807_v16  ;;  %v11914_v16 = vld [vmem:[#allocation50_spill] sm:$0xff] }
 0x424   : > { %6825 = vmatpush3.msra.mxu0 %v11909_v45  ;;  %6852 = vmatpush3.msra.mxu1 %v10843_v51  ;;  %v11915_v56 = vand.u32 4294901760, %v11914_v16  ;;  %v11917_v51 = vld [vmem:[#allocation28_spill] sm:$0xff] }
 0x425   : > { %6826 = vmatprep.subr.mxu0 %v11910_v18  ;;  %6853 = vmatprep.subr.mxu1 %v10873_v15 }
 0x426   : > { %6827 = vmatpush3.msra.mxu0 %v11911_v21  ;;  %6854 = vmatpush3.msra.mxu1 %v11912_v3 }
 0x427   : > { %6828 = vmatprep.subr.mxu0 %v11913_v23  ;;  %6855 = vmatprep.subr.mxu1 %v10914_v50 }
 0x428   : > { %6829 = vmatpush3.msra.mxu0 %v11915_v56  ;;  %6856 = vmatpush3.msra.mxu1 %v11916_v27 }
 0x429   : > { %5994 = vmatmul.mubr.f32.vlgmr.msra.gmra.mxu0 %v11917_v51  ;;  %6857 = vmatprep.subr.mxu1 %v11918_v28 }
 0x42a   : > { %6858 = vmatpush3.msra.mxu1 %v10970_v31 }
 0x42b   : > { %6859 = vmatprep.subr.mxu1 %v10966_v1 }
 0x42c   : > { %6860 = vmatpush3.msra.mxu1 %v10992_v54 }
 0x42d   : > { %6861 = vmatprep.subr.mxu1 %v11882_v48 }
 0x42e   : > { %6862 = vmatpush3.msra.mxu1 %v11018_v0 }
 0x42f   : > { %6863 = vmatprep.subr.mxu1 %v10989_v62 }
 0x430   : > { %6864 = vmatpush3.msra.mxu1 %v11011_v34 }
 0x431   : > { %6098 = vmatmul.mubr.f32.vlgmr.msra.gmra.mxu1 %v11917_v51 }
 0x4a6   : > { %v6690_v15 = vpop.f32.mrf.mxu0 }
 0x4a8   : > { %v6691_v50 = vpop.f32.mrf.mxu0 }
 0x4a9   : > { %v6692_v52 = vadd.f32 %v6691_v50, %v6690_v15 }
 0x4af   : > { %v6725_v40 = vpop.f32.mrf.mxu1 }
 0x4b1   : > { %v6726_v12 = vpop.f32.mrf.mxu1 }
 0x4b2   : > { %v6727_v54 = vadd.f32 %v6726_v12, %v6725_v40 }
 0x4b4   : > { %v5582_v62 = vadd.f32 %v6727_v54, %v6692_v52 }
 0x4c7   : > { %v6760_v13 = vpop.f32.mrf.mxu0 }
 0x4c9   : > { %v6761_v53 = vpop.f32.mrf.mxu0 }
 0x4ca   : > { %v6762_v47 = vadd.f32 %v6761_v53, %v6760_v13 }
 0x4cc   : > { %v5720_v44 = vadd.f32 %v6762_v47, %v5582_v62 }
 0x4d0   : > { %v6795_v1 = vpop.f32.mrf.mxu1 }
 0x4d2   : > { %v6796_v48 = vpop.f32.mrf.mxu1 }
 0x4d3   : > { %v6797_v34 = vadd.f32 %v6796_v48, %v6795_v1 }
 0x4d5   : > { %v5828_v39 = vadd.f32 %v6797_v34, %v5720_v44 }
 0x4e9   : > { %v6830_v31 = vpop.f32.mrf.mxu0 }
 0x4eb   : > { %v6831_v0 = vpop.f32.mrf.mxu0 }
 0x4ec   : > { %v6832_v35 = vadd.f32 %v6831_v0, %v6830_v31 }
 0x4ee   : > { %v5996_v59 = vadd.f32 %v6832_v35, %v5828_v39 }
 0x4f1   : > { %v6865_v29 = vpop.f32.mrf.mxu1 }
 0x4f3   : > { %v6866_v2 = vpop.f32.mrf.mxu1 }
 0x4f4   : > { %v6867_v24 = vadd.f32 %v6866_v2, %v6865_v29 }
 0x4f6   : > { %v6100_v57 = vadd.f32 %v6867_v24, %v5996_v59 }
 0x4f8   : > { %6103 = vst.msk [vmem:[%s325_s28] sm:$0xff] %vm351_vm0, %v6100_v57 }
 0x4f9   : > { %7412 = shalt.err (!%p7409_p5)
}
 0x4fa   : > { %s7413_s17 = scalar_lea.hbm %s6117_s12, 128  ;;  %s7417_s20 = scalar_lea.hbm %s11265_s6, 256 }
 0x4fb   : > { %p7414_p6 = scmp.ne.s32.totalorder %s6117_s12, %s7413_s17  ;;  %p7418_p10 = scmp.lt.s32.totalorder %s6117_s12, %s11265_s6 }
 0x4fc   : > { %p7419_p11 = scmp.lt.s32.totalorder %s7417_s20, %s7413_s17 }
 0x4fd   : > { %p7415_p7 = pnand %p7414_p6, %p7559_p4 }
 0x4fe   : > { %p7420_p12 = por %p7419_p11, %p7418_p10 }
 0x4ff   : > { %p7416_p9 = pneg %p7415_p7 }
 0x501   : > { %p7421_p13 = pnand %p7420_p12, %p7416_p9 }
 0x503   : > { %7424 = shalt.err (!%p7421_p13)
}
 0x504   : > { %7168 = dma.vmem_to_hbm [thread:$0]  (%p7559_p4), %s6120_s30, 128, %s6117_s12, %s6105_s13  }
 0x505 PF: > { %p7174_p0 = scmp.ge.s32.totalorder %s7475_s26, 2  ;;  %s6131_s8 = sand.u32 1, %s7455_s21  }
 0x506   : > { %s6132_s11 = scalar_lea.sflag [#allocation7], %s6131_s8 }
 0x507   : > { %p7171_p1 = pnand %p7174_p0, %p7566_p8 }
 0x509   : > { %p7172_p2 = pneg %p7171_p1 }
 0x50b   : > { %7450 = dma.done.wait (%p7172_p2), %s6132_s11, 128  }
 0x50c   : > { %7452 = vsyncadd (%p7172_p2), %s6132_s11, 4294967168  ;;  %s19_s26 = sadd.s32 1, %s7475_s26   ;;  %s11919_s21 = smov %s7459_s22 }
 0x50d   : > { %p16_p3 = scmp.ge.s32.totalorder %s19_s26, 4   ;;  %s11920_s22 = smov %s7463_s23 }
 0x50e   : > { %s11921_s23 = smov %s7572_s10  ;;  %s11922_s24 = smov %s7471_s25 }
 0x50f   : > { %s11923_s25 = smov %s11925_s29  ;;  %18 = sbr.rel (!%p16_p3) target bundleno = 4 (0x4), region = 99 }
 0x514   :  { %6137 = vsyncpa [#allocation7], 1 }
 0x515   :  { %6139 = vsyncpa [#allocation7 + $0x1], 1 }

</bundles_post_ra>
